<compile_context>
chip_gen: v5e
topology: v5e:2x2
jax: 0.10.0
libtpu: 0.0.40
codegen_flags: <defaults>
</compile_context>

<pallas_src>
import functools

import jax
import jax.numpy as jnp
from jax import lax
from jax.experimental import pallas as pl
from jax.experimental.pallas import tpu as pltpu


def _fused_tagger_kernel(
        x_ref, len_ref, tags_ref, lng_ref, lnb_ref,
        w0_ih_ref, b0_ref, w0f_hh_ref, w0b_hh_ref,
        w1_ih_ref, b1_ref, w1f_hh_ref, w1b_hh_ref,
        wtag_ref, btag_ref, tr_ref,
        loss_ref,
        out0_ref, out1_ref,              # VMEM scratch: (B, T, 2H) per layer
        *, B, T, F, H, K):
    f32 = jnp.float32
    H2, H3, H4, H8 = 2 * H, 3 * H, 4 * H, 8 * H

    # ---------------- LayerNorm over the feature axis ----------------
    x = x_ref[...]                                          # (B, T, F)
    mean = jnp.mean(x, axis=-1, keepdims=True)
    xc = x - mean
    var = jnp.mean(xc * xc, axis=-1, keepdims=True)
    xn = xc * lax.rsqrt(var + 1e-5) * lng_ref[...] + lnb_ref[...]

    # ------- validity masks from lengths (packed-sequence semantics) -------
    iota_t = lax.broadcasted_iota(jnp.int32, (B, T), 1)
    valid = iota_t < len_ref[...]                           # (B, T) bool
    # Pre-broadcast once per timestep; reused by every jnp.where below.
    keep_h = [jnp.broadcast_to(valid[:, t:t + 1], (B, H)) for t in range(T)]
    keep_k = [jnp.broadcast_to(valid[:, t:t + 1], (B, K)) for t in range(T)]
    keep_1 = [valid[:, t:t + 1] for t in range(T)]

    # ---- layer-0 input projection for BOTH directions in one matmul ----
    # x_flat is a free leading-dim flatten; gate columns are [fwd i,f,o,g | bwd i,f,o,g].
    x_flat = xn.reshape(B * T, F)
    gx0 = (jnp.dot(x_flat, w0_ih_ref[...], preferred_element_type=f32)
           + b0_ref[...]).reshape(B, T, H8)

    def lstm_cell(pre, c_prev):
        # pre: (B, 4H) packed [i | f | o | g]; one sigmoid + one tanh EUP push.
        sig = jax.nn.sigmoid(pre[:, :H3])
        g_g = jnp.tanh(pre[:, H3:])
        i_g = sig[:, :H]
        f_g = sig[:, H:H2]
        o_g = sig[:, H2:H3]
        c_new = f_g * c_prev + i_g * g_g
        h_new = o_g * jnp.tanh(c_new)
        return h_new, c_new

    def bidir_layer(gx, wf_hh_ref, wb_hh_ref, out_ref):
        # Interleaved fwd (step s) and bwd (step T-1-s) recurrences: two
        # independent chains unrolled together so the scheduler overlaps them.
        w_f = wf_hh_ref[...]                                # (H, 4H)
        w_b = wb_hh_ref[...]
        hf = jnp.zeros((B, H), f32); cf = jnp.zeros((B, H), f32)
        hb = jnp.zeros((B, H), f32); cb = jnp.zeros((B, H), f32)
        for s in range(T):                                  # fully unrolled (T static)
            tf = s
            tb = T - 1 - s
            pre_f = gx[:, tf, :H4] + jnp.dot(hf, w_f, preferred_element_type=f32)
            pre_b = gx[:, tb, H4:] + jnp.dot(hb, w_b, preferred_element_type=f32)
            hf_new, cf_new = lstm_cell(pre_f, cf)
            hb_new, cb_new = lstm_cell(pre_b, cb)
            mf = keep_h[tf]
            mb = keep_h[tb]
            hf = jnp.where(mf, hf_new, hf)                  # state frozen past length
            cf = jnp.where(mf, cf_new, cf)
            hb = jnp.where(mb, hb_new, hb)
            cb = jnp.where(mb, cb_new, cb)
            out_ref[:, tf, :H] = jnp.where(mf, hf_new, 0.0)  # pad_packed_sequence zeros
            out_ref[:, tb, H:] = jnp.where(mb, hb_new, 0.0)

    # ---------------- layer 0 (bidirectional) ----------------
    bidir_layer(gx0, w0f_hh_ref, w0b_hh_ref, out0_ref)

    # TODO(synk): inter-layer LSTM dropout (p=0.5) is identity here (eval mode).

    # ---------------- layer 1 (bidirectional) ----------------
    out0_flat = out0_ref[...].reshape(B * T, H2)            # [fwd | bwd] lanes
    gx1 = (jnp.dot(out0_flat, w1_ih_ref[...], preferred_element_type=f32)
           + b1_ref[...]).reshape(B, T, H8)
    bidir_layer(gx1, w1f_hh_ref, w1b_hh_ref, out1_ref)

    # ---------------- hidden2tag (one matmul, no fwd/bwd split) ----------------
    out1_flat = out1_ref[...].reshape(B * T, H2)
    emis = (jnp.dot(out1_flat, wtag_ref[...], preferred_element_type=f32)
            + btag_ref[...]).reshape(B, T, K)

    # ---------------- CRF negative log-likelihood ----------------
    tags = tags_ref[...]                                    # (B, T) int32
    trans = tr_ref[...]                                     # (K, K)
    iota_k = lax.broadcasted_iota(jnp.int32, (B, K), 1)

    # numerator (joint log-likelihood); transition lookup via VPU masked sums
    score = jnp.zeros((B, 1), f32)
    oh_prev = None
    for t in range(T):
        e_t = emis[:, t, :]                                              # (B, K)
        oh_curr = (tags[:, t:t + 1] == iota_k).astype(f32)               # (B, K)
        step = jnp.sum(e_t * oh_curr, axis=1, keepdims=True)             # emission term
        if t > 0:
            rows = jnp.sum(oh_prev[:, :, None] * trans[None, :, :], axis=1)  # trans[prev, :]
            step = step + jnp.sum(rows * oh_curr, axis=1, keepdims=True)     # trans[prev, curr]
        score = score + jnp.where(keep_1[t], step, 0.0)
        oh_prev = oh_curr

    # denominator (log partition); reproduces the reference broadcast exactly
    # (emissions enter along the *previous*-tag axis, as in main.py's CRF).
    alpha = emis[:, 0, :]                                   # (B, K)
    for t in range(1, T):
        e_t = emis[:, t, :]
        scores = alpha[:, :, None] + trans[None, :, :] + e_t[:, :, None]  # (B, K, K)
        smax = jnp.max(scores, axis=1)                                    # (B, K)
        alpha_t = jnp.log(jnp.sum(jnp.exp(scores - smax[:, None, :]), axis=1)) + smax
        alpha = jnp.where(keep_k[t], alpha_t, alpha)
    amax = jnp.max(alpha, axis=1, keepdims=True)
    log_den = jnp.log(jnp.sum(jnp.exp(alpha - amax), axis=1, keepdims=True)) + amax

    # mean over batch (matches torch.mean in the reference CRF.forward)
    loss_ref[...] = jnp.sum(log_den - score, axis=0, keepdims=True) / B


def lstm_tagger_forward(params, features, lengths, tags):
    B, T, F = features.shape
    H = params["w0f_hh"].shape[0]
    K = params["trans"].shape[0]

    kernel = functools.partial(_fused_tagger_kernel, B=B, T=T, F=F, H=H, K=K)

    args = (
        features,
        lengths.astype(jnp.int32).reshape(B, 1),
        tags.astype(jnp.int32),
        params["ln_g"], params["ln_b"],
        params["w0_ih"], params["b0"], params["w0f_hh"], params["w0b_hh"],
        params["w1_ih"], params["b1"], params["w1f_hh"], params["w1b_hh"],
        params["wtag"], params["btag"], params["trans"],
    )
    loss = pl.pallas_call(
        kernel,
        out_shape=jax.ShapeDtypeStruct((1, 1), jnp.float32),
        in_specs=[pl.BlockSpec(memory_space=pltpu.MemorySpace.VMEM)] * len(args),
        out_specs=pl.BlockSpec(memory_space=pltpu.MemorySpace.VMEM),
        scratch_shapes=[pltpu.VMEM((B, T, 2 * H), jnp.float32),   # layer-0 outputs
                        pltpu.VMEM((B, T, 2 * H), jnp.float32)],  # layer-1 outputs
    )(*args)
    return loss[0, 0]


# --------------------------- parameter creation ------------------------------
def init_params(key, feature_dim, hidden_dim, num_tags):
    """PyTorch-style init, repacked into the kernel's layouts:
       * gate order reordered from PyTorch [i,f,g,o] to kernel [i,f,o,g]
       * W_ih transposed to (in_dim, 4H); both directions lane-concatenated to (in_dim, 8H)
       * W_hh transposed to (H, 4H) (packed-gate recurrent matmul)
    """
    H = hidden_dim
    keys = iter(jax.random.split(key, 32))
    bound = 1.0 / float(H) ** 0.5
    perm = jnp.array([0, 1, 3, 2])          # PyTorch [i,f,g,o] -> kernel [i,f,o,g]

    def reorder_T(w):                        # (4H, in) -> (in, 4H), gate order i,f,o,g
        w4 = w.reshape(4, H, -1)[perm]
        return w4.reshape(4 * H, -1).T

    def reorder_b(b):                        # (4H,) -> (1, 4H)
        return b.reshape(4, H)[perm].reshape(1, 4 * H)

    def lstm_dir(in_dim):
        wih = jax.random.uniform(next(keys), (4 * H, in_dim), jnp.float32, -bound, bound)
        whh = jax.random.uniform(next(keys), (4 * H, H), jnp.float32, -bound, bound)
        bih = jax.random.uniform(next(keys), (4 * H,), jnp.float32, -bound, bound)
        bhh = jax.random.uniform(next(keys), (4 * H,), jnp.float32, -bound, bound)
        return reorder_T(wih), reorder_T(whh), reorder_b(bih + bhh)

    params = {"ln_g": jnp.ones((1, 1, feature_dim), jnp.float32),
              "ln_b": jnp.zeros((1, 1, feature_dim), jnp.float32)}

    # layer 0 (input dim = feature_dim)
    w0f_ih, w0f_hh, b0f = lstm_dir(feature_dim)
    w0b_ih, w0b_hh, b0b = lstm_dir(feature_dim)
    params["w0_ih"] = jnp.concatenate([w0f_ih, w0b_ih], axis=1)   # (F, 8H)
    params["b0"] = jnp.concatenate([b0f, b0b], axis=1)            # (1, 8H)
    params["w0f_hh"] = w0f_hh                                     # (H, 4H)
    params["w0b_hh"] = w0b_hh

    # layer 1 (input dim = 2H, [fwd | bwd] of layer 0)
    w1f_ih, w1f_hh, b1f = lstm_dir(2 * H)
    w1b_ih, w1b_hh, b1b = lstm_dir(2 * H)
    params["w1_ih"] = jnp.concatenate([w1f_ih, w1b_ih], axis=1)   # (2H, 8H)
    params["b1"] = jnp.concatenate([b1f, b1b], axis=1)
    params["w1f_hh"] = w1f_hh
    params["w1b_hh"] = w1b_hh

    # hidden2tag + CRF transitions
    bt = 1.0 / float(2 * H) ** 0.5
    wtag = jax.random.uniform(next(keys), (num_tags, 2 * H), jnp.float32, -bt, bt)
    btag = jax.random.uniform(next(keys), (num_tags,), jnp.float32, -bt, bt)
    params["wtag"] = wtag.T                                       # (2H, K)
    params["btag"] = btag.reshape(1, -1)
    params["trans"] = jax.random.normal(next(keys), (num_tags, num_tags), jnp.float32)
    return params


if __name__ == "__main__":
    B, T, FEAT, HID, NUM_TAGS = 2, 8, 16, 32, 8

    key = jax.random.PRNGKey(0)
    k_feat, k_tags, k_params = jax.random.split(key, 3)

    features = jax.random.normal(k_feat, (B, T, FEAT), jnp.float32)
    lengths = jnp.array([8, 5], jnp.int32)       # sorted descending (enforce_sorted=True)
    tags = jax.random.randint(k_tags, (B, T), 0, NUM_TAGS, jnp.int32)
    params = init_params(k_params, FEAT, HID, NUM_TAGS)

    loss = lstm_tagger_forward(params, features, lengths, tags)
    jax.block_until_ready(loss)
    print("KERNEL_OK")
</pallas_src>

<mosaic_0001>
module attributes {stable_mosaic.version = 11 : i64} {
  func.func @_fused_tagger_kernel(%arg0: memref<2x8x16xf32, #tpu.memory_space<vmem>>, %arg1: memref<2x1xi32, #tpu.memory_space<vmem>>, %arg2: memref<2x8xi32, #tpu.memory_space<vmem>>, %arg3: memref<1x1x16xf32, #tpu.memory_space<vmem>>, %arg4: memref<1x1x16xf32, #tpu.memory_space<vmem>>, %arg5: memref<16x256xf32, #tpu.memory_space<vmem>>, %arg6: memref<1x256xf32, #tpu.memory_space<vmem>>, %arg7: memref<32x128xf32, #tpu.memory_space<vmem>>, %arg8: memref<32x128xf32, #tpu.memory_space<vmem>>, %arg9: memref<64x256xf32, #tpu.memory_space<vmem>>, %arg10: memref<1x256xf32, #tpu.memory_space<vmem>>, %arg11: memref<32x128xf32, #tpu.memory_space<vmem>>, %arg12: memref<32x128xf32, #tpu.memory_space<vmem>>, %arg13: memref<64x8xf32, #tpu.memory_space<vmem>>, %arg14: memref<1x8xf32, #tpu.memory_space<vmem>>, %arg15: memref<8x8xf32, #tpu.memory_space<vmem>>, %arg16: memref<1x1xf32, #tpu.memory_space<vmem>>, %arg17: memref<2x8x64xf32, #tpu.memory_space<vmem>>, %arg18: memref<2x8x64xf32, #tpu.memory_space<vmem>>) attributes {dimension_semantics = [], scalar_prefetch = 0 : i64, scratch_operands = 2 : i64, tpu.core_type = #tpu.core_type<tc>} {
    %c0 = arith.constant 0 : index
    %c0_0 = arith.constant 0 : index
    %c0_1 = arith.constant 0 : index
    %0 = vector.load %arg0[%c0, %c0_0, %c0_1] : memref<2x8x16xf32, #tpu.memory_space<vmem>>, vector<2x8x16xf32>
    %cst = arith.constant dense<0.000000e+00> : vector<2x8xf32>
    %1 = vector.multi_reduction <add>, %0, %cst [2] : vector<2x8x16xf32> to vector<2x8xf32>
    %2 = vector.shape_cast %1 : vector<2x8xf32> to vector<2x8x1xf32>
    %cst_2 = arith.constant 1.600000e+01 : f32
    %3 = vector.broadcast %cst_2 : f32 to vector<2x8x1xf32>
    %4 = arith.divf %2, %3 : vector<2x8x1xf32>
    %5 = vector.broadcast %4 : vector<2x8x1xf32> to vector<2x8x16xf32>
    %6 = arith.subf %0, %5 : vector<2x8x16xf32>
    %7 = arith.mulf %6, %6 : vector<2x8x16xf32>
    %cst_3 = arith.constant dense<0.000000e+00> : vector<2x8xf32>
    %8 = vector.multi_reduction <add>, %7, %cst_3 [2] : vector<2x8x16xf32> to vector<2x8xf32>
    %9 = vector.shape_cast %8 : vector<2x8xf32> to vector<2x8x1xf32>
    %cst_4 = arith.constant 1.600000e+01 : f32
    %10 = vector.broadcast %cst_4 : f32 to vector<2x8x1xf32>
    %11 = arith.divf %9, %10 : vector<2x8x1xf32>
    %cst_5 = arith.constant 9.99999974E-6 : f32
    %12 = vector.broadcast %cst_5 : f32 to vector<2x8x1xf32>
    %13 = arith.addf %11, %12 : vector<2x8x1xf32>
    %14 = math.rsqrt %13 : vector<2x8x1xf32>
    %15 = vector.broadcast %14 : vector<2x8x1xf32> to vector<2x8x16xf32>
    %16 = arith.mulf %6, %15 : vector<2x8x16xf32>
    %c0_6 = arith.constant 0 : index
    %c0_7 = arith.constant 0 : index
    %c0_8 = arith.constant 0 : index
    %17 = vector.load %arg3[%c0_6, %c0_7, %c0_8] : memref<1x1x16xf32, #tpu.memory_space<vmem>>, vector<1x1x16xf32>
    %18 = vector.broadcast %17 : vector<1x1x16xf32> to vector<2x8x16xf32>
    %19 = arith.mulf %16, %18 : vector<2x8x16xf32>
    %c0_9 = arith.constant 0 : index
    %c0_10 = arith.constant 0 : index
    %c0_11 = arith.constant 0 : index
    %20 = vector.load %arg4[%c0_9, %c0_10, %c0_11] : memref<1x1x16xf32, #tpu.memory_space<vmem>>, vector<1x1x16xf32>
    %21 = vector.broadcast %20 : vector<1x1x16xf32> to vector<2x8x16xf32>
    %22 = arith.addf %19, %21 : vector<2x8x16xf32>
    %23 = tpu.iota {dimensions = array<i32: 1>} : vector<2x8xi32>
    %c0_12 = arith.constant 0 : index
    %c0_13 = arith.constant 0 : index
    %24 = vector.load %arg1[%c0_12, %c0_13] : memref<2x1xi32, #tpu.memory_space<vmem>>, vector<2x1xi32>
    %25 = vector.broadcast %24 : vector<2x1xi32> to vector<2x8xi32>
    %26 = arith.cmpi slt, %23, %25 : vector<2x8xi32>
    %27 = vector.extract_strided_slice %26 {offsets = [0, 0], sizes = [2, 1], strides = [1, 1]} : vector<2x8xi1> to vector<2x1xi1>
    %28 = vector.shape_cast %27 : vector<2x1xi1> to vector<2x1xi1>
    %29 = vector.broadcast %28 : vector<2x1xi1> to vector<2x32xi1>
    %30 = vector.extract_strided_slice %26 {offsets = [0, 1], sizes = [2, 1], strides = [1, 1]} : vector<2x8xi1> to vector<2x1xi1>
    %31 = vector.shape_cast %30 : vector<2x1xi1> to vector<2x1xi1>
    %32 = vector.broadcast %31 : vector<2x1xi1> to vector<2x32xi1>
    %33 = vector.extract_strided_slice %26 {offsets = [0, 2], sizes = [2, 1], strides = [1, 1]} : vector<2x8xi1> to vector<2x1xi1>
    %34 = vector.shape_cast %33 : vector<2x1xi1> to vector<2x1xi1>
    %35 = vector.broadcast %34 : vector<2x1xi1> to vector<2x32xi1>
    %36 = vector.extract_strided_slice %26 {offsets = [0, 3], sizes = [2, 1], strides = [1, 1]} : vector<2x8xi1> to vector<2x1xi1>
    %37 = vector.shape_cast %36 : vector<2x1xi1> to vector<2x1xi1>
    %38 = vector.broadcast %37 : vector<2x1xi1> to vector<2x32xi1>
    %39 = vector.extract_strided_slice %26 {offsets = [0, 4], sizes = [2, 1], strides = [1, 1]} : vector<2x8xi1> to vector<2x1xi1>
    %40 = vector.shape_cast %39 : vector<2x1xi1> to vector<2x1xi1>
    %41 = vector.broadcast %40 : vector<2x1xi1> to vector<2x32xi1>
    %42 = vector.extract_strided_slice %26 {offsets = [0, 5], sizes = [2, 1], strides = [1, 1]} : vector<2x8xi1> to vector<2x1xi1>
    %43 = vector.shape_cast %42 : vector<2x1xi1> to vector<2x1xi1>
    %44 = vector.broadcast %43 : vector<2x1xi1> to vector<2x32xi1>
    %45 = vector.extract_strided_slice %26 {offsets = [0, 6], sizes = [2, 1], strides = [1, 1]} : vector<2x8xi1> to vector<2x1xi1>
    %46 = vector.shape_cast %45 : vector<2x1xi1> to vector<2x1xi1>
    %47 = vector.broadcast %46 : vector<2x1xi1> to vector<2x32xi1>
    %48 = vector.extract_strided_slice %26 {offsets = [0, 7], sizes = [2, 1], strides = [1, 1]} : vector<2x8xi1> to vector<2x1xi1>
    %49 = vector.shape_cast %48 : vector<2x1xi1> to vector<2x1xi1>
    %50 = vector.broadcast %49 : vector<2x1xi1> to vector<2x32xi1>
    %51 = vector.extract_strided_slice %26 {offsets = [0, 1], sizes = [2, 1], strides = [1, 1]} : vector<2x8xi1> to vector<2x1xi1>
    %52 = vector.shape_cast %51 : vector<2x1xi1> to vector<2x1xi1>
    %53 = vector.broadcast %52 : vector<2x1xi1> to vector<2x8xi1>
    %54 = vector.extract_strided_slice %26 {offsets = [0, 2], sizes = [2, 1], strides = [1, 1]} : vector<2x8xi1> to vector<2x1xi1>
    %55 = vector.shape_cast %54 : vector<2x1xi1> to vector<2x1xi1>
    %56 = vector.broadcast %55 : vector<2x1xi1> to vector<2x8xi1>
    %57 = vector.extract_strided_slice %26 {offsets = [0, 3], sizes = [2, 1], strides = [1, 1]} : vector<2x8xi1> to vector<2x1xi1>
    %58 = vector.shape_cast %57 : vector<2x1xi1> to vector<2x1xi1>
    %59 = vector.broadcast %58 : vector<2x1xi1> to vector<2x8xi1>
    %60 = vector.extract_strided_slice %26 {offsets = [0, 4], sizes = [2, 1], strides = [1, 1]} : vector<2x8xi1> to vector<2x1xi1>
    %61 = vector.shape_cast %60 : vector<2x1xi1> to vector<2x1xi1>
    %62 = vector.broadcast %61 : vector<2x1xi1> to vector<2x8xi1>
    %63 = vector.extract_strided_slice %26 {offsets = [0, 5], sizes = [2, 1], strides = [1, 1]} : vector<2x8xi1> to vector<2x1xi1>
    %64 = vector.shape_cast %63 : vector<2x1xi1> to vector<2x1xi1>
    %65 = vector.broadcast %64 : vector<2x1xi1> to vector<2x8xi1>
    %66 = vector.extract_strided_slice %26 {offsets = [0, 6], sizes = [2, 1], strides = [1, 1]} : vector<2x8xi1> to vector<2x1xi1>
    %67 = vector.shape_cast %66 : vector<2x1xi1> to vector<2x1xi1>
    %68 = vector.broadcast %67 : vector<2x1xi1> to vector<2x8xi1>
    %69 = vector.extract_strided_slice %26 {offsets = [0, 7], sizes = [2, 1], strides = [1, 1]} : vector<2x8xi1> to vector<2x1xi1>
    %70 = vector.shape_cast %69 : vector<2x1xi1> to vector<2x1xi1>
    %71 = vector.broadcast %70 : vector<2x1xi1> to vector<2x8xi1>
    %72 = vector.extract_strided_slice %26 {offsets = [0, 0], sizes = [2, 1], strides = [1, 1]} : vector<2x8xi1> to vector<2x1xi1>
    %73 = vector.extract_strided_slice %26 {offsets = [0, 1], sizes = [2, 1], strides = [1, 1]} : vector<2x8xi1> to vector<2x1xi1>
    %74 = vector.extract_strided_slice %26 {offsets = [0, 2], sizes = [2, 1], strides = [1, 1]} : vector<2x8xi1> to vector<2x1xi1>
    %75 = vector.extract_strided_slice %26 {offsets = [0, 3], sizes = [2, 1], strides = [1, 1]} : vector<2x8xi1> to vector<2x1xi1>
    %76 = vector.extract_strided_slice %26 {offsets = [0, 4], sizes = [2, 1], strides = [1, 1]} : vector<2x8xi1> to vector<2x1xi1>
    %77 = vector.extract_strided_slice %26 {offsets = [0, 5], sizes = [2, 1], strides = [1, 1]} : vector<2x8xi1> to vector<2x1xi1>
    %78 = vector.extract_strided_slice %26 {offsets = [0, 6], sizes = [2, 1], strides = [1, 1]} : vector<2x8xi1> to vector<2x1xi1>
    %79 = vector.extract_strided_slice %26 {offsets = [0, 7], sizes = [2, 1], strides = [1, 1]} : vector<2x8xi1> to vector<2x1xi1>
    %80 = vector.shape_cast %22 : vector<2x8x16xf32> to vector<16x16xf32>
    %c0_14 = arith.constant 0 : index
    %c0_15 = arith.constant 0 : index
    %81 = vector.load %arg5[%c0_14, %c0_15] : memref<16x256xf32, #tpu.memory_space<vmem>>, vector<16x256xf32>
    %cst_16 = arith.constant dense<0.000000e+00> : vector<16x256xf32>
    %82 = tpu.matmul %80, %81, %cst_16 {dimension_numbers = #tpu.dot_dimension_numbers<[1], [0], [0], [1], [0, 0, 1, 1], [], []>} : vector<16x16xf32>, vector<16x256xf32>, vector<16x256xf32> -> vector<16x256xf32>
    %c0_17 = arith.constant 0 : index
    %c0_18 = arith.constant 0 : index
    %83 = vector.load %arg6[%c0_17, %c0_18] : memref<1x256xf32, #tpu.memory_space<vmem>>, vector<1x256xf32>
    %84 = vector.broadcast %83 : vector<1x256xf32> to vector<16x256xf32>
    %85 = arith.addf %82, %84 : vector<16x256xf32>
    %86 = vector.shape_cast %85 : vector<16x256xf32> to vector<2x8x256xf32>
    %c0_19 = arith.constant 0 : index
    %c0_20 = arith.constant 0 : index
    %87 = vector.load %arg7[%c0_19, %c0_20] : memref<32x128xf32, #tpu.memory_space<vmem>>, vector<32x128xf32>
    %c0_21 = arith.constant 0 : index
    %c0_22 = arith.constant 0 : index
    %88 = vector.load %arg8[%c0_21, %c0_22] : memref<32x128xf32, #tpu.memory_space<vmem>>, vector<32x128xf32>
    %cst_23 = arith.constant 0.000000e+00 : f32
    %89 = vector.broadcast %cst_23 : f32 to vector<2x32xf32>
    %cst_24 = arith.constant 0.000000e+00 : f32
    %90 = vector.broadcast %cst_24 : f32 to vector<2x32xf32>
    %cst_25 = arith.constant 0.000000e+00 : f32
    %91 = vector.broadcast %cst_25 : f32 to vector<2x32xf32>
    %cst_26 = arith.constant 0.000000e+00 : f32
    %92 = vector.broadcast %cst_26 : f32 to vector<2x32xf32>
    %93 = vector.extract_strided_slice %86 {offsets = [0, 0, 0], sizes = [2, 1, 128], strides = [1, 1, 1]} : vector<2x8x256xf32> to vector<2x1x128xf32>
    %94 = vector.shape_cast %93 : vector<2x1x128xf32> to vector<2x128xf32>
    %cst_27 = arith.constant dense<0.000000e+00> : vector<2x128xf32>
    %95 = tpu.matmul %89, %87, %cst_27 {dimension_numbers = #tpu.dot_dimension_numbers<[1], [0], [0], [1], [0, 0, 1, 1], [], []>} : vector<2x32xf32>, vector<32x128xf32>, vector<2x128xf32> -> vector<2x128xf32>
    %96 = arith.addf %94, %95 : vector<2x128xf32>
    %97 = vector.extract_strided_slice %86 {offsets = [0, 7, 128], sizes = [2, 1, 128], strides = [1, 1, 1]} : vector<2x8x256xf32> to vector<2x1x128xf32>
    %98 = vector.shape_cast %97 : vector<2x1x128xf32> to vector<2x128xf32>
    %cst_28 = arith.constant dense<0.000000e+00> : vector<2x128xf32>
    %99 = tpu.matmul %91, %88, %cst_28 {dimension_numbers = #tpu.dot_dimension_numbers<[1], [0], [0], [1], [0, 0, 1, 1], [], []>} : vector<2x32xf32>, vector<32x128xf32>, vector<2x128xf32> -> vector<2x128xf32>
    %100 = arith.addf %98, %99 : vector<2x128xf32>
    %101 = vector.extract_strided_slice %96 {offsets = [0, 0], sizes = [2, 96], strides = [1, 1]} : vector<2x128xf32> to vector<2x96xf32>
    %102 = arith.negf %101 : vector<2x96xf32>
    %103 = math.exp %102 : vector<2x96xf32>
    %cst_29 = arith.constant 1.000000e+00 : f32
    %104 = vector.broadcast %cst_29 : f32 to vector<2x96xf32>
    %105 = arith.addf %104, %103 : vector<2x96xf32>
    %106 = arith.divf %104, %105 : vector<2x96xf32>
    %107 = vector.extract_strided_slice %96 {offsets = [0, 96], sizes = [2, 32], strides = [1, 1]} : vector<2x128xf32> to vector<2x32xf32>
    %108 = math.tanh %107 : vector<2x32xf32>
    %109 = vector.extract_strided_slice %106 {offsets = [0, 0], sizes = [2, 32], strides = [1, 1]} : vector<2x96xf32> to vector<2x32xf32>
    %110 = vector.extract_strided_slice %106 {offsets = [0, 32], sizes = [2, 32], strides = [1, 1]} : vector<2x96xf32> to vector<2x32xf32>
    %111 = vector.extract_strided_slice %106 {offsets = [0, 64], sizes = [2, 32], strides = [1, 1]} : vector<2x96xf32> to vector<2x32xf32>
    %112 = arith.mulf %110, %90 : vector<2x32xf32>
    %113 = arith.mulf %109, %108 : vector<2x32xf32>
    %114 = arith.addf %112, %113 : vector<2x32xf32>
    %115 = math.tanh %114 : vector<2x32xf32>
    %116 = arith.mulf %111, %115 : vector<2x32xf32>
    %117 = vector.extract_strided_slice %100 {offsets = [0, 0], sizes = [2, 96], strides = [1, 1]} : vector<2x128xf32> to vector<2x96xf32>
    %118 = arith.negf %117 : vector<2x96xf32>
    %119 = math.exp %118 : vector<2x96xf32>
    %cst_30 = arith.constant 1.000000e+00 : f32
    %120 = vector.broadcast %cst_30 : f32 to vector<2x96xf32>
    %121 = arith.addf %120, %119 : vector<2x96xf32>
    %122 = arith.divf %120, %121 : vector<2x96xf32>
    %123 = vector.extract_strided_slice %100 {offsets = [0, 96], sizes = [2, 32], strides = [1, 1]} : vector<2x128xf32> to vector<2x32xf32>
    %124 = math.tanh %123 : vector<2x32xf32>
    %125 = vector.extract_strided_slice %122 {offsets = [0, 0], sizes = [2, 32], strides = [1, 1]} : vector<2x96xf32> to vector<2x32xf32>
    %126 = vector.extract_strided_slice %122 {offsets = [0, 32], sizes = [2, 32], strides = [1, 1]} : vector<2x96xf32> to vector<2x32xf32>
    %127 = vector.extract_strided_slice %122 {offsets = [0, 64], sizes = [2, 32], strides = [1, 1]} : vector<2x96xf32> to vector<2x32xf32>
    %128 = arith.mulf %126, %92 : vector<2x32xf32>
    %129 = arith.mulf %125, %124 : vector<2x32xf32>
    %130 = arith.addf %128, %129 : vector<2x32xf32>
    %131 = math.tanh %130 : vector<2x32xf32>
    %132 = arith.mulf %127, %131 : vector<2x32xf32>
    %133 = arith.select %29, %116, %89 : vector<2x32xi1>, vector<2x32xf32>
    %134 = arith.select %29, %114, %90 : vector<2x32xi1>, vector<2x32xf32>
    %135 = arith.select %50, %132, %91 : vector<2x32xi1>, vector<2x32xf32>
    %136 = arith.select %50, %130, %92 : vector<2x32xi1>, vector<2x32xf32>
    %cst_31 = arith.constant 0.000000e+00 : f32
    %137 = vector.broadcast %cst_31 : f32 to vector<2x32xf32>
    %138 = arith.select %29, %116, %137 : vector<2x32xi1>, vector<2x32xf32>
    %c0_32 = arith.constant 0 : index
    %c0_33 = arith.constant 0 : index
    %c0_34 = arith.constant 0 : index
    %139 = vector.load %arg17[%c0_32, %c0_33, %c0_34] : memref<2x8x64xf32, #tpu.memory_space<vmem>>, vector<2x1x32xf32>
    %140 = vector.shape_cast %139 : vector<2x1x32xf32> to vector<2x32xf32>
    %141 = vector.shape_cast %138 : vector<2x32xf32> to vector<2x1x32xf32>
    tpu.vector_store %arg17[%c0_32, %c0_33, %c0_34], %141 {strides = array<i32>} : memref<2x8x64xf32, #tpu.memory_space<vmem>>, vector<2x1x32xf32>,
    %cst_35 = arith.constant 0.000000e+00 : f32
    %142 = vector.broadcast %cst_35 : f32 to vector<2x32xf32>
    %143 = arith.select %50, %132, %142 : vector<2x32xi1>, vector<2x32xf32>
    %c0_36 = arith.constant 0 : index
    %c7 = arith.constant 7 : index
    %c32 = arith.constant 32 : index
    %144 = vector.load %arg17[%c0_36, %c7, %c32] : memref<2x8x64xf32, #tpu.memory_space<vmem>>, vector<2x1x32xf32>
    %145 = vector.shape_cast %144 : vector<2x1x32xf32> to vector<2x32xf32>
    %146 = vector.shape_cast %143 : vector<2x32xf32> to vector<2x1x32xf32>
    tpu.vector_store %arg17[%c0_36, %c7, %c32], %146 {strides = array<i32>} : memref<2x8x64xf32, #tpu.memory_space<vmem>>, vector<2x1x32xf32>,
    %147 = vector.extract_strided_slice %86 {offsets = [0, 1, 0], sizes = [2, 1, 128], strides = [1, 1, 1]} : vector<2x8x256xf32> to vector<2x1x128xf32>
    %148 = vector.shape_cast %147 : vector<2x1x128xf32> to vector<2x128xf32>
    %cst_37 = arith.constant dense<0.000000e+00> : vector<2x128xf32>
    %149 = tpu.matmul %133, %87, %cst_37 {dimension_numbers = #tpu.dot_dimension_numbers<[1], [0], [0], [1], [0, 0, 1, 1], [], []>} : vector<2x32xf32>, vector<32x128xf32>, vector<2x128xf32> -> vector<2x128xf32>
    %150 = arith.addf %148, %149 : vector<2x128xf32>
    %151 = vector.extract_strided_slice %86 {offsets = [0, 6, 128], sizes = [2, 1, 128], strides = [1, 1, 1]} : vector<2x8x256xf32> to vector<2x1x128xf32>
    %152 = vector.shape_cast %151 : vector<2x1x128xf32> to vector<2x128xf32>
    %cst_38 = arith.constant dense<0.000000e+00> : vector<2x128xf32>
    %153 = tpu.matmul %135, %88, %cst_38 {dimension_numbers = #tpu.dot_dimension_numbers<[1], [0], [0], [1], [0, 0, 1, 1], [], []>} : vector<2x32xf32>, vector<32x128xf32>, vector<2x128xf32> -> vector<2x128xf32>
    %154 = arith.addf %152, %153 : vector<2x128xf32>
    %155 = vector.extract_strided_slice %150 {offsets = [0, 0], sizes = [2, 96], strides = [1, 1]} : vector<2x128xf32> to vector<2x96xf32>
    %156 = arith.negf %155 : vector<2x96xf32>
    %157 = math.exp %156 : vector<2x96xf32>
    %cst_39 = arith.constant 1.000000e+00 : f32
    %158 = vector.broadcast %cst_39 : f32 to vector<2x96xf32>
    %159 = arith.addf %158, %157 : vector<2x96xf32>
    %160 = arith.divf %158, %159 : vector<2x96xf32>
    %161 = vector.extract_strided_slice %150 {offsets = [0, 96], sizes = [2, 32], strides = [1, 1]} : vector<2x128xf32> to vector<2x32xf32>
    %162 = math.tanh %161 : vector<2x32xf32>
    %163 = vector.extract_strided_slice %160 {offsets = [0, 0], sizes = [2, 32], strides = [1, 1]} : vector<2x96xf32> to vector<2x32xf32>
    %164 = vector.extract_strided_slice %160 {offsets = [0, 32], sizes = [2, 32], strides = [1, 1]} : vector<2x96xf32> to vector<2x32xf32>
    %165 = vector.extract_strided_slice %160 {offsets = [0, 64], sizes = [2, 32], strides = [1, 1]} : vector<2x96xf32> to vector<2x32xf32>
    %166 = arith.mulf %164, %134 : vector<2x32xf32>
    %167 = arith.mulf %163, %162 : vector<2x32xf32>
    %168 = arith.addf %166, %167 : vector<2x32xf32>
    %169 = math.tanh %168 : vector<2x32xf32>
    %170 = arith.mulf %165, %169 : vector<2x32xf32>
    %171 = vector.extract_strided_slice %154 {offsets = [0, 0], sizes = [2, 96], strides = [1, 1]} : vector<2x128xf32> to vector<2x96xf32>
    %172 = arith.negf %171 : vector<2x96xf32>
    %173 = math.exp %172 : vector<2x96xf32>
    %cst_40 = arith.constant 1.000000e+00 : f32
    %174 = vector.broadcast %cst_40 : f32 to vector<2x96xf32>
    %175 = arith.addf %174, %173 : vector<2x96xf32>
    %176 = arith.divf %174, %175 : vector<2x96xf32>
    %177 = vector.extract_strided_slice %154 {offsets = [0, 96], sizes = [2, 32], strides = [1, 1]} : vector<2x128xf32> to vector<2x32xf32>
    %178 = math.tanh %177 : vector<2x32xf32>
    %179 = vector.extract_strided_slice %176 {offsets = [0, 0], sizes = [2, 32], strides = [1, 1]} : vector<2x96xf32> to vector<2x32xf32>
    %180 = vector.extract_strided_slice %176 {offsets = [0, 32], sizes = [2, 32], strides = [1, 1]} : vector<2x96xf32> to vector<2x32xf32>
    %181 = vector.extract_strided_slice %176 {offsets = [0, 64], sizes = [2, 32], strides = [1, 1]} : vector<2x96xf32> to vector<2x32xf32>
    %182 = arith.mulf %180, %136 : vector<2x32xf32>
    %183 = arith.mulf %179, %178 : vector<2x32xf32>
    %184 = arith.addf %182, %183 : vector<2x32xf32>
    %185 = math.tanh %184 : vector<2x32xf32>
    %186 = arith.mulf %181, %185 : vector<2x32xf32>
    %187 = arith.select %32, %170, %133 : vector<2x32xi1>, vector<2x32xf32>
    %188 = arith.select %32, %168, %134 : vector<2x32xi1>, vector<2x32xf32>
    %189 = arith.select %47, %186, %135 : vector<2x32xi1>, vector<2x32xf32>
    %190 = arith.select %47, %184, %136 : vector<2x32xi1>, vector<2x32xf32>
    %cst_41 = arith.constant 0.000000e+00 : f32
    %191 = vector.broadcast %cst_41 : f32 to vector<2x32xf32>
    %192 = arith.select %32, %170, %191 : vector<2x32xi1>, vector<2x32xf32>
    %c0_42 = arith.constant 0 : index
    %c1 = arith.constant 1 : index
    %c0_43 = arith.constant 0 : index
    %193 = vector.load %arg17[%c0_42, %c1, %c0_43] : memref<2x8x64xf32, #tpu.memory_space<vmem>>, vector<2x1x32xf32>
    %194 = vector.shape_cast %193 : vector<2x1x32xf32> to vector<2x32xf32>
    %195 = vector.shape_cast %192 : vector<2x32xf32> to vector<2x1x32xf32>
    tpu.vector_store %arg17[%c0_42, %c1, %c0_43], %195 {strides = array<i32>} : memref<2x8x64xf32, #tpu.memory_space<vmem>>, vector<2x1x32xf32>,
    %cst_44 = arith.constant 0.000000e+00 : f32
    %196 = vector.broadcast %cst_44 : f32 to vector<2x32xf32>
    %197 = arith.select %47, %186, %196 : vector<2x32xi1>, vector<2x32xf32>
    %c0_45 = arith.constant 0 : index
    %c6 = arith.constant 6 : index
    %c32_46 = arith.constant 32 : index
    %198 = vector.load %arg17[%c0_45, %c6, %c32_46] : memref<2x8x64xf32, #tpu.memory_space<vmem>>, vector<2x1x32xf32>
    %199 = vector.shape_cast %198 : vector<2x1x32xf32> to vector<2x32xf32>
    %200 = vector.shape_cast %197 : vector<2x32xf32> to vector<2x1x32xf32>
    tpu.vector_store %arg17[%c0_45, %c6, %c32_46], %200 {strides = array<i32>} : memref<2x8x64xf32, #tpu.memory_space<vmem>>, vector<2x1x32xf32>,
    %201 = vector.extract_strided_slice %86 {offsets = [0, 2, 0], sizes = [2, 1, 128], strides = [1, 1, 1]} : vector<2x8x256xf32> to vector<2x1x128xf32>
    %202 = vector.shape_cast %201 : vector<2x1x128xf32> to vector<2x128xf32>
    %cst_47 = arith.constant dense<0.000000e+00> : vector<2x128xf32>
    %203 = tpu.matmul %187, %87, %cst_47 {dimension_numbers = #tpu.dot_dimension_numbers<[1], [0], [0], [1], [0, 0, 1, 1], [], []>} : vector<2x32xf32>, vector<32x128xf32>, vector<2x128xf32> -> vector<2x128xf32>
    %204 = arith.addf %202, %203 : vector<2x128xf32>
    %205 = vector.extract_strided_slice %86 {offsets = [0, 5, 128], sizes = [2, 1, 128], strides = [1, 1, 1]} : vector<2x8x256xf32> to vector<2x1x128xf32>
    %206 = vector.shape_cast %205 : vector<2x1x128xf32> to vector<2x128xf32>
    %cst_48 = arith.constant dense<0.000000e+00> : vector<2x128xf32>
    %207 = tpu.matmul %189, %88, %cst_48 {dimension_numbers = #tpu.dot_dimension_numbers<[1], [0], [0], [1], [0, 0, 1, 1], [], []>} : vector<2x32xf32>, vector<32x128xf32>, vector<2x128xf32> -> vector<2x128xf32>
    %208 = arith.addf %206, %207 : vector<2x128xf32>
    %209 = vector.extract_strided_slice %204 {offsets = [0, 0], sizes = [2, 96], strides = [1, 1]} : vector<2x128xf32> to vector<2x96xf32>
    %210 = arith.negf %209 : vector<2x96xf32>
    %211 = math.exp %210 : vector<2x96xf32>
    %cst_49 = arith.constant 1.000000e+00 : f32
    %212 = vector.broadcast %cst_49 : f32 to vector<2x96xf32>
    %213 = arith.addf %212, %211 : vector<2x96xf32>
    %214 = arith.divf %212, %213 : vector<2x96xf32>
    %215 = vector.extract_strided_slice %204 {offsets = [0, 96], sizes = [2, 32], strides = [1, 1]} : vector<2x128xf32> to vector<2x32xf32>
    %216 = math.tanh %215 : vector<2x32xf32>
    %217 = vector.extract_strided_slice %214 {offsets = [0, 0], sizes = [2, 32], strides = [1, 1]} : vector<2x96xf32> to vector<2x32xf32>
    %218 = vector.extract_strided_slice %214 {offsets = [0, 32], sizes = [2, 32], strides = [1, 1]} : vector<2x96xf32> to vector<2x32xf32>
    %219 = vector.extract_strided_slice %214 {offsets = [0, 64], sizes = [2, 32], strides = [1, 1]} : vector<2x96xf32> to vector<2x32xf32>
    %220 = arith.mulf %218, %188 : vector<2x32xf32>
    %221 = arith.mulf %217, %216 : vector<2x32xf32>
    %222 = arith.addf %220, %221 : vector<2x32xf32>
    %223 = math.tanh %222 : vector<2x32xf32>
    %224 = arith.mulf %219, %223 : vector<2x32xf32>
    %225 = vector.extract_strided_slice %208 {offsets = [0, 0], sizes = [2, 96], strides = [1, 1]} : vector<2x128xf32> to vector<2x96xf32>
    %226 = arith.negf %225 : vector<2x96xf32>
    %227 = math.exp %226 : vector<2x96xf32>
    %cst_50 = arith.constant 1.000000e+00 : f32
    %228 = vector.broadcast %cst_50 : f32 to vector<2x96xf32>
    %229 = arith.addf %228, %227 : vector<2x96xf32>
    %230 = arith.divf %228, %229 : vector<2x96xf32>
    %231 = vector.extract_strided_slice %208 {offsets = [0, 96], sizes = [2, 32], strides = [1, 1]} : vector<2x128xf32> to vector<2x32xf32>
    %232 = math.tanh %231 : vector<2x32xf32>
    %233 = vector.extract_strided_slice %230 {offsets = [0, 0], sizes = [2, 32], strides = [1, 1]} : vector<2x96xf32> to vector<2x32xf32>
    %234 = vector.extract_strided_slice %230 {offsets = [0, 32], sizes = [2, 32], strides = [1, 1]} : vector<2x96xf32> to vector<2x32xf32>
    %235 = vector.extract_strided_slice %230 {offsets = [0, 64], sizes = [2, 32], strides = [1, 1]} : vector<2x96xf32> to vector<2x32xf32>
    %236 = arith.mulf %234, %190 : vector<2x32xf32>
    %237 = arith.mulf %233, %232 : vector<2x32xf32>
    %238 = arith.addf %236, %237 : vector<2x32xf32>
    %239 = math.tanh %238 : vector<2x32xf32>
    %240 = arith.mulf %235, %239 : vector<2x32xf32>
    %241 = arith.select %35, %224, %187 : vector<2x32xi1>, vector<2x32xf32>
    %242 = arith.select %35, %222, %188 : vector<2x32xi1>, vector<2x32xf32>
    %243 = arith.select %44, %240, %189 : vector<2x32xi1>, vector<2x32xf32>
    %244 = arith.select %44, %238, %190 : vector<2x32xi1>, vector<2x32xf32>
    %cst_51 = arith.constant 0.000000e+00 : f32
    %245 = vector.broadcast %cst_51 : f32 to vector<2x32xf32>
    %246 = arith.select %35, %224, %245 : vector<2x32xi1>, vector<2x32xf32>
    %c0_52 = arith.constant 0 : index
    %c2 = arith.constant 2 : index
    %c0_53 = arith.constant 0 : index
    %247 = vector.load %arg17[%c0_52, %c2, %c0_53] : memref<2x8x64xf32, #tpu.memory_space<vmem>>, vector<2x1x32xf32>
    %248 = vector.shape_cast %247 : vector<2x1x32xf32> to vector<2x32xf32>
    %249 = vector.shape_cast %246 : vector<2x32xf32> to vector<2x1x32xf32>
    tpu.vector_store %arg17[%c0_52, %c2, %c0_53], %249 {strides = array<i32>} : memref<2x8x64xf32, #tpu.memory_space<vmem>>, vector<2x1x32xf32>,
    %cst_54 = arith.constant 0.000000e+00 : f32
    %250 = vector.broadcast %cst_54 : f32 to vector<2x32xf32>
    %251 = arith.select %44, %240, %250 : vector<2x32xi1>, vector<2x32xf32>
    %c0_55 = arith.constant 0 : index
    %c5 = arith.constant 5 : index
    %c32_56 = arith.constant 32 : index
    %252 = vector.load %arg17[%c0_55, %c5, %c32_56] : memref<2x8x64xf32, #tpu.memory_space<vmem>>, vector<2x1x32xf32>
    %253 = vector.shape_cast %252 : vector<2x1x32xf32> to vector<2x32xf32>
    %254 = vector.shape_cast %251 : vector<2x32xf32> to vector<2x1x32xf32>
    tpu.vector_store %arg17[%c0_55, %c5, %c32_56], %254 {strides = array<i32>} : memref<2x8x64xf32, #tpu.memory_space<vmem>>, vector<2x1x32xf32>,
    %255 = vector.extract_strided_slice %86 {offsets = [0, 3, 0], sizes = [2, 1, 128], strides = [1, 1, 1]} : vector<2x8x256xf32> to vector<2x1x128xf32>
    %256 = vector.shape_cast %255 : vector<2x1x128xf32> to vector<2x128xf32>
    %cst_57 = arith.constant dense<0.000000e+00> : vector<2x128xf32>
    %257 = tpu.matmul %241, %87, %cst_57 {dimension_numbers = #tpu.dot_dimension_numbers<[1], [0], [0], [1], [0, 0, 1, 1], [], []>} : vector<2x32xf32>, vector<32x128xf32>, vector<2x128xf32> -> vector<2x128xf32>
    %258 = arith.addf %256, %257 : vector<2x128xf32>
    %259 = vector.extract_strided_slice %86 {offsets = [0, 4, 128], sizes = [2, 1, 128], strides = [1, 1, 1]} : vector<2x8x256xf32> to vector<2x1x128xf32>
    %260 = vector.shape_cast %259 : vector<2x1x128xf32> to vector<2x128xf32>
    %cst_58 = arith.constant dense<0.000000e+00> : vector<2x128xf32>
    %261 = tpu.matmul %243, %88, %cst_58 {dimension_numbers = #tpu.dot_dimension_numbers<[1], [0], [0], [1], [0, 0, 1, 1], [], []>} : vector<2x32xf32>, vector<32x128xf32>, vector<2x128xf32> -> vector<2x128xf32>
    %262 = arith.addf %260, %261 : vector<2x128xf32>
    %263 = vector.extract_strided_slice %258 {offsets = [0, 0], sizes = [2, 96], strides = [1, 1]} : vector<2x128xf32> to vector<2x96xf32>
    %264 = arith.negf %263 : vector<2x96xf32>
    %265 = math.exp %264 : vector<2x96xf32>
    %cst_59 = arith.constant 1.000000e+00 : f32
    %266 = vector.broadcast %cst_59 : f32 to vector<2x96xf32>
    %267 = arith.addf %266, %265 : vector<2x96xf32>
    %268 = arith.divf %266, %267 : vector<2x96xf32>
    %269 = vector.extract_strided_slice %258 {offsets = [0, 96], sizes = [2, 32], strides = [1, 1]} : vector<2x128xf32> to vector<2x32xf32>
    %270 = math.tanh %269 : vector<2x32xf32>
    %271 = vector.extract_strided_slice %268 {offsets = [0, 0], sizes = [2, 32], strides = [1, 1]} : vector<2x96xf32> to vector<2x32xf32>
    %272 = vector.extract_strided_slice %268 {offsets = [0, 32], sizes = [2, 32], strides = [1, 1]} : vector<2x96xf32> to vector<2x32xf32>
    %273 = vector.extract_strided_slice %268 {offsets = [0, 64], sizes = [2, 32], strides = [1, 1]} : vector<2x96xf32> to vector<2x32xf32>
    %274 = arith.mulf %272, %242 : vector<2x32xf32>
    %275 = arith.mulf %271, %270 : vector<2x32xf32>
    %276 = arith.addf %274, %275 : vector<2x32xf32>
    %277 = math.tanh %276 : vector<2x32xf32>
    %278 = arith.mulf %273, %277 : vector<2x32xf32>
    %279 = vector.extract_strided_slice %262 {offsets = [0, 0], sizes = [2, 96], strides = [1, 1]} : vector<2x128xf32> to vector<2x96xf32>
    %280 = arith.negf %279 : vector<2x96xf32>
    %281 = math.exp %280 : vector<2x96xf32>
    %cst_60 = arith.constant 1.000000e+00 : f32
    %282 = vector.broadcast %cst_60 : f32 to vector<2x96xf32>
    %283 = arith.addf %282, %281 : vector<2x96xf32>
    %284 = arith.divf %282, %283 : vector<2x96xf32>
    %285 = vector.extract_strided_slice %262 {offsets = [0, 96], sizes = [2, 32], strides = [1, 1]} : vector<2x128xf32> to vector<2x32xf32>
    %286 = math.tanh %285 : vector<2x32xf32>
    %287 = vector.extract_strided_slice %284 {offsets = [0, 0], sizes = [2, 32], strides = [1, 1]} : vector<2x96xf32> to vector<2x32xf32>
    %288 = vector.extract_strided_slice %284 {offsets = [0, 32], sizes = [2, 32], strides = [1, 1]} : vector<2x96xf32> to vector<2x32xf32>
    %289 = vector.extract_strided_slice %284 {offsets = [0, 64], sizes = [2, 32], strides = [1, 1]} : vector<2x96xf32> to vector<2x32xf32>
    %290 = arith.mulf %288, %244 : vector<2x32xf32>
    %291 = arith.mulf %287, %286 : vector<2x32xf32>
    %292 = arith.addf %290, %291 : vector<2x32xf32>
    %293 = math.tanh %292 : vector<2x32xf32>
    %294 = arith.mulf %289, %293 : vector<2x32xf32>
    %295 = arith.select %38, %278, %241 : vector<2x32xi1>, vector<2x32xf32>
    %296 = arith.select %38, %276, %242 : vector<2x32xi1>, vector<2x32xf32>
    %297 = arith.select %41, %294, %243 : vector<2x32xi1>, vector<2x32xf32>
    %298 = arith.select %41, %292, %244 : vector<2x32xi1>, vector<2x32xf32>
    %cst_61 = arith.constant 0.000000e+00 : f32
    %299 = vector.broadcast %cst_61 : f32 to vector<2x32xf32>
    %300 = arith.select %38, %278, %299 : vector<2x32xi1>, vector<2x32xf32>
    %c0_62 = arith.constant 0 : index
    %c3 = arith.constant 3 : index
    %c0_63 = arith.constant 0 : index
    %301 = vector.load %arg17[%c0_62, %c3, %c0_63] : memref<2x8x64xf32, #tpu.memory_space<vmem>>, vector<2x1x32xf32>
    %302 = vector.shape_cast %301 : vector<2x1x32xf32> to vector<2x32xf32>
    %303 = vector.shape_cast %300 : vector<2x32xf32> to vector<2x1x32xf32>
    tpu.vector_store %arg17[%c0_62, %c3, %c0_63], %303 {strides = array<i32>} : memref<2x8x64xf32, #tpu.memory_space<vmem>>, vector<2x1x32xf32>,
    %cst_64 = arith.constant 0.000000e+00 : f32
    %304 = vector.broadcast %cst_64 : f32 to vector<2x32xf32>
    %305 = arith.select %41, %294, %304 : vector<2x32xi1>, vector<2x32xf32>
    %c0_65 = arith.constant 0 : index
    %c4 = arith.constant 4 : index
    %c32_66 = arith.constant 32 : index
    %306 = vector.load %arg17[%c0_65, %c4, %c32_66] : memref<2x8x64xf32, #tpu.memory_space<vmem>>, vector<2x1x32xf32>
    %307 = vector.shape_cast %306 : vector<2x1x32xf32> to vector<2x32xf32>
    %308 = vector.shape_cast %305 : vector<2x32xf32> to vector<2x1x32xf32>
    tpu.vector_store %arg17[%c0_65, %c4, %c32_66], %308 {strides = array<i32>} : memref<2x8x64xf32, #tpu.memory_space<vmem>>, vector<2x1x32xf32>,
    %309 = vector.extract_strided_slice %86 {offsets = [0, 4, 0], sizes = [2, 1, 128], strides = [1, 1, 1]} : vector<2x8x256xf32> to vector<2x1x128xf32>
    %310 = vector.shape_cast %309 : vector<2x1x128xf32> to vector<2x128xf32>
    %cst_67 = arith.constant dense<0.000000e+00> : vector<2x128xf32>
    %311 = tpu.matmul %295, %87, %cst_67 {dimension_numbers = #tpu.dot_dimension_numbers<[1], [0], [0], [1], [0, 0, 1, 1], [], []>} : vector<2x32xf32>, vector<32x128xf32>, vector<2x128xf32> -> vector<2x128xf32>
    %312 = arith.addf %310, %311 : vector<2x128xf32>
    %313 = vector.extract_strided_slice %86 {offsets = [0, 3, 128], sizes = [2, 1, 128], strides = [1, 1, 1]} : vector<2x8x256xf32> to vector<2x1x128xf32>
    %314 = vector.shape_cast %313 : vector<2x1x128xf32> to vector<2x128xf32>
    %cst_68 = arith.constant dense<0.000000e+00> : vector<2x128xf32>
    %315 = tpu.matmul %297, %88, %cst_68 {dimension_numbers = #tpu.dot_dimension_numbers<[1], [0], [0], [1], [0, 0, 1, 1], [], []>} : vector<2x32xf32>, vector<32x128xf32>, vector<2x128xf32> -> vector<2x128xf32>
    %316 = arith.addf %314, %315 : vector<2x128xf32>
    %317 = vector.extract_strided_slice %312 {offsets = [0, 0], sizes = [2, 96], strides = [1, 1]} : vector<2x128xf32> to vector<2x96xf32>
    %318 = arith.negf %317 : vector<2x96xf32>
    %319 = math.exp %318 : vector<2x96xf32>
    %cst_69 = arith.constant 1.000000e+00 : f32
    %320 = vector.broadcast %cst_69 : f32 to vector<2x96xf32>
    %321 = arith.addf %320, %319 : vector<2x96xf32>
    %322 = arith.divf %320, %321 : vector<2x96xf32>
    %323 = vector.extract_strided_slice %312 {offsets = [0, 96], sizes = [2, 32], strides = [1, 1]} : vector<2x128xf32> to vector<2x32xf32>
    %324 = math.tanh %323 : vector<2x32xf32>
    %325 = vector.extract_strided_slice %322 {offsets = [0, 0], sizes = [2, 32], strides = [1, 1]} : vector<2x96xf32> to vector<2x32xf32>
    %326 = vector.extract_strided_slice %322 {offsets = [0, 32], sizes = [2, 32], strides = [1, 1]} : vector<2x96xf32> to vector<2x32xf32>
    %327 = vector.extract_strided_slice %322 {offsets = [0, 64], sizes = [2, 32], strides = [1, 1]} : vector<2x96xf32> to vector<2x32xf32>
    %328 = arith.mulf %326, %296 : vector<2x32xf32>
    %329 = arith.mulf %325, %324 : vector<2x32xf32>
    %330 = arith.addf %328, %329 : vector<2x32xf32>
    %331 = math.tanh %330 : vector<2x32xf32>
    %332 = arith.mulf %327, %331 : vector<2x32xf32>
    %333 = vector.extract_strided_slice %316 {offsets = [0, 0], sizes = [2, 96], strides = [1, 1]} : vector<2x128xf32> to vector<2x96xf32>
    %334 = arith.negf %333 : vector<2x96xf32>
    %335 = math.exp %334 : vector<2x96xf32>
    %cst_70 = arith.constant 1.000000e+00 : f32
    %336 = vector.broadcast %cst_70 : f32 to vector<2x96xf32>
    %337 = arith.addf %336, %335 : vector<2x96xf32>
    %338 = arith.divf %336, %337 : vector<2x96xf32>
    %339 = vector.extract_strided_slice %316 {offsets = [0, 96], sizes = [2, 32], strides = [1, 1]} : vector<2x128xf32> to vector<2x32xf32>
    %340 = math.tanh %339 : vector<2x32xf32>
    %341 = vector.extract_strided_slice %338 {offsets = [0, 0], sizes = [2, 32], strides = [1, 1]} : vector<2x96xf32> to vector<2x32xf32>
    %342 = vector.extract_strided_slice %338 {offsets = [0, 32], sizes = [2, 32], strides = [1, 1]} : vector<2x96xf32> to vector<2x32xf32>
    %343 = vector.extract_strided_slice %338 {offsets = [0, 64], sizes = [2, 32], strides = [1, 1]} : vector<2x96xf32> to vector<2x32xf32>
    %344 = arith.mulf %342, %298 : vector<2x32xf32>
    %345 = arith.mulf %341, %340 : vector<2x32xf32>
    %346 = arith.addf %344, %345 : vector<2x32xf32>
    %347 = math.tanh %346 : vector<2x32xf32>
    %348 = arith.mulf %343, %347 : vector<2x32xf32>
    %349 = arith.select %41, %332, %295 : vector<2x32xi1>, vector<2x32xf32>
    %350 = arith.select %41, %330, %296 : vector<2x32xi1>, vector<2x32xf32>
    %351 = arith.select %38, %348, %297 : vector<2x32xi1>, vector<2x32xf32>
    %352 = arith.select %38, %346, %298 : vector<2x32xi1>, vector<2x32xf32>
    %cst_71 = arith.constant 0.000000e+00 : f32
    %353 = vector.broadcast %cst_71 : f32 to vector<2x32xf32>
    %354 = arith.select %41, %332, %353 : vector<2x32xi1>, vector<2x32xf32>
    %c0_72 = arith.constant 0 : index
    %c4_73 = arith.constant 4 : index
    %c0_74 = arith.constant 0 : index
    %355 = vector.load %arg17[%c0_72, %c4_73, %c0_74] : memref<2x8x64xf32, #tpu.memory_space<vmem>>, vector<2x1x32xf32>
    %356 = vector.shape_cast %355 : vector<2x1x32xf32> to vector<2x32xf32>
    %357 = vector.shape_cast %354 : vector<2x32xf32> to vector<2x1x32xf32>
    tpu.vector_store %arg17[%c0_72, %c4_73, %c0_74], %357 {strides = array<i32>} : memref<2x8x64xf32, #tpu.memory_space<vmem>>, vector<2x1x32xf32>,
    %cst_75 = arith.constant 0.000000e+00 : f32
    %358 = vector.broadcast %cst_75 : f32 to vector<2x32xf32>
    %359 = arith.select %38, %348, %358 : vector<2x32xi1>, vector<2x32xf32>
    %c0_76 = arith.constant 0 : index
    %c3_77 = arith.constant 3 : index
    %c32_78 = arith.constant 32 : index
    %360 = vector.load %arg17[%c0_76, %c3_77, %c32_78] : memref<2x8x64xf32, #tpu.memory_space<vmem>>, vector<2x1x32xf32>
    %361 = vector.shape_cast %360 : vector<2x1x32xf32> to vector<2x32xf32>
    %362 = vector.shape_cast %359 : vector<2x32xf32> to vector<2x1x32xf32>
    tpu.vector_store %arg17[%c0_76, %c3_77, %c32_78], %362 {strides = array<i32>} : memref<2x8x64xf32, #tpu.memory_space<vmem>>, vector<2x1x32xf32>,
    %363 = vector.extract_strided_slice %86 {offsets = [0, 5, 0], sizes = [2, 1, 128], strides = [1, 1, 1]} : vector<2x8x256xf32> to vector<2x1x128xf32>
    %364 = vector.shape_cast %363 : vector<2x1x128xf32> to vector<2x128xf32>
    %cst_79 = arith.constant dense<0.000000e+00> : vector<2x128xf32>
    %365 = tpu.matmul %349, %87, %cst_79 {dimension_numbers = #tpu.dot_dimension_numbers<[1], [0], [0], [1], [0, 0, 1, 1], [], []>} : vector<2x32xf32>, vector<32x128xf32>, vector<2x128xf32> -> vector<2x128xf32>
    %366 = arith.addf %364, %365 : vector<2x128xf32>
    %367 = vector.extract_strided_slice %86 {offsets = [0, 2, 128], sizes = [2, 1, 128], strides = [1, 1, 1]} : vector<2x8x256xf32> to vector<2x1x128xf32>
    %368 = vector.shape_cast %367 : vector<2x1x128xf32> to vector<2x128xf32>
    %cst_80 = arith.constant dense<0.000000e+00> : vector<2x128xf32>
    %369 = tpu.matmul %351, %88, %cst_80 {dimension_numbers = #tpu.dot_dimension_numbers<[1], [0], [0], [1], [0, 0, 1, 1], [], []>} : vector<2x32xf32>, vector<32x128xf32>, vector<2x128xf32> -> vector<2x128xf32>
    %370 = arith.addf %368, %369 : vector<2x128xf32>
    %371 = vector.extract_strided_slice %366 {offsets = [0, 0], sizes = [2, 96], strides = [1, 1]} : vector<2x128xf32> to vector<2x96xf32>
    %372 = arith.negf %371 : vector<2x96xf32>
    %373 = math.exp %372 : vector<2x96xf32>
    %cst_81 = arith.constant 1.000000e+00 : f32
    %374 = vector.broadcast %cst_81 : f32 to vector<2x96xf32>
    %375 = arith.addf %374, %373 : vector<2x96xf32>
    %376 = arith.divf %374, %375 : vector<2x96xf32>
    %377 = vector.extract_strided_slice %366 {offsets = [0, 96], sizes = [2, 32], strides = [1, 1]} : vector<2x128xf32> to vector<2x32xf32>
    %378 = math.tanh %377 : vector<2x32xf32>
    %379 = vector.extract_strided_slice %376 {offsets = [0, 0], sizes = [2, 32], strides = [1, 1]} : vector<2x96xf32> to vector<2x32xf32>
    %380 = vector.extract_strided_slice %376 {offsets = [0, 32], sizes = [2, 32], strides = [1, 1]} : vector<2x96xf32> to vector<2x32xf32>
    %381 = vector.extract_strided_slice %376 {offsets = [0, 64], sizes = [2, 32], strides = [1, 1]} : vector<2x96xf32> to vector<2x32xf32>
    %382 = arith.mulf %380, %350 : vector<2x32xf32>
    %383 = arith.mulf %379, %378 : vector<2x32xf32>
    %384 = arith.addf %382, %383 : vector<2x32xf32>
    %385 = math.tanh %384 : vector<2x32xf32>
    %386 = arith.mulf %381, %385 : vector<2x32xf32>
    %387 = vector.extract_strided_slice %370 {offsets = [0, 0], sizes = [2, 96], strides = [1, 1]} : vector<2x128xf32> to vector<2x96xf32>
    %388 = arith.negf %387 : vector<2x96xf32>
    %389 = math.exp %388 : vector<2x96xf32>
    %cst_82 = arith.constant 1.000000e+00 : f32
    %390 = vector.broadcast %cst_82 : f32 to vector<2x96xf32>
    %391 = arith.addf %390, %389 : vector<2x96xf32>
    %392 = arith.divf %390, %391 : vector<2x96xf32>
    %393 = vector.extract_strided_slice %370 {offsets = [0, 96], sizes = [2, 32], strides = [1, 1]} : vector<2x128xf32> to vector<2x32xf32>
    %394 = math.tanh %393 : vector<2x32xf32>
    %395 = vector.extract_strided_slice %392 {offsets = [0, 0], sizes = [2, 32], strides = [1, 1]} : vector<2x96xf32> to vector<2x32xf32>
    %396 = vector.extract_strided_slice %392 {offsets = [0, 32], sizes = [2, 32], strides = [1, 1]} : vector<2x96xf32> to vector<2x32xf32>
    %397 = vector.extract_strided_slice %392 {offsets = [0, 64], sizes = [2, 32], strides = [1, 1]} : vector<2x96xf32> to vector<2x32xf32>
    %398 = arith.mulf %396, %352 : vector<2x32xf32>
    %399 = arith.mulf %395, %394 : vector<2x32xf32>
    %400 = arith.addf %398, %399 : vector<2x32xf32>
    %401 = math.tanh %400 : vector<2x32xf32>
    %402 = arith.mulf %397, %401 : vector<2x32xf32>
    %403 = arith.select %44, %386, %349 : vector<2x32xi1>, vector<2x32xf32>
    %404 = arith.select %44, %384, %350 : vector<2x32xi1>, vector<2x32xf32>
    %405 = arith.select %35, %402, %351 : vector<2x32xi1>, vector<2x32xf32>
    %406 = arith.select %35, %400, %352 : vector<2x32xi1>, vector<2x32xf32>
    %cst_83 = arith.constant 0.000000e+00 : f32
    %407 = vector.broadcast %cst_83 : f32 to vector<2x32xf32>
    %408 = arith.select %44, %386, %407 : vector<2x32xi1>, vector<2x32xf32>
    %c0_84 = arith.constant 0 : index
    %c5_85 = arith.constant 5 : index
    %c0_86 = arith.constant 0 : index
    %409 = vector.load %arg17[%c0_84, %c5_85, %c0_86] : memref<2x8x64xf32, #tpu.memory_space<vmem>>, vector<2x1x32xf32>
    %410 = vector.shape_cast %409 : vector<2x1x32xf32> to vector<2x32xf32>
    %411 = vector.shape_cast %408 : vector<2x32xf32> to vector<2x1x32xf32>
    tpu.vector_store %arg17[%c0_84, %c5_85, %c0_86], %411 {strides = array<i32>} : memref<2x8x64xf32, #tpu.memory_space<vmem>>, vector<2x1x32xf32>,
    %cst_87 = arith.constant 0.000000e+00 : f32
    %412 = vector.broadcast %cst_87 : f32 to vector<2x32xf32>
    %413 = arith.select %35, %402, %412 : vector<2x32xi1>, vector<2x32xf32>
    %c0_88 = arith.constant 0 : index
    %c2_89 = arith.constant 2 : index
    %c32_90 = arith.constant 32 : index
    %414 = vector.load %arg17[%c0_88, %c2_89, %c32_90] : memref<2x8x64xf32, #tpu.memory_space<vmem>>, vector<2x1x32xf32>
    %415 = vector.shape_cast %414 : vector<2x1x32xf32> to vector<2x32xf32>
    %416 = vector.shape_cast %413 : vector<2x32xf32> to vector<2x1x32xf32>
    tpu.vector_store %arg17[%c0_88, %c2_89, %c32_90], %416 {strides = array<i32>} : memref<2x8x64xf32, #tpu.memory_space<vmem>>, vector<2x1x32xf32>,
    %417 = vector.extract_strided_slice %86 {offsets = [0, 6, 0], sizes = [2, 1, 128], strides = [1, 1, 1]} : vector<2x8x256xf32> to vector<2x1x128xf32>
    %418 = vector.shape_cast %417 : vector<2x1x128xf32> to vector<2x128xf32>
    %cst_91 = arith.constant dense<0.000000e+00> : vector<2x128xf32>
    %419 = tpu.matmul %403, %87, %cst_91 {dimension_numbers = #tpu.dot_dimension_numbers<[1], [0], [0], [1], [0, 0, 1, 1], [], []>} : vector<2x32xf32>, vector<32x128xf32>, vector<2x128xf32> -> vector<2x128xf32>
    %420 = arith.addf %418, %419 : vector<2x128xf32>
    %421 = vector.extract_strided_slice %86 {offsets = [0, 1, 128], sizes = [2, 1, 128], strides = [1, 1, 1]} : vector<2x8x256xf32> to vector<2x1x128xf32>
    %422 = vector.shape_cast %421 : vector<2x1x128xf32> to vector<2x128xf32>
    %cst_92 = arith.constant dense<0.000000e+00> : vector<2x128xf32>
    %423 = tpu.matmul %405, %88, %cst_92 {dimension_numbers = #tpu.dot_dimension_numbers<[1], [0], [0], [1], [0, 0, 1, 1], [], []>} : vector<2x32xf32>, vector<32x128xf32>, vector<2x128xf32> -> vector<2x128xf32>
    %424 = arith.addf %422, %423 : vector<2x128xf32>
    %425 = vector.extract_strided_slice %420 {offsets = [0, 0], sizes = [2, 96], strides = [1, 1]} : vector<2x128xf32> to vector<2x96xf32>
    %426 = arith.negf %425 : vector<2x96xf32>
    %427 = math.exp %426 : vector<2x96xf32>
    %cst_93 = arith.constant 1.000000e+00 : f32
    %428 = vector.broadcast %cst_93 : f32 to vector<2x96xf32>
    %429 = arith.addf %428, %427 : vector<2x96xf32>
    %430 = arith.divf %428, %429 : vector<2x96xf32>
    %431 = vector.extract_strided_slice %420 {offsets = [0, 96], sizes = [2, 32], strides = [1, 1]} : vector<2x128xf32> to vector<2x32xf32>
    %432 = math.tanh %431 : vector<2x32xf32>
    %433 = vector.extract_strided_slice %430 {offsets = [0, 0], sizes = [2, 32], strides = [1, 1]} : vector<2x96xf32> to vector<2x32xf32>
    %434 = vector.extract_strided_slice %430 {offsets = [0, 32], sizes = [2, 32], strides = [1, 1]} : vector<2x96xf32> to vector<2x32xf32>
    %435 = vector.extract_strided_slice %430 {offsets = [0, 64], sizes = [2, 32], strides = [1, 1]} : vector<2x96xf32> to vector<2x32xf32>
    %436 = arith.mulf %434, %404 : vector<2x32xf32>
    %437 = arith.mulf %433, %432 : vector<2x32xf32>
    %438 = arith.addf %436, %437 : vector<2x32xf32>
    %439 = math.tanh %438 : vector<2x32xf32>
    %440 = arith.mulf %435, %439 : vector<2x32xf32>
    %441 = vector.extract_strided_slice %424 {offsets = [0, 0], sizes = [2, 96], strides = [1, 1]} : vector<2x128xf32> to vector<2x96xf32>
    %442 = arith.negf %441 : vector<2x96xf32>
    %443 = math.exp %442 : vector<2x96xf32>
    %cst_94 = arith.constant 1.000000e+00 : f32
    %444 = vector.broadcast %cst_94 : f32 to vector<2x96xf32>
    %445 = arith.addf %444, %443 : vector<2x96xf32>
    %446 = arith.divf %444, %445 : vector<2x96xf32>
    %447 = vector.extract_strided_slice %424 {offsets = [0, 96], sizes = [2, 32], strides = [1, 1]} : vector<2x128xf32> to vector<2x32xf32>
    %448 = math.tanh %447 : vector<2x32xf32>
    %449 = vector.extract_strided_slice %446 {offsets = [0, 0], sizes = [2, 32], strides = [1, 1]} : vector<2x96xf32> to vector<2x32xf32>
    %450 = vector.extract_strided_slice %446 {offsets = [0, 32], sizes = [2, 32], strides = [1, 1]} : vector<2x96xf32> to vector<2x32xf32>
    %451 = vector.extract_strided_slice %446 {offsets = [0, 64], sizes = [2, 32], strides = [1, 1]} : vector<2x96xf32> to vector<2x32xf32>
    %452 = arith.mulf %450, %406 : vector<2x32xf32>
    %453 = arith.mulf %449, %448 : vector<2x32xf32>
    %454 = arith.addf %452, %453 : vector<2x32xf32>
    %455 = math.tanh %454 : vector<2x32xf32>
    %456 = arith.mulf %451, %455 : vector<2x32xf32>
    %457 = arith.select %47, %440, %403 : vector<2x32xi1>, vector<2x32xf32>
    %458 = arith.select %47, %438, %404 : vector<2x32xi1>, vector<2x32xf32>
    %459 = arith.select %32, %456, %405 : vector<2x32xi1>, vector<2x32xf32>
    %460 = arith.select %32, %454, %406 : vector<2x32xi1>, vector<2x32xf32>
    %cst_95 = arith.constant 0.000000e+00 : f32
    %461 = vector.broadcast %cst_95 : f32 to vector<2x32xf32>
    %462 = arith.select %47, %440, %461 : vector<2x32xi1>, vector<2x32xf32>
    %c0_96 = arith.constant 0 : index
    %c6_97 = arith.constant 6 : index
    %c0_98 = arith.constant 0 : index
    %463 = vector.load %arg17[%c0_96, %c6_97, %c0_98] : memref<2x8x64xf32, #tpu.memory_space<vmem>>, vector<2x1x32xf32>
    %464 = vector.shape_cast %463 : vector<2x1x32xf32> to vector<2x32xf32>
    %465 = vector.shape_cast %462 : vector<2x32xf32> to vector<2x1x32xf32>
    tpu.vector_store %arg17[%c0_96, %c6_97, %c0_98], %465 {strides = array<i32>} : memref<2x8x64xf32, #tpu.memory_space<vmem>>, vector<2x1x32xf32>,
    %cst_99 = arith.constant 0.000000e+00 : f32
    %466 = vector.broadcast %cst_99 : f32 to vector<2x32xf32>
    %467 = arith.select %32, %456, %466 : vector<2x32xi1>, vector<2x32xf32>
    %c0_100 = arith.constant 0 : index
    %c1_101 = arith.constant 1 : index
    %c32_102 = arith.constant 32 : index
    %468 = vector.load %arg17[%c0_100, %c1_101, %c32_102] : memref<2x8x64xf32, #tpu.memory_space<vmem>>, vector<2x1x32xf32>
    %469 = vector.shape_cast %468 : vector<2x1x32xf32> to vector<2x32xf32>
    %470 = vector.shape_cast %467 : vector<2x32xf32> to vector<2x1x32xf32>
    tpu.vector_store %arg17[%c0_100, %c1_101, %c32_102], %470 {strides = array<i32>} : memref<2x8x64xf32, #tpu.memory_space<vmem>>, vector<2x1x32xf32>,
    %471 = vector.extract_strided_slice %86 {offsets = [0, 7, 0], sizes = [2, 1, 128], strides = [1, 1, 1]} : vector<2x8x256xf32> to vector<2x1x128xf32>
    %472 = vector.shape_cast %471 : vector<2x1x128xf32> to vector<2x128xf32>
    %cst_103 = arith.constant dense<0.000000e+00> : vector<2x128xf32>
    %473 = tpu.matmul %457, %87, %cst_103 {dimension_numbers = #tpu.dot_dimension_numbers<[1], [0], [0], [1], [0, 0, 1, 1], [], []>} : vector<2x32xf32>, vector<32x128xf32>, vector<2x128xf32> -> vector<2x128xf32>
    %474 = arith.addf %472, %473 : vector<2x128xf32>
    %475 = vector.extract_strided_slice %86 {offsets = [0, 0, 128], sizes = [2, 1, 128], strides = [1, 1, 1]} : vector<2x8x256xf32> to vector<2x1x128xf32>
    %476 = vector.shape_cast %475 : vector<2x1x128xf32> to vector<2x128xf32>
    %cst_104 = arith.constant dense<0.000000e+00> : vector<2x128xf32>
    %477 = tpu.matmul %459, %88, %cst_104 {dimension_numbers = #tpu.dot_dimension_numbers<[1], [0], [0], [1], [0, 0, 1, 1], [], []>} : vector<2x32xf32>, vector<32x128xf32>, vector<2x128xf32> -> vector<2x128xf32>
    %478 = arith.addf %476, %477 : vector<2x128xf32>
    %479 = vector.extract_strided_slice %474 {offsets = [0, 0], sizes = [2, 96], strides = [1, 1]} : vector<2x128xf32> to vector<2x96xf32>
    %480 = arith.negf %479 : vector<2x96xf32>
    %481 = math.exp %480 : vector<2x96xf32>
    %cst_105 = arith.constant 1.000000e+00 : f32
    %482 = vector.broadcast %cst_105 : f32 to vector<2x96xf32>
    %483 = arith.addf %482, %481 : vector<2x96xf32>
    %484 = arith.divf %482, %483 : vector<2x96xf32>
    %485 = vector.extract_strided_slice %474 {offsets = [0, 96], sizes = [2, 32], strides = [1, 1]} : vector<2x128xf32> to vector<2x32xf32>
    %486 = math.tanh %485 : vector<2x32xf32>
    %487 = vector.extract_strided_slice %484 {offsets = [0, 0], sizes = [2, 32], strides = [1, 1]} : vector<2x96xf32> to vector<2x32xf32>
    %488 = vector.extract_strided_slice %484 {offsets = [0, 32], sizes = [2, 32], strides = [1, 1]} : vector<2x96xf32> to vector<2x32xf32>
    %489 = vector.extract_strided_slice %484 {offsets = [0, 64], sizes = [2, 32], strides = [1, 1]} : vector<2x96xf32> to vector<2x32xf32>
    %490 = arith.mulf %488, %458 : vector<2x32xf32>
    %491 = arith.mulf %487, %486 : vector<2x32xf32>
    %492 = arith.addf %490, %491 : vector<2x32xf32>
    %493 = math.tanh %492 : vector<2x32xf32>
    %494 = arith.mulf %489, %493 : vector<2x32xf32>
    %495 = vector.extract_strided_slice %478 {offsets = [0, 0], sizes = [2, 96], strides = [1, 1]} : vector<2x128xf32> to vector<2x96xf32>
    %496 = arith.negf %495 : vector<2x96xf32>
    %497 = math.exp %496 : vector<2x96xf32>
    %cst_106 = arith.constant 1.000000e+00 : f32
    %498 = vector.broadcast %cst_106 : f32 to vector<2x96xf32>
    %499 = arith.addf %498, %497 : vector<2x96xf32>
    %500 = arith.divf %498, %499 : vector<2x96xf32>
    %501 = vector.extract_strided_slice %478 {offsets = [0, 96], sizes = [2, 32], strides = [1, 1]} : vector<2x128xf32> to vector<2x32xf32>
    %502 = math.tanh %501 : vector<2x32xf32>
    %503 = vector.extract_strided_slice %500 {offsets = [0, 0], sizes = [2, 32], strides = [1, 1]} : vector<2x96xf32> to vector<2x32xf32>
    %504 = vector.extract_strided_slice %500 {offsets = [0, 32], sizes = [2, 32], strides = [1, 1]} : vector<2x96xf32> to vector<2x32xf32>
    %505 = vector.extract_strided_slice %500 {offsets = [0, 64], sizes = [2, 32], strides = [1, 1]} : vector<2x96xf32> to vector<2x32xf32>
    %506 = arith.mulf %504, %460 : vector<2x32xf32>
    %507 = arith.mulf %503, %502 : vector<2x32xf32>
    %508 = arith.addf %506, %507 : vector<2x32xf32>
    %509 = math.tanh %508 : vector<2x32xf32>
    %510 = arith.mulf %505, %509 : vector<2x32xf32>
    %cst_107 = arith.constant 0.000000e+00 : f32
    %511 = vector.broadcast %cst_107 : f32 to vector<2x32xf32>
    %512 = arith.select %50, %494, %511 : vector<2x32xi1>, vector<2x32xf32>
    %c0_108 = arith.constant 0 : index
    %c7_109 = arith.constant 7 : index
    %c0_110 = arith.constant 0 : index
    %513 = vector.load %arg17[%c0_108, %c7_109, %c0_110] : memref<2x8x64xf32, #tpu.memory_space<vmem>>, vector<2x1x32xf32>
    %514 = vector.shape_cast %513 : vector<2x1x32xf32> to vector<2x32xf32>
    %515 = vector.shape_cast %512 : vector<2x32xf32> to vector<2x1x32xf32>
    tpu.vector_store %arg17[%c0_108, %c7_109, %c0_110], %515 {strides = array<i32>} : memref<2x8x64xf32, #tpu.memory_space<vmem>>, vector<2x1x32xf32>,
    %cst_111 = arith.constant 0.000000e+00 : f32
    %516 = vector.broadcast %cst_111 : f32 to vector<2x32xf32>
    %517 = arith.select %29, %510, %516 : vector<2x32xi1>, vector<2x32xf32>
    %c0_112 = arith.constant 0 : index
    %c0_113 = arith.constant 0 : index
    %c32_114 = arith.constant 32 : index
    %518 = vector.load %arg17[%c0_112, %c0_113, %c32_114] : memref<2x8x64xf32, #tpu.memory_space<vmem>>, vector<2x1x32xf32>
    %519 = vector.shape_cast %518 : vector<2x1x32xf32> to vector<2x32xf32>
    %520 = vector.shape_cast %517 : vector<2x32xf32> to vector<2x1x32xf32>
    tpu.vector_store %arg17[%c0_112, %c0_113, %c32_114], %520 {strides = array<i32>} : memref<2x8x64xf32, #tpu.memory_space<vmem>>, vector<2x1x32xf32>,
    %c0_115 = arith.constant 0 : index
    %c0_116 = arith.constant 0 : index
    %c0_117 = arith.constant 0 : index
    %521 = vector.load %arg17[%c0_115, %c0_116, %c0_117] : memref<2x8x64xf32, #tpu.memory_space<vmem>>, vector<2x8x64xf32>
    %522 = vector.shape_cast %521 : vector<2x8x64xf32> to vector<16x64xf32>
    %c0_118 = arith.constant 0 : index
    %c0_119 = arith.constant 0 : index
    %523 = vector.load %arg9[%c0_118, %c0_119] : memref<64x256xf32, #tpu.memory_space<vmem>>, vector<64x256xf32>
    %cst_120 = arith.constant dense<0.000000e+00> : vector<16x256xf32>
    %524 = tpu.matmul %522, %523, %cst_120 {dimension_numbers = #tpu.dot_dimension_numbers<[1], [0], [0], [1], [0, 0, 1, 1], [], []>} : vector<16x64xf32>, vector<64x256xf32>, vector<16x256xf32> -> vector<16x256xf32>
    %c0_121 = arith.constant 0 : index
    %c0_122 = arith.constant 0 : index
    %525 = vector.load %arg10[%c0_121, %c0_122] : memref<1x256xf32, #tpu.memory_space<vmem>>, vector<1x256xf32>
    %526 = vector.broadcast %525 : vector<1x256xf32> to vector<16x256xf32>
    %527 = arith.addf %524, %526 : vector<16x256xf32>
    %528 = vector.shape_cast %527 : vector<16x256xf32> to vector<2x8x256xf32>
    %c0_123 = arith.constant 0 : index
    %c0_124 = arith.constant 0 : index
    %529 = vector.load %arg11[%c0_123, %c0_124] : memref<32x128xf32, #tpu.memory_space<vmem>>, vector<32x128xf32>
    %c0_125 = arith.constant 0 : index
    %c0_126 = arith.constant 0 : index
    %530 = vector.load %arg12[%c0_125, %c0_126] : memref<32x128xf32, #tpu.memory_space<vmem>>, vector<32x128xf32>
    %cst_127 = arith.constant 0.000000e+00 : f32
    %531 = vector.broadcast %cst_127 : f32 to vector<2x32xf32>
    %cst_128 = arith.constant 0.000000e+00 : f32
    %532 = vector.broadcast %cst_128 : f32 to vector<2x32xf32>
    %cst_129 = arith.constant 0.000000e+00 : f32
    %533 = vector.broadcast %cst_129 : f32 to vector<2x32xf32>
    %cst_130 = arith.constant 0.000000e+00 : f32
    %534 = vector.broadcast %cst_130 : f32 to vector<2x32xf32>
    %535 = vector.extract_strided_slice %528 {offsets = [0, 0, 0], sizes = [2, 1, 128], strides = [1, 1, 1]} : vector<2x8x256xf32> to vector<2x1x128xf32>
    %536 = vector.shape_cast %535 : vector<2x1x128xf32> to vector<2x128xf32>
    %cst_131 = arith.constant dense<0.000000e+00> : vector<2x128xf32>
    %537 = tpu.matmul %531, %529, %cst_131 {dimension_numbers = #tpu.dot_dimension_numbers<[1], [0], [0], [1], [0, 0, 1, 1], [], []>} : vector<2x32xf32>, vector<32x128xf32>, vector<2x128xf32> -> vector<2x128xf32>
    %538 = arith.addf %536, %537 : vector<2x128xf32>
    %539 = vector.extract_strided_slice %528 {offsets = [0, 7, 128], sizes = [2, 1, 128], strides = [1, 1, 1]} : vector<2x8x256xf32> to vector<2x1x128xf32>
    %540 = vector.shape_cast %539 : vector<2x1x128xf32> to vector<2x128xf32>
    %cst_132 = arith.constant dense<0.000000e+00> : vector<2x128xf32>
    %541 = tpu.matmul %533, %530, %cst_132 {dimension_numbers = #tpu.dot_dimension_numbers<[1], [0], [0], [1], [0, 0, 1, 1], [], []>} : vector<2x32xf32>, vector<32x128xf32>, vector<2x128xf32> -> vector<2x128xf32>
    %542 = arith.addf %540, %541 : vector<2x128xf32>
    %543 = vector.extract_strided_slice %538 {offsets = [0, 0], sizes = [2, 96], strides = [1, 1]} : vector<2x128xf32> to vector<2x96xf32>
    %544 = arith.negf %543 : vector<2x96xf32>
    %545 = math.exp %544 : vector<2x96xf32>
    %cst_133 = arith.constant 1.000000e+00 : f32
    %546 = vector.broadcast %cst_133 : f32 to vector<2x96xf32>
    %547 = arith.addf %546, %545 : vector<2x96xf32>
    %548 = arith.divf %546, %547 : vector<2x96xf32>
    %549 = vector.extract_strided_slice %538 {offsets = [0, 96], sizes = [2, 32], strides = [1, 1]} : vector<2x128xf32> to vector<2x32xf32>
    %550 = math.tanh %549 : vector<2x32xf32>
    %551 = vector.extract_strided_slice %548 {offsets = [0, 0], sizes = [2, 32], strides = [1, 1]} : vector<2x96xf32> to vector<2x32xf32>
    %552 = vector.extract_strided_slice %548 {offsets = [0, 32], sizes = [2, 32], strides = [1, 1]} : vector<2x96xf32> to vector<2x32xf32>
    %553 = vector.extract_strided_slice %548 {offsets = [0, 64], sizes = [2, 32], strides = [1, 1]} : vector<2x96xf32> to vector<2x32xf32>
    %554 = arith.mulf %552, %532 : vector<2x32xf32>
    %555 = arith.mulf %551, %550 : vector<2x32xf32>
    %556 = arith.addf %554, %555 : vector<2x32xf32>
    %557 = math.tanh %556 : vector<2x32xf32>
    %558 = arith.mulf %553, %557 : vector<2x32xf32>
    %559 = vector.extract_strided_slice %542 {offsets = [0, 0], sizes = [2, 96], strides = [1, 1]} : vector<2x128xf32> to vector<2x96xf32>
    %560 = arith.negf %559 : vector<2x96xf32>
    %561 = math.exp %560 : vector<2x96xf32>
    %cst_134 = arith.constant 1.000000e+00 : f32
    %562 = vector.broadcast %cst_134 : f32 to vector<2x96xf32>
    %563 = arith.addf %562, %561 : vector<2x96xf32>
    %564 = arith.divf %562, %563 : vector<2x96xf32>
    %565 = vector.extract_strided_slice %542 {offsets = [0, 96], sizes = [2, 32], strides = [1, 1]} : vector<2x128xf32> to vector<2x32xf32>
    %566 = math.tanh %565 : vector<2x32xf32>
    %567 = vector.extract_strided_slice %564 {offsets = [0, 0], sizes = [2, 32], strides = [1, 1]} : vector<2x96xf32> to vector<2x32xf32>
    %568 = vector.extract_strided_slice %564 {offsets = [0, 32], sizes = [2, 32], strides = [1, 1]} : vector<2x96xf32> to vector<2x32xf32>
    %569 = vector.extract_strided_slice %564 {offsets = [0, 64], sizes = [2, 32], strides = [1, 1]} : vector<2x96xf32> to vector<2x32xf32>
    %570 = arith.mulf %568, %534 : vector<2x32xf32>
    %571 = arith.mulf %567, %566 : vector<2x32xf32>
    %572 = arith.addf %570, %571 : vector<2x32xf32>
    %573 = math.tanh %572 : vector<2x32xf32>
    %574 = arith.mulf %569, %573 : vector<2x32xf32>
    %575 = arith.select %29, %558, %531 : vector<2x32xi1>, vector<2x32xf32>
    %576 = arith.select %29, %556, %532 : vector<2x32xi1>, vector<2x32xf32>
    %577 = arith.select %50, %574, %533 : vector<2x32xi1>, vector<2x32xf32>
    %578 = arith.select %50, %572, %534 : vector<2x32xi1>, vector<2x32xf32>
    %cst_135 = arith.constant 0.000000e+00 : f32
    %579 = vector.broadcast %cst_135 : f32 to vector<2x32xf32>
    %580 = arith.select %29, %558, %579 : vector<2x32xi1>, vector<2x32xf32>
    %c0_136 = arith.constant 0 : index
    %c0_137 = arith.constant 0 : index
    %c0_138 = arith.constant 0 : index
    %581 = vector.load %arg18[%c0_136, %c0_137, %c0_138] : memref<2x8x64xf32, #tpu.memory_space<vmem>>, vector<2x1x32xf32>
    %582 = vector.shape_cast %581 : vector<2x1x32xf32> to vector<2x32xf32>
    %583 = vector.shape_cast %580 : vector<2x32xf32> to vector<2x1x32xf32>
    tpu.vector_store %arg18[%c0_136, %c0_137, %c0_138], %583 {strides = array<i32>} : memref<2x8x64xf32, #tpu.memory_space<vmem>>, vector<2x1x32xf32>,
    %cst_139 = arith.constant 0.000000e+00 : f32
    %584 = vector.broadcast %cst_139 : f32 to vector<2x32xf32>
    %585 = arith.select %50, %574, %584 : vector<2x32xi1>, vector<2x32xf32>
    %c0_140 = arith.constant 0 : index
    %c7_141 = arith.constant 7 : index
    %c32_142 = arith.constant 32 : index
    %586 = vector.load %arg18[%c0_140, %c7_141, %c32_142] : memref<2x8x64xf32, #tpu.memory_space<vmem>>, vector<2x1x32xf32>
    %587 = vector.shape_cast %586 : vector<2x1x32xf32> to vector<2x32xf32>
    %588 = vector.shape_cast %585 : vector<2x32xf32> to vector<2x1x32xf32>
    tpu.vector_store %arg18[%c0_140, %c7_141, %c32_142], %588 {strides = array<i32>} : memref<2x8x64xf32, #tpu.memory_space<vmem>>, vector<2x1x32xf32>,
    %589 = vector.extract_strided_slice %528 {offsets = [0, 1, 0], sizes = [2, 1, 128], strides = [1, 1, 1]} : vector<2x8x256xf32> to vector<2x1x128xf32>
    %590 = vector.shape_cast %589 : vector<2x1x128xf32> to vector<2x128xf32>
    %cst_143 = arith.constant dense<0.000000e+00> : vector<2x128xf32>
    %591 = tpu.matmul %575, %529, %cst_143 {dimension_numbers = #tpu.dot_dimension_numbers<[1], [0], [0], [1], [0, 0, 1, 1], [], []>} : vector<2x32xf32>, vector<32x128xf32>, vector<2x128xf32> -> vector<2x128xf32>
    %592 = arith.addf %590, %591 : vector<2x128xf32>
    %593 = vector.extract_strided_slice %528 {offsets = [0, 6, 128], sizes = [2, 1, 128], strides = [1, 1, 1]} : vector<2x8x256xf32> to vector<2x1x128xf32>
    %594 = vector.shape_cast %593 : vector<2x1x128xf32> to vector<2x128xf32>
    %cst_144 = arith.constant dense<0.000000e+00> : vector<2x128xf32>
    %595 = tpu.matmul %577, %530, %cst_144 {dimension_numbers = #tpu.dot_dimension_numbers<[1], [0], [0], [1], [0, 0, 1, 1], [], []>} : vector<2x32xf32>, vector<32x128xf32>, vector<2x128xf32> -> vector<2x128xf32>
    %596 = arith.addf %594, %595 : vector<2x128xf32>
    %597 = vector.extract_strided_slice %592 {offsets = [0, 0], sizes = [2, 96], strides = [1, 1]} : vector<2x128xf32> to vector<2x96xf32>
    %598 = arith.negf %597 : vector<2x96xf32>
    %599 = math.exp %598 : vector<2x96xf32>
    %cst_145 = arith.constant 1.000000e+00 : f32
    %600 = vector.broadcast %cst_145 : f32 to vector<2x96xf32>
    %601 = arith.addf %600, %599 : vector<2x96xf32>
    %602 = arith.divf %600, %601 : vector<2x96xf32>
    %603 = vector.extract_strided_slice %592 {offsets = [0, 96], sizes = [2, 32], strides = [1, 1]} : vector<2x128xf32> to vector<2x32xf32>
    %604 = math.tanh %603 : vector<2x32xf32>
    %605 = vector.extract_strided_slice %602 {offsets = [0, 0], sizes = [2, 32], strides = [1, 1]} : vector<2x96xf32> to vector<2x32xf32>
    %606 = vector.extract_strided_slice %602 {offsets = [0, 32], sizes = [2, 32], strides = [1, 1]} : vector<2x96xf32> to vector<2x32xf32>
    %607 = vector.extract_strided_slice %602 {offsets = [0, 64], sizes = [2, 32], strides = [1, 1]} : vector<2x96xf32> to vector<2x32xf32>
    %608 = arith.mulf %606, %576 : vector<2x32xf32>
    %609 = arith.mulf %605, %604 : vector<2x32xf32>
    %610 = arith.addf %608, %609 : vector<2x32xf32>
    %611 = math.tanh %610 : vector<2x32xf32>
    %612 = arith.mulf %607, %611 : vector<2x32xf32>
    %613 = vector.extract_strided_slice %596 {offsets = [0, 0], sizes = [2, 96], strides = [1, 1]} : vector<2x128xf32> to vector<2x96xf32>
    %614 = arith.negf %613 : vector<2x96xf32>
    %615 = math.exp %614 : vector<2x96xf32>
    %cst_146 = arith.constant 1.000000e+00 : f32
    %616 = vector.broadcast %cst_146 : f32 to vector<2x96xf32>
    %617 = arith.addf %616, %615 : vector<2x96xf32>
    %618 = arith.divf %616, %617 : vector<2x96xf32>
    %619 = vector.extract_strided_slice %596 {offsets = [0, 96], sizes = [2, 32], strides = [1, 1]} : vector<2x128xf32> to vector<2x32xf32>
    %620 = math.tanh %619 : vector<2x32xf32>
    %621 = vector.extract_strided_slice %618 {offsets = [0, 0], sizes = [2, 32], strides = [1, 1]} : vector<2x96xf32> to vector<2x32xf32>
    %622 = vector.extract_strided_slice %618 {offsets = [0, 32], sizes = [2, 32], strides = [1, 1]} : vector<2x96xf32> to vector<2x32xf32>
    %623 = vector.extract_strided_slice %618 {offsets = [0, 64], sizes = [2, 32], strides = [1, 1]} : vector<2x96xf32> to vector<2x32xf32>
    %624 = arith.mulf %622, %578 : vector<2x32xf32>
    %625 = arith.mulf %621, %620 : vector<2x32xf32>
    %626 = arith.addf %624, %625 : vector<2x32xf32>
    %627 = math.tanh %626 : vector<2x32xf32>
    %628 = arith.mulf %623, %627 : vector<2x32xf32>
    %629 = arith.select %32, %612, %575 : vector<2x32xi1>, vector<2x32xf32>
    %630 = arith.select %32, %610, %576 : vector<2x32xi1>, vector<2x32xf32>
    %631 = arith.select %47, %628, %577 : vector<2x32xi1>, vector<2x32xf32>
    %632 = arith.select %47, %626, %578 : vector<2x32xi1>, vector<2x32xf32>
    %cst_147 = arith.constant 0.000000e+00 : f32
    %633 = vector.broadcast %cst_147 : f32 to vector<2x32xf32>
    %634 = arith.select %32, %612, %633 : vector<2x32xi1>, vector<2x32xf32>
    %c0_148 = arith.constant 0 : index
    %c1_149 = arith.constant 1 : index
    %c0_150 = arith.constant 0 : index
    %635 = vector.load %arg18[%c0_148, %c1_149, %c0_150] : memref<2x8x64xf32, #tpu.memory_space<vmem>>, vector<2x1x32xf32>
    %636 = vector.shape_cast %635 : vector<2x1x32xf32> to vector<2x32xf32>
    %637 = vector.shape_cast %634 : vector<2x32xf32> to vector<2x1x32xf32>
    tpu.vector_store %arg18[%c0_148, %c1_149, %c0_150], %637 {strides = array<i32>} : memref<2x8x64xf32, #tpu.memory_space<vmem>>, vector<2x1x32xf32>,
    %cst_151 = arith.constant 0.000000e+00 : f32
    %638 = vector.broadcast %cst_151 : f32 to vector<2x32xf32>
    %639 = arith.select %47, %628, %638 : vector<2x32xi1>, vector<2x32xf32>
    %c0_152 = arith.constant 0 : index
    %c6_153 = arith.constant 6 : index
    %c32_154 = arith.constant 32 : index
    %640 = vector.load %arg18[%c0_152, %c6_153, %c32_154] : memref<2x8x64xf32, #tpu.memory_space<vmem>>, vector<2x1x32xf32>
    %641 = vector.shape_cast %640 : vector<2x1x32xf32> to vector<2x32xf32>
    %642 = vector.shape_cast %639 : vector<2x32xf32> to vector<2x1x32xf32>
    tpu.vector_store %arg18[%c0_152, %c6_153, %c32_154], %642 {strides = array<i32>} : memref<2x8x64xf32, #tpu.memory_space<vmem>>, vector<2x1x32xf32>,
    %643 = vector.extract_strided_slice %528 {offsets = [0, 2, 0], sizes = [2, 1, 128], strides = [1, 1, 1]} : vector<2x8x256xf32> to vector<2x1x128xf32>
    %644 = vector.shape_cast %643 : vector<2x1x128xf32> to vector<2x128xf32>
    %cst_155 = arith.constant dense<0.000000e+00> : vector<2x128xf32>
    %645 = tpu.matmul %629, %529, %cst_155 {dimension_numbers = #tpu.dot_dimension_numbers<[1], [0], [0], [1], [0, 0, 1, 1], [], []>} : vector<2x32xf32>, vector<32x128xf32>, vector<2x128xf32> -> vector<2x128xf32>
    %646 = arith.addf %644, %645 : vector<2x128xf32>
    %647 = vector.extract_strided_slice %528 {offsets = [0, 5, 128], sizes = [2, 1, 128], strides = [1, 1, 1]} : vector<2x8x256xf32> to vector<2x1x128xf32>
    %648 = vector.shape_cast %647 : vector<2x1x128xf32> to vector<2x128xf32>
    %cst_156 = arith.constant dense<0.000000e+00> : vector<2x128xf32>
    %649 = tpu.matmul %631, %530, %cst_156 {dimension_numbers = #tpu.dot_dimension_numbers<[1], [0], [0], [1], [0, 0, 1, 1], [], []>} : vector<2x32xf32>, vector<32x128xf32>, vector<2x128xf32> -> vector<2x128xf32>
    %650 = arith.addf %648, %649 : vector<2x128xf32>
    %651 = vector.extract_strided_slice %646 {offsets = [0, 0], sizes = [2, 96], strides = [1, 1]} : vector<2x128xf32> to vector<2x96xf32>
    %652 = arith.negf %651 : vector<2x96xf32>
    %653 = math.exp %652 : vector<2x96xf32>
    %cst_157 = arith.constant 1.000000e+00 : f32
    %654 = vector.broadcast %cst_157 : f32 to vector<2x96xf32>
    %655 = arith.addf %654, %653 : vector<2x96xf32>
    %656 = arith.divf %654, %655 : vector<2x96xf32>
    %657 = vector.extract_strided_slice %646 {offsets = [0, 96], sizes = [2, 32], strides = [1, 1]} : vector<2x128xf32> to vector<2x32xf32>
    %658 = math.tanh %657 : vector<2x32xf32>
    %659 = vector.extract_strided_slice %656 {offsets = [0, 0], sizes = [2, 32], strides = [1, 1]} : vector<2x96xf32> to vector<2x32xf32>
    %660 = vector.extract_strided_slice %656 {offsets = [0, 32], sizes = [2, 32], strides = [1, 1]} : vector<2x96xf32> to vector<2x32xf32>
    %661 = vector.extract_strided_slice %656 {offsets = [0, 64], sizes = [2, 32], strides = [1, 1]} : vector<2x96xf32> to vector<2x32xf32>
    %662 = arith.mulf %660, %630 : vector<2x32xf32>
    %663 = arith.mulf %659, %658 : vector<2x32xf32>
    %664 = arith.addf %662, %663 : vector<2x32xf32>
    %665 = math.tanh %664 : vector<2x32xf32>
    %666 = arith.mulf %661, %665 : vector<2x32xf32>
    %667 = vector.extract_strided_slice %650 {offsets = [0, 0], sizes = [2, 96], strides = [1, 1]} : vector<2x128xf32> to vector<2x96xf32>
    %668 = arith.negf %667 : vector<2x96xf32>
    %669 = math.exp %668 : vector<2x96xf32>
    %cst_158 = arith.constant 1.000000e+00 : f32
    %670 = vector.broadcast %cst_158 : f32 to vector<2x96xf32>
    %671 = arith.addf %670, %669 : vector<2x96xf32>
    %672 = arith.divf %670, %671 : vector<2x96xf32>
    %673 = vector.extract_strided_slice %650 {offsets = [0, 96], sizes = [2, 32], strides = [1, 1]} : vector<2x128xf32> to vector<2x32xf32>
    %674 = math.tanh %673 : vector<2x32xf32>
    %675 = vector.extract_strided_slice %672 {offsets = [0, 0], sizes = [2, 32], strides = [1, 1]} : vector<2x96xf32> to vector<2x32xf32>
    %676 = vector.extract_strided_slice %672 {offsets = [0, 32], sizes = [2, 32], strides = [1, 1]} : vector<2x96xf32> to vector<2x32xf32>
    %677 = vector.extract_strided_slice %672 {offsets = [0, 64], sizes = [2, 32], strides = [1, 1]} : vector<2x96xf32> to vector<2x32xf32>
    %678 = arith.mulf %676, %632 : vector<2x32xf32>
    %679 = arith.mulf %675, %674 : vector<2x32xf32>
    %680 = arith.addf %678, %679 : vector<2x32xf32>
    %681 = math.tanh %680 : vector<2x32xf32>
    %682 = arith.mulf %677, %681 : vector<2x32xf32>
    %683 = arith.select %35, %666, %629 : vector<2x32xi1>, vector<2x32xf32>
    %684 = arith.select %35, %664, %630 : vector<2x32xi1>, vector<2x32xf32>
    %685 = arith.select %44, %682, %631 : vector<2x32xi1>, vector<2x32xf32>
    %686 = arith.select %44, %680, %632 : vector<2x32xi1>, vector<2x32xf32>
    %cst_159 = arith.constant 0.000000e+00 : f32
    %687 = vector.broadcast %cst_159 : f32 to vector<2x32xf32>
    %688 = arith.select %35, %666, %687 : vector<2x32xi1>, vector<2x32xf32>
    %c0_160 = arith.constant 0 : index
    %c2_161 = arith.constant 2 : index
    %c0_162 = arith.constant 0 : index
    %689 = vector.load %arg18[%c0_160, %c2_161, %c0_162] : memref<2x8x64xf32, #tpu.memory_space<vmem>>, vector<2x1x32xf32>
    %690 = vector.shape_cast %689 : vector<2x1x32xf32> to vector<2x32xf32>
    %691 = vector.shape_cast %688 : vector<2x32xf32> to vector<2x1x32xf32>
    tpu.vector_store %arg18[%c0_160, %c2_161, %c0_162], %691 {strides = array<i32>} : memref<2x8x64xf32, #tpu.memory_space<vmem>>, vector<2x1x32xf32>,
    %cst_163 = arith.constant 0.000000e+00 : f32
    %692 = vector.broadcast %cst_163 : f32 to vector<2x32xf32>
    %693 = arith.select %44, %682, %692 : vector<2x32xi1>, vector<2x32xf32>
    %c0_164 = arith.constant 0 : index
    %c5_165 = arith.constant 5 : index
    %c32_166 = arith.constant 32 : index
    %694 = vector.load %arg18[%c0_164, %c5_165, %c32_166] : memref<2x8x64xf32, #tpu.memory_space<vmem>>, vector<2x1x32xf32>
    %695 = vector.shape_cast %694 : vector<2x1x32xf32> to vector<2x32xf32>
    %696 = vector.shape_cast %693 : vector<2x32xf32> to vector<2x1x32xf32>
    tpu.vector_store %arg18[%c0_164, %c5_165, %c32_166], %696 {strides = array<i32>} : memref<2x8x64xf32, #tpu.memory_space<vmem>>, vector<2x1x32xf32>,
    %697 = vector.extract_strided_slice %528 {offsets = [0, 3, 0], sizes = [2, 1, 128], strides = [1, 1, 1]} : vector<2x8x256xf32> to vector<2x1x128xf32>
    %698 = vector.shape_cast %697 : vector<2x1x128xf32> to vector<2x128xf32>
    %cst_167 = arith.constant dense<0.000000e+00> : vector<2x128xf32>
    %699 = tpu.matmul %683, %529, %cst_167 {dimension_numbers = #tpu.dot_dimension_numbers<[1], [0], [0], [1], [0, 0, 1, 1], [], []>} : vector<2x32xf32>, vector<32x128xf32>, vector<2x128xf32> -> vector<2x128xf32>
    %700 = arith.addf %698, %699 : vector<2x128xf32>
    %701 = vector.extract_strided_slice %528 {offsets = [0, 4, 128], sizes = [2, 1, 128], strides = [1, 1, 1]} : vector<2x8x256xf32> to vector<2x1x128xf32>
    %702 = vector.shape_cast %701 : vector<2x1x128xf32> to vector<2x128xf32>
    %cst_168 = arith.constant dense<0.000000e+00> : vector<2x128xf32>
    %703 = tpu.matmul %685, %530, %cst_168 {dimension_numbers = #tpu.dot_dimension_numbers<[1], [0], [0], [1], [0, 0, 1, 1], [], []>} : vector<2x32xf32>, vector<32x128xf32>, vector<2x128xf32> -> vector<2x128xf32>
    %704 = arith.addf %702, %703 : vector<2x128xf32>
    %705 = vector.extract_strided_slice %700 {offsets = [0, 0], sizes = [2, 96], strides = [1, 1]} : vector<2x128xf32> to vector<2x96xf32>
    %706 = arith.negf %705 : vector<2x96xf32>
    %707 = math.exp %706 : vector<2x96xf32>
    %cst_169 = arith.constant 1.000000e+00 : f32
    %708 = vector.broadcast %cst_169 : f32 to vector<2x96xf32>
    %709 = arith.addf %708, %707 : vector<2x96xf32>
    %710 = arith.divf %708, %709 : vector<2x96xf32>
    %711 = vector.extract_strided_slice %700 {offsets = [0, 96], sizes = [2, 32], strides = [1, 1]} : vector<2x128xf32> to vector<2x32xf32>
    %712 = math.tanh %711 : vector<2x32xf32>
    %713 = vector.extract_strided_slice %710 {offsets = [0, 0], sizes = [2, 32], strides = [1, 1]} : vector<2x96xf32> to vector<2x32xf32>
    %714 = vector.extract_strided_slice %710 {offsets = [0, 32], sizes = [2, 32], strides = [1, 1]} : vector<2x96xf32> to vector<2x32xf32>
    %715 = vector.extract_strided_slice %710 {offsets = [0, 64], sizes = [2, 32], strides = [1, 1]} : vector<2x96xf32> to vector<2x32xf32>
    %716 = arith.mulf %714, %684 : vector<2x32xf32>
    %717 = arith.mulf %713, %712 : vector<2x32xf32>
    %718 = arith.addf %716, %717 : vector<2x32xf32>
    %719 = math.tanh %718 : vector<2x32xf32>
    %720 = arith.mulf %715, %719 : vector<2x32xf32>
    %721 = vector.extract_strided_slice %704 {offsets = [0, 0], sizes = [2, 96], strides = [1, 1]} : vector<2x128xf32> to vector<2x96xf32>
    %722 = arith.negf %721 : vector<2x96xf32>
    %723 = math.exp %722 : vector<2x96xf32>
    %cst_170 = arith.constant 1.000000e+00 : f32
    %724 = vector.broadcast %cst_170 : f32 to vector<2x96xf32>
    %725 = arith.addf %724, %723 : vector<2x96xf32>
    %726 = arith.divf %724, %725 : vector<2x96xf32>
    %727 = vector.extract_strided_slice %704 {offsets = [0, 96], sizes = [2, 32], strides = [1, 1]} : vector<2x128xf32> to vector<2x32xf32>
    %728 = math.tanh %727 : vector<2x32xf32>
    %729 = vector.extract_strided_slice %726 {offsets = [0, 0], sizes = [2, 32], strides = [1, 1]} : vector<2x96xf32> to vector<2x32xf32>
    %730 = vector.extract_strided_slice %726 {offsets = [0, 32], sizes = [2, 32], strides = [1, 1]} : vector<2x96xf32> to vector<2x32xf32>
    %731 = vector.extract_strided_slice %726 {offsets = [0, 64], sizes = [2, 32], strides = [1, 1]} : vector<2x96xf32> to vector<2x32xf32>
    %732 = arith.mulf %730, %686 : vector<2x32xf32>
    %733 = arith.mulf %729, %728 : vector<2x32xf32>
    %734 = arith.addf %732, %733 : vector<2x32xf32>
    %735 = math.tanh %734 : vector<2x32xf32>
    %736 = arith.mulf %731, %735 : vector<2x32xf32>
    %737 = arith.select %38, %720, %683 : vector<2x32xi1>, vector<2x32xf32>
    %738 = arith.select %38, %718, %684 : vector<2x32xi1>, vector<2x32xf32>
    %739 = arith.select %41, %736, %685 : vector<2x32xi1>, vector<2x32xf32>
    %740 = arith.select %41, %734, %686 : vector<2x32xi1>, vector<2x32xf32>
    %cst_171 = arith.constant 0.000000e+00 : f32
    %741 = vector.broadcast %cst_171 : f32 to vector<2x32xf32>
    %742 = arith.select %38, %720, %741 : vector<2x32xi1>, vector<2x32xf32>
    %c0_172 = arith.constant 0 : index
    %c3_173 = arith.constant 3 : index
    %c0_174 = arith.constant 0 : index
    %743 = vector.load %arg18[%c0_172, %c3_173, %c0_174] : memref<2x8x64xf32, #tpu.memory_space<vmem>>, vector<2x1x32xf32>
    %744 = vector.shape_cast %743 : vector<2x1x32xf32> to vector<2x32xf32>
    %745 = vector.shape_cast %742 : vector<2x32xf32> to vector<2x1x32xf32>
    tpu.vector_store %arg18[%c0_172, %c3_173, %c0_174], %745 {strides = array<i32>} : memref<2x8x64xf32, #tpu.memory_space<vmem>>, vector<2x1x32xf32>,
    %cst_175 = arith.constant 0.000000e+00 : f32
    %746 = vector.broadcast %cst_175 : f32 to vector<2x32xf32>
    %747 = arith.select %41, %736, %746 : vector<2x32xi1>, vector<2x32xf32>
    %c0_176 = arith.constant 0 : index
    %c4_177 = arith.constant 4 : index
    %c32_178 = arith.constant 32 : index
    %748 = vector.load %arg18[%c0_176, %c4_177, %c32_178] : memref<2x8x64xf32, #tpu.memory_space<vmem>>, vector<2x1x32xf32>
    %749 = vector.shape_cast %748 : vector<2x1x32xf32> to vector<2x32xf32>
    %750 = vector.shape_cast %747 : vector<2x32xf32> to vector<2x1x32xf32>
    tpu.vector_store %arg18[%c0_176, %c4_177, %c32_178], %750 {strides = array<i32>} : memref<2x8x64xf32, #tpu.memory_space<vmem>>, vector<2x1x32xf32>,
    %751 = vector.extract_strided_slice %528 {offsets = [0, 4, 0], sizes = [2, 1, 128], strides = [1, 1, 1]} : vector<2x8x256xf32> to vector<2x1x128xf32>
    %752 = vector.shape_cast %751 : vector<2x1x128xf32> to vector<2x128xf32>
    %cst_179 = arith.constant dense<0.000000e+00> : vector<2x128xf32>
    %753 = tpu.matmul %737, %529, %cst_179 {dimension_numbers = #tpu.dot_dimension_numbers<[1], [0], [0], [1], [0, 0, 1, 1], [], []>} : vector<2x32xf32>, vector<32x128xf32>, vector<2x128xf32> -> vector<2x128xf32>
    %754 = arith.addf %752, %753 : vector<2x128xf32>
    %755 = vector.extract_strided_slice %528 {offsets = [0, 3, 128], sizes = [2, 1, 128], strides = [1, 1, 1]} : vector<2x8x256xf32> to vector<2x1x128xf32>
    %756 = vector.shape_cast %755 : vector<2x1x128xf32> to vector<2x128xf32>
    %cst_180 = arith.constant dense<0.000000e+00> : vector<2x128xf32>
    %757 = tpu.matmul %739, %530, %cst_180 {dimension_numbers = #tpu.dot_dimension_numbers<[1], [0], [0], [1], [0, 0, 1, 1], [], []>} : vector<2x32xf32>, vector<32x128xf32>, vector<2x128xf32> -> vector<2x128xf32>
    %758 = arith.addf %756, %757 : vector<2x128xf32>
    %759 = vector.extract_strided_slice %754 {offsets = [0, 0], sizes = [2, 96], strides = [1, 1]} : vector<2x128xf32> to vector<2x96xf32>
    %760 = arith.negf %759 : vector<2x96xf32>
    %761 = math.exp %760 : vector<2x96xf32>
    %cst_181 = arith.constant 1.000000e+00 : f32
    %762 = vector.broadcast %cst_181 : f32 to vector<2x96xf32>
    %763 = arith.addf %762, %761 : vector<2x96xf32>
    %764 = arith.divf %762, %763 : vector<2x96xf32>
    %765 = vector.extract_strided_slice %754 {offsets = [0, 96], sizes = [2, 32], strides = [1, 1]} : vector<2x128xf32> to vector<2x32xf32>
    %766 = math.tanh %765 : vector<2x32xf32>
    %767 = vector.extract_strided_slice %764 {offsets = [0, 0], sizes = [2, 32], strides = [1, 1]} : vector<2x96xf32> to vector<2x32xf32>
    %768 = vector.extract_strided_slice %764 {offsets = [0, 32], sizes = [2, 32], strides = [1, 1]} : vector<2x96xf32> to vector<2x32xf32>
    %769 = vector.extract_strided_slice %764 {offsets = [0, 64], sizes = [2, 32], strides = [1, 1]} : vector<2x96xf32> to vector<2x32xf32>
    %770 = arith.mulf %768, %738 : vector<2x32xf32>
    %771 = arith.mulf %767, %766 : vector<2x32xf32>
    %772 = arith.addf %770, %771 : vector<2x32xf32>
    %773 = math.tanh %772 : vector<2x32xf32>
    %774 = arith.mulf %769, %773 : vector<2x32xf32>
    %775 = vector.extract_strided_slice %758 {offsets = [0, 0], sizes = [2, 96], strides = [1, 1]} : vector<2x128xf32> to vector<2x96xf32>
    %776 = arith.negf %775 : vector<2x96xf32>
    %777 = math.exp %776 : vector<2x96xf32>
    %cst_182 = arith.constant 1.000000e+00 : f32
    %778 = vector.broadcast %cst_182 : f32 to vector<2x96xf32>
    %779 = arith.addf %778, %777 : vector<2x96xf32>
    %780 = arith.divf %778, %779 : vector<2x96xf32>
    %781 = vector.extract_strided_slice %758 {offsets = [0, 96], sizes = [2, 32], strides = [1, 1]} : vector<2x128xf32> to vector<2x32xf32>
    %782 = math.tanh %781 : vector<2x32xf32>
    %783 = vector.extract_strided_slice %780 {offsets = [0, 0], sizes = [2, 32], strides = [1, 1]} : vector<2x96xf32> to vector<2x32xf32>
    %784 = vector.extract_strided_slice %780 {offsets = [0, 32], sizes = [2, 32], strides = [1, 1]} : vector<2x96xf32> to vector<2x32xf32>
    %785 = vector.extract_strided_slice %780 {offsets = [0, 64], sizes = [2, 32], strides = [1, 1]} : vector<2x96xf32> to vector<2x32xf32>
    %786 = arith.mulf %784, %740 : vector<2x32xf32>
    %787 = arith.mulf %783, %782 : vector<2x32xf32>
    %788 = arith.addf %786, %787 : vector<2x32xf32>
    %789 = math.tanh %788 : vector<2x32xf32>
    %790 = arith.mulf %785, %789 : vector<2x32xf32>
    %791 = arith.select %41, %774, %737 : vector<2x32xi1>, vector<2x32xf32>
    %792 = arith.select %41, %772, %738 : vector<2x32xi1>, vector<2x32xf32>
    %793 = arith.select %38, %790, %739 : vector<2x32xi1>, vector<2x32xf32>
    %794 = arith.select %38, %788, %740 : vector<2x32xi1>, vector<2x32xf32>
    %cst_183 = arith.constant 0.000000e+00 : f32
    %795 = vector.broadcast %cst_183 : f32 to vector<2x32xf32>
    %796 = arith.select %41, %774, %795 : vector<2x32xi1>, vector<2x32xf32>
    %c0_184 = arith.constant 0 : index
    %c4_185 = arith.constant 4 : index
    %c0_186 = arith.constant 0 : index
    %797 = vector.load %arg18[%c0_184, %c4_185, %c0_186] : memref<2x8x64xf32, #tpu.memory_space<vmem>>, vector<2x1x32xf32>
    %798 = vector.shape_cast %797 : vector<2x1x32xf32> to vector<2x32xf32>
    %799 = vector.shape_cast %796 : vector<2x32xf32> to vector<2x1x32xf32>
    tpu.vector_store %arg18[%c0_184, %c4_185, %c0_186], %799 {strides = array<i32>} : memref<2x8x64xf32, #tpu.memory_space<vmem>>, vector<2x1x32xf32>,
    %cst_187 = arith.constant 0.000000e+00 : f32
    %800 = vector.broadcast %cst_187 : f32 to vector<2x32xf32>
    %801 = arith.select %38, %790, %800 : vector<2x32xi1>, vector<2x32xf32>
    %c0_188 = arith.constant 0 : index
    %c3_189 = arith.constant 3 : index
    %c32_190 = arith.constant 32 : index
    %802 = vector.load %arg18[%c0_188, %c3_189, %c32_190] : memref<2x8x64xf32, #tpu.memory_space<vmem>>, vector<2x1x32xf32>
    %803 = vector.shape_cast %802 : vector<2x1x32xf32> to vector<2x32xf32>
    %804 = vector.shape_cast %801 : vector<2x32xf32> to vector<2x1x32xf32>
    tpu.vector_store %arg18[%c0_188, %c3_189, %c32_190], %804 {strides = array<i32>} : memref<2x8x64xf32, #tpu.memory_space<vmem>>, vector<2x1x32xf32>,
    %805 = vector.extract_strided_slice %528 {offsets = [0, 5, 0], sizes = [2, 1, 128], strides = [1, 1, 1]} : vector<2x8x256xf32> to vector<2x1x128xf32>
    %806 = vector.shape_cast %805 : vector<2x1x128xf32> to vector<2x128xf32>
    %cst_191 = arith.constant dense<0.000000e+00> : vector<2x128xf32>
    %807 = tpu.matmul %791, %529, %cst_191 {dimension_numbers = #tpu.dot_dimension_numbers<[1], [0], [0], [1], [0, 0, 1, 1], [], []>} : vector<2x32xf32>, vector<32x128xf32>, vector<2x128xf32> -> vector<2x128xf32>
    %808 = arith.addf %806, %807 : vector<2x128xf32>
    %809 = vector.extract_strided_slice %528 {offsets = [0, 2, 128], sizes = [2, 1, 128], strides = [1, 1, 1]} : vector<2x8x256xf32> to vector<2x1x128xf32>
    %810 = vector.shape_cast %809 : vector<2x1x128xf32> to vector<2x128xf32>
    %cst_192 = arith.constant dense<0.000000e+00> : vector<2x128xf32>
    %811 = tpu.matmul %793, %530, %cst_192 {dimension_numbers = #tpu.dot_dimension_numbers<[1], [0], [0], [1], [0, 0, 1, 1], [], []>} : vector<2x32xf32>, vector<32x128xf32>, vector<2x128xf32> -> vector<2x128xf32>
    %812 = arith.addf %810, %811 : vector<2x128xf32>
    %813 = vector.extract_strided_slice %808 {offsets = [0, 0], sizes = [2, 96], strides = [1, 1]} : vector<2x128xf32> to vector<2x96xf32>
    %814 = arith.negf %813 : vector<2x96xf32>
    %815 = math.exp %814 : vector<2x96xf32>
    %cst_193 = arith.constant 1.000000e+00 : f32
    %816 = vector.broadcast %cst_193 : f32 to vector<2x96xf32>
    %817 = arith.addf %816, %815 : vector<2x96xf32>
    %818 = arith.divf %816, %817 : vector<2x96xf32>
    %819 = vector.extract_strided_slice %808 {offsets = [0, 96], sizes = [2, 32], strides = [1, 1]} : vector<2x128xf32> to vector<2x32xf32>
    %820 = math.tanh %819 : vector<2x32xf32>
    %821 = vector.extract_strided_slice %818 {offsets = [0, 0], sizes = [2, 32], strides = [1, 1]} : vector<2x96xf32> to vector<2x32xf32>
    %822 = vector.extract_strided_slice %818 {offsets = [0, 32], sizes = [2, 32], strides = [1, 1]} : vector<2x96xf32> to vector<2x32xf32>
    %823 = vector.extract_strided_slice %818 {offsets = [0, 64], sizes = [2, 32], strides = [1, 1]} : vector<2x96xf32> to vector<2x32xf32>
    %824 = arith.mulf %822, %792 : vector<2x32xf32>
    %825 = arith.mulf %821, %820 : vector<2x32xf32>
    %826 = arith.addf %824, %825 : vector<2x32xf32>
    %827 = math.tanh %826 : vector<2x32xf32>
    %828 = arith.mulf %823, %827 : vector<2x32xf32>
    %829 = vector.extract_strided_slice %812 {offsets = [0, 0], sizes = [2, 96], strides = [1, 1]} : vector<2x128xf32> to vector<2x96xf32>
    %830 = arith.negf %829 : vector<2x96xf32>
    %831 = math.exp %830 : vector<2x96xf32>
    %cst_194 = arith.constant 1.000000e+00 : f32
    %832 = vector.broadcast %cst_194 : f32 to vector<2x96xf32>
    %833 = arith.addf %832, %831 : vector<2x96xf32>
    %834 = arith.divf %832, %833 : vector<2x96xf32>
    %835 = vector.extract_strided_slice %812 {offsets = [0, 96], sizes = [2, 32], strides = [1, 1]} : vector<2x128xf32> to vector<2x32xf32>
    %836 = math.tanh %835 : vector<2x32xf32>
    %837 = vector.extract_strided_slice %834 {offsets = [0, 0], sizes = [2, 32], strides = [1, 1]} : vector<2x96xf32> to vector<2x32xf32>
    %838 = vector.extract_strided_slice %834 {offsets = [0, 32], sizes = [2, 32], strides = [1, 1]} : vector<2x96xf32> to vector<2x32xf32>
    %839 = vector.extract_strided_slice %834 {offsets = [0, 64], sizes = [2, 32], strides = [1, 1]} : vector<2x96xf32> to vector<2x32xf32>
    %840 = arith.mulf %838, %794 : vector<2x32xf32>
    %841 = arith.mulf %837, %836 : vector<2x32xf32>
    %842 = arith.addf %840, %841 : vector<2x32xf32>
    %843 = math.tanh %842 : vector<2x32xf32>
    %844 = arith.mulf %839, %843 : vector<2x32xf32>
    %845 = arith.select %44, %828, %791 : vector<2x32xi1>, vector<2x32xf32>
    %846 = arith.select %44, %826, %792 : vector<2x32xi1>, vector<2x32xf32>
    %847 = arith.select %35, %844, %793 : vector<2x32xi1>, vector<2x32xf32>
    %848 = arith.select %35, %842, %794 : vector<2x32xi1>, vector<2x32xf32>
    %cst_195 = arith.constant 0.000000e+00 : f32
    %849 = vector.broadcast %cst_195 : f32 to vector<2x32xf32>
    %850 = arith.select %44, %828, %849 : vector<2x32xi1>, vector<2x32xf32>
    %c0_196 = arith.constant 0 : index
    %c5_197 = arith.constant 5 : index
    %c0_198 = arith.constant 0 : index
    %851 = vector.load %arg18[%c0_196, %c5_197, %c0_198] : memref<2x8x64xf32, #tpu.memory_space<vmem>>, vector<2x1x32xf32>
    %852 = vector.shape_cast %851 : vector<2x1x32xf32> to vector<2x32xf32>
    %853 = vector.shape_cast %850 : vector<2x32xf32> to vector<2x1x32xf32>
    tpu.vector_store %arg18[%c0_196, %c5_197, %c0_198], %853 {strides = array<i32>} : memref<2x8x64xf32, #tpu.memory_space<vmem>>, vector<2x1x32xf32>,
    %cst_199 = arith.constant 0.000000e+00 : f32
    %854 = vector.broadcast %cst_199 : f32 to vector<2x32xf32>
    %855 = arith.select %35, %844, %854 : vector<2x32xi1>, vector<2x32xf32>
    %c0_200 = arith.constant 0 : index
    %c2_201 = arith.constant 2 : index
    %c32_202 = arith.constant 32 : index
    %856 = vector.load %arg18[%c0_200, %c2_201, %c32_202] : memref<2x8x64xf32, #tpu.memory_space<vmem>>, vector<2x1x32xf32>
    %857 = vector.shape_cast %856 : vector<2x1x32xf32> to vector<2x32xf32>
    %858 = vector.shape_cast %855 : vector<2x32xf32> to vector<2x1x32xf32>
    tpu.vector_store %arg18[%c0_200, %c2_201, %c32_202], %858 {strides = array<i32>} : memref<2x8x64xf32, #tpu.memory_space<vmem>>, vector<2x1x32xf32>,
    %859 = vector.extract_strided_slice %528 {offsets = [0, 6, 0], sizes = [2, 1, 128], strides = [1, 1, 1]} : vector<2x8x256xf32> to vector<2x1x128xf32>
    %860 = vector.shape_cast %859 : vector<2x1x128xf32> to vector<2x128xf32>
    %cst_203 = arith.constant dense<0.000000e+00> : vector<2x128xf32>
    %861 = tpu.matmul %845, %529, %cst_203 {dimension_numbers = #tpu.dot_dimension_numbers<[1], [0], [0], [1], [0, 0, 1, 1], [], []>} : vector<2x32xf32>, vector<32x128xf32>, vector<2x128xf32> -> vector<2x128xf32>
    %862 = arith.addf %860, %861 : vector<2x128xf32>
    %863 = vector.extract_strided_slice %528 {offsets = [0, 1, 128], sizes = [2, 1, 128], strides = [1, 1, 1]} : vector<2x8x256xf32> to vector<2x1x128xf32>
    %864 = vector.shape_cast %863 : vector<2x1x128xf32> to vector<2x128xf32>
    %cst_204 = arith.constant dense<0.000000e+00> : vector<2x128xf32>
    %865 = tpu.matmul %847, %530, %cst_204 {dimension_numbers = #tpu.dot_dimension_numbers<[1], [0], [0], [1], [0, 0, 1, 1], [], []>} : vector<2x32xf32>, vector<32x128xf32>, vector<2x128xf32> -> vector<2x128xf32>
    %866 = arith.addf %864, %865 : vector<2x128xf32>
    %867 = vector.extract_strided_slice %862 {offsets = [0, 0], sizes = [2, 96], strides = [1, 1]} : vector<2x128xf32> to vector<2x96xf32>
    %868 = arith.negf %867 : vector<2x96xf32>
    %869 = math.exp %868 : vector<2x96xf32>
    %cst_205 = arith.constant 1.000000e+00 : f32
    %870 = vector.broadcast %cst_205 : f32 to vector<2x96xf32>
    %871 = arith.addf %870, %869 : vector<2x96xf32>
    %872 = arith.divf %870, %871 : vector<2x96xf32>
    %873 = vector.extract_strided_slice %862 {offsets = [0, 96], sizes = [2, 32], strides = [1, 1]} : vector<2x128xf32> to vector<2x32xf32>
    %874 = math.tanh %873 : vector<2x32xf32>
    %875 = vector.extract_strided_slice %872 {offsets = [0, 0], sizes = [2, 32], strides = [1, 1]} : vector<2x96xf32> to vector<2x32xf32>
    %876 = vector.extract_strided_slice %872 {offsets = [0, 32], sizes = [2, 32], strides = [1, 1]} : vector<2x96xf32> to vector<2x32xf32>
    %877 = vector.extract_strided_slice %872 {offsets = [0, 64], sizes = [2, 32], strides = [1, 1]} : vector<2x96xf32> to vector<2x32xf32>
    %878 = arith.mulf %876, %846 : vector<2x32xf32>
    %879 = arith.mulf %875, %874 : vector<2x32xf32>
    %880 = arith.addf %878, %879 : vector<2x32xf32>
    %881 = math.tanh %880 : vector<2x32xf32>
    %882 = arith.mulf %877, %881 : vector<2x32xf32>
    %883 = vector.extract_strided_slice %866 {offsets = [0, 0], sizes = [2, 96], strides = [1, 1]} : vector<2x128xf32> to vector<2x96xf32>
    %884 = arith.negf %883 : vector<2x96xf32>
    %885 = math.exp %884 : vector<2x96xf32>
    %cst_206 = arith.constant 1.000000e+00 : f32
    %886 = vector.broadcast %cst_206 : f32 to vector<2x96xf32>
    %887 = arith.addf %886, %885 : vector<2x96xf32>
    %888 = arith.divf %886, %887 : vector<2x96xf32>
    %889 = vector.extract_strided_slice %866 {offsets = [0, 96], sizes = [2, 32], strides = [1, 1]} : vector<2x128xf32> to vector<2x32xf32>
    %890 = math.tanh %889 : vector<2x32xf32>
    %891 = vector.extract_strided_slice %888 {offsets = [0, 0], sizes = [2, 32], strides = [1, 1]} : vector<2x96xf32> to vector<2x32xf32>
    %892 = vector.extract_strided_slice %888 {offsets = [0, 32], sizes = [2, 32], strides = [1, 1]} : vector<2x96xf32> to vector<2x32xf32>
    %893 = vector.extract_strided_slice %888 {offsets = [0, 64], sizes = [2, 32], strides = [1, 1]} : vector<2x96xf32> to vector<2x32xf32>
    %894 = arith.mulf %892, %848 : vector<2x32xf32>
    %895 = arith.mulf %891, %890 : vector<2x32xf32>
    %896 = arith.addf %894, %895 : vector<2x32xf32>
    %897 = math.tanh %896 : vector<2x32xf32>
    %898 = arith.mulf %893, %897 : vector<2x32xf32>
    %899 = arith.select %47, %882, %845 : vector<2x32xi1>, vector<2x32xf32>
    %900 = arith.select %47, %880, %846 : vector<2x32xi1>, vector<2x32xf32>
    %901 = arith.select %32, %898, %847 : vector<2x32xi1>, vector<2x32xf32>
    %902 = arith.select %32, %896, %848 : vector<2x32xi1>, vector<2x32xf32>
    %cst_207 = arith.constant 0.000000e+00 : f32
    %903 = vector.broadcast %cst_207 : f32 to vector<2x32xf32>
    %904 = arith.select %47, %882, %903 : vector<2x32xi1>, vector<2x32xf32>
    %c0_208 = arith.constant 0 : index
    %c6_209 = arith.constant 6 : index
    %c0_210 = arith.constant 0 : index
    %905 = vector.load %arg18[%c0_208, %c6_209, %c0_210] : memref<2x8x64xf32, #tpu.memory_space<vmem>>, vector<2x1x32xf32>
    %906 = vector.shape_cast %905 : vector<2x1x32xf32> to vector<2x32xf32>
    %907 = vector.shape_cast %904 : vector<2x32xf32> to vector<2x1x32xf32>
    tpu.vector_store %arg18[%c0_208, %c6_209, %c0_210], %907 {strides = array<i32>} : memref<2x8x64xf32, #tpu.memory_space<vmem>>, vector<2x1x32xf32>,
    %cst_211 = arith.constant 0.000000e+00 : f32
    %908 = vector.broadcast %cst_211 : f32 to vector<2x32xf32>
    %909 = arith.select %32, %898, %908 : vector<2x32xi1>, vector<2x32xf32>
    %c0_212 = arith.constant 0 : index
    %c1_213 = arith.constant 1 : index
    %c32_214 = arith.constant 32 : index
    %910 = vector.load %arg18[%c0_212, %c1_213, %c32_214] : memref<2x8x64xf32, #tpu.memory_space<vmem>>, vector<2x1x32xf32>
    %911 = vector.shape_cast %910 : vector<2x1x32xf32> to vector<2x32xf32>
    %912 = vector.shape_cast %909 : vector<2x32xf32> to vector<2x1x32xf32>
    tpu.vector_store %arg18[%c0_212, %c1_213, %c32_214], %912 {strides = array<i32>} : memref<2x8x64xf32, #tpu.memory_space<vmem>>, vector<2x1x32xf32>,
    %913 = vector.extract_strided_slice %528 {offsets = [0, 7, 0], sizes = [2, 1, 128], strides = [1, 1, 1]} : vector<2x8x256xf32> to vector<2x1x128xf32>
    %914 = vector.shape_cast %913 : vector<2x1x128xf32> to vector<2x128xf32>
    %cst_215 = arith.constant dense<0.000000e+00> : vector<2x128xf32>
    %915 = tpu.matmul %899, %529, %cst_215 {dimension_numbers = #tpu.dot_dimension_numbers<[1], [0], [0], [1], [0, 0, 1, 1], [], []>} : vector<2x32xf32>, vector<32x128xf32>, vector<2x128xf32> -> vector<2x128xf32>
    %916 = arith.addf %914, %915 : vector<2x128xf32>
    %917 = vector.extract_strided_slice %528 {offsets = [0, 0, 128], sizes = [2, 1, 128], strides = [1, 1, 1]} : vector<2x8x256xf32> to vector<2x1x128xf32>
    %918 = vector.shape_cast %917 : vector<2x1x128xf32> to vector<2x128xf32>
    %cst_216 = arith.constant dense<0.000000e+00> : vector<2x128xf32>
    %919 = tpu.matmul %901, %530, %cst_216 {dimension_numbers = #tpu.dot_dimension_numbers<[1], [0], [0], [1], [0, 0, 1, 1], [], []>} : vector<2x32xf32>, vector<32x128xf32>, vector<2x128xf32> -> vector<2x128xf32>
    %920 = arith.addf %918, %919 : vector<2x128xf32>
    %921 = vector.extract_strided_slice %916 {offsets = [0, 0], sizes = [2, 96], strides = [1, 1]} : vector<2x128xf32> to vector<2x96xf32>
    %922 = arith.negf %921 : vector<2x96xf32>
    %923 = math.exp %922 : vector<2x96xf32>
    %cst_217 = arith.constant 1.000000e+00 : f32
    %924 = vector.broadcast %cst_217 : f32 to vector<2x96xf32>
    %925 = arith.addf %924, %923 : vector<2x96xf32>
    %926 = arith.divf %924, %925 : vector<2x96xf32>
    %927 = vector.extract_strided_slice %916 {offsets = [0, 96], sizes = [2, 32], strides = [1, 1]} : vector<2x128xf32> to vector<2x32xf32>
    %928 = math.tanh %927 : vector<2x32xf32>
    %929 = vector.extract_strided_slice %926 {offsets = [0, 0], sizes = [2, 32], strides = [1, 1]} : vector<2x96xf32> to vector<2x32xf32>
    %930 = vector.extract_strided_slice %926 {offsets = [0, 32], sizes = [2, 32], strides = [1, 1]} : vector<2x96xf32> to vector<2x32xf32>
    %931 = vector.extract_strided_slice %926 {offsets = [0, 64], sizes = [2, 32], strides = [1, 1]} : vector<2x96xf32> to vector<2x32xf32>
    %932 = arith.mulf %930, %900 : vector<2x32xf32>
    %933 = arith.mulf %929, %928 : vector<2x32xf32>
    %934 = arith.addf %932, %933 : vector<2x32xf32>
    %935 = math.tanh %934 : vector<2x32xf32>
    %936 = arith.mulf %931, %935 : vector<2x32xf32>
    %937 = vector.extract_strided_slice %920 {offsets = [0, 0], sizes = [2, 96], strides = [1, 1]} : vector<2x128xf32> to vector<2x96xf32>
    %938 = arith.negf %937 : vector<2x96xf32>
    %939 = math.exp %938 : vector<2x96xf32>
    %cst_218 = arith.constant 1.000000e+00 : f32
    %940 = vector.broadcast %cst_218 : f32 to vector<2x96xf32>
    %941 = arith.addf %940, %939 : vector<2x96xf32>
    %942 = arith.divf %940, %941 : vector<2x96xf32>
    %943 = vector.extract_strided_slice %920 {offsets = [0, 96], sizes = [2, 32], strides = [1, 1]} : vector<2x128xf32> to vector<2x32xf32>
    %944 = math.tanh %943 : vector<2x32xf32>
    %945 = vector.extract_strided_slice %942 {offsets = [0, 0], sizes = [2, 32], strides = [1, 1]} : vector<2x96xf32> to vector<2x32xf32>
    %946 = vector.extract_strided_slice %942 {offsets = [0, 32], sizes = [2, 32], strides = [1, 1]} : vector<2x96xf32> to vector<2x32xf32>
    %947 = vector.extract_strided_slice %942 {offsets = [0, 64], sizes = [2, 32], strides = [1, 1]} : vector<2x96xf32> to vector<2x32xf32>
    %948 = arith.mulf %946, %902 : vector<2x32xf32>
    %949 = arith.mulf %945, %944 : vector<2x32xf32>
    %950 = arith.addf %948, %949 : vector<2x32xf32>
    %951 = math.tanh %950 : vector<2x32xf32>
    %952 = arith.mulf %947, %951 : vector<2x32xf32>
    %cst_219 = arith.constant 0.000000e+00 : f32
    %953 = vector.broadcast %cst_219 : f32 to vector<2x32xf32>
    %954 = arith.select %50, %936, %953 : vector<2x32xi1>, vector<2x32xf32>
    %c0_220 = arith.constant 0 : index
    %c7_221 = arith.constant 7 : index
    %c0_222 = arith.constant 0 : index
    %955 = vector.load %arg18[%c0_220, %c7_221, %c0_222] : memref<2x8x64xf32, #tpu.memory_space<vmem>>, vector<2x1x32xf32>
    %956 = vector.shape_cast %955 : vector<2x1x32xf32> to vector<2x32xf32>
    %957 = vector.shape_cast %954 : vector<2x32xf32> to vector<2x1x32xf32>
    tpu.vector_store %arg18[%c0_220, %c7_221, %c0_222], %957 {strides = array<i32>} : memref<2x8x64xf32, #tpu.memory_space<vmem>>, vector<2x1x32xf32>,
    %cst_223 = arith.constant 0.000000e+00 : f32
    %958 = vector.broadcast %cst_223 : f32 to vector<2x32xf32>
    %959 = arith.select %29, %952, %958 : vector<2x32xi1>, vector<2x32xf32>
    %c0_224 = arith.constant 0 : index
    %c0_225 = arith.constant 0 : index
    %c32_226 = arith.constant 32 : index
    %960 = vector.load %arg18[%c0_224, %c0_225, %c32_226] : memref<2x8x64xf32, #tpu.memory_space<vmem>>, vector<2x1x32xf32>
    %961 = vector.shape_cast %960 : vector<2x1x32xf32> to vector<2x32xf32>
    %962 = vector.shape_cast %959 : vector<2x32xf32> to vector<2x1x32xf32>
    tpu.vector_store %arg18[%c0_224, %c0_225, %c32_226], %962 {strides = array<i32>} : memref<2x8x64xf32, #tpu.memory_space<vmem>>, vector<2x1x32xf32>,
    %c0_227 = arith.constant 0 : index
    %c0_228 = arith.constant 0 : index
    %c0_229 = arith.constant 0 : index
    %963 = vector.load %arg18[%c0_227, %c0_228, %c0_229] : memref<2x8x64xf32, #tpu.memory_space<vmem>>, vector<2x8x64xf32>
    %964 = vector.shape_cast %963 : vector<2x8x64xf32> to vector<16x64xf32>
    %c0_230 = arith.constant 0 : index
    %c0_231 = arith.constant 0 : index
    %965 = vector.load %arg13[%c0_230, %c0_231] : memref<64x8xf32, #tpu.memory_space<vmem>>, vector<64x8xf32>
    %cst_232 = arith.constant dense<0.000000e+00> : vector<16x8xf32>
    %966 = tpu.matmul %964, %965, %cst_232 {dimension_numbers = #tpu.dot_dimension_numbers<[1], [0], [0], [1], [0, 0, 1, 1], [], []>} : vector<16x64xf32>, vector<64x8xf32>, vector<16x8xf32> -> vector<16x8xf32>
    %c0_233 = arith.constant 0 : index
    %c0_234 = arith.constant 0 : index
    %967 = vector.load %arg14[%c0_233, %c0_234] : memref<1x8xf32, #tpu.memory_space<vmem>>, vector<1x8xf32>
    %968 = vector.broadcast %967 : vector<1x8xf32> to vector<16x8xf32>
    %969 = arith.addf %966, %968 : vector<16x8xf32>
    %970 = vector.shape_cast %969 : vector<16x8xf32> to vector<2x8x8xf32>
    %c0_235 = arith.constant 0 : index
    %c0_236 = arith.constant 0 : index
    %971 = vector.load %arg2[%c0_235, %c0_236] : memref<2x8xi32, #tpu.memory_space<vmem>>, vector<2x8xi32>
    %c0_237 = arith.constant 0 : index
    %c0_238 = arith.constant 0 : index
    %972 = vector.load %arg15[%c0_237, %c0_238] : memref<8x8xf32, #tpu.memory_space<vmem>>, vector<8x8xf32>
    %973 = tpu.iota {dimensions = array<i32: 1>} : vector<2x8xi32>
    %cst_239 = arith.constant 0.000000e+00 : f32
    %974 = vector.broadcast %cst_239 : f32 to vector<2x1xf32>
    %975 = vector.extract_strided_slice %970 {offsets = [0, 0, 0], sizes = [2, 1, 8], strides = [1, 1, 1]} : vector<2x8x8xf32> to vector<2x1x8xf32>
    %976 = vector.shape_cast %975 : vector<2x1x8xf32> to vector<2x8xf32>
    %977 = vector.extract_strided_slice %971 {offsets = [0, 0], sizes = [2, 1], strides = [1, 1]} : vector<2x8xi32> to vector<2x1xi32>
    %978 = vector.broadcast %977 : vector<2x1xi32> to vector<2x8xi32>
    %979 = arith.cmpi eq, %978, %973 : vector<2x8xi32>
    %980 = arith.extui %979 : vector<2x8xi1> to vector<2x8xi32>
    %981 = arith.sitofp %980 : vector<2x8xi32> to vector<2x8xf32>
    %982 = arith.mulf %976, %981 : vector<2x8xf32>
    %cst_240 = arith.constant dense<0.000000e+00> : vector<2xf32>
    %983 = vector.multi_reduction <add>, %982, %cst_240 [1] : vector<2x8xf32> to vector<2xf32>
    %984 = vector.shape_cast %983 : vector<2xf32> to vector<2x1xf32>
    %cst_241 = arith.constant 0.000000e+00 : f32
    %985 = vector.broadcast %cst_241 : f32 to vector<2x1xf32>
    %986 = arith.select %72, %984, %985 : vector<2x1xi1>, vector<2x1xf32>
    %987 = arith.addf %974, %986 : vector<2x1xf32>
    %988 = vector.extract_strided_slice %970 {offsets = [0, 1, 0], sizes = [2, 1, 8], strides = [1, 1, 1]} : vector<2x8x8xf32> to vector<2x1x8xf32>
    %989 = vector.shape_cast %988 : vector<2x1x8xf32> to vector<2x8xf32>
    %990 = vector.extract_strided_slice %971 {offsets = [0, 1], sizes = [2, 1], strides = [1, 1]} : vector<2x8xi32> to vector<2x1xi32>
    %991 = vector.broadcast %990 : vector<2x1xi32> to vector<2x8xi32>
    %992 = arith.cmpi eq, %991, %973 : vector<2x8xi32>
    %993 = arith.extui %992 : vector<2x8xi1> to vector<2x8xi32>
    %994 = arith.sitofp %993 : vector<2x8xi32> to vector<2x8xf32>
    %995 = arith.mulf %989, %994 : vector<2x8xf32>
    %cst_242 = arith.constant dense<0.000000e+00> : vector<2xf32>
    %996 = vector.multi_reduction <add>, %995, %cst_242 [1] : vector<2x8xf32> to vector<2xf32>
    %997 = vector.shape_cast %996 : vector<2xf32> to vector<2x1xf32>
    %998 = vector.shape_cast %981 : vector<2x8xf32> to vector<2x8x1xf32>
    %999 = vector.shape_cast %972 : vector<8x8xf32> to vector<1x8x8xf32>
    %1000 = vector.broadcast %998 : vector<2x8x1xf32> to vector<2x8x8xf32>
    %1001 = vector.broadcast %999 : vector<1x8x8xf32> to vector<2x8x8xf32>
    %1002 = arith.mulf %1000, %1001 : vector<2x8x8xf32>
    %cst_243 = arith.constant dense<0.000000e+00> : vector<2x8xf32>
    %1003 = vector.multi_reduction <add>, %1002, %cst_243 [1] : vector<2x8x8xf32> to vector<2x8xf32>
    %1004 = arith.mulf %1003, %994 : vector<2x8xf32>
    %cst_244 = arith.constant dense<0.000000e+00> : vector<2xf32>
    %1005 = vector.multi_reduction <add>, %1004, %cst_244 [1] : vector<2x8xf32> to vector<2xf32>
    %1006 = vector.shape_cast %1005 : vector<2xf32> to vector<2x1xf32>
    %1007 = arith.addf %997, %1006 : vector<2x1xf32>
    %cst_245 = arith.constant 0.000000e+00 : f32
    %1008 = vector.broadcast %cst_245 : f32 to vector<2x1xf32>
    %1009 = arith.select %73, %1007, %1008 : vector<2x1xi1>, vector<2x1xf32>
    %1010 = arith.addf %987, %1009 : vector<2x1xf32>
    %1011 = vector.extract_strided_slice %970 {offsets = [0, 2, 0], sizes = [2, 1, 8], strides = [1, 1, 1]} : vector<2x8x8xf32> to vector<2x1x8xf32>
    %1012 = vector.shape_cast %1011 : vector<2x1x8xf32> to vector<2x8xf32>
    %1013 = vector.extract_strided_slice %971 {offsets = [0, 2], sizes = [2, 1], strides = [1, 1]} : vector<2x8xi32> to vector<2x1xi32>
    %1014 = vector.broadcast %1013 : vector<2x1xi32> to vector<2x8xi32>
    %1015 = arith.cmpi eq, %1014, %973 : vector<2x8xi32>
    %1016 = arith.extui %1015 : vector<2x8xi1> to vector<2x8xi32>
    %1017 = arith.sitofp %1016 : vector<2x8xi32> to vector<2x8xf32>
    %1018 = arith.mulf %1012, %1017 : vector<2x8xf32>
    %cst_246 = arith.constant dense<0.000000e+00> : vector<2xf32>
    %1019 = vector.multi_reduction <add>, %1018, %cst_246 [1] : vector<2x8xf32> to vector<2xf32>
    %1020 = vector.shape_cast %1019 : vector<2xf32> to vector<2x1xf32>
    %1021 = vector.shape_cast %994 : vector<2x8xf32> to vector<2x8x1xf32>
    %1022 = vector.shape_cast %972 : vector<8x8xf32> to vector<1x8x8xf32>
    %1023 = vector.broadcast %1021 : vector<2x8x1xf32> to vector<2x8x8xf32>
    %1024 = vector.broadcast %1022 : vector<1x8x8xf32> to vector<2x8x8xf32>
    %1025 = arith.mulf %1023, %1024 : vector<2x8x8xf32>
    %cst_247 = arith.constant dense<0.000000e+00> : vector<2x8xf32>
    %1026 = vector.multi_reduction <add>, %1025, %cst_247 [1] : vector<2x8x8xf32> to vector<2x8xf32>
    %1027 = arith.mulf %1026, %1017 : vector<2x8xf32>
    %cst_248 = arith.constant dense<0.000000e+00> : vector<2xf32>
    %1028 = vector.multi_reduction <add>, %1027, %cst_248 [1] : vector<2x8xf32> to vector<2xf32>
    %1029 = vector.shape_cast %1028 : vector<2xf32> to vector<2x1xf32>
    %1030 = arith.addf %1020, %1029 : vector<2x1xf32>
    %cst_249 = arith.constant 0.000000e+00 : f32
    %1031 = vector.broadcast %cst_249 : f32 to vector<2x1xf32>
    %1032 = arith.select %74, %1030, %1031 : vector<2x1xi1>, vector<2x1xf32>
    %1033 = arith.addf %1010, %1032 : vector<2x1xf32>
    %1034 = vector.extract_strided_slice %970 {offsets = [0, 3, 0], sizes = [2, 1, 8], strides = [1, 1, 1]} : vector<2x8x8xf32> to vector<2x1x8xf32>
    %1035 = vector.shape_cast %1034 : vector<2x1x8xf32> to vector<2x8xf32>
    %1036 = vector.extract_strided_slice %971 {offsets = [0, 3], sizes = [2, 1], strides = [1, 1]} : vector<2x8xi32> to vector<2x1xi32>
    %1037 = vector.broadcast %1036 : vector<2x1xi32> to vector<2x8xi32>
    %1038 = arith.cmpi eq, %1037, %973 : vector<2x8xi32>
    %1039 = arith.extui %1038 : vector<2x8xi1> to vector<2x8xi32>
    %1040 = arith.sitofp %1039 : vector<2x8xi32> to vector<2x8xf32>
    %1041 = arith.mulf %1035, %1040 : vector<2x8xf32>
    %cst_250 = arith.constant dense<0.000000e+00> : vector<2xf32>
    %1042 = vector.multi_reduction <add>, %1041, %cst_250 [1] : vector<2x8xf32> to vector<2xf32>
    %1043 = vector.shape_cast %1042 : vector<2xf32> to vector<2x1xf32>
    %1044 = vector.shape_cast %1017 : vector<2x8xf32> to vector<2x8x1xf32>
    %1045 = vector.shape_cast %972 : vector<8x8xf32> to vector<1x8x8xf32>
    %1046 = vector.broadcast %1044 : vector<2x8x1xf32> to vector<2x8x8xf32>
    %1047 = vector.broadcast %1045 : vector<1x8x8xf32> to vector<2x8x8xf32>
    %1048 = arith.mulf %1046, %1047 : vector<2x8x8xf32>
    %cst_251 = arith.constant dense<0.000000e+00> : vector<2x8xf32>
    %1049 = vector.multi_reduction <add>, %1048, %cst_251 [1] : vector<2x8x8xf32> to vector<2x8xf32>
    %1050 = arith.mulf %1049, %1040 : vector<2x8xf32>
    %cst_252 = arith.constant dense<0.000000e+00> : vector<2xf32>
    %1051 = vector.multi_reduction <add>, %1050, %cst_252 [1] : vector<2x8xf32> to vector<2xf32>
    %1052 = vector.shape_cast %1051 : vector<2xf32> to vector<2x1xf32>
    %1053 = arith.addf %1043, %1052 : vector<2x1xf32>
    %cst_253 = arith.constant 0.000000e+00 : f32
    %1054 = vector.broadcast %cst_253 : f32 to vector<2x1xf32>
    %1055 = arith.select %75, %1053, %1054 : vector<2x1xi1>, vector<2x1xf32>
    %1056 = arith.addf %1033, %1055 : vector<2x1xf32>
    %1057 = vector.extract_strided_slice %970 {offsets = [0, 4, 0], sizes = [2, 1, 8], strides = [1, 1, 1]} : vector<2x8x8xf32> to vector<2x1x8xf32>
    %1058 = vector.shape_cast %1057 : vector<2x1x8xf32> to vector<2x8xf32>
    %1059 = vector.extract_strided_slice %971 {offsets = [0, 4], sizes = [2, 1], strides = [1, 1]} : vector<2x8xi32> to vector<2x1xi32>
    %1060 = vector.broadcast %1059 : vector<2x1xi32> to vector<2x8xi32>
    %1061 = arith.cmpi eq, %1060, %973 : vector<2x8xi32>
    %1062 = arith.extui %1061 : vector<2x8xi1> to vector<2x8xi32>
    %1063 = arith.sitofp %1062 : vector<2x8xi32> to vector<2x8xf32>
    %1064 = arith.mulf %1058, %1063 : vector<2x8xf32>
    %cst_254 = arith.constant dense<0.000000e+00> : vector<2xf32>
    %1065 = vector.multi_reduction <add>, %1064, %cst_254 [1] : vector<2x8xf32> to vector<2xf32>
    %1066 = vector.shape_cast %1065 : vector<2xf32> to vector<2x1xf32>
    %1067 = vector.shape_cast %1040 : vector<2x8xf32> to vector<2x8x1xf32>
    %1068 = vector.shape_cast %972 : vector<8x8xf32> to vector<1x8x8xf32>
    %1069 = vector.broadcast %1067 : vector<2x8x1xf32> to vector<2x8x8xf32>
    %1070 = vector.broadcast %1068 : vector<1x8x8xf32> to vector<2x8x8xf32>
    %1071 = arith.mulf %1069, %1070 : vector<2x8x8xf32>
    %cst_255 = arith.constant dense<0.000000e+00> : vector<2x8xf32>
    %1072 = vector.multi_reduction <add>, %1071, %cst_255 [1] : vector<2x8x8xf32> to vector<2x8xf32>
    %1073 = arith.mulf %1072, %1063 : vector<2x8xf32>
    %cst_256 = arith.constant dense<0.000000e+00> : vector<2xf32>
    %1074 = vector.multi_reduction <add>, %1073, %cst_256 [1] : vector<2x8xf32> to vector<2xf32>
    %1075 = vector.shape_cast %1074 : vector<2xf32> to vector<2x1xf32>
    %1076 = arith.addf %1066, %1075 : vector<2x1xf32>
    %cst_257 = arith.constant 0.000000e+00 : f32
    %1077 = vector.broadcast %cst_257 : f32 to vector<2x1xf32>
    %1078 = arith.select %76, %1076, %1077 : vector<2x1xi1>, vector<2x1xf32>
    %1079 = arith.addf %1056, %1078 : vector<2x1xf32>
    %1080 = vector.extract_strided_slice %970 {offsets = [0, 5, 0], sizes = [2, 1, 8], strides = [1, 1, 1]} : vector<2x8x8xf32> to vector<2x1x8xf32>
    %1081 = vector.shape_cast %1080 : vector<2x1x8xf32> to vector<2x8xf32>
    %1082 = vector.extract_strided_slice %971 {offsets = [0, 5], sizes = [2, 1], strides = [1, 1]} : vector<2x8xi32> to vector<2x1xi32>
    %1083 = vector.broadcast %1082 : vector<2x1xi32> to vector<2x8xi32>
    %1084 = arith.cmpi eq, %1083, %973 : vector<2x8xi32>
    %1085 = arith.extui %1084 : vector<2x8xi1> to vector<2x8xi32>
    %1086 = arith.sitofp %1085 : vector<2x8xi32> to vector<2x8xf32>
    %1087 = arith.mulf %1081, %1086 : vector<2x8xf32>
    %cst_258 = arith.constant dense<0.000000e+00> : vector<2xf32>
    %1088 = vector.multi_reduction <add>, %1087, %cst_258 [1] : vector<2x8xf32> to vector<2xf32>
    %1089 = vector.shape_cast %1088 : vector<2xf32> to vector<2x1xf32>
    %1090 = vector.shape_cast %1063 : vector<2x8xf32> to vector<2x8x1xf32>
    %1091 = vector.shape_cast %972 : vector<8x8xf32> to vector<1x8x8xf32>
    %1092 = vector.broadcast %1090 : vector<2x8x1xf32> to vector<2x8x8xf32>
    %1093 = vector.broadcast %1091 : vector<1x8x8xf32> to vector<2x8x8xf32>
    %1094 = arith.mulf %1092, %1093 : vector<2x8x8xf32>
    %cst_259 = arith.constant dense<0.000000e+00> : vector<2x8xf32>
    %1095 = vector.multi_reduction <add>, %1094, %cst_259 [1] : vector<2x8x8xf32> to vector<2x8xf32>
    %1096 = arith.mulf %1095, %1086 : vector<2x8xf32>
    %cst_260 = arith.constant dense<0.000000e+00> : vector<2xf32>
    %1097 = vector.multi_reduction <add>, %1096, %cst_260 [1] : vector<2x8xf32> to vector<2xf32>
    %1098 = vector.shape_cast %1097 : vector<2xf32> to vector<2x1xf32>
    %1099 = arith.addf %1089, %1098 : vector<2x1xf32>
    %cst_261 = arith.constant 0.000000e+00 : f32
    %1100 = vector.broadcast %cst_261 : f32 to vector<2x1xf32>
    %1101 = arith.select %77, %1099, %1100 : vector<2x1xi1>, vector<2x1xf32>
    %1102 = arith.addf %1079, %1101 : vector<2x1xf32>
    %1103 = vector.extract_strided_slice %970 {offsets = [0, 6, 0], sizes = [2, 1, 8], strides = [1, 1, 1]} : vector<2x8x8xf32> to vector<2x1x8xf32>
    %1104 = vector.shape_cast %1103 : vector<2x1x8xf32> to vector<2x8xf32>
    %1105 = vector.extract_strided_slice %971 {offsets = [0, 6], sizes = [2, 1], strides = [1, 1]} : vector<2x8xi32> to vector<2x1xi32>
    %1106 = vector.broadcast %1105 : vector<2x1xi32> to vector<2x8xi32>
    %1107 = arith.cmpi eq, %1106, %973 : vector<2x8xi32>
    %1108 = arith.extui %1107 : vector<2x8xi1> to vector<2x8xi32>
    %1109 = arith.sitofp %1108 : vector<2x8xi32> to vector<2x8xf32>
    %1110 = arith.mulf %1104, %1109 : vector<2x8xf32>
    %cst_262 = arith.constant dense<0.000000e+00> : vector<2xf32>
    %1111 = vector.multi_reduction <add>, %1110, %cst_262 [1] : vector<2x8xf32> to vector<2xf32>
    %1112 = vector.shape_cast %1111 : vector<2xf32> to vector<2x1xf32>
    %1113 = vector.shape_cast %1086 : vector<2x8xf32> to vector<2x8x1xf32>
    %1114 = vector.shape_cast %972 : vector<8x8xf32> to vector<1x8x8xf32>
    %1115 = vector.broadcast %1113 : vector<2x8x1xf32> to vector<2x8x8xf32>
    %1116 = vector.broadcast %1114 : vector<1x8x8xf32> to vector<2x8x8xf32>
    %1117 = arith.mulf %1115, %1116 : vector<2x8x8xf32>
    %cst_263 = arith.constant dense<0.000000e+00> : vector<2x8xf32>
    %1118 = vector.multi_reduction <add>, %1117, %cst_263 [1] : vector<2x8x8xf32> to vector<2x8xf32>
    %1119 = arith.mulf %1118, %1109 : vector<2x8xf32>
    %cst_264 = arith.constant dense<0.000000e+00> : vector<2xf32>
    %1120 = vector.multi_reduction <add>, %1119, %cst_264 [1] : vector<2x8xf32> to vector<2xf32>
    %1121 = vector.shape_cast %1120 : vector<2xf32> to vector<2x1xf32>
    %1122 = arith.addf %1112, %1121 : vector<2x1xf32>
    %cst_265 = arith.constant 0.000000e+00 : f32
    %1123 = vector.broadcast %cst_265 : f32 to vector<2x1xf32>
    %1124 = arith.select %78, %1122, %1123 : vector<2x1xi1>, vector<2x1xf32>
    %1125 = arith.addf %1102, %1124 : vector<2x1xf32>
    %1126 = vector.extract_strided_slice %970 {offsets = [0, 7, 0], sizes = [2, 1, 8], strides = [1, 1, 1]} : vector<2x8x8xf32> to vector<2x1x8xf32>
    %1127 = vector.shape_cast %1126 : vector<2x1x8xf32> to vector<2x8xf32>
    %1128 = vector.extract_strided_slice %971 {offsets = [0, 7], sizes = [2, 1], strides = [1, 1]} : vector<2x8xi32> to vector<2x1xi32>
    %1129 = vector.broadcast %1128 : vector<2x1xi32> to vector<2x8xi32>
    %1130 = arith.cmpi eq, %1129, %973 : vector<2x8xi32>
    %1131 = arith.extui %1130 : vector<2x8xi1> to vector<2x8xi32>
    %1132 = arith.sitofp %1131 : vector<2x8xi32> to vector<2x8xf32>
    %1133 = arith.mulf %1127, %1132 : vector<2x8xf32>
    %cst_266 = arith.constant dense<0.000000e+00> : vector<2xf32>
    %1134 = vector.multi_reduction <add>, %1133, %cst_266 [1] : vector<2x8xf32> to vector<2xf32>
    %1135 = vector.shape_cast %1134 : vector<2xf32> to vector<2x1xf32>
    %1136 = vector.shape_cast %1109 : vector<2x8xf32> to vector<2x8x1xf32>
    %1137 = vector.shape_cast %972 : vector<8x8xf32> to vector<1x8x8xf32>
    %1138 = vector.broadcast %1136 : vector<2x8x1xf32> to vector<2x8x8xf32>
    %1139 = vector.broadcast %1137 : vector<1x8x8xf32> to vector<2x8x8xf32>
    %1140 = arith.mulf %1138, %1139 : vector<2x8x8xf32>
    %cst_267 = arith.constant dense<0.000000e+00> : vector<2x8xf32>
    %1141 = vector.multi_reduction <add>, %1140, %cst_267 [1] : vector<2x8x8xf32> to vector<2x8xf32>
    %1142 = arith.mulf %1141, %1132 : vector<2x8xf32>
    %cst_268 = arith.constant dense<0.000000e+00> : vector<2xf32>
    %1143 = vector.multi_reduction <add>, %1142, %cst_268 [1] : vector<2x8xf32> to vector<2xf32>
    %1144 = vector.shape_cast %1143 : vector<2xf32> to vector<2x1xf32>
    %1145 = arith.addf %1135, %1144 : vector<2x1xf32>
    %cst_269 = arith.constant 0.000000e+00 : f32
    %1146 = vector.broadcast %cst_269 : f32 to vector<2x1xf32>
    %1147 = arith.select %79, %1145, %1146 : vector<2x1xi1>, vector<2x1xf32>
    %1148 = arith.addf %1125, %1147 : vector<2x1xf32>
    %1149 = vector.extract_strided_slice %970 {offsets = [0, 0, 0], sizes = [2, 1, 8], strides = [1, 1, 1]} : vector<2x8x8xf32> to vector<2x1x8xf32>
    %1150 = vector.shape_cast %1149 : vector<2x1x8xf32> to vector<2x8xf32>
    %1151 = vector.extract_strided_slice %970 {offsets = [0, 1, 0], sizes = [2, 1, 8], strides = [1, 1, 1]} : vector<2x8x8xf32> to vector<2x1x8xf32>
    %1152 = vector.shape_cast %1151 : vector<2x1x8xf32> to vector<2x8xf32>
    %1153 = vector.shape_cast %1150 : vector<2x8xf32> to vector<2x8x1xf32>
    %1154 = vector.shape_cast %972 : vector<8x8xf32> to vector<1x8x8xf32>
    %1155 = vector.broadcast %1153 : vector<2x8x1xf32> to vector<2x8x8xf32>
    %1156 = vector.broadcast %1154 : vector<1x8x8xf32> to vector<2x8x8xf32>
    %1157 = arith.addf %1155, %1156 : vector<2x8x8xf32>
    %1158 = vector.shape_cast %1152 : vector<2x8xf32> to vector<2x8x1xf32>
    %1159 = vector.broadcast %1158 : vector<2x8x1xf32> to vector<2x8x8xf32>
    %1160 = arith.addf %1157, %1159 : vector<2x8x8xf32>
    %cst_270 = arith.constant dense<0xFF800000> : vector<2x8xf32>
    %1161 = vector.multi_reduction <maximumf>, %1160, %cst_270 [1] : vector<2x8x8xf32> to vector<2x8xf32>
    %1162 = vector.shape_cast %1161 : vector<2x8xf32> to vector<2x1x8xf32>
    %1163 = vector.broadcast %1162 : vector<2x1x8xf32> to vector<2x8x8xf32>
    %1164 = arith.subf %1160, %1163 : vector<2x8x8xf32>
    %1165 = math.exp %1164 : vector<2x8x8xf32>
    %cst_271 = arith.constant dense<0.000000e+00> : vector<2x8xf32>
    %1166 = vector.multi_reduction <add>, %1165, %cst_271 [1] : vector<2x8x8xf32> to vector<2x8xf32>
    %1167 = math.log %1166 : vector<2x8xf32>
    %1168 = arith.addf %1167, %1161 : vector<2x8xf32>
    %1169 = arith.select %53, %1168, %1150 : vector<2x8xi1>, vector<2x8xf32>
    %1170 = vector.extract_strided_slice %970 {offsets = [0, 2, 0], sizes = [2, 1, 8], strides = [1, 1, 1]} : vector<2x8x8xf32> to vector<2x1x8xf32>
    %1171 = vector.shape_cast %1170 : vector<2x1x8xf32> to vector<2x8xf32>
    %1172 = vector.shape_cast %1169 : vector<2x8xf32> to vector<2x8x1xf32>
    %1173 = vector.shape_cast %972 : vector<8x8xf32> to vector<1x8x8xf32>
    %1174 = vector.broadcast %1172 : vector<2x8x1xf32> to vector<2x8x8xf32>
    %1175 = vector.broadcast %1173 : vector<1x8x8xf32> to vector<2x8x8xf32>
    %1176 = arith.addf %1174, %1175 : vector<2x8x8xf32>
    %1177 = vector.shape_cast %1171 : vector<2x8xf32> to vector<2x8x1xf32>
    %1178 = vector.broadcast %1177 : vector<2x8x1xf32> to vector<2x8x8xf32>
    %1179 = arith.addf %1176, %1178 : vector<2x8x8xf32>
    %cst_272 = arith.constant dense<0xFF800000> : vector<2x8xf32>
    %1180 = vector.multi_reduction <maximumf>, %1179, %cst_272 [1] : vector<2x8x8xf32> to vector<2x8xf32>
    %1181 = vector.shape_cast %1180 : vector<2x8xf32> to vector<2x1x8xf32>
    %1182 = vector.broadcast %1181 : vector<2x1x8xf32> to vector<2x8x8xf32>
    %1183 = arith.subf %1179, %1182 : vector<2x8x8xf32>
    %1184 = math.exp %1183 : vector<2x8x8xf32>
    %cst_273 = arith.constant dense<0.000000e+00> : vector<2x8xf32>
    %1185 = vector.multi_reduction <add>, %1184, %cst_273 [1] : vector<2x8x8xf32> to vector<2x8xf32>
    %1186 = math.log %1185 : vector<2x8xf32>
    %1187 = arith.addf %1186, %1180 : vector<2x8xf32>
    %1188 = arith.select %56, %1187, %1169 : vector<2x8xi1>, vector<2x8xf32>
    %1189 = vector.extract_strided_slice %970 {offsets = [0, 3, 0], sizes = [2, 1, 8], strides = [1, 1, 1]} : vector<2x8x8xf32> to vector<2x1x8xf32>
    %1190 = vector.shape_cast %1189 : vector<2x1x8xf32> to vector<2x8xf32>
    %1191 = vector.shape_cast %1188 : vector<2x8xf32> to vector<2x8x1xf32>
    %1192 = vector.shape_cast %972 : vector<8x8xf32> to vector<1x8x8xf32>
    %1193 = vector.broadcast %1191 : vector<2x8x1xf32> to vector<2x8x8xf32>
    %1194 = vector.broadcast %1192 : vector<1x8x8xf32> to vector<2x8x8xf32>
    %1195 = arith.addf %1193, %1194 : vector<2x8x8xf32>
    %1196 = vector.shape_cast %1190 : vector<2x8xf32> to vector<2x8x1xf32>
    %1197 = vector.broadcast %1196 : vector<2x8x1xf32> to vector<2x8x8xf32>
    %1198 = arith.addf %1195, %1197 : vector<2x8x8xf32>
    %cst_274 = arith.constant dense<0xFF800000> : vector<2x8xf32>
    %1199 = vector.multi_reduction <maximumf>, %1198, %cst_274 [1] : vector<2x8x8xf32> to vector<2x8xf32>
    %1200 = vector.shape_cast %1199 : vector<2x8xf32> to vector<2x1x8xf32>
    %1201 = vector.broadcast %1200 : vector<2x1x8xf32> to vector<2x8x8xf32>
    %1202 = arith.subf %1198, %1201 : vector<2x8x8xf32>
    %1203 = math.exp %1202 : vector<2x8x8xf32>
    %cst_275 = arith.constant dense<0.000000e+00> : vector<2x8xf32>
    %1204 = vector.multi_reduction <add>, %1203, %cst_275 [1] : vector<2x8x8xf32> to vector<2x8xf32>
    %1205 = math.log %1204 : vector<2x8xf32>
    %1206 = arith.addf %1205, %1199 : vector<2x8xf32>
    %1207 = arith.select %59, %1206, %1188 : vector<2x8xi1>, vector<2x8xf32>
    %1208 = vector.extract_strided_slice %970 {offsets = [0, 4, 0], sizes = [2, 1, 8], strides = [1, 1, 1]} : vector<2x8x8xf32> to vector<2x1x8xf32>
    %1209 = vector.shape_cast %1208 : vector<2x1x8xf32> to vector<2x8xf32>
    %1210 = vector.shape_cast %1207 : vector<2x8xf32> to vector<2x8x1xf32>
    %1211 = vector.shape_cast %972 : vector<8x8xf32> to vector<1x8x8xf32>
    %1212 = vector.broadcast %1210 : vector<2x8x1xf32> to vector<2x8x8xf32>
    %1213 = vector.broadcast %1211 : vector<1x8x8xf32> to vector<2x8x8xf32>
    %1214 = arith.addf %1212, %1213 : vector<2x8x8xf32>
    %1215 = vector.shape_cast %1209 : vector<2x8xf32> to vector<2x8x1xf32>
    %1216 = vector.broadcast %1215 : vector<2x8x1xf32> to vector<2x8x8xf32>
    %1217 = arith.addf %1214, %1216 : vector<2x8x8xf32>
    %cst_276 = arith.constant dense<0xFF800000> : vector<2x8xf32>
    %1218 = vector.multi_reduction <maximumf>, %1217, %cst_276 [1] : vector<2x8x8xf32> to vector<2x8xf32>
    %1219 = vector.shape_cast %1218 : vector<2x8xf32> to vector<2x1x8xf32>
    %1220 = vector.broadcast %1219 : vector<2x1x8xf32> to vector<2x8x8xf32>
    %1221 = arith.subf %1217, %1220 : vector<2x8x8xf32>
    %1222 = math.exp %1221 : vector<2x8x8xf32>
    %cst_277 = arith.constant dense<0.000000e+00> : vector<2x8xf32>
    %1223 = vector.multi_reduction <add>, %1222, %cst_277 [1] : vector<2x8x8xf32> to vector<2x8xf32>
    %1224 = math.log %1223 : vector<2x8xf32>
    %1225 = arith.addf %1224, %1218 : vector<2x8xf32>
    %1226 = arith.select %62, %1225, %1207 : vector<2x8xi1>, vector<2x8xf32>
    %1227 = vector.extract_strided_slice %970 {offsets = [0, 5, 0], sizes = [2, 1, 8], strides = [1, 1, 1]} : vector<2x8x8xf32> to vector<2x1x8xf32>
    %1228 = vector.shape_cast %1227 : vector<2x1x8xf32> to vector<2x8xf32>
    %1229 = vector.shape_cast %1226 : vector<2x8xf32> to vector<2x8x1xf32>
    %1230 = vector.shape_cast %972 : vector<8x8xf32> to vector<1x8x8xf32>
    %1231 = vector.broadcast %1229 : vector<2x8x1xf32> to vector<2x8x8xf32>
    %1232 = vector.broadcast %1230 : vector<1x8x8xf32> to vector<2x8x8xf32>
    %1233 = arith.addf %1231, %1232 : vector<2x8x8xf32>
    %1234 = vector.shape_cast %1228 : vector<2x8xf32> to vector<2x8x1xf32>
    %1235 = vector.broadcast %1234 : vector<2x8x1xf32> to vector<2x8x8xf32>
    %1236 = arith.addf %1233, %1235 : vector<2x8x8xf32>
    %cst_278 = arith.constant dense<0xFF800000> : vector<2x8xf32>
    %1237 = vector.multi_reduction <maximumf>, %1236, %cst_278 [1] : vector<2x8x8xf32> to vector<2x8xf32>
    %1238 = vector.shape_cast %1237 : vector<2x8xf32> to vector<2x1x8xf32>
    %1239 = vector.broadcast %1238 : vector<2x1x8xf32> to vector<2x8x8xf32>
    %1240 = arith.subf %1236, %1239 : vector<2x8x8xf32>
    %1241 = math.exp %1240 : vector<2x8x8xf32>
    %cst_279 = arith.constant dense<0.000000e+00> : vector<2x8xf32>
    %1242 = vector.multi_reduction <add>, %1241, %cst_279 [1] : vector<2x8x8xf32> to vector<2x8xf32>
    %1243 = math.log %1242 : vector<2x8xf32>
    %1244 = arith.addf %1243, %1237 : vector<2x8xf32>
    %1245 = arith.select %65, %1244, %1226 : vector<2x8xi1>, vector<2x8xf32>
    %1246 = vector.extract_strided_slice %970 {offsets = [0, 6, 0], sizes = [2, 1, 8], strides = [1, 1, 1]} : vector<2x8x8xf32> to vector<2x1x8xf32>
    %1247 = vector.shape_cast %1246 : vector<2x1x8xf32> to vector<2x8xf32>
    %1248 = vector.shape_cast %1245 : vector<2x8xf32> to vector<2x8x1xf32>
    %1249 = vector.shape_cast %972 : vector<8x8xf32> to vector<1x8x8xf32>
    %1250 = vector.broadcast %1248 : vector<2x8x1xf32> to vector<2x8x8xf32>
    %1251 = vector.broadcast %1249 : vector<1x8x8xf32> to vector<2x8x8xf32>
    %1252 = arith.addf %1250, %1251 : vector<2x8x8xf32>
    %1253 = vector.shape_cast %1247 : vector<2x8xf32> to vector<2x8x1xf32>
    %1254 = vector.broadcast %1253 : vector<2x8x1xf32> to vector<2x8x8xf32>
    %1255 = arith.addf %1252, %1254 : vector<2x8x8xf32>
    %cst_280 = arith.constant dense<0xFF800000> : vector<2x8xf32>
    %1256 = vector.multi_reduction <maximumf>, %1255, %cst_280 [1] : vector<2x8x8xf32> to vector<2x8xf32>
    %1257 = vector.shape_cast %1256 : vector<2x8xf32> to vector<2x1x8xf32>
    %1258 = vector.broadcast %1257 : vector<2x1x8xf32> to vector<2x8x8xf32>
    %1259 = arith.subf %1255, %1258 : vector<2x8x8xf32>
    %1260 = math.exp %1259 : vector<2x8x8xf32>
    %cst_281 = arith.constant dense<0.000000e+00> : vector<2x8xf32>
    %1261 = vector.multi_reduction <add>, %1260, %cst_281 [1] : vector<2x8x8xf32> to vector<2x8xf32>
    %1262 = math.log %1261 : vector<2x8xf32>
    %1263 = arith.addf %1262, %1256 : vector<2x8xf32>
    %1264 = arith.select %68, %1263, %1245 : vector<2x8xi1>, vector<2x8xf32>
    %1265 = vector.extract_strided_slice %970 {offsets = [0, 7, 0], sizes = [2, 1, 8], strides = [1, 1, 1]} : vector<2x8x8xf32> to vector<2x1x8xf32>
    %1266 = vector.shape_cast %1265 : vector<2x1x8xf32> to vector<2x8xf32>
    %1267 = vector.shape_cast %1264 : vector<2x8xf32> to vector<2x8x1xf32>
    %1268 = vector.shape_cast %972 : vector<8x8xf32> to vector<1x8x8xf32>
    %1269 = vector.broadcast %1267 : vector<2x8x1xf32> to vector<2x8x8xf32>
    %1270 = vector.broadcast %1268 : vector<1x8x8xf32> to vector<2x8x8xf32>
    %1271 = arith.addf %1269, %1270 : vector<2x8x8xf32>
    %1272 = vector.shape_cast %1266 : vector<2x8xf32> to vector<2x8x1xf32>
    %1273 = vector.broadcast %1272 : vector<2x8x1xf32> to vector<2x8x8xf32>
    %1274 = arith.addf %1271, %1273 : vector<2x8x8xf32>
    %cst_282 = arith.constant dense<0xFF800000> : vector<2x8xf32>
    %1275 = vector.multi_reduction <maximumf>, %1274, %cst_282 [1] : vector<2x8x8xf32> to vector<2x8xf32>
    %1276 = vector.shape_cast %1275 : vector<2x8xf32> to vector<2x1x8xf32>
    %1277 = vector.broadcast %1276 : vector<2x1x8xf32> to vector<2x8x8xf32>
    %1278 = arith.subf %1274, %1277 : vector<2x8x8xf32>
    %1279 = math.exp %1278 : vector<2x8x8xf32>
    %cst_283 = arith.constant dense<0.000000e+00> : vector<2x8xf32>
    %1280 = vector.multi_reduction <add>, %1279, %cst_283 [1] : vector<2x8x8xf32> to vector<2x8xf32>
    %1281 = math.log %1280 : vector<2x8xf32>
    %1282 = arith.addf %1281, %1275 : vector<2x8xf32>
    %1283 = arith.select %71, %1282, %1264 : vector<2x8xi1>, vector<2x8xf32>
    %cst_284 = arith.constant dense<0xFF800000> : vector<2xf32>
    %1284 = vector.multi_reduction <maximumf>, %1283, %cst_284 [1] : vector<2x8xf32> to vector<2xf32>
    %1285 = vector.shape_cast %1284 : vector<2xf32> to vector<2x1xf32>
    %1286 = vector.broadcast %1285 : vector<2x1xf32> to vector<2x8xf32>
    %1287 = arith.subf %1283, %1286 : vector<2x8xf32>
    %1288 = math.exp %1287 : vector<2x8xf32>
    %cst_285 = arith.constant dense<0.000000e+00> : vector<2xf32>
    %1289 = vector.multi_reduction <add>, %1288, %cst_285 [1] : vector<2x8xf32> to vector<2xf32>
    %1290 = vector.shape_cast %1289 : vector<2xf32> to vector<2x1xf32>
    %1291 = math.log %1290 : vector<2x1xf32>
    %1292 = arith.addf %1291, %1285 : vector<2x1xf32>
    %1293 = arith.subf %1292, %1148 : vector<2x1xf32>
    %cst_286 = arith.constant dense<0.000000e+00> : vector<1xf32>
    %1294 = vector.multi_reduction <add>, %1293, %cst_286 [0] : vector<2x1xf32> to vector<1xf32>
    %1295 = vector.shape_cast %1294 : vector<1xf32> to vector<1x1xf32>
    %cst_287 = arith.constant 2.000000e+00 : f32
    %1296 = vector.broadcast %cst_287 : f32 to vector<1x1xf32>
    %1297 = arith.divf %1295, %1296 : vector<1x1xf32>
    %c0_288 = arith.constant 0 : index
    %c0_289 = arith.constant 0 : index
    %1298 = vector.load %arg16[%c0_288, %c0_289] : memref<1x1xf32, #tpu.memory_space<vmem>>, vector<1x1xf32>
    tpu.vector_store %arg16[%c0_288, %c0_289], %1297 {strides = array<i32>} : memref<1x1xf32, #tpu.memory_space<vmem>>, vector<1x1xf32>,
    return
  }
}

</mosaic_0001>

<bundles_post_ra>
// kernel: tpu_custom_call.1
= control target key start
LH: loop header
LB: loop body
LE: loop exit
PB: predicated region body
PF: predicated region fallthrough
CT: control target
= control target key end

     0   :  { %s9119_s0 = inlined_call_operand.hbm [shape: f32[2,8,16], index: 0, kind: input, shape index: {}]   ;;  %s9120_s1 = inlined_call_operand.vmem [shape: s32[2,1], index: 1, kind: input, shape index: {}]   ;;  %s9121_s2 = inlined_call_operand.vmem [shape: s32[2,8], index: 2, kind: input, shape index: {}]   ;;  %s9122_s3 = inlined_call_operand.hbm [shape: f32[1,1,16], index: 3, kind: input, shape index: {}]   ;;  %s9123_s4 = inlined_call_operand.hbm [shape: f32[1,1,16], index: 4, kind: input, shape index: {}]   ;;  %s9124_s5 = inlined_call_operand.vmem [shape: f32[16,256], index: 5, kind: input, shape index: {}]   ;;  %s9125_s6 = inlined_call_operand.vmem [shape: f32[1,256], index: 6, kind: input, shape index: {}]   ;;  %s9126_s7 = inlined_call_operand.vmem [shape: f32[32,128], index: 7, kind: input, shape index: {}]   ;;  %s9127_s8 = inlined_call_operand.hbm [shape: f32[32,128], index: 8, kind: input, shape index: {}]   ;;  %s9128_s9 = inlined_call_operand.hbm [shape: f32[64,256], index: 9, kind: input, shape index: {}]   ;;  %s9129_s10 = inlined_call_operand.vmem [shape: f32[1,256], index: 10, kind: input, shape index: {}]   ;;  %s9130_s11 = inlined_call_operand.hbm [shape: f32[32,128], index: 11, kind: input, shape index: {}]   ;;  %s9131_s12 = inlined_call_operand.hbm [shape: f32[32,128], index: 12, kind: input, shape index: {}]   ;;  %s9132_s13 = inlined_call_operand.vmem [shape: f32[64,8], index: 13, kind: input, shape index: {}]   ;;  %s9133_s14 = inlined_call_operand.vmem [shape: f32[1,8], index: 14, kind: input, shape index: {}]   ;;  %s9134_s15 = inlined_call_operand.vmem [shape: f32[8,8], index: 15, kind: input, shape index: {}]   ;;  %s9135_s16 = inlined_call_operand.hbm [shape: f32[1,1], index: 16, kind: output, shape index: {}]  }
   0x1   :  { %9142 = sst [smem:[#allocation22_spill]] %s9119_s0 }
   0x2   :  { %21 = vsyncpa [#allocation5], 0 }
   0x3   :  { %22 = vsyncpa [#allocation8], 0 }
   0x4   :  { %23 = vsyncpa [#allocation11], 0 }
   0x5   :  { %24 = vsyncpa [#allocation14], 0  ;;  %s48_s23 = sshll.u32 %s9122_s3, 4  ;;  %s49_s23 = int_to_ptr.hbm [resolvable:$true] %s48_s23 }
   0x6   :  { %25 = vsyncpa [#allocation6], 0  ;;  %s7047_s24 = smov [#allocation7]   ;;  %s75_s28 = sshll.u32 %s9127_s8, 4  ;;  %s76_s28 = int_to_ptr.hbm [resolvable:$true] %s75_s28 }
   0x7   :  { %s50_s25 = sshll.u32 %s7047_s24, 4  ;;  %s7048_s29 = smov [#allocation10]   ;;  %s51_s25 = int_to_ptr.vmem [resolvable:$true] %s50_s25 }
   0x8   :  { %53 = dma.hbm_to_vmem [thread:$0]  %s49_s23, 16, %s51_s25, [#allocation8]  }
   0x9   :  { %s77_s30 = sshll.u32 %s7048_s29, 4  ;;  %s103_s18 = sshll.u32 %s9130_s11, 4  ;;  %s78_s30 = int_to_ptr.vmem [resolvable:$true] %s77_s30  ;;  %s104_s18 = int_to_ptr.hbm [resolvable:$true] %s103_s18 }
   0xa   :  { %s7049_s3 = smov 128   ;;  %s7050_s19 = smov 8  }
   0xb   :  { %83 = dma.hbm_to_vmem [thread:$0]  %s76_s28, 512, %s78_s30, [#allocation11], %s7049_s3, %s7049_s3, %s7050_s19  }
   0xc   :  { %s9143_s22 = sld [smem:[#allocation22_spill]]  ;;  %s7051_s8 = smov [#allocation13]  }
   0xd   :  { %s105_s24 = sshll.u32 %s7051_s8, 4  ;;  %s7052_s11 = smov [#allocation4]   ;;  %s106_s24 = int_to_ptr.vmem [resolvable:$true] %s105_s24 }
   0xe   :  { %111 = dma.hbm_to_vmem [thread:$0]  %s104_s18, 512, %s106_s24, [#allocation14], %s7049_s3, %s7049_s3, %s7050_s19  }
   0xf   :  { %s32_s25 = sshll.u32 %s7052_s11, 4  ;;  %s59_s29 = sshll.u32 %s9123_s4, 4  ;;  %s33_s25 = int_to_ptr.vmem [resolvable:$true] %s32_s25  ;;  %s60_s29 = int_to_ptr.hbm [resolvable:$true] %s59_s29 }
  0x10   :  { %s88_s0 = sshll.u32 %s9128_s9, 4  ;;  %s7053_s17 = smov [#allocation9]   ;;  %s89_s0 = int_to_ptr.hbm [resolvable:$true] %s88_s0 }
  0x11   :  { %s61_s20 = sshll.u32 %s7053_s17, 4  ;;  %s7054_s18 = smov [#allocation12]   ;;  %s62_s20 = int_to_ptr.vmem [resolvable:$true] %s61_s20 }
  0x12   :  { %s30_s23 = sshll.u32 %s9143_s22, 4  ;;  %s90_s21 = sshll.u32 %s7054_s18, 4  ;;  %s31_s23 = int_to_ptr.hbm [resolvable:$true] %s30_s23  ;;  %s91_s21 = int_to_ptr.vmem [resolvable:$true] %s90_s21 }
  0x13   :  { %38 = dma.hbm_to_vmem [thread:$0]  %s31_s23, 256, %s33_s25, [#allocation5], %s7049_s3, %s7049_s3, %s7050_s19  }
  0x14   :  { %64 = dma.hbm_to_vmem [thread:$0]  %s60_s29, 16, %s62_s20, [#allocation8]  }
  0x15   :  { %s7055_s22 = smov 256   ;;  %s7056_s4 = smov 16  }
  0x16   :  { %96 = dma.hbm_to_vmem [thread:$0]  %s89_s0, 2048, %s91_s21, [#allocation11], %s7055_s22, %s7055_s22, %s7056_s4  }
  0x17   :  { %s116_s11 = sshll.u32 %s9131_s12, 4  ;;  %s7057_s23 = smov [#allocation15]   ;;  %s117_s11 = int_to_ptr.hbm [resolvable:$true] %s116_s11 }
  0x18   :  { %s118_s25 = sshll.u32 %s7057_s23, 4  ;;  %s119_s25 = int_to_ptr.vmem [resolvable:$true] %s118_s25 }
  0x19   :  { %124 = dma.hbm_to_vmem [thread:$0]  %s117_s11, 512, %s119_s25, [#allocation14], %s7049_s3, %s7049_s3, %s7050_s19  }
  0x1a   :  { %7037 = dma.done.wait [#allocation5], 256  }
  0x1b   :  { %7038 = vsyncadd [#allocation5], 4294967040 }
  0x1c   :  { %7039 = dma.done.wait [#allocation8], 32  }
  0x1d   :  { %7040 = vsyncadd [#allocation8], 4294967264 }
  0x1e   :  { %7041 = dma.done.wait [#allocation11], 2560  }
  0x1f   :  { %7042 = vsyncadd [#allocation11], 4294964736 }
  0x20   :  { %7043 = dma.done.wait [#allocation14], 1024  }
  0x21   :  { %7044 = vsyncadd [#allocation14], 4294966272  ;;  %vm161_vm0 = vcmask 130048   ;;  %v159_v0 = vld [vmem:[#allocation4] sm:$0xff]  ;;  %v160_v2 = vld [vmem:[#allocation4 + $0x8] sm:$0xff]  ;;  %v7058_v4 = vmov 16.0  }
  0x22   :  { %v162_v1 = vsel %vm161_vm0, %v159_v0, 0.0  ;;  %v165_v3 = vsel %vm161_vm0, %v160_v2, 0.0  ;;  %6247 = vrcp.f32 %v7058_v4  ;;  %v7224_v21 = vld [vmem:[%s9126_s7 + $0x18] sm:$0xff]  ;;  %v7231_v22 = vld [vmem:[%s9126_s7 + $0x10] sm:$0xff]  ;;  %v7238_v23 = vld [vmem:[%s9126_s7 + $0x8] sm:$0xff]  ;;  %v7059_v25 = vmov 0.0  }
  0x23   :  { %163 = vadd.xlane.f32.xlu0 %v162_v1  ;;  %351 = vmatpush.msra.mxu3 %v7224_v21  ;;  %v7245_v24 = vld [vmem:[%s9126_s7] sm:$0xff]  ;;  %v7250_v26 = vld [vmem:[#allocation10 + $0x18] sm:$0xff]  ;;  %v7262_v29 = vld [vmem:[#allocation10] sm:$0xff]  ;;  %s7064_s23 = smov 96   ;;  %s7071_s19 = smov 1  }
  0x24   :  { %1165 = vmatpush.msra.mxu2 %v7224_v21  ;;  %v7254_v27 = vld [vmem:[#allocation10 + $0x10] sm:$0xff]  ;;  %v7258_v28 = vld [vmem:[#allocation10 + $0x8] sm:$0xff]  ;;  %v267_v30 = vld [vmem:[%s9124_s5 + $0x10] sm:$0xff]  ;;  %s7072_s26 = smov 127   ;;  %s7073_s27 = smov 2  }
  0x25   :  { %352 = vmatpush.msra.mxu3 %v7231_v22  ;;  %v268_v31 = vld [vmem:[%s9124_s5 + $0x18] sm:$0xff]  ;;  %295 = vmatpush.msra.mxu0 %v267_v30  ;;  %v265_v32 = vld [vmem:[%s9124_s5] sm:$0xff]  ;;  %v266_v33 = vld [vmem:[%s9124_s5 + $0x8] sm:$0xff]  ;;  %s7074_s29 = smov 126   ;;  %s7076_s28 = smov 125  }
  0x26   :  { %1166 = vmatpush.msra.mxu2 %v7231_v22  ;;  %318 = vmatpush.msra.mxu1 %v268_v31  ;;  %v6244_v48 = vld [vmem:[#allocation7] ss:$0 sm:$0xff]  ;;  %v6245_v52 = vld [vmem:[#allocation9] ss:$0 sm:$0xff]  ;;  %v269_v63 = vld [vmem:[%s9125_s6] sm:$0x3] }
  0x27   :  { %353 = vmatpush.msra.mxu3 %v7238_v23  ;;  %296 = vmatpush.msra.mxu0 %v265_v32  ;;  %v272_v1 = vperm.slane %v269_v63, 1  ;;  %s7060_s6 = smov 32   ;;  %s7078_s20 = smov 124  }
  0x28   :  { %v6248_v5 = vpop.eup %6247  ;;  %1167 = vmatpush.msra.mxu2 %v7238_v23  ;;  %319 = vmatpush.msra.mxu1 %v266_v33  ;;  %s7080_s18 = smov 6   ;;  %s7081_s21 = smov 7  }
  0x29   :  { %v169_v6 = vmul.f32 16.0, %v6248_v5  ;;  %vm173_vm1 = vweird.f32 %v6248_v5  ;;  %354 = vmatpush.msra.mxu3 %v7245_v24  ;;  %608 = vmatpush.msrb.mxu0 %v7224_v21  ;;  %s7082_s22 = smov 121   ;;  %s7083_s4 = smov 123  }
  0x2a   :  { %1168 = vmatpush.msra.mxu2 %v7245_v24  ;;  %355 = vmatmul.f32.vlgmr.msra.gmra.mxu3 %v7059_v25  ;;  %s7084_s5 = smov 122   ;;  %s7086_s8 = smov [#allocation16]  }
  0x2b   :  { %166 = vadd.xlane.f32.xlu0 %v165_v3  ;;  %v170_v7 = vsub.f32 1.0, %v169_v6  ;;  %377 = vmatpush.msrb.mxu3 %v7250_v26 }
  0x2c   :  { %1727 = vmatpush.msrb.mxu2 %v7224_v21  ;;  %914 = vmatpush.msrb.mxu1 %v7250_v26 }
  0x2d   :  { %v171_v8 = vmul.f32 %v6248_v5, %v170_v7  ;;  %378 = vmatpush.msrb.mxu3 %v7254_v27  ;;  %609 = vmatpush.msrb.mxu0 %v7231_v22 }
  0x2e   :  { %1728 = vmatpush.msrb.mxu2 %v7231_v22  ;;  %915 = vmatpush.msrb.mxu1 %v7254_v27 }
  0x2f   :  { %v172_v9 = vadd.f32 %v6248_v5, %v171_v8  ;;  %379 = vmatpush.msrb.mxu3 %v7258_v28  ;;  %610 = vmatpush.msrb.mxu0 %v7238_v23 }
  0x30   :  { %1729 = vmatpush.msrb.mxu2 %v7238_v23  ;;  %916 = vmatpush.msrb.mxu1 %v7258_v28 }
  0x31   :  { %v7207_v10 = vsel %vm173_vm1, %v6248_v5, %v172_v9  ;;  %380 = vmatpush.msrb.mxu3 %v7262_v29  ;;  %611 = vmatpush.msrb.mxu0 %v7245_v24 }
  0x32   :  { %1730 = vmatpush.msrb.mxu2 %v7245_v24  ;;  %381 = vmatmul.f32.vlgmr.msrb.gmra.mxu3 %v7059_v25 }
  0x33   :  { %636 = vmatpush.msra.mxu3 %v7250_v26  ;;  %917 = vmatpush.msrb.mxu1 %v7262_v29 }
  0x35   :  { %637 = vmatpush.msra.mxu3 %v7254_v27 }
  0x37   :  { %638 = vmatpush.msra.mxu3 %v7258_v28 }
  0x39   :  { %639 = vmatpush.msra.mxu3 %v7262_v29 }
  0x3b   :  { %1195 = vmatpush.msrb.mxu3 %v7250_v26 }
  0x3d   :  { %1196 = vmatpush.msrb.mxu3 %v7254_v27 }
  0x3f   :  { %1197 = vmatpush.msrb.mxu3 %v7258_v28 }
  0x41   :  { %1198 = vmatpush.msrb.mxu3 %v7262_v29 }
  0x96   :  { %v164_v11 = vpop.xlane.xlu0 %163 }
  0x97   :  { %v175_v12 = vmul.f32 %v7207_v10, %v164_v11 }
  0x99   :  { %v7210_v13 = vsub.f32 %v159_v0, %v175_v12  ;;  %v271_v12 = vperm.slane %v269_v63, 0 }
  0x9b   :  { %v179_v14 = vmul.f32 %v7210_v13, %v7210_v13 }
  0x9d   :  { %v181_v15 = vsel %vm161_vm0, %v179_v14, 0.0 }
  0x9e   :  { %182 = vadd.xlane.f32.xlu1 %v181_v15  ;;  %v167_v16 = vpop.xlane.xlu0 %166 }
  0x9f   :  { %v176_v17 = vmul.f32 %v7207_v10, %v167_v16 }
  0xa1   :  { %v7216_v18 = vsub.f32 %v160_v2, %v176_v17 }
  0xa3   :  { %v180_v19 = vmul.f32 %v7216_v18, %v7216_v18 }
  0xa5   :  { %v184_v20 = vsel %vm161_vm0, %v180_v19, 0.0 }
  0xa6   :  { %185 = vadd.xlane.f32.xlu1 %v184_v20 }
  0xad   :  { %v356_v62 = vpop.f32.mrf.mxu3 }
  0xae   :  { %v360_v15 = vrot.slane %v356_v62, 1 }
  0xb5   :  { %v382_v0 = vpop.f32.mrf.mxu3 }
  0xb6   :  { %v386_v2 = vrot.slane %v382_v0, 1  ;;  %v387_v8 = vrot.slane %v382_v0, 2 }
 0x111   :  { %v183_v34 = vpop.xlane.xlu1 %182 }
 0x112   :  { %v187_v35 = vmul.f32 %v183_v34, %v7207_v10 }
 0x114   :  { %v189_v36 = vadd.f32 1e-05, %v187_v35 }
 0x116   :  { %6249 = vrsqrt.f32 %v189_v36  ;;  %vm197_vm3 = vweird.f32 %v189_v36 }
 0x119   :  { %v186_v37 = vpop.xlane.xlu1 %185 }
 0x11a   :  { %v188_v38 = vmul.f32 %v186_v37, %v7207_v10 }
 0x11c   :  { %v6250_v39 = vpop.eup %6249  ;;  %v190_v40 = vadd.f32 1e-05, %v188_v38 }
 0x11d   :  { %v192_v41 = vmul.f32 %v6250_v39, %v189_v36  ;;  %vm198_vm2 = vweird.f32 %v6250_v39 }
 0x11e   :  { %6251 = vrsqrt.f32 %v190_v40  ;;  %vm199_vm4 = vmor %vm197_vm3, %vm198_vm2  ;;  %vm207_vm5 = vweird.f32 %v190_v40 }
 0x11f   :  { %v193_v42 = vmul.f32 %v6250_v39, %v192_v41 }
 0x121   :  { %v194_v43 = vmul.f32 0.5, %v193_v42 }
 0x123   :  { %v195_v44 = vsub.f32 1.5, %v194_v43 }
 0x124   :  { %v6252_v45 = vpop.eup %6251 }
 0x125   :  { %v196_v46 = vmul.f32 %v6250_v39, %v195_v44  ;;  %v202_v47 = vmul.f32 %v6252_v45, %v190_v40  ;;  %vm208_vm6 = vweird.f32 %v6252_v45 }
 0x126   :  { %vm209_vm7 = vmor %vm207_vm5, %vm208_vm6 }
 0x127   :  { %v203_v49 = vmul.f32 %v6252_v45, %v202_v47  ;;  %v200_v50 = vsel %vm199_vm4, %v6250_v39, %v196_v46 }
 0x128   :  { %v211_v51 = vmul.f32 %v200_v50, %v7210_v13 }
 0x129   :  { %v204_v53 = vmul.f32 0.5, %v203_v49 }
 0x12a   :  { %v217_v54 = vmul.f32 %v6244_v48, %v211_v51 }
 0x12b   :  { %v205_v55 = vsub.f32 1.5, %v204_v53 }
 0x12c   :  { %v223_v56 = vadd.f32 %v6245_v52, %v217_v54 }
 0x12d   :  { %v206_v57 = vmul.f32 %v6252_v45, %v205_v55 }
 0x12e   :  { %6034 = vmatmul.msk.f32.vlgmr.msra.gmra.mxu0 %vm161_vm0, %v223_v56  ;;  %6036 = vmatmul.msk.f32.vlgmr.msra.gmra.mxu1 %vm161_vm0, %v223_v56 }
 0x12f   :  { %v210_v58 = vsel %vm209_vm7, %v6252_v45, %v206_v57  ;;  %884 = vmatpush.msra.mxu0 %v7224_v21  ;;  %1476 = vmatpush.msra.mxu1 %v7250_v26 }
 0x130   :  { %v212_v59 = vmul.f32 %v210_v58, %v7216_v18 }
 0x131   :  { %885 = vmatpush.msra.mxu0 %v7231_v22  ;;  %1477 = vmatpush.msra.mxu1 %v7254_v27 }
 0x132   :  { %v218_v60 = vmul.f32 %v6244_v48, %v212_v59 }
 0x133   :  { %886 = vmatpush.msra.mxu0 %v7238_v23  ;;  %1478 = vmatpush.msra.mxu1 %v7258_v28 }
 0x134   :  { %v224_v61 = vadd.f32 %v6245_v52, %v218_v60 }
 0x135   :  { %887 = vmatpush.msra.mxu0 %v7245_v24  ;;  %1479 = vmatpush.msra.mxu1 %v7262_v29 }
 0x136   :  { %6035 = vmatmul.msk.f32.gmra.mxu0 %vm161_vm0, %v224_v61  ;;  %6037 = vmatmul.msk.f32.gmra.mxu1 %vm161_vm0, %v224_v61 }
 0x1ab   :  { %v298_v3 = vpop.f32.mrf.mxu0  ;;  %v321_v4 = vpop.f32.mrf.mxu1 }
 0x1ac   :  { %v7314_v5 = vadd.f32 %v321_v4, %v272_v1  ;;  %v7325_v18 = vadd.f32 %v298_v3, %v271_v12 }
 0x1ae   :  { %v390_v6 = vadd.f32 %v386_v2, %v7314_v5  ;;  %v363_v19 = vadd.f32 %v356_v62, %v7325_v18 }
 0x1b0   :  { %6253 = vtanh.f32 %v390_v6  ;;  %v6040_v31 = vmul.f32 -1.442695, %v390_v6  ;;  %v6038_v39 = vmul.f32 -1.442695, %v363_v19 }
 0x1b3   :  { %v324_v7 = vpop.f32.mrf.mxu1  ;;  %v301_v10 = vpop.f32.mrf.mxu0 }
 0x1b4   :  { %v7317_v9 = vadd.f32 %v324_v7, %v272_v1  ;;  %v7321_v14 = vadd.f32 %v301_v10, %v271_v12 }
 0x1b6   :  { %v6254_v11 = vpop.eup %6253  ;;  %v391_v13 = vadd.f32 %v387_v8, %v7317_v9  ;;  %v364_v16 = vadd.f32 %v360_v15, %v7321_v14 }
 0x1b7   :  { %510 = vrot.lane.b32.xlu2 %v6254_v11, %s7060_s6 }
 0x1b8   :  { %6255 = vtanh.f32 %v391_v13  ;;  %v6041_v32 = vmul.f32 -1.442695, %v391_v13  ;;  %v6039_v35 = vmul.f32 -1.442695, %v364_v16 }
 0x1b9   :  { %6257 = vtanh.f32 %v364_v16 }
 0x1ba   :  { %6259 = vtanh.f32 %v363_v19 }
 0x1bb   :  { %6261 = vpow2.f32 %v6040_v31 }
 0x1bc   :  { %6263 = vpow2.f32 %v6041_v32 }
 0x1be   :  { %v6256_v17 = vpop.eup %6255 }
 0x1bf   :  { %512 = vrot.lane.b32.xlu2 %v6256_v17, %s7060_s6  ;;  %v6258_v20 = vpop.eup %6257 }
 0x1c0   :  { %v6260_v30 = vpop.eup %6259 }
 0x1c1   :  { %v6262_v33 = vpop.eup %6261 }
 0x1c2   :  { %v472_v34 = vadd.f32 1.0, %v6262_v33  ;;  %v6264_v36 = vpop.eup %6263 }
 0x1c3   :  { %v473_v37 = vadd.f32 1.0, %v6264_v36 }
 0x1c4   :  { %6265 = vrcp.f32 %v472_v34  ;;  %v485_v52 = vand.u32 2147483648, %v472_v34  ;;  %vm479_vm9 = vweird.f32 %v472_v34  ;;  %v483_v53 = vand.u32 2147483647, %v472_v34 }
 0x1c5   :  { %6267 = vpow2.f32 %v6039_v35  ;;  %v500_v0 = vand.u32 2147483648, %v473_v37  ;;  %vm494_vm13 = vweird.f32 %v473_v37  ;;  %v498_v1 = vand.u32 2147483647, %v473_v37 }
 0x1c6   :  { %6269 = vrcp.f32 %v473_v37  ;;  %v486_v57 = vor.u32 1.1754944e-38, %v485_v52  ;;  %vm484_vm11 = vcmp.eq.f32.partialorder %v483_v53, 8.507059e+37  ;;  %v7062_v53 = vmov 7  }
 0x1c7   :  { %438 = vrot.lane.b32.xlu2 %v6258_v20, %s7060_s6  ;;  %6271 = vpow2.f32 %v6038_v39  ;;  %v501_v6 = vor.u32 1.1754944e-38, %v500_v0  ;;  %vm499_vm15 = vcmp.eq.f32.partialorder %v498_v1, 8.507059e+37 }
 0x1c8   :  { %6185 = vset.pattern.permute.xlu2 %v7062_v53 }
 0x1ca   :  { %v6266_v38 = vpop.eup %6265 }
 0x1cb   :  { %v6268_v40 = vpop.eup %6267  ;;  %v475_v41 = vmul.f32 %v6266_v38, %v472_v34  ;;  %vm480_vm8 = vweird.f32 %v6266_v38 }
 0x1cc   :  { %v399_v42 = vadd.f32 1.0, %v6268_v40  ;;  %v6270_v44 = vpop.eup %6269  ;;  %vm481_vm10 = vmor %vm479_vm9, %vm480_vm8  ;;  %v7061_v40 = vmov 0   ;;  %vm543_vm8 = vcmask 1041409  }
 0x1cd   :  { %v476_v43 = vsub.f32 1.0, %v475_v41  ;;  %v6272_v45 = vpop.eup %6271  ;;  %v490_v47 = vmul.f32 %v6270_v44, %v473_v37  ;;  %vm495_vm12 = vweird.f32 %v6270_v44  ;;  %6184 = vset.pattern.permute.xlu0 %v7061_v40 }
 0x1ce   :  { %6273 = vrcp.f32 %v399_v42  ;;  %v398_v48 = vadd.f32 1.0, %v6272_v45  ;;  %vm496_vm14 = vmor %vm494_vm13, %vm495_vm12  ;;  %v426_v13 = vand.u32 2147483648, %v399_v42  ;;  %vm420_vm1 = vweird.f32 %v399_v42 }
 0x1cf   :  { %436 = vrot.lane.b32.xlu2 %v6260_v30, %s7060_s6  ;;  %v477_v46 = vmul.f32 %v6266_v38, %v476_v43  ;;  %v491_v50 = vsub.f32 1.0, %v490_v47  ;;  %v424_v15 = vand.u32 2147483647, %v399_v42  ;;  %vm9138_vm12 = vcmask 253952  }
 0x1d0   :  { %6275 = vrcp.f32 %v398_v48  ;;  %v427_v19 = vor.u32 1.1754944e-38, %v426_v13  ;;  %v411_v33 = vand.u32 2147483648, %v398_v48  ;;  %vm405_vm5 = vweird.f32 %v398_v48 }
 0x1d1   :  { %v478_v49 = vadd.f32 %v6266_v38, %v477_v46  ;;  %v492_v55 = vmul.f32 %v6270_v44, %v491_v50  ;;  %vm425_vm3 = vcmp.eq.f32.partialorder %v424_v15, 8.507059e+37  ;;  %v409_v34 = vand.u32 2147483647, %v398_v48 }
 0x1d2   :  { %v412_v36 = vor.u32 1.1754944e-38, %v411_v33 }
 0x1d3   :  { %v482_v54 = vsel %vm481_vm10, %v6266_v38, %v478_v49  ;;  %v493_v61 = vadd.f32 %v6270_v44, %v492_v55  ;;  %vm410_vm7 = vcmp.eq.f32.partialorder %v409_v34, 8.507059e+37 }
 0x1d4   :  { %v6274_v51 = vpop.eup %6273  ;;  %v7330_v59 = vsel %vm484_vm11, %v486_v57, %v482_v54  ;;  %vm335_vm11 = vcmask 261120  }
 0x1d5   :  { %v416_v56 = vmul.f32 %v6274_v51, %v399_v42  ;;  %v497_v2 = vsel %vm496_vm14, %v6270_v44, %v493_v61  ;;  %vm421_vm0 = vweird.f32 %v6274_v51  ;;  %v506_v41 = vmul.f32 0.0, %v7330_v59 }
 0x1d6   :  { %v6276_v63 = vpop.eup %6275  ;;  %v502_v8 = vsel %vm499_vm15, %v501_v6, %v497_v2  ;;  %vm422_vm2 = vmor %vm420_vm1, %vm421_vm0 }
 0x1d7   :  { %v417_v62 = vsub.f32 1.0, %v416_v56  ;;  %v401_v4 = vmul.f32 %v6276_v63, %v398_v48  ;;  %vm406_vm4 = vweird.f32 %v6276_v63  ;;  %v507_v44 = vmul.f32 0.0, %v502_v8 }
 0x1d8   :  { %vm407_vm6 = vmor %vm405_vm5, %vm406_vm4 }
 0x1d9   :  { %v418_v3 = vmul.f32 %v6274_v51, %v417_v62  ;;  %v402_v12 = vsub.f32 1.0, %v401_v4  ;;  %v225_v62 = vlaneseq }
 0x1db   :  { %v419_v11 = vadd.f32 %v6274_v51, %v418_v3  ;;  %v403_v17 = vmul.f32 %v6276_v63, %v402_v12  ;;  %v7356_v3 = vand.u32 127, %v225_v62 }
 0x1dd   :  { %v423_v16 = vsel %vm422_vm2, %v6274_v51, %v419_v11  ;;  %v404_v32 = vadd.f32 %v6276_v63, %v403_v17  ;;  %v227_v51 = vld [vmem:[%s9120_s1] sm:$0x3]  ;;  %s7063_s1 = smov 64  }
 0x1de   :  { %v7335_v30 = vsel %vm425_vm3, %v427_v19, %v423_v16 }
 0x1df   :  { %v408_v35 = vsel %vm407_vm6, %v6276_v63, %v404_v32  ;;  %v433_v4 = vmul.f32 0.0, %v7335_v30 }
 0x1e0   :  { %v7339_v37 = vsel %vm410_vm7, %v412_v36, %v408_v35 }
 0x211   :  { %v511_v58 = vpop.permute.xlu2 %510 }
 0x212   :  { %v516_v60 = vmul.f32 %v511_v58, %v7330_v59 }
 0x214   :  { %520 = vrot.lane.b32.xlu0 %v516_v60, %s7060_s6  ;;  %v432_v60 = vmul.f32 0.0, %v7339_v37 }
 0x219   :  { %v513_v7 = vpop.permute.xlu2 %512 }
 0x21a   :  { %v517_v10 = vmul.f32 %v513_v7, %v502_v8 }
 0x21c   :  { %522 = vrot.lane.b32.xlu1 %v517_v10, %s7060_s6 }
 0x221   :  { %v439_v20 = vpop.permute.xlu2 %438 }
 0x222   :  { %v443_v31 = vmul.f32 %v439_v20, %v7335_v30 }
 0x224   :  { %448 = vrot.lane.b32.xlu2 %v443_v31, %s7060_s6 }
 0x229   :  { %v437_v38 = vpop.permute.xlu2 %436 }
 0x22a   :  { %v442_v39 = vmul.f32 %v437_v38, %v7339_v37 }
 0x22c   :  { %446 = vrot.lane.b32.xlu1 %v442_v39, %s7060_s6 }
 0x27e   :  { %v449_v54 = vpop.permute.xlu2 %448 }
 0x27f   :  { %v453_v6 = vadd.f32 %v449_v54, %v433_v4 }
 0x281   :  { %v551_v12 = vrot.slane %v453_v6, 7 }
 0x286   :  { %v521_v42 = vpop.permute.xlu0 %520 }
 0x287   :  { %v526_v43 = vadd.f32 %v521_v42, %v506_v41 }
 0x289   :  { %6277 = vtanh.f32 %v526_v43  ;;  %v568_v48 = vrot.slane %v526_v43, 7 }
 0x28e   :  { %v523_v45 = vpop.permute.xlu1 %522 }
 0x28f   :  { %v6278_v46 = vpop.eup %6277  ;;  %v527_v47 = vadd.f32 %v523_v45, %v507_v44 }
 0x290   :  { %532 = vrot.lane.b32.xlu0 %v6278_v46, %s7060_s6 }
 0x291   :  { %6279 = vtanh.f32 %v527_v47  ;;  %v569_v49 = vrot.slane %v527_v47, 6 }
 0x293   :  { %v570_v50 = vsel %vm543_vm8, %v569_v49, %v568_v48 }
 0x297   :  { %v6280_v52 = vpop.eup %6279 }
 0x298   :  { %534 = vrot.lane.b32.xlu2 %v6280_v52, %s7060_s6  ;;  %229 = vperm.xlu0 %6184, %v227_v51  }
 0x29e   :  { %v447_v57 = vpop.permute.xlu1 %446 }
 0x29f   :  { %v452_v63 = vadd.f32 %v447_v57, %v432_v60 }
 0x2a1   :  { %6281 = vtanh.f32 %v452_v63  ;;  %v552_v13 = vsel %vm543_vm8, %v551_v12, %v452_v63 }
 0x2a2   :  { %6283 = vtanh.f32 %v453_v6 }
 0x2a7   :  { %v6282_v10 = vpop.eup %6281 }
 0x2a8   :  { %v6284_v11 = vpop.eup %6283 }
 0x2f2   :  { %v535_v55 = vpop.permute.xlu2 %534 }
 0x2f3   :  { %v539_v56 = vmul.f32 %v535_v55, %v502_v8 }
 0x2f5   :  { %v560_v0 = vrot.slane %v539_v56, 6 }
 0x302   :  { %v533_v58 = vpop.permute.xlu0 %532 }
 0x303   :  { %v538_v61 = vmul.f32 %v533_v58, %v7330_v59 }
 0x305   :  { %v559_v1 = vrot.slane %v538_v61, 7 }
 0x307   :  { %v561_v2 = vsel %vm543_vm8, %v560_v0, %v559_v1 }
 0x308   :  { %562 = vrot.lane.b32.xlu1 %v561_v2, %s7063_s1 }
 0x30a   :  { %v230_v7 = vpop.permute.xlu0 %229 }
 0x30b   :  { %vm7361_vm9 = vcmp.lt.s32.totalorder %v7356_v3, %v230_v7 }
 0x30c   :  { %v7368_v8 = vsel %vm7361_vm9, 1, %v7061_v40 }
 0x30d   :  { %234 = vperm.xlu0 %6184, %v7368_v8   ;;  %262 = vperm.xlu2 %6185, %v7368_v8  }
 0x310   :  { %458 = vrot.lane.b32.xlu1 %v6282_v10, %s7060_s6 }
 0x315   :  { %460 = vrot.lane.b32.xlu2 %v6284_v11, %s7060_s6 }
 0x318   :  { %571 = vrot.lane.b32.xlu1 %v570_v50, %s7064_s23 }
 0x320   :  { %553 = vrot.lane.b32.xlu1 %v552_v13, %s7064_s23 }
 0x367   :  { %v7377_v15 = vpop.permute.xlu2 %262 }
 0x368   :  { %vm9136_vm10 = vcmp.eq.s32.totalorder %v7377_v15, 1 }
 0x36f   :  { %v461_v19 = vpop.permute.xlu2 %460 }
 0x370   :  { %v465_v20 = vmul.f32 %v461_v19, %v7335_v30 }
 0x372   :  { %v542_v32 = vrot.slane %v465_v20, 7 }
 0x37a   :  { %v563_v16 = vpop.permute.xlu1 %562 }
 0x37b   :  { %v7382_v17 = vsel %vm9136_vm10, %v563_v16, 0.0 }
 0x37c   :  { %6043 = vmatmul.msk.f32.vlgmr.msra.gmra.mxu3 %vm335_vm11, %v7382_v17 }
 0x37d   :  { %1757 = vmatpush.msra.mxu3 %v7250_v26 }
 0x37f   :  { %1758 = vmatpush.msra.mxu3 %v7254_v27  ;;  %v7394_v35 = vpop.permute.xlu0 %234 }
 0x380   :  { %vm9137_vm13 = vcmp.eq.s32.totalorder %v7394_v35, 1 }
 0x381   :  { %1759 = vmatpush.msra.mxu3 %v7258_v28 }
 0x382   :  { %v459_v31 = vpop.permute.xlu1 %458 }
 0x383   :  { %v464_v33 = vmul.f32 %v459_v31, %v7339_v37  ;;  %1760 = vmatpush.msra.mxu3 %v7262_v29 }
 0x385   :  { %v544_v34 = vsel %vm543_vm8, %v542_v32, %v464_v33 }
 0x386   :  { %545 = vrot.lane.b32.xlu2 %v544_v34, %s7063_s1 }
 0x38a   :  { %v572_v46 = vpop.permute.xlu1 %571 }
 0x38b   :  { %v7417_v47 = vsel %vm9136_vm10, %v572_v46, 0.0 }
 0x38c   :  { %v774_v48 = vrot.slane %v7417_v47, 2  ;;  %v775_v49 = vrot.slane %v7417_v47, 3 }
 0x392   :  { %v554_v32 = vpop.permute.xlu1 %553 }
 0x393   :  { %v7432_v34 = vsel %vm9137_vm13, %v554_v32, 0.0 }
 0x3e0   :  { %v546_v30 = vpop.permute.xlu2 %545 }
 0x3e1   :  { %v7399_v36 = vsel %vm9137_vm13, %v546_v30, 0.0 }
 0x3e2   :  { %v576_v38 = vrot.slane %v7399_v36, 1  ;;  %579 = vst.msk [vmem:[#allocation2] sm:$0x1] %vm9138_vm12, %v7399_v36  ;;  %6042 = vmatmul.msk.f32.vlgmr.msrb.gmra.mxu0 %vm335_vm11, %v7399_v36 }
 0x3e3   :  { %1446 = vmatpush.msrb.mxu0 %v7224_v21 }
 0x3e4   :  { %580 = vst.msk [vmem:[#allocation2 + $0x8] sm:$0x1] %vm9138_vm12, %v576_v38 }
 0x3e5   :  { %1447 = vmatpush.msrb.mxu0 %v7231_v22 }
 0x3e7   :  { %1448 = vmatpush.msrb.mxu0 %v7238_v23 }
 0x3e9   :  { %1449 = vmatpush.msrb.mxu0 %v7245_v24 }
 0x3ff   :  { %v641_v37 = vpop.f32.mrf.mxu3 }
 0x400   :  { %v645_v39 = vrot.slane %v641_v37, 2  ;;  %v646_v41 = vrot.slane %v641_v37, 3 }
 0x402   :  { %v649_v42 = vadd.f32 %v645_v39, %v7314_v5  ;;  %v650_v43 = vadd.f32 %v646_v41, %v7317_v9 }
 0x404   :  { %6285 = vtanh.f32 %v649_v42  ;;  %v6047_v50 = vmul.f32 -1.442695, %v650_v43  ;;  %v6046_v55 = vmul.f32 -1.442695, %v649_v42 }
 0x405   :  { %6287 = vtanh.f32 %v650_v43 }
 0x406   :  { %6289 = vpow2.f32 %v6047_v50 }
 0x40a   :  { %v6286_v44 = vpop.eup %6285 }
 0x40b   :  { %v6288_v45 = vpop.eup %6287  ;;  %786 = vrot.lane.b32.xlu0 %v6286_v44, %s7060_s6 }
 0x40c   :  { %788 = vrot.lane.b32.xlu2 %v6288_v45, %s7060_s6  ;;  %v6290_v51 = vpop.eup %6289 }
 0x40d   :  { %v740_v52 = vadd.f32 1.0, %v6290_v51 }
 0x40f   :  { %6291 = vrcp.f32 %v740_v52  ;;  %v767_v2 = vand.u32 2147483648, %v740_v52  ;;  %vm761_vm15 = vweird.f32 %v740_v52  ;;  %v765_v4 = vand.u32 2147483647, %v740_v52 }
 0x410   :  { %6293 = vpow2.f32 %v6046_v55 }
 0x411   :  { %v768_v10 = vor.u32 1.1754944e-38, %v767_v2  ;;  %vm766_vm1 = vcmp.eq.f32.partialorder %v765_v4, 8.507059e+37 }
 0x413   :  { %776 = vrot.lane.b32.xlu0 %v774_v48, %s7060_s6  ;;  %v692_v48 = vrot.slane %v7432_v34, 7 }
 0x414   :  { %778 = vrot.lane.b32.xlu2 %v775_v49, %s7060_s6 }
 0x415   :  { %v6292_v54 = vpop.eup %6291 }
 0x416   :  { %v757_v56 = vmul.f32 %v6292_v54, %v740_v52  ;;  %v6294_v58 = vpop.eup %6293  ;;  %vm762_vm14 = vweird.f32 %v6292_v54 }
 0x417   :  { %v739_v61 = vadd.f32 1.0, %v6294_v58  ;;  %vm763_vm0 = vmor %vm761_vm15, %vm762_vm14 }
 0x418   :  { %v758_v57 = vsub.f32 1.0, %v757_v56 }
 0x419   :  { %6295 = vrcp.f32 %v739_v61  ;;  %v752_v39 = vand.u32 2147483648, %v739_v61  ;;  %vm746_vm3 = vweird.f32 %v739_v61  ;;  %v750_v41 = vand.u32 2147483647, %v739_v61 }
 0x41a   :  { %v759_v60 = vmul.f32 %v6292_v54, %v758_v57 }
 0x41b   :  { %v753_v43 = vor.u32 1.1754944e-38, %v752_v39  ;;  %vm751_vm5 = vcmp.eq.f32.partialorder %v750_v41, 8.507059e+37 }
 0x41c   :  { %v760_v0 = vadd.f32 %v6292_v54, %v759_v60 }
 0x41e   :  { %v764_v7 = vsel %vm763_vm0, %v6292_v54, %v760_v0 }
 0x41f   :  { %v7424_v11 = vsel %vm766_vm1, %v768_v10, %v764_v7  ;;  %v6296_v13 = vpop.eup %6295 }
 0x420   :  { %v742_v20 = vmul.f32 %v6296_v13, %v739_v61  ;;  %vm747_vm2 = vweird.f32 %v6296_v13 }
 0x421   :  { %vm748_vm4 = vmor %vm746_vm3, %vm747_vm2 }
 0x422   :  { %v743_v33 = vsub.f32 1.0, %v742_v20 }
 0x424   :  { %v744_v30 = vmul.f32 %v6296_v13, %v743_v33 }
 0x426   :  { %v745_v37 = vadd.f32 %v6296_v13, %v744_v30 }
 0x428   :  { %v749_v42 = vsel %vm748_vm4, %v6296_v13, %v745_v37 }
 0x429   :  { %v7437_v45 = vsel %vm751_vm5, %v753_v43, %v749_v42 }
 0x45f   :  { %v613_v63 = vpop.f32.mrf.mxu0 }
 0x460   :  { %v617_v1 = vrot.slane %v613_v63, 7  ;;  %v621_v19 = vadd.f32 %v613_v63, %v7321_v14 }
 0x462   :  { %v620_v6 = vadd.f32 %v617_v1, %v7325_v18  ;;  %v6045_v50 = vmul.f32 -1.442695, %v621_v19 }
 0x464   :  { %6297 = vtanh.f32 %v620_v6  ;;  %v6044_v49 = vmul.f32 -1.442695, %v620_v6 }
 0x465   :  { %6299 = vtanh.f32 %v621_v19  ;;  %v7065_v19 = vmov 6  }
 0x466   :  { %v789_v12 = vpop.permute.xlu2 %788  ;;  %6301 = vpow2.f32 %v6044_v49  ;;  %6186 = vset.pattern.permute.xlu2 %v7065_v19 }
 0x467   :  { %v793_v16 = vmul.f32 %v789_v12, %v7424_v11  ;;  %6303 = vpow2.f32 %v6045_v50 }
 0x469   :  { %798 = vrot.lane.b32.xlu2 %v793_v16, %s7060_s6 }
 0x46a   :  { %v6298_v31 = vpop.eup %6297 }
 0x46b   :  { %703 = vrot.lane.b32.xlu1 %v6298_v31, %s7060_s6  ;;  %v6300_v38 = vpop.eup %6299 }
 0x46c   :  { %v6302_v51 = vpop.eup %6301 }
 0x46d   :  { %v657_v52 = vadd.f32 1.0, %v6302_v51  ;;  %v6304_v54 = vpop.eup %6303 }
 0x46e   :  { %v658_v55 = vadd.f32 1.0, %v6304_v54  ;;  %v779_v61 = vpop.permute.xlu2 %778 }
 0x46f   :  { %6305 = vrcp.f32 %v657_v52  ;;  %v670_v4 = vand.u32 2147483648, %v657_v52  ;;  %vm664_vm7 = vweird.f32 %v657_v52  ;;  %v668_v6 = vand.u32 2147483647, %v657_v52 }
 0x470   :  { %6307 = vrcp.f32 %v658_v55  ;;  %v783_v13 = vmul.f32 %v779_v61, %v7424_v11  ;;  %vm679_vm1 = vweird.f32 %v658_v55  ;;  %v683_v37 = vand.u32 2147483647, %v658_v55 }
 0x471   :  { %695 = vrot.lane.b32.xlu2 %v7432_v34, %s7060_s6  ;;  %v671_v16 = vor.u32 1.1754944e-38, %v670_v4  ;;  %vm669_vm15 = vcmp.eq.f32.partialorder %v668_v6, 8.507059e+37 }
 0x472   :  { %vm684_vm3 = vcmp.eq.f32.partialorder %v683_v37, 8.507059e+37 }
 0x473   :  { %705 = vrot.lane.b32.xlu1 %v6300_v38, %s7060_s6  ;;  %v685_v38 = vand.u32 2147483648, %v658_v55 }
 0x475   :  { %v6306_v56 = vpop.eup %6305  ;;  %v686_v41 = vor.u32 1.1754944e-38, %v685_v38 }
 0x476   :  { %v660_v57 = vmul.f32 %v6306_v56, %v657_v52  ;;  %v6308_v60 = vpop.eup %6307  ;;  %vm665_vm6 = vweird.f32 %v6306_v56 }
 0x477   :  { %v675_v63 = vmul.f32 %v6308_v60, %v658_v55  ;;  %vm666_vm14 = vmor %vm664_vm7, %vm665_vm6  ;;  %vm680_vm0 = vweird.f32 %v6308_v60 }
 0x478   :  { %v661_v58 = vsub.f32 1.0, %v660_v57  ;;  %vm681_vm2 = vmor %vm679_vm1, %vm680_vm0  ;;  %v7066_v57 = vmov 1  }
 0x479   :  { %v676_v1 = vsub.f32 1.0, %v675_v63 }
 0x47a   :  { %v662_v0 = vmul.f32 %v6306_v56, %v661_v58 }
 0x47b   :  { %v677_v10 = vmul.f32 %v6308_v60, %v676_v1 }
 0x47c   :  { %v663_v2 = vadd.f32 %v6306_v56, %v662_v0 }
 0x47d   :  { %v787_v44 = vpop.permute.xlu0 %786  ;;  %v678_v33 = vadd.f32 %v6308_v60, %v677_v10 }
 0x47e   :  { %v792_v46 = vmul.f32 %v787_v44, %v7437_v45  ;;  %v667_v12 = vsel %vm666_vm14, %v6306_v56, %v663_v2 }
 0x47f   :  { %v672_v32 = vsel %vm669_vm15, %v671_v16, %v667_v12  ;;  %v682_v39 = vsel %vm681_vm2, %v6308_v60, %v678_v33 }
 0x480   :  { %796 = vrot.lane.b32.xlu0 %v792_v46, %s7060_s6  ;;  %v687_v42 = vsel %vm684_vm3, %v686_v41, %v682_v39 }
 0x488   :  { %693 = vrot.lane.b32.xlu0 %v692_v48, %s7060_s6  ;;  %v777_v48 = vpop.permute.xlu0 %776 }
 0x489   :  { %v782_v49 = vmul.f32 %v777_v48, %v7437_v45 }
 0x4c3   :  { %v799_v7 = vpop.permute.xlu2 %798 }
 0x4c4   :  { %v803_v20 = vadd.f32 %v799_v7, %v783_v13 }
 0x4c6   :  { %6309 = vtanh.f32 %v803_v20  ;;  %v844_v52 = vrot.slane %v803_v20, 5 }
 0x4cb   :  { %v696_v60 = vpop.permute.xlu2 %695 }
 0x4cc   :  { %v6310_v46 = vpop.eup %6309  ;;  %v700_v1 = vmul.f32 %v696_v60, %v687_v42 }
 0x4dd   :  { %v704_v31 = vpop.permute.xlu1 %703 }
 0x4de   :  { %v709_v30 = vmul.f32 %v704_v31, %v672_v32 }
 0x4e0   :  { %713 = vrot.lane.b32.xlu1 %v709_v30, %s7060_s6 }
 0x4e5   :  { %v706_v43 = vpop.permute.xlu1 %705 }
 0x4e6   :  { %v710_v44 = vmul.f32 %v706_v43, %v687_v42 }
 0x4e8   :  { %715 = vrot.lane.b32.xlu0 %v710_v44, %s7060_s6  ;;  %810 = vrot.lane.b32.xlu1 %v6310_v46, %s7060_s6 }
 0x4f2   :  { %v797_v50 = vpop.permute.xlu0 %796 }
 0x4f3   :  { %v802_v51 = vadd.f32 %v797_v50, %v782_v49 }
 0x4f5   :  { %6311 = vtanh.f32 %v802_v51  ;;  %v843_v54 = vrot.slane %v802_v51, 6 }
 0x4f7   :  { %v845_v55 = vsel %vm543_vm8, %v844_v52, %v843_v54 }
 0x4fa   :  { %v694_v58 = vpop.permute.xlu0 %693 }
 0x4fb   :  { %v6312_v56 = vpop.eup %6311  ;;  %v699_v61 = vmul.f32 %v694_v58, %v672_v32 }
 0x4fc   :  { %808 = vrot.lane.b32.xlu2 %v6312_v56, %s7060_s6 }
 0x504   :  { %258 = vperm.xlu2 %6186, %v7368_v8  }
 0x50c   :  { %6187 = vset.pattern.permute.xlu2 %v7066_v57 }
 0x50d   :  { %238 = vperm.xlu2 %6187, %v7368_v8  }
 0x552   :  { %v714_v63 = vpop.permute.xlu1 %713 }
 0x553   :  { %v719_v0 = vadd.f32 %v714_v63, %v699_v61 }
 0x555   :  { %6313 = vtanh.f32 %v719_v0  ;;  %v826_v30 = vrot.slane %v719_v0, 1 }
 0x556   :  { %v809_v2 = vpop.permute.xlu2 %808 }
 0x557   :  { %v814_v13 = vmul.f32 %v809_v2, %v7437_v45 }
 0x559   :  { %v834_v20 = vrot.slane %v814_v13, 6 }
 0x55a   :  { %v716_v4 = vpop.permute.xlu0 %715  ;;  %v811_v6 = vpop.permute.xlu1 %810 }
 0x55b   :  { %v6314_v7 = vpop.eup %6313  ;;  %v720_v10 = vadd.f32 %v716_v4, %v700_v1  ;;  %v815_v12 = vmul.f32 %v811_v6, %v7424_v11 }
 0x55c   :  { %725 = vrot.lane.b32.xlu0 %v6314_v7, %s7060_s6 }
 0x55d   :  { %6315 = vtanh.f32 %v720_v10  ;;  %v835_v16 = vrot.slane %v815_v12, 5  ;;  %v827_v38 = vsel %vm543_vm8, %v720_v10, %v826_v30 }
 0x55e   :  { %v7463_v37 = vpop.permute.xlu2 %258 }
 0x55f   :  { %v836_v33 = vsel %vm543_vm8, %v835_v16, %v834_v20  ;;  %vm260_vm4 = vcmp.eq.s32.totalorder %v7463_v37, 1 }
 0x563   :  { %v6316_v31 = vpop.eup %6315 }
 0x564   :  { %727 = vrot.lane.b32.xlu1 %v6316_v31, %s7060_s6  ;;  %837 = vrot.lane.b32.xlu0 %v836_v33, %s7063_s1 }
 0x56c   :  { %846 = vrot.lane.b32.xlu0 %v845_v55, %s7064_s23 }
 0x574   :  { %828 = vrot.lane.b32.xlu0 %v827_v38, %s7064_s23 }
 0x5ce   :  { %v726_v11 = vpop.permute.xlu0 %725 }
 0x5cf   :  { %v731_v45 = vmul.f32 %v726_v11, %v672_v32  ;;  %v7482_v32 = vpop.permute.xlu2 %238 }
 0x5d0   :  { %vm240_vm5 = vcmp.eq.s32.totalorder %v7482_v32, 1 }
 0x5d1   :  { %v818_v43 = vrot.slane %v731_v45, 1 }
 0x5d6   :  { %v728_v39 = vpop.permute.xlu1 %727  ;;  %v7466_v41 = vpop.permute.xlu0 %837 }
 0x5d7   :  { %v732_v44 = vmul.f32 %v728_v39, %v687_v42  ;;  %v7472_v46 = vsel %vm260_vm4, %v7466_v41, %v7382_v17 }
 0x5d8   :  { %6049 = vmatmul.msk.f32.vlgmr.msrb.gmra.mxu1 %vm335_vm11, %v7472_v46 }
 0x5d9   :  { %v819_v48 = vsel %vm543_vm8, %v732_v44, %v818_v43  ;;  %2038 = vmatpush.msrb.mxu1 %v7250_v26 }
 0x5da   :  { %820 = vrot.lane.b32.xlu1 %v819_v48, %s7063_s1 }
 0x5db   :  { %2039 = vmatpush.msrb.mxu1 %v7254_v27 }
 0x5dd   :  { %2040 = vmatpush.msrb.mxu1 %v7258_v28 }
 0x5df   :  { %2041 = vmatpush.msrb.mxu1 %v7262_v29 }
 0x64c   :  { %v821_v42 = vpop.permute.xlu1 %820 }
 0x64d   :  { %v7488_v49 = vsel %vm240_vm5, %v821_v42, %v7399_v36  ;;  %v850_v26 = vsel %vm240_vm5, %v821_v42, 0.0 }
 0x64e   :  { %v852_v50 = vrot.slane %v850_v26, 1  ;;  %854 = vst.msk [vmem:[#allocation2 + $0x1] sm:$0x1] %vm9138_vm12, %v850_v26  ;;  %6048 = vmatmul.msk.f32.vlgmr.msra.gmra.mxu0 %vm335_vm11, %v7488_v49 }
 0x64f   :  { %2008 = vmatpush.msra.mxu0 %v7224_v21  ;;  %v847_v21 = vpop.permute.xlu0 %846 }
 0x650   :  { %855 = vst.msk [vmem:[#allocation2 + $0x9] sm:$0x1] %vm9138_vm12, %v852_v50 }
 0x651   :  { %2009 = vmatpush.msra.mxu0 %v7231_v22  ;;  %v7507_v22 = vsel %vm260_vm4, %v847_v21, %v7417_v47 }
 0x653   :  { %2010 = vmatpush.msra.mxu0 %v7238_v23  ;;  %v1053_v23 = vrot.slane %v7507_v22, 3 }
 0x655   :  { %v919_v27 = vpop.f32.mrf.mxu1  ;;  %2011 = vmatpush.msra.mxu0 %v7245_v24  ;;  %v1054_v24 = vrot.slane %v7507_v22, 4 }
 0x656   :  { %v923_v28 = vrot.slane %v919_v27, 3  ;;  %v924_v29 = vrot.slane %v919_v27, 4 }
 0x657   :  { %v829_v31 = vpop.permute.xlu0 %828 }
 0x658   :  { %v927_v36 = vadd.f32 %v923_v28, %v7314_v5  ;;  %v928_v51 = vadd.f32 %v924_v29, %v7317_v9  ;;  %v7520_v33 = vsel %vm240_vm5, %v829_v31, %v7432_v34 }
 0x659   :  { %v971_v30 = vrot.slane %v7520_v33, 7 }
 0x65a   :  { %6317 = vtanh.f32 %v927_v36  ;;  %v6052_v55 = vmul.f32 -1.442695, %v927_v36  ;;  %v6053_v0 = vmul.f32 -1.442695, %v928_v51 }
 0x65b   :  { %6319 = vtanh.f32 %v928_v51 }
 0x65c   :  { %6321 = vpow2.f32 %v6052_v55 }
 0x660   :  { %v6318_v52 = vpop.eup %6317 }
 0x661   :  { %v6320_v54 = vpop.eup %6319  ;;  %1065 = vrot.lane.b32.xlu2 %v6318_v52, %s7060_s6 }
 0x662   :  { %1067 = vrot.lane.b32.xlu1 %v6320_v54, %s7060_s6  ;;  %v6322_v56 = vpop.eup %6321 }
 0x663   :  { %v1018_v58 = vadd.f32 1.0, %v6322_v56 }
 0x665   :  { %6323 = vrcp.f32 %v1018_v58  ;;  %v1031_v2 = vand.u32 2147483648, %v1018_v58  ;;  %vm1025_vm7 = vweird.f32 %v1018_v58  ;;  %v1029_v4 = vand.u32 2147483647, %v1018_v58 }
 0x666   :  { %6325 = vpow2.f32 %v6053_v0 }
 0x667   :  { %v1032_v10 = vor.u32 1.1754944e-38, %v1031_v2  ;;  %vm1030_vm15 = vcmp.eq.f32.partialorder %v1029_v4, 8.507059e+37 }
 0x669   :  { %1055 = vrot.lane.b32.xlu2 %v1053_v23, %s7060_s6  ;;  %v970_v23 = vrot.slane %v7520_v33, 6 }
 0x66a   :  { %1057 = vrot.lane.b32.xlu1 %v1054_v24, %s7060_s6 }
 0x66b   :  { %v6324_v60 = vpop.eup %6323 }
 0x66c   :  { %v1021_v61 = vmul.f32 %v6324_v60, %v1018_v58  ;;  %vm1026_vm6 = vweird.f32 %v6324_v60  ;;  %v6326_v7 = vpop.eup %6325 }
 0x66d   :  { %vm1027_vm14 = vmor %vm1025_vm7, %vm1026_vm6  ;;  %v1019_v16 = vadd.f32 1.0, %v6326_v7 }
 0x66e   :  { %v1022_v63 = vsub.f32 1.0, %v1021_v61 }
 0x66f   :  { %6327 = vrcp.f32 %v1019_v16  ;;  %v1046_v27 = vand.u32 2147483648, %v1019_v16  ;;  %vm1040_vm1 = vweird.f32 %v1019_v16  ;;  %v1044_v29 = vand.u32 2147483647, %v1019_v16 }
 0x670   :  { %v1023_v1 = vmul.f32 %v6324_v60, %v1022_v63 }
 0x671   :  { %v1047_v52 = vor.u32 1.1754944e-38, %v1046_v27  ;;  %vm1045_vm3 = vcmp.eq.f32.partialorder %v1044_v29, 8.507059e+37 }
 0x672   :  { %v1024_v47 = vadd.f32 %v6324_v60, %v1023_v1 }
 0x674   :  { %v1028_v6 = vsel %vm1027_vm14, %v6324_v60, %v1024_v47 }
 0x675   :  { %v7513_v12 = vsel %vm1030_vm15, %v1032_v10, %v1028_v6  ;;  %v6328_v38 = vpop.eup %6327 }
 0x676   :  { %v1036_v11 = vmul.f32 %v6328_v38, %v1019_v16  ;;  %vm1041_vm0 = vweird.f32 %v6328_v38 }
 0x677   :  { %vm1042_vm2 = vmor %vm1040_vm1, %vm1041_vm0 }
 0x678   :  { %v1037_v44 = vsub.f32 1.0, %v1036_v11 }
 0x67a   :  { %v1038_v26 = vmul.f32 %v6328_v38, %v1037_v44 }
 0x67c   :  { %v1039_v50 = vadd.f32 %v6328_v38, %v1038_v26 }
 0x67e   :  { %v1043_v36 = vsel %vm1042_vm2, %v6328_v38, %v1039_v50 }
 0x67f   :  { %v7528_v54 = vsel %vm1045_vm3, %v1047_v52, %v1043_v36 }
 0x6bb   :  { %v1066_v13 = vpop.permute.xlu2 %1065 }
 0x6bc   :  { %v1071_v20 = vmul.f32 %v1066_v13, %v7513_v12 }
 0x6be   :  { %1075 = vrot.lane.b32.xlu1 %v1071_v20, %s7060_s6 }
 0x6c3   :  { %v1056_v4 = vpop.permute.xlu2 %1055 }
 0x6c4   :  { %v1061_v13 = vmul.f32 %v1056_v4, %v7513_v12 }
 0x6c6   :  { %974 = vrot.lane.b32.xlu1 %v971_v30, %s7060_s6 }
 0x6cb   :  { %v889_v45 = vpop.f32.mrf.mxu0 }
 0x6cc   :  { %v893_v39 = vrot.slane %v889_v45, 6  ;;  %v894_v43 = vrot.slane %v889_v45, 7 }
 0x6ce   :  { %v897_v48 = vadd.f32 %v893_v39, %v7325_v18  ;;  %v898_v42 = vadd.f32 %v894_v43, %v7321_v14 }
 0x6d0   :  { %6329 = vtanh.f32 %v897_v48  ;;  %v6051_v24 = vmul.f32 -1.442695, %v898_v42  ;;  %v6050_v60 = vmul.f32 -1.442695, %v897_v48 }
 0x6d1   :  { %6331 = vtanh.f32 %v898_v42  ;;  %v7067_v42 = vmov 5  }
 0x6d2   :  { %6333 = vpow2.f32 %v6051_v24  ;;  %6188 = vset.pattern.permute.xlu0 %v7067_v42 }
 0x6d4   :  { %v1068_v51 = vpop.permute.xlu1 %1067 }
 0x6d5   :  { %v1072_v21 = vmul.f32 %v1068_v51, %v7528_v54 }
 0x6d6   :  { %v6330_v34 = vpop.eup %6329 }
 0x6d7   :  { %v6332_v28 = vpop.eup %6331  ;;  %982 = vrot.lane.b32.xlu0 %v6330_v34, %s7060_s6 }
 0x6d8   :  { %984 = vrot.lane.b32.xlu2 %v6332_v28, %s7060_s6  ;;  %v6334_v55 = vpop.eup %6333 }
 0x6d9   :  { %v936_v56 = vadd.f32 1.0, %v6334_v55 }
 0x6db   :  { %6335 = vrcp.f32 %v936_v56  ;;  %v963_v7 = vand.u32 2147483648, %v936_v56  ;;  %vm957_vm7 = vweird.f32 %v936_v56  ;;  %v961_v10 = vand.u32 2147483647, %v936_v56 }
 0x6dc   :  { %6337 = vpow2.f32 %v6050_v60  ;;  %v1058_v47 = vpop.permute.xlu1 %1057 }
 0x6dd   :  { %v964_v31 = vor.u32 1.1754944e-38, %v963_v7  ;;  %vm962_vm15 = vcmp.eq.f32.partialorder %v961_v10, 8.507059e+37 }
 0x6df   :  { %1077 = vrot.lane.b32.xlu0 %v1072_v21, %s7060_s6  ;;  %v1062_v21 = vmul.f32 %v1058_v47, %v7528_v54 }
 0x6e0   :  { %972 = vrot.lane.b32.xlu2 %v970_v23, %s7060_s6 }
 0x6e1   :  { %v6336_v58 = vpop.eup %6335 }
 0x6e2   :  { %v953_v61 = vmul.f32 %v6336_v58, %v936_v56  ;;  %v6338_v0 = vpop.eup %6337  ;;  %vm958_vm6 = vweird.f32 %v6336_v58 }
 0x6e3   :  { %v935_v2 = vadd.f32 1.0, %v6338_v0  ;;  %vm959_vm14 = vmor %vm957_vm7, %vm958_vm6 }
 0x6e4   :  { %v954_v63 = vsub.f32 1.0, %v953_v61  ;;  %v7068_v61 = vmov 2  }
 0x6e5   :  { %6339 = vrcp.f32 %v935_v2  ;;  %v948_v34 = vand.u32 2147483648, %v935_v2  ;;  %vm942_vm1 = vweird.f32 %v935_v2  ;;  %v946_v27 = vand.u32 2147483647, %v935_v2  ;;  %6189 = vset.pattern.permute.xlu1 %v7068_v61 }
 0x6e6   :  { %v955_v1 = vmul.f32 %v6336_v58, %v954_v63 }
 0x6e7   :  { %v949_v29 = vor.u32 1.1754944e-38, %v948_v34  ;;  %vm947_vm3 = vcmp.eq.f32.partialorder %v946_v27, 8.507059e+37 }
 0x6e8   :  { %v956_v6 = vadd.f32 %v6336_v58, %v955_v1 }
 0x6ea   :  { %v960_v16 = vsel %vm959_vm14, %v6336_v58, %v956_v6 }
 0x6eb   :  { %v7535_v38 = vsel %vm962_vm15, %v964_v31, %v960_v16  ;;  %v6340_v45 = vpop.eup %6339 }
 0x6ec   :  { %v938_v43 = vmul.f32 %v6340_v45, %v935_v2  ;;  %vm943_vm0 = vweird.f32 %v6340_v45 }
 0x6ed   :  { %vm944_vm2 = vmor %vm942_vm1, %vm943_vm0 }
 0x6ee   :  { %v939_v48 = vsub.f32 1.0, %v938_v43 }
 0x6f0   :  { %v940_v26 = vmul.f32 %v6340_v45, %v939_v48 }
 0x6f2   :  { %v941_v50 = vadd.f32 %v6340_v45, %v940_v26 }
 0x6f4   :  { %v945_v28 = vsel %vm944_vm2, %v6340_v45, %v941_v50 }
 0x6f5   :  { %v950_v36 = vsel %vm947_vm3, %v949_v29, %v945_v28 }
 0x730   :  { %v1076_v20 = vpop.permute.xlu1 %1075 }
 0x731   :  { %v1081_v30 = vadd.f32 %v1076_v20, %v1061_v13 }
 0x732   :  { %v985_v11 = vpop.permute.xlu2 %984 }
 0x733   :  { %6341 = vtanh.f32 %v1081_v30  ;;  %v989_v39 = vmul.f32 %v985_v11, %v7535_v38  ;;  %v1124_v55 = vrot.slane %v1081_v30, 5 }
 0x735   :  { %994 = vrot.lane.b32.xlu2 %v989_v39, %s7060_s6 }
 0x738   :  { %v975_v0 = vpop.permute.xlu1 %974 }
 0x739   :  { %v6342_v44 = vpop.eup %6341  ;;  %v979_v1 = vmul.f32 %v975_v0, %v7535_v38  ;;  %v6834_v0 = vld [vmem:[%s9126_s7] sm:$0xff] }
 0x73a   :  { %1087 = vrot.lane.b32.xlu1 %v6342_v44, %s7060_s6  ;;  %v973_v63 = vpop.permute.xlu2 %972 }
 0x73b   :  { %v978_v6 = vmul.f32 %v973_v63, %v950_v36  ;;  %v6832_v63 = vld [vmem:[%s9126_s7 + $0x10] sm:$0xff] }
 0x749   :  { %v983_v51 = vpop.permute.xlu0 %982 }
 0x74a   :  { %v988_v52 = vmul.f32 %v983_v51, %v950_v36 }
 0x74c   :  { %992 = vrot.lane.b32.xlu0 %v988_v52, %s7060_s6 }
 0x751   :  { %v1078_v23 = vpop.permute.xlu0 %1077 }
 0x752   :  { %v1082_v24 = vadd.f32 %v1078_v23, %v1062_v21  ;;  %v6829_v21 = vld [vmem:[#allocation10 + $0x8] sm:$0xff]  ;;  %v6830_v23 = vld [vmem:[#allocation10] sm:$0xff] }
 0x754   :  { %6343 = vtanh.f32 %v1082_v24  ;;  %v1125_v56 = vrot.slane %v1082_v24, 4 }
 0x756   :  { %v1126_v58 = vsel %vm543_vm8, %v1125_v56, %v1124_v55 }
 0x75a   :  { %v6344_v60 = vpop.eup %6343 }
 0x75b   :  { %1089 = vrot.lane.b32.xlu0 %v6344_v60, %s7060_s6  ;;  %v6831_v60 = vld [vmem:[%s9126_s7 + $0x18] sm:$0xff] }
 0x763   :  { %254 = vperm.xlu0 %6188, %v7368_v8  }
 0x78f   :  { %v995_v47 = vpop.permute.xlu2 %994 }
 0x790   :  { %v999_v2 = vadd.f32 %v995_v47, %v979_v1 }
 0x792   :  { %6345 = vtanh.f32 %v999_v2  ;;  %v1107_v13 = vrot.slane %v999_v2, 1 }
 0x798   :  { %v6346_v4 = vpop.eup %6345 }
 0x799   :  { %1006 = vrot.lane.b32.xlu1 %v6346_v4, %s7060_s6 }
 0x7a1   :  { %242 = vperm.xlu1 %6189, %v7368_v8  }
 0x7a9   :  { %1127 = vrot.lane.b32.xlu1 %v1126_v58, %s7064_s23 }
 0x7ac   :  { %v1088_v30 = vpop.permute.xlu1 %1087 }
 0x7ad   :  { %v1093_v11 = vmul.f32 %v1088_v30, %v7513_v12 }
 0x7af   :  { %v1115_v43 = vrot.slane %v1093_v11, 5 }
 0x7be   :  { %v993_v7 = vpop.permute.xlu0 %992 }
 0x7bf   :  { %v998_v10 = vadd.f32 %v993_v7, %v978_v6 }
 0x7c1   :  { %6347 = vtanh.f32 %v998_v10  ;;  %v1106_v16 = vrot.slane %v998_v10, 2 }
 0x7c3   :  { %v1108_v20 = vsel %vm543_vm8, %v1107_v13, %v1106_v16 }
 0x7c4   :  { %1109 = vrot.lane.b32.xlu1 %v1108_v20, %s7064_s23 }
 0x7c7   :  { %v6348_v31 = vpop.eup %6347 }
 0x7c8   :  { %1004 = vrot.lane.b32.xlu2 %v6348_v31, %s7060_s6 }
 0x7cd   :  { %v1090_v45 = vpop.permute.xlu0 %1089 }
 0x7ce   :  { %v1094_v39 = vmul.f32 %v1090_v45, %v7528_v54 }
 0x7d0   :  { %v1116_v44 = vrot.slane %v1094_v39, 4 }
 0x7d2   :  { %v1117_v48 = vsel %vm543_vm8, %v1116_v44, %v1115_v43 }
 0x7d3   :  { %1118 = vrot.lane.b32.xlu2 %v1117_v48, %s7063_s1 }
 0x7d5   :  { %v7561_v12 = vpop.permute.xlu0 %254 }
 0x7d6   :  { %vm256_vm6 = vcmp.eq.s32.totalorder %v7561_v12, 1 }
 0x80b   :  { %v1007_v26 = vpop.permute.xlu1 %1006 }
 0x80c   :  { %v1011_v50 = vmul.f32 %v1007_v26, %v7535_v38  ;;  %v6827_v38 = vld [vmem:[#allocation10 + $0x18] sm:$0xff] }
 0x80e   :  { %v1098_v28 = vrot.slane %v1011_v50, 1 }
 0x813   :  { %v7574_v24 = vpop.permute.xlu1 %242 }
 0x814   :  { %vm244_vm7 = vcmp.eq.s32.totalorder %v7574_v24, 1 }
 0x81b   :  { %v1128_v13 = vpop.permute.xlu1 %1127 }
 0x81c   :  { %v7607_v16 = vsel %vm256_vm6, %v1128_v13, %v7507_v22 }
 0x81d   :  { %v1334_v20 = vrot.slane %v7607_v16, 4  ;;  %v1335_v31 = vrot.slane %v7607_v16, 5 }
 0x822   :  { %v1005_v34 = vpop.permute.xlu2 %1004 }
 0x823   :  { %v1010_v27 = vmul.f32 %v1005_v34, %v950_v36  ;;  %v6828_v36 = vld [vmem:[#allocation10 + $0x10] sm:$0xff] }
 0x825   :  { %v1097_v29 = vrot.slane %v1010_v27, 2 }
 0x827   :  { %v1099_v51 = vsel %vm543_vm8, %v1098_v28, %v1097_v29 }
 0x828   :  { %1100 = vrot.lane.b32.xlu2 %v1099_v51, %s7063_s1 }
 0x82d   :  { %v7564_v54 = vpop.permute.xlu2 %1118 }
 0x82e   :  { %v7570_v52 = vsel %vm256_vm6, %v7564_v54, %v7472_v46 }
 0x82f   :  { %6055 = vmatmul.msk.f32.vlgmr.msrb.gmra.mxu3 %vm335_vm11, %v7570_v52 }
 0x830   :  { %2315 = vmatpush.msrb.mxu3 %v6827_v38 }
 0x832   :  { %2316 = vmatpush.msrb.mxu3 %v6828_v36 }
 0x834   :  { %2317 = vmatpush.msrb.mxu3 %v6829_v21 }
 0x836   :  { %2318 = vmatpush.msrb.mxu3 %v6830_v23 }
 0x882   :  { %v1101_v55 = vpop.permute.xlu2 %1100 }
 0x883   :  { %v1131_v46 = vsel %vm244_vm7, %v1101_v55, 0.0  ;;  %v7582_v56 = vsel %vm244_vm7, %v1101_v55, %v7488_v49  ;;  %v6833_v49 = vld [vmem:[%s9126_s7 + $0x8] sm:$0xff]  ;;  %v1110_v55 = vpop.permute.xlu1 %1109  ;;  %s7075_s7 = smov 3  }
 0x884   :  { %v1133_v58 = vrot.slane %v1131_v46, 1  ;;  %1135 = vst.msk [vmem:[#allocation2 + $0x2] sm:$0x1] %vm9138_vm12, %v1131_v46  ;;  %6054 = vmatmul.msk.f32.vlgmr.msra.gmra.mxu2 %vm335_vm11, %v7582_v56 }
 0x885   :  { %2285 = vmatpush.msra.mxu2 %v6831_v60  ;;  %v7620_v60 = vsel %vm244_vm7, %v1110_v55, %v7520_v33 }
 0x886   :  { %1136 = vst.msk [vmem:[#allocation2 + $0xa] sm:$0x1] %vm9138_vm12, %v1133_v58 }
 0x887   :  { %2286 = vmatpush.msra.mxu2 %v6832_v63 }
 0x889   :  { %2287 = vmatpush.msra.mxu2 %v6833_v49 }
 0x88b   :  { %2288 = vmatpush.msra.mxu2 %v6834_v0 }
 0x8b2   :  { %v1200_v1 = vpop.f32.mrf.mxu3 }
 0x8b3   :  { %v1204_v47 = vrot.slane %v1200_v1, 4  ;;  %v1205_v2 = vrot.slane %v1200_v1, 5 }
 0x8b5   :  { %v1208_v4 = vadd.f32 %v1204_v47, %v7314_v5  ;;  %v1209_v6 = vadd.f32 %v1205_v2, %v7317_v9  ;;  %v1251_v2 = vrot.slane %v7620_v60, 5 }
 0x8b7   :  { %6349 = vtanh.f32 %v1208_v4  ;;  %v6059_v30 = vmul.f32 -1.442695, %v1209_v6  ;;  %v6058_v43 = vmul.f32 -1.442695, %v1208_v4 }
 0x8b8   :  { %6351 = vtanh.f32 %v1209_v6 }
 0x8b9   :  { %6353 = vpow2.f32 %v6059_v30 }
 0x8bd   :  { %v6350_v7 = vpop.eup %6349 }
 0x8be   :  { %v6352_v10 = vpop.eup %6351  ;;  %1346 = vrot.lane.b32.xlu0 %v6350_v7, %s7060_s6 }
 0x8bf   :  { %1348 = vrot.lane.b32.xlu2 %v6352_v10, %s7060_s6  ;;  %v6354_v11 = vpop.eup %6353 }
 0x8c0   :  { %v1300_v45 = vadd.f32 1.0, %v6354_v11 }
 0x8c2   :  { %6355 = vrcp.f32 %v1300_v45  ;;  %v1327_v23 = vand.u32 2147483648, %v1300_v45  ;;  %vm1321_vm15 = vweird.f32 %v1300_v45  ;;  %v1325_v46 = vand.u32 2147483647, %v1300_v45 }
 0x8c3   :  { %6357 = vpow2.f32 %v6058_v43 }
 0x8c4   :  { %v1328_v63 = vor.u32 1.1754944e-38, %v1327_v23  ;;  %vm1326_vm1 = vcmp.eq.f32.partialorder %v1325_v46, 8.507059e+37  ;;  %v7069_v23 = vmov 4  }
 0x8c5   :  { %6190 = vset.pattern.permute.xlu1 %v7069_v23 }
 0x8c6   :  { %1336 = vrot.lane.b32.xlu0 %v1334_v20, %s7060_s6 }
 0x8c7   :  { %1338 = vrot.lane.b32.xlu2 %v1335_v31, %s7060_s6 }
 0x8c8   :  { %v6356_v39 = vpop.eup %6355 }
 0x8c9   :  { %v1317_v44 = vmul.f32 %v6356_v39, %v1300_v45  ;;  %v6358_v28 = vpop.eup %6357  ;;  %vm1322_vm14 = vweird.f32 %v6356_v39 }
 0x8ca   :  { %v1299_v51 = vadd.f32 1.0, %v6358_v28  ;;  %vm1323_vm0 = vmor %vm1321_vm15, %vm1322_vm14 }
 0x8cb   :  { %v1318_v27 = vsub.f32 1.0, %v1317_v44 }
 0x8cc   :  { %v1312_v33 = vand.u32 2147483648, %v1299_v51  ;;  %vm1306_vm3 = vweird.f32 %v1299_v51  ;;  %v1310_v13 = vand.u32 2147483647, %v1299_v51 }
 0x8cd   :  { %v1319_v29 = vmul.f32 %v6356_v39, %v1318_v27 }
 0x8ce   :  { %v1313_v31 = vor.u32 1.1754944e-38, %v1312_v33  ;;  %vm1311_vm15 = vcmp.eq.f32.partialorder %v1310_v13, 8.507059e+37 }
 0x8cf   :  { %v1320_v36 = vadd.f32 %v6356_v39, %v1319_v29 }
 0x8d1   :  { %v1324_v58 = vsel %vm1323_vm0, %v6356_v39, %v1320_v36  ;;  %v1252_v39 = vrot.slane %v7620_v60, 6 }
 0x8d2   :  { %v7622_v49 = vsel %vm1326_vm1, %v1328_v63, %v1324_v58 }
 0x907   :  { %v1170_v48 = vpop.f32.mrf.mxu2 }
 0x908   :  { %v1174_v22 = vrot.slane %v1170_v48, 5  ;;  %v1175_v26 = vrot.slane %v1170_v48, 6 }
 0x90a   :  { %v1178_v50 = vadd.f32 %v1174_v22, %v7325_v18  ;;  %v1179_v34 = vadd.f32 %v1175_v26, %v7321_v14 }
 0x90c   :  { %6359 = vtanh.f32 %v1178_v50  ;;  %v6056_v43 = vmul.f32 -1.442695, %v1178_v50  ;;  %v6057_v44 = vmul.f32 -1.442695, %v1179_v34 }
 0x90d   :  { %6361 = vtanh.f32 %v1179_v34 }
 0x90e   :  { %6363 = vrcp.f32 %v1299_v51 }
 0x90f   :  { %6365 = vpow2.f32 %v6056_v43 }
 0x910   :  { %6367 = vpow2.f32 %v6057_v44 }
 0x912   :  { %v6360_v38 = vpop.eup %6359 }
 0x913   :  { %v6362_v21 = vpop.eup %6361  ;;  %1263 = vrot.lane.b32.xlu1 %v6360_v38, %s7060_s6 }
 0x914   :  { %1265 = vrot.lane.b32.xlu0 %v6362_v21, %s7060_s6  ;;  %v6364_v1 = vpop.eup %6363 }
 0x915   :  { %v1302_v4 = vmul.f32 %v6364_v1, %v1299_v51  ;;  %vm1307_vm2 = vweird.f32 %v6364_v1  ;;  %v6366_v48 = vpop.eup %6365 }
 0x916   :  { %vm1308_vm14 = vmor %vm1306_vm3, %vm1307_vm2  ;;  %v6368_v22 = vpop.eup %6367  ;;  %v1216_v26 = vadd.f32 1.0, %v6366_v48 }
 0x917   :  { %v1303_v6 = vsub.f32 1.0, %v1302_v4  ;;  %v1217_v27 = vadd.f32 1.0, %v6368_v22 }
 0x918   :  { %6369 = vrcp.f32 %v1216_v26  ;;  %v1229_v63 = vand.u32 2147483648, %v1216_v26  ;;  %vm1223_vm2 = vweird.f32 %v1216_v26 }
 0x919   :  { %v1349_v0 = vpop.permute.xlu2 %1348  ;;  %v1304_v7 = vmul.f32 %v6364_v1, %v1303_v6  ;;  %6371 = vrcp.f32 %v1217_v27  ;;  %vm1238_vm3 = vweird.f32 %v1217_v27 }
 0x91a   :  { %v1353_v47 = vmul.f32 %v1349_v0, %v7622_v49  ;;  %v1244_v0 = vand.u32 2147483648, %v1217_v27  ;;  %v1230_v6 = vor.u32 1.1754944e-38, %v1229_v63 }
 0x91b   :  { %v1305_v10 = vadd.f32 %v6364_v1, %v1304_v7 }
 0x91c   :  { %1253 = vrot.lane.b32.xlu0 %v1251_v2, %s7060_s6  ;;  %1358 = vrot.lane.b32.xlu1 %v1353_v47, %s7060_s6  ;;  %v1242_v47 = vand.u32 2147483647, %v1217_v27  ;;  %v1245_v7 = vor.u32 1.1754944e-38, %v1244_v0 }
 0x91d   :  { %v1309_v20 = vsel %vm1308_vm14, %v6364_v1, %v1305_v10  ;;  %v1227_v1 = vand.u32 2147483647, %v1216_v26 }
 0x91e   :  { %v7628_v11 = vsel %vm1311_vm15, %v1313_v31, %v1309_v20  ;;  %v6370_v28 = vpop.eup %6369  ;;  %vm1243_vm13 = vcmp.eq.f32.partialorder %v1242_v47, 8.507059e+37 }
 0x91f   :  { %v6372_v29 = vpop.eup %6371  ;;  %v1219_v51 = vmul.f32 %v6370_v28, %v1216_v26  ;;  %vm1224_vm0 = vweird.f32 %v6370_v28  ;;  %vm1228_vm10 = vcmp.eq.f32.partialorder %v1227_v1, 8.507059e+37 }
 0x920   :  { %v1234_v38 = vmul.f32 %v6372_v29, %v1217_v27  ;;  %vm1239_vm1 = vweird.f32 %v6372_v29  ;;  %vm1225_vm14 = vmor %vm1223_vm2, %vm1224_vm0 }
 0x921   :  { %v1220_v36 = vsub.f32 1.0, %v1219_v51  ;;  %vm1240_vm15 = vmor %vm1238_vm3, %vm1239_vm1  ;;  %v1339_v10 = vpop.permute.xlu2 %1338 }
 0x922   :  { %v1235_v21 = vsub.f32 1.0, %v1234_v38  ;;  %v1343_v43 = vmul.f32 %v1339_v10, %v7622_v49 }
 0x923   :  { %v1221_v55 = vmul.f32 %v6370_v28, %v1220_v36  ;;  %v7070_v36 = vmov 3  }
 0x924   :  { %v1236_v50 = vmul.f32 %v6372_v29, %v1235_v21  ;;  %6191 = vset.pattern.permute.xlu2 %v7070_v36 }
 0x925   :  { %v1222_v46 = vadd.f32 %v6370_v28, %v1221_v55 }
 0x926   :  { %v1237_v58 = vadd.f32 %v6372_v29, %v1236_v50 }
 0x927   :  { %v1226_v2 = vsel %vm1225_vm14, %v6370_v28, %v1222_v46 }
 0x928   :  { %v1241_v4 = vsel %vm1240_vm15, %v6372_v29, %v1237_v58  ;;  %v1231_v13 = vsel %vm1228_vm10, %v1230_v6, %v1226_v2 }
 0x929   :  { %v1246_v31 = vsel %vm1243_vm13, %v1245_v7, %v1241_v4 }
 0x930   :  { %v1347_v30 = vpop.permute.xlu0 %1346 }
 0x931   :  { %v1352_v45 = vmul.f32 %v1347_v30, %v7628_v11 }
 0x933   :  { %1356 = vrot.lane.b32.xlu2 %v1352_v45, %s7060_s6 }
 0x938   :  { %v1337_v34 = vpop.permute.xlu0 %1336 }
 0x93b   :  { %1255 = vrot.lane.b32.xlu2 %v1252_v39, %s7060_s6  ;;  %v1342_v39 = vmul.f32 %v1337_v34, %v7628_v11 }
 0x985   :  { %v1264_v33 = vpop.permute.xlu1 %1263 }
 0x986   :  { %v1266_v20 = vpop.permute.xlu0 %1265  ;;  %v1269_v30 = vmul.f32 %v1264_v33, %v1231_v13 }
 0x987   :  { %v1270_v45 = vmul.f32 %v1266_v20, %v1246_v31 }
 0x988   :  { %1273 = vrot.lane.b32.xlu1 %v1269_v30, %s7060_s6 }
 0x989   :  { %1275 = vrot.lane.b32.xlu0 %v1270_v45, %s7060_s6 }
 0x98d   :  { %v1357_v44 = vpop.permute.xlu2 %1356 }
 0x98e   :  { %v1359_v48 = vpop.permute.xlu1 %1358  ;;  %v1362_v22 = vadd.f32 %v1357_v44, %v1342_v39  ;;  %v1254_v21 = vpop.permute.xlu0 %1253 }
 0x98f   :  { %v1363_v26 = vadd.f32 %v1359_v48, %v1343_v43  ;;  %v1259_v50 = vmul.f32 %v1254_v21, %v1231_v13 }
 0x990   :  { %6373 = vtanh.f32 %v1362_v22  ;;  %v1405_v27 = vrot.slane %v1362_v22, 4 }
 0x991   :  { %6375 = vtanh.f32 %v1363_v26  ;;  %v1406_v28 = vrot.slane %v1363_v26, 3 }
 0x993   :  { %v1407_v29 = vsel %vm543_vm8, %v1406_v28, %v1405_v27 }
 0x995   :  { %v1256_v55 = vpop.permute.xlu2 %1255 }
 0x996   :  { %v6374_v51 = vpop.eup %6373  ;;  %v1260_v34 = vmul.f32 %v1256_v55, %v1246_v31 }
 0x997   :  { %v6376_v38 = vpop.eup %6375  ;;  %1368 = vrot.lane.b32.xlu2 %v6374_v51, %s7060_s6 }
 0x998   :  { %1370 = vrot.lane.b32.xlu1 %v6376_v38, %s7060_s6 }
 0x9a0   :  { %250 = vperm.xlu1 %6190, %v7368_v8  }
 0x9f1   :  { %v1369_v2 = vpop.permute.xlu2 %1368 }
 0x9f2   :  { %v1374_v4 = vmul.f32 %v1369_v2, %v7628_v11 }
 0x9f4   :  { %v1396_v10 = vrot.slane %v1374_v4, 4 }
 0x9fa   :  { %v1274_v46 = vpop.permute.xlu1 %1273 }
 0x9fb   :  { %v1276_v58 = vpop.permute.xlu0 %1275  ;;  %v1279_v63 = vadd.f32 %v1274_v46, %v1259_v50 }
 0x9fc   :  { %v1280_v0 = vadd.f32 %v1276_v58, %v1260_v34 }
 0x9fd   :  { %6377 = vtanh.f32 %v1279_v63  ;;  %v1387_v45 = vrot.slane %v1279_v63, 3 }
 0x9fe   :  { %6379 = vtanh.f32 %v1280_v0  ;;  %v1388_v30 = vrot.slane %v1280_v0, 2 }
 0xa00   :  { %v1389_v39 = vsel %vm543_vm8, %v1388_v30, %v1387_v45 }
 0xa03   :  { %v6378_v1 = vpop.eup %6377 }
 0xa04   :  { %v6380_v47 = vpop.eup %6379  ;;  %1285 = vrot.lane.b32.xlu0 %v6378_v1, %s7060_s6 }
 0xa05   :  { %1287 = vrot.lane.b32.xlu2 %v6380_v47, %s7060_s6 }
 0xa0a   :  { %v1371_v6 = vpop.permute.xlu1 %1370 }
 0xa0b   :  { %v1375_v7 = vmul.f32 %v1371_v6, %v7622_v49 }
 0xa0d   :  { %v1397_v33 = vrot.slane %v1375_v7, 3  ;;  %246 = vperm.xlu2 %6191, %v7368_v8  }
 0xa0f   :  { %v1398_v20 = vsel %vm543_vm8, %v1397_v33, %v1396_v10 }
 0xa10   :  { %1399 = vrot.lane.b32.xlu0 %v1398_v20, %s7063_s1 }
 0xa12   :  { %v7656_v26 = vpop.permute.xlu1 %250 }
 0xa13   :  { %vm252_vm10 = vcmp.eq.s32.totalorder %v7656_v26, 1 }
 0xa18   :  { %1408 = vrot.lane.b32.xlu0 %v1407_v29, %s7064_s23 }
 0xa20   :  { %1390 = vrot.lane.b32.xlu0 %v1389_v39, %s7064_s23 }
 0xa5f   :  { %v1288_v11 = vpop.permute.xlu2 %1287 }
 0xa60   :  { %v1292_v43 = vmul.f32 %v1288_v11, %v1246_v31 }
 0xa62   :  { %v1379_v48 = vrot.slane %v1292_v43, 2 }
 0xa76   :  { %v1286_v44 = vpop.permute.xlu0 %1285 }
 0xa77   :  { %v1291_v49 = vmul.f32 %v1286_v44, %v1231_v13  ;;  %v7669_v13 = vpop.permute.xlu2 %246 }
 0xa78   :  { %vm9139_vm13 = vcmp.eq.s32.totalorder %v7669_v13, 1 }
 0xa79   :  { %v1378_v22 = vrot.slane %v1291_v49, 3 }
 0xa7b   :  { %v1380_v8 = vsel %vm543_vm8, %v1379_v48, %v1378_v22 }
 0xa7c   :  { %1381 = vrot.lane.b32.xlu1 %v1380_v8, %s7063_s1 }
 0xa82   :  { %v7659_v27 = vpop.permute.xlu0 %1399 }
 0xa83   :  { %v7665_v28 = vsel %vm252_vm10, %v7659_v27, %v7570_v52 }
 0xa84   :  { %6061 = vmatmul.msk.f32.vlgmr.msra.gmra.mxu1 %vm335_vm11, %v7665_v28 }
 0xa8a   :  { %v1409_v58 = vpop.permute.xlu0 %1408 }
 0xa8b   :  { %v7690_v63 = vsel %vm252_vm10, %v1409_v58, %v7607_v16 }
 0xa8c   :  { %v1615_v0 = vrot.slane %v7690_v63, 5  ;;  %v1616_v1 = vrot.slane %v7690_v63, 6 }
 0xaee   :  { %v1382_v31 = vpop.permute.xlu1 %1381 }
 0xaef   :  { %v7675_v29 = vsel %vm9139_vm13, %v1382_v31, %v7582_v56  ;;  %v1412_v51 = vsel %vm9139_vm13, %v1382_v31, 0.0  ;;  %v1391_v31 = vpop.permute.xlu0 %1390 }
 0xaf0   :  { %v1414_v38 = vrot.slane %v1412_v51, 1  ;;  %1416 = vst.msk [vmem:[#allocation2 + $0x3] sm:$0x1] %vm9138_vm12, %v1412_v51  ;;  %6060 = vmatmul.msk.f32.vlgmr.msrb.gmra.mxu0 %vm335_vm11, %v7675_v29  ;;  %v7703_v51 = vsel %vm9139_vm13, %v1391_v31, %v7620_v60 }
 0xaf2   :  { %1417 = vst.msk [vmem:[#allocation2 + $0xb] sm:$0x1] %vm9138_vm12, %v1414_v38 }
 0xb01   :  { %v1481_v52 = vpop.f32.mrf.mxu1 }
 0xb02   :  { %v1485_v21 = vrot.slane %v1481_v52, 5  ;;  %v1486_v55 = vrot.slane %v1481_v52, 6 }
 0xb04   :  { %v1489_v50 = vadd.f32 %v1485_v21, %v7314_v5  ;;  %v1490_v34 = vadd.f32 %v1486_v55, %v7317_v9 }
 0xb06   :  { %6381 = vtanh.f32 %v1489_v50  ;;  %v6064_v47 = vmul.f32 -1.442695, %v1489_v50  ;;  %v6065_v7 = vmul.f32 -1.442695, %v1490_v34 }
 0xb07   :  { %6383 = vtanh.f32 %v1490_v34 }
 0xb08   :  { %6385 = vpow2.f32 %v6064_v47 }
 0xb0c   :  { %v6382_v56 = vpop.eup %6381 }
 0xb0d   :  { %v6384_v46 = vpop.eup %6383  ;;  %1627 = vrot.lane.b32.xlu2 %v6382_v56, %s7060_s6  ;;  %v1533_v56 = vrot.slane %v7703_v51, 5 }
 0xb0e   :  { %1629 = vrot.lane.b32.xlu1 %v6384_v46, %s7060_s6  ;;  %v6386_v2 = vpop.eup %6385 }
 0xb0f   :  { %v1580_v4 = vadd.f32 1.0, %v6386_v2 }
 0xb11   :  { %6387 = vrcp.f32 %v1580_v4  ;;  %v1593_v39 = vand.u32 2147483648, %v1580_v4  ;;  %vm1587_vm1 = vweird.f32 %v1580_v4  ;;  %v1591_v11 = vand.u32 2147483647, %v1580_v4 }
 0xb12   :  { %6389 = vpow2.f32 %v6065_v7 }
 0xb13   :  { %v1594_v44 = vor.u32 1.1754944e-38, %v1593_v39  ;;  %vm1592_vm3 = vcmp.eq.f32.partialorder %v1591_v11, 8.507059e+37 }
 0xb15   :  { %1617 = vrot.lane.b32.xlu2 %v1615_v0, %s7060_s6 }
 0xb16   :  { %1619 = vrot.lane.b32.xlu1 %v1616_v1, %s7060_s6 }
 0xb17   :  { %v6388_v6 = vpop.eup %6387 }
 0xb18   :  { %v1583_v10 = vmul.f32 %v6388_v6, %v1580_v4  ;;  %v6390_v20 = vpop.eup %6389  ;;  %vm1588_vm0 = vweird.f32 %v6388_v6 }
 0xb19   :  { %v1581_v30 = vadd.f32 1.0, %v6390_v20  ;;  %vm1589_vm2 = vmor %vm1587_vm1, %vm1588_vm0 }
 0xb1a   :  { %v1584_v33 = vsub.f32 1.0, %v1583_v10 }
 0xb1b   :  { %6391 = vrcp.f32 %v1581_v30  ;;  %v1608_v47 = vand.u32 2147483648, %v1581_v30  ;;  %vm1602_vm15 = vweird.f32 %v1581_v30  ;;  %v1606_v2 = vand.u32 2147483647, %v1581_v30 }
 0xb1c   :  { %v1585_v16 = vmul.f32 %v6388_v6, %v1584_v33  ;;  %v1532_v33 = vrot.slane %v7703_v51, 4 }
 0xb1d   :  { %vm1607_vm1 = vcmp.eq.f32.partialorder %v1606_v2, 8.507059e+37 }
 0xb1e   :  { %v1586_v45 = vadd.f32 %v6388_v6, %v1585_v16 }
 0xb20   :  { %v1590_v43 = vsel %vm1589_vm2, %v6388_v6, %v1586_v45  ;;  %v1609_v6 = vor.u32 1.1754944e-38, %v1608_v47 }
 0xb21   :  { %v7696_v49 = vsel %vm1592_vm3, %v1594_v44, %v1590_v43  ;;  %v6392_v8 = vpop.eup %6391 }
 0xb22   :  { %v1598_v52 = vmul.f32 %v6392_v8, %v1581_v30  ;;  %vm1603_vm14 = vweird.f32 %v6392_v8 }
 0xb23   :  { %vm1604_vm0 = vmor %vm1602_vm15, %vm1603_vm14 }
 0xb24   :  { %v1599_v46 = vsub.f32 1.0, %v1598_v52 }
 0xb26   :  { %v1600_v58 = vmul.f32 %v6392_v8, %v1599_v46 }
 0xb28   :  { %v1601_v60 = vadd.f32 %v6392_v8, %v1600_v58 }
 0xb2a   :  { %v1605_v4 = vsel %vm1604_vm0, %v6392_v8, %v1601_v60 }
 0xb2b   :  { %v7711_v7 = vsel %vm1607_vm1, %v1609_v6, %v1605_v4 }
 0xb67   :  { %v1628_v48 = vpop.permute.xlu2 %1627 }
 0xb68   :  { %v1633_v22 = vmul.f32 %v1628_v48, %v7696_v49 }
 0xb6a   :  { %1637 = vrot.lane.b32.xlu1 %v1633_v22, %s7060_s6 }
 0xb6d   :  { %v1451_v38 = vpop.f32.mrf.mxu0 }
 0xb6e   :  { %v1455_v21 = vrot.slane %v1451_v38, 4  ;;  %v1456_v55 = vrot.slane %v1451_v38, 5 }
 0xb6f   :  { %v1618_v31 = vpop.permute.xlu2 %1617 }
 0xb70   :  { %v1459_v50 = vadd.f32 %v1455_v21, %v7325_v18  ;;  %v1460_v34 = vadd.f32 %v1456_v55, %v7321_v14  ;;  %v1623_v60 = vmul.f32 %v1618_v31, %v7696_v49 }
 0xb72   :  { %6393 = vtanh.f32 %v1459_v50  ;;  %1536 = vrot.lane.b32.xlu1 %v1533_v56, %s7060_s6  ;;  %v6063_v20 = vmul.f32 -1.442695, %v1460_v34  ;;  %v6062_v11 = vmul.f32 -1.442695, %v1459_v50 }
 0xb73   :  { %6395 = vtanh.f32 %v1460_v34 }
 0xb74   :  { %6397 = vpow2.f32 %v6063_v20 }
 0xb78   :  { %v6394_v0 = vpop.eup %6393 }
 0xb79   :  { %v6396_v1 = vpop.eup %6395  ;;  %1544 = vrot.lane.b32.xlu0 %v6394_v0, %s7060_s6 }
 0xb7a   :  { %1546 = vrot.lane.b32.xlu2 %v6396_v1, %s7060_s6  ;;  %v6398_v45 = vpop.eup %6397 }
 0xb7b   :  { %v1498_v39 = vadd.f32 1.0, %v6398_v45 }
 0xb7d   :  { %6399 = vrcp.f32 %v1498_v39  ;;  %v1525_v52 = vand.u32 2147483648, %v1498_v39  ;;  %vm1519_vm3 = vweird.f32 %v1498_v39  ;;  %v1523_v21 = vand.u32 2147483647, %v1498_v39 }
 0xb7e   :  { %6401 = vpow2.f32 %v6062_v11 }
 0xb7f   :  { %v1526_v34 = vor.u32 1.1754944e-38, %v1525_v52  ;;  %vm1524_vm15 = vcmp.eq.f32.partialorder %v1523_v21, 8.507059e+37 }
 0xb80   :  { %v1630_v10 = vpop.permute.xlu1 %1629 }
 0xb81   :  { %v1634_v16 = vmul.f32 %v1630_v10, %v7711_v7 }
 0xb82   :  { %1534 = vrot.lane.b32.xlu2 %v1532_v33, %s7060_s6 }
 0xb83   :  { %1639 = vrot.lane.b32.xlu0 %v1634_v16, %s7060_s6  ;;  %v6400_v30 = vpop.eup %6399 }
 0xb84   :  { %v1515_v43 = vmul.f32 %v6400_v30, %v1498_v39  ;;  %v6402_v48 = vpop.eup %6401  ;;  %vm1520_vm2 = vweird.f32 %v6400_v30 }
 0xb85   :  { %v1497_v8 = vadd.f32 1.0, %v6402_v48  ;;  %vm1521_vm14 = vmor %vm1519_vm3, %vm1520_vm2 }
 0xb86   :  { %v1516_v44 = vsub.f32 1.0, %v1515_v43 }
 0xb87   :  { %6403 = vrcp.f32 %v1497_v8  ;;  %v1510_v16 = vand.u32 2147483648, %v1497_v8  ;;  %vm1504_vm1 = vweird.f32 %v1497_v8  ;;  %v1508_v20 = vand.u32 2147483647, %v1497_v8 }
 0xb88   :  { %v1517_v22 = vmul.f32 %v6400_v30, %v1516_v44  ;;  %v1620_v56 = vpop.permute.xlu1 %1619 }
 0xb89   :  { %v1511_v39 = vor.u32 1.1754944e-38, %v1510_v16  ;;  %vm1509_vm3 = vcmp.eq.f32.partialorder %v1508_v20, 8.507059e+37  ;;  %v1624_v44 = vmul.f32 %v1620_v56, %v7711_v7 }
 0xb8a   :  { %v1518_v38 = vadd.f32 %v6400_v30, %v1517_v22 }
 0xb8c   :  { %v1522_v55 = vsel %vm1521_vm14, %v6400_v30, %v1518_v38 }
 0xb8d   :  { %v7717_v46 = vsel %vm1524_vm15, %v1526_v34, %v1522_v55  ;;  %v6404_v58 = vpop.eup %6403 }
 0xb8e   :  { %v1500_v1 = vmul.f32 %v6404_v58, %v1497_v8  ;;  %vm1505_vm0 = vweird.f32 %v6404_v58 }
 0xb8f   :  { %vm1506_vm2 = vmor %vm1504_vm1, %vm1505_vm0 }
 0xb90   :  { %v1501_v2 = vsub.f32 1.0, %v1500_v1 }
 0xb92   :  { %v1502_v6 = vmul.f32 %v6404_v58, %v1501_v2 }
 0xb94   :  { %v1503_v10 = vadd.f32 %v6404_v58, %v1502_v6 }
 0xb96   :  { %v1507_v45 = vsel %vm1506_vm2, %v6404_v58, %v1503_v10 }
 0xb97   :  { %v1512_v30 = vsel %vm1509_vm3, %v1511_v39, %v1507_v45 }
 0xbd4   :  { %v1547_v50 = vpop.permute.xlu2 %1546 }
 0xbd5   :  { %v1551_v0 = vmul.f32 %v1547_v50, %v7717_v46 }
 0xbd7   :  { %1556 = vrot.lane.b32.xlu2 %v1551_v0, %s7060_s6 }
 0xbdc   :  { %v1638_v47 = vpop.permute.xlu1 %1637  ;;  %v1535_v21 = vpop.permute.xlu2 %1534 }
 0xbdd   :  { %v1643_v4 = vadd.f32 %v1638_v47, %v1623_v60  ;;  %v1540_v56 = vmul.f32 %v1535_v21, %v1512_v30 }
 0xbdf   :  { %6405 = vtanh.f32 %v1643_v4  ;;  %v1686_v31 = vrot.slane %v1643_v4, 3 }
 0xbe4   :  { %v1537_v55 = vpop.permute.xlu1 %1536 }
 0xbe5   :  { %v6406_v33 = vpop.eup %6405  ;;  %v1541_v34 = vmul.f32 %v1537_v55, %v7717_v46 }
 0xbe6   :  { %1649 = vrot.lane.b32.xlu1 %v6406_v33, %s7060_s6 }
 0xbeb   :  { %v1545_v11 = vpop.permute.xlu0 %1544 }
 0xbec   :  { %v1550_v43 = vmul.f32 %v1545_v11, %v1512_v30 }
 0xbee   :  { %1554 = vrot.lane.b32.xlu0 %v1550_v43, %s7060_s6 }
 0xbf5   :  { %v1640_v48 = vpop.permute.xlu0 %1639 }
 0xbf6   :  { %v1644_v22 = vadd.f32 %v1640_v48, %v1624_v44 }
 0xbf8   :  { %6407 = vtanh.f32 %v1644_v22  ;;  %v1687_v38 = vrot.slane %v1644_v22, 2 }
 0xbfa   :  { %v1688_v8 = vsel %vm543_vm8, %v1687_v38, %v1686_v31 }
 0xbfe   :  { %v6408_v52 = vpop.eup %6407 }
 0xbff   :  { %1651 = vrot.lane.b32.xlu0 %v6408_v52, %s7060_s6 }
 0xc31   :  { %v1557_v50 = vpop.permute.xlu2 %1556 }
 0xc32   :  { %v1561_v58 = vadd.f32 %v1557_v50, %v1541_v34 }
 0xc34   :  { %6409 = vtanh.f32 %v1561_v58  ;;  %v1669_v47 = vrot.slane %v1561_v58, 3 }
 0xc3a   :  { %v6410_v0 = vpop.eup %6409 }
 0xc3b   :  { %1568 = vrot.lane.b32.xlu1 %v6410_v0, %s7060_s6 }
 0xc43   :  { %1689 = vrot.lane.b32.xlu1 %v1688_v8, %s7064_s23 }
 0xc58   :  { %v1650_v10 = vpop.permute.xlu1 %1649 }
 0xc59   :  { %v1655_v33 = vmul.f32 %v1650_v10, %v7696_v49 }
 0xc5b   :  { %v1677_v45 = vrot.slane %v1655_v33, 3 }
 0xc60   :  { %v1555_v1 = vpop.permute.xlu0 %1554 }
 0xc61   :  { %v1560_v60 = vadd.f32 %v1555_v1, %v1540_v56 }
 0xc63   :  { %6411 = vtanh.f32 %v1560_v60  ;;  %v1668_v2 = vrot.slane %v1560_v60, 4 }
 0xc65   :  { %v1670_v4 = vsel %vm543_vm8, %v1669_v47, %v1668_v2 }
 0xc66   :  { %1671 = vrot.lane.b32.xlu1 %v1670_v4, %s7064_s23 }
 0xc69   :  { %v6412_v6 = vpop.eup %6411 }
 0xc6a   :  { %1566 = vrot.lane.b32.xlu2 %v6412_v6, %s7060_s6 }
 0xc71   :  { %v1652_v16 = vpop.permute.xlu0 %1651 }
 0xc72   :  { %v1656_v20 = vmul.f32 %v1652_v16, %v7711_v7 }
 0xc74   :  { %v1678_v39 = vrot.slane %v1656_v20, 2 }
 0xc76   :  { %v1679_v11 = vsel %vm543_vm8, %v1678_v39, %v1677_v45 }
 0xc77   :  { %1680 = vrot.lane.b32.xlu0 %v1679_v11, %s7063_s1 }
 0xcad   :  { %v1569_v43 = vpop.permute.xlu1 %1568 }
 0xcae   :  { %v1573_v44 = vmul.f32 %v1569_v43, %v7717_v46 }
 0xcb0   :  { %v1660_v31 = vrot.slane %v1573_v44, 3 }
 0xcb5   :  { %v1690_v0 = vpop.permute.xlu1 %1689 }
 0xcc4   :  { %v1567_v48 = vpop.permute.xlu2 %1566 }
 0xcc5   :  { %v1572_v22 = vmul.f32 %v1567_v48, %v1512_v30 }
 0xcc7   :  { %v1659_v38 = vrot.slane %v1572_v22, 4 }
 0xcc9   :  { %v1661_v8 = vsel %vm543_vm8, %v1660_v31, %v1659_v38 }
 0xcca   :  { %1662 = vrot.lane.b32.xlu2 %v1661_v8, %s7063_s1 }
 0xcd8   :  { %v1672_v45 = vpop.permute.xlu1 %1671 }
 0xcd9   :  { %v7780_v39 = vsel %vm252_vm10, %v1672_v45, %v7703_v51 }
 0xcda   :  { %v1813_v11 = vrot.slane %v7780_v39, 3 }
 0xce9   :  { %v7740_v49 = vpop.permute.xlu0 %1680 }
 0xcea   :  { %v7746_v7 = vsel %vm9139_vm13, %v7740_v49, %v7665_v28 }
 0xceb   :  { %6067 = vmatmul.msk.f32.vlgmr.msra.gmra.mxu3 %vm335_vm11, %v7746_v7 }
 0xd24   :  { %v7750_v46 = vpop.permute.xlu2 %1662 }
 0xd25   :  { %v7756_v30 = vsel %vm252_vm10, %v7750_v46, %v7675_v29  ;;  %v7767_v29 = vsel %vm9139_vm13, %v1690_v0, %v7690_v63 }
 0xd26   :  { %6066 = vmatmul.msk.f32.vlgmr.msrb.gmra.mxu2 %vm335_vm11, %v7756_v30  ;;  %v1896_v56 = vrot.slane %v7767_v29, 6  ;;  %v1897_v1 = vrot.slane %v7767_v29, 7 }
 0xd6e   :  { %v1762_v52 = vpop.f32.mrf.mxu3 }
 0xd6f   :  { %v1766_v21 = vrot.slane %v1762_v52, 6  ;;  %v1767_v55 = vrot.slane %v1762_v52, 7 }
 0xd71   :  { %v1770_v28 = vadd.f32 %v1766_v21, %v7314_v5  ;;  %v1771_v34 = vadd.f32 %v1767_v55, %v7317_v9 }
 0xd73   :  { %6413 = vtanh.f32 %v1770_v28  ;;  %v6071_v60 = vmul.f32 -1.442695, %v1771_v34  ;;  %v6070_v44 = vmul.f32 -1.442695, %v1770_v28 }
 0xd74   :  { %6415 = vtanh.f32 %v1771_v34 }
 0xd75   :  { %6417 = vpow2.f32 %v6071_v60 }
 0xd79   :  { %v6414_v50 = vpop.eup %6413 }
 0xd7a   :  { %v6416_v58 = vpop.eup %6415  ;;  %1908 = vrot.lane.b32.xlu0 %v6414_v50, %s7060_s6 }
 0xd7b   :  { %1910 = vrot.lane.b32.xlu2 %v6416_v58, %s7060_s6  ;;  %v6418_v63 = vpop.eup %6417 }
 0xd7c   :  { %v1862_v20 = vadd.f32 1.0, %v6418_v63 }
 0xd7e   :  { %v1889_v21 = vand.u32 2147483648, %v1862_v20  ;;  %vm1883_vm15 = vweird.f32 %v1862_v20  ;;  %v1887_v51 = vand.u32 2147483647, %v1862_v20 }
 0xd80   :  { %v1890_v34 = vor.u32 1.1754944e-38, %v1889_v21  ;;  %vm1888_vm1 = vcmp.eq.f32.partialorder %v1887_v51, 8.507059e+37 }
 0xd82   :  { %1898 = vrot.lane.b32.xlu0 %v1896_v56, %s7060_s6 }
 0xd83   :  { %1900 = vrot.lane.b32.xlu2 %v1897_v1, %s7060_s6 }
 0xda9   :  { %v1732_v47 = vpop.f32.mrf.mxu2 }
 0xdaa   :  { %v1736_v2 = vrot.slane %v1732_v47, 3  ;;  %v1737_v4 = vrot.slane %v1732_v47, 4 }
 0xdac   :  { %v1740_v6 = vadd.f32 %v1736_v2, %v7325_v18  ;;  %v1741_v10 = vadd.f32 %v1737_v4, %v7321_v14 }
 0xdae   :  { %6419 = vtanh.f32 %v1740_v6 }
 0xdaf   :  { %6421 = vtanh.f32 %v1741_v10 }
 0xdb0   :  { %6423 = vrcp.f32 %v1862_v20 }
 0xdb1   :  { %6425 = vpow2.f32 %v6070_v44  ;;  %v6069_v44 = vmul.f32 -1.442695, %v1741_v10 }
 0xdb4   :  { %v6420_v33 = vpop.eup %6419 }
 0xdb5   :  { %v6422_v16 = vpop.eup %6421  ;;  %1825 = vrot.lane.b32.xlu1 %v6420_v33, %s7060_s6 }
 0xdb6   :  { %1827 = vrot.lane.b32.xlu0 %v6422_v16, %s7060_s6  ;;  %v6424_v43 = vpop.eup %6423 }
 0xdb7   :  { %v1879_v48 = vmul.f32 %v6424_v43, %v1862_v20  ;;  %v6426_v31 = vpop.eup %6425  ;;  %vm1884_vm14 = vweird.f32 %v6424_v43 }
 0xdb8   :  { %v1861_v8 = vadd.f32 1.0, %v6426_v31  ;;  %vm1885_vm0 = vmor %vm1883_vm15, %vm1884_vm14 }
 0xdb9   :  { %v1880_v22 = vsub.f32 1.0, %v1879_v48 }
 0xdba   :  { %6427 = vrcp.f32 %v1861_v8  ;;  %v1874_v2 = vand.u32 2147483648, %v1861_v8  ;;  %vm1868_vm3 = vweird.f32 %v1861_v8  ;;  %v1872_v4 = vand.u32 2147483647, %v1861_v8 }
 0xdbb   :  { %v1881_v38 = vmul.f32 %v6424_v43, %v1880_v22 }
 0xdbc   :  { %v1875_v33 = vor.u32 1.1754944e-38, %v1874_v2  ;;  %vm1873_vm15 = vcmp.eq.f32.partialorder %v1872_v4, 8.507059e+37 }
 0xdbd   :  { %v1882_v52 = vadd.f32 %v6424_v43, %v1881_v38 }
 0xdbe   :  { %1815 = vrot.lane.b32.xlu0 %v1813_v11, %s7060_s6  ;;  %v1814_v11 = vrot.slane %v7780_v39, 4 }
 0xdbf   :  { %v1886_v55 = vsel %vm1885_vm0, %v6424_v43, %v1882_v52  ;;  %v6068_v43 = vmul.f32 -1.442695, %v1740_v6 }
 0xdc0   :  { %v7784_v50 = vsel %vm1888_vm1, %v1890_v34, %v1886_v55  ;;  %v6428_v28 = vpop.eup %6427 }
 0xdc1   :  { %v1864_v56 = vmul.f32 %v6428_v28, %v1861_v8  ;;  %vm1869_vm2 = vweird.f32 %v6428_v28  ;;  %6429 = vpow2.f32 %v6068_v43 }
 0xdc2   :  { %vm1870_vm14 = vmor %vm1868_vm3, %vm1869_vm2  ;;  %6431 = vpow2.f32 %v6069_v44 }
 0xdc3   :  { %v1865_v1 = vsub.f32 1.0, %v1864_v56 }
 0xdc5   :  { %v1866_v60 = vmul.f32 %v6428_v28, %v1865_v1 }
 0xdc7   :  { %v1867_v47 = vadd.f32 %v6428_v28, %v1866_v60  ;;  %v6430_v48 = vpop.eup %6429 }
 0xdc8   :  { %v6432_v22 = vpop.eup %6431  ;;  %v1778_v31 = vadd.f32 1.0, %v6430_v48 }
 0xdc9   :  { %v1871_v63 = vsel %vm1870_vm14, %v6428_v28, %v1867_v47  ;;  %v1779_v38 = vadd.f32 1.0, %v6432_v22 }
 0xdca   :  { %v7788_v20 = vsel %vm1873_vm15, %v1875_v33, %v1871_v63  ;;  %6433 = vrcp.f32 %v1778_v31  ;;  %v1791_v10 = vand.u32 2147483648, %v1778_v31  ;;  %vm1785_vm2 = vweird.f32 %v1778_v31 }
 0xdcb   :  { %6435 = vrcp.f32 %v1779_v38  ;;  %v1806_v1 = vand.u32 2147483648, %v1779_v38  ;;  %v1789_v60 = vand.u32 2147483647, %v1778_v31  ;;  %vm1800_vm3 = vweird.f32 %v1779_v38 }
 0xdcc   :  { %v1804_v47 = vand.u32 2147483647, %v1779_v38  ;;  %v1792_v63 = vor.u32 1.1754944e-38, %v1791_v10 }
 0xdcd   :  { %v1807_v33 = vor.u32 1.1754944e-38, %v1806_v1  ;;  %vm1790_vm12 = vcmp.eq.f32.partialorder %v1789_v60, 8.507059e+37 }
 0xdce   :  { %vm1805_vm13 = vcmp.eq.f32.partialorder %v1804_v47, 8.507059e+37 }
 0xdd0   :  { %v6434_v8 = vpop.eup %6433 }
 0xdd1   :  { %v6436_v52 = vpop.eup %6435  ;;  %v1781_v21 = vmul.f32 %v6434_v8, %v1778_v31  ;;  %vm1786_vm0 = vweird.f32 %v6434_v8 }
 0xdd2   :  { %v1796_v51 = vmul.f32 %v6436_v52, %v1779_v38  ;;  %vm1801_vm1 = vweird.f32 %v6436_v52  ;;  %vm1787_vm14 = vmor %vm1785_vm2, %vm1786_vm0 }
 0xdd3   :  { %v1782_v55 = vsub.f32 1.0, %v1781_v21  ;;  %vm1802_vm15 = vmor %vm1800_vm3, %vm1801_vm1 }
 0xdd4   :  { %v1797_v34 = vsub.f32 1.0, %v1796_v51 }
 0xdd5   :  { %v1911_v58 = vpop.permute.xlu2 %1910 }
 0xdd6   :  { %v1915_v0 = vmul.f32 %v1911_v58, %v7784_v50  ;;  %v1783_v58 = vmul.f32 %v6434_v8, %v1782_v55  ;;  %v1798_v28 = vmul.f32 %v6436_v52, %v1797_v34 }
 0xdd8   :  { %1920 = vrot.lane.b32.xlu1 %v1915_v0, %s7060_s6  ;;  %v1784_v56 = vadd.f32 %v6434_v8, %v1783_v58  ;;  %v1799_v6 = vadd.f32 %v6436_v52, %v1798_v28 }
 0xdda   :  { %v1788_v2 = vsel %vm1787_vm14, %v6434_v8, %v1784_v56  ;;  %v1803_v4 = vsel %vm1802_vm15, %v6436_v52, %v1799_v6 }
 0xddb   :  { %v1808_v43 = vsel %vm1805_vm13, %v1807_v33, %v1803_v4 }
 0xddd   :  { %v1901_v22 = vpop.permute.xlu2 %1900 }
 0xdde   :  { %v1905_v38 = vmul.f32 %v1901_v22, %v7784_v50 }
 0xdec   :  { %v1909_v16 = vpop.permute.xlu0 %1908 }
 0xded   :  { %v1914_v45 = vmul.f32 %v1909_v16, %v7788_v20 }
 0xdef   :  { %1918 = vrot.lane.b32.xlu2 %v1914_v45, %s7060_s6  ;;  %v1793_v45 = vsel %vm1790_vm12, %v1792_v63, %v1788_v2 }
 0xdf4   :  { %v1899_v0 = vpop.permute.xlu0 %1898 }
 0xdf5   :  { %v1904_v31 = vmul.f32 %v1899_v0, %v7788_v20 }
 0xdf7   :  { %1817 = vrot.lane.b32.xlu2 %v1814_v11, %s7060_s6 }
 0xe27   :  { %v1826_v16 = vpop.permute.xlu1 %1825 }
 0xe28   :  { %v1828_v11 = vpop.permute.xlu0 %1827  ;;  %v1831_v44 = vmul.f32 %v1826_v16, %v1793_v45 }
 0xe29   :  { %v1832_v48 = vmul.f32 %v1828_v11, %v1808_v43 }
 0xe2a   :  { %1835 = vrot.lane.b32.xlu1 %v1831_v44, %s7060_s6 }
 0xe2b   :  { %1837 = vrot.lane.b32.xlu0 %v1832_v48, %s7060_s6 }
 0xe30   :  { %v1816_v6 = vpop.permute.xlu0 %1815 }
 0xe31   :  { %v1821_v10 = vmul.f32 %v1816_v6, %v1793_v45 }
 0xe49   :  { %v1919_v8 = vpop.permute.xlu2 %1918 }
 0xe4a   :  { %v1921_v52 = vpop.permute.xlu1 %1920  ;;  %v1924_v21 = vadd.f32 %v1919_v8, %v1904_v31 }
 0xe4b   :  { %v1925_v51 = vadd.f32 %v1921_v52, %v1905_v38 }
 0xe4c   :  { %6437 = vtanh.f32 %v1924_v21  ;;  %v1967_v55 = vrot.slane %v1924_v21, 2 }
 0xe4d   :  { %6439 = vtanh.f32 %v1925_v51  ;;  %v1968_v34 = vrot.slane %v1925_v51, 1 }
 0xe4f   :  { %v1969_v58 = vsel %vm543_vm8, %v1968_v34, %v1967_v55 }
 0xe51   :  { %v1818_v0 = vpop.permute.xlu2 %1817 }
 0xe52   :  { %v6438_v28 = vpop.eup %6437  ;;  %v1822_v1 = vmul.f32 %v1818_v0, %v1808_v43 }
 0xe53   :  { %v6440_v56 = vpop.eup %6439  ;;  %1930 = vrot.lane.b32.xlu2 %v6438_v28, %s7060_s6 }
 0xe54   :  { %1932 = vrot.lane.b32.xlu1 %v6440_v56, %s7060_s6 }
 0xe9c   :  { %v1836_v60 = vpop.permute.xlu1 %1835 }
 0xe9d   :  { %v1838_v47 = vpop.permute.xlu0 %1837  ;;  %v1841_v2 = vadd.f32 %v1836_v60, %v1821_v10 }
 0xe9e   :  { %v1842_v4 = vadd.f32 %v1838_v47, %v1822_v1 }
 0xe9f   :  { %6441 = vtanh.f32 %v1841_v2  ;;  %v1949_v11 = vrot.slane %v1841_v2, 5 }
 0xea0   :  { %6443 = vtanh.f32 %v1842_v4  ;;  %v1950_v16 = vrot.slane %v1842_v4, 4 }
 0xea2   :  { %v1951_v44 = vsel %vm543_vm8, %v1950_v16, %v1949_v11 }
 0xea5   :  { %v6442_v63 = vpop.eup %6441 }
 0xea6   :  { %v6444_v33 = vpop.eup %6443  ;;  %1847 = vrot.lane.b32.xlu0 %v6442_v63, %s7060_s6 }
 0xea7   :  { %1849 = vrot.lane.b32.xlu2 %v6444_v33, %s7060_s6 }
 0xead   :  { %v1931_v48 = vpop.permute.xlu2 %1930 }
 0xeae   :  { %v1936_v22 = vmul.f32 %v1931_v48, %v7788_v20 }
 0xeaf   :  { %1970 = vrot.lane.b32.xlu2 %v1969_v58, %s7064_s23 }
 0xeb0   :  { %v1958_v8 = vrot.slane %v1936_v22, 2 }
 0xeb7   :  { %1952 = vrot.lane.b32.xlu2 %v1951_v44, %s7064_s23 }
 0xec6   :  { %v1933_v31 = vpop.permute.xlu1 %1932 }
 0xec7   :  { %v1937_v38 = vmul.f32 %v1933_v31, %v7784_v50 }
 0xec9   :  { %v1959_v52 = vrot.slane %v1937_v38, 1 }
 0xecb   :  { %v1960_v21 = vsel %vm543_vm8, %v1959_v52, %v1958_v8 }
 0xecc   :  { %1961 = vrot.lane.b32.xlu1 %v1960_v21, %s7063_s1 }
 0xf01   :  { %v1850_v51 = vpop.permute.xlu2 %1849 }
 0xf02   :  { %v1854_v55 = vmul.f32 %v1850_v51, %v1808_v43 }
 0xf04   :  { %v1941_v28 = vrot.slane %v1854_v55, 4 }
 0xf09   :  { %v1971_v2 = vpop.permute.xlu2 %1970 }
 0xf11   :  { %v1953_v63 = vpop.permute.xlu2 %1952 }
 0xf12   :  { %v7848_v33 = vsel %vm256_vm6, %v1953_v63, %v7780_v39 }
 0xf13   :  { %v2093_v16 = vrot.slane %v7848_v33, 2 }
 0xf18   :  { %v1848_v34 = vpop.permute.xlu0 %1847 }
 0xf19   :  { %v1853_v58 = vmul.f32 %v1848_v34, %v1793_v45 }
 0xf1b   :  { %v1940_v56 = vrot.slane %v1853_v58, 5 }
 0xf1d   :  { %v1942_v6 = vsel %vm543_vm8, %v1941_v28, %v1940_v56 }
 0xf1e   :  { %1943 = vrot.lane.b32.xlu0 %v1942_v6, %s7063_s1 }
 0xf3e   :  { %v7812_v20 = vpop.permute.xlu1 %1961 }
 0xf3f   :  { %v7818_v50 = vsel %vm244_vm7, %v7812_v20, %v7746_v7 }
 0xf40   :  { %6073 = vmatmul.msk.f32.vlgmr.msrb.gmra.mxu1 %vm335_vm11, %v7818_v50 }
 0xf90   :  { %v7822_v43 = vpop.permute.xlu0 %1943 }
 0xf91   :  { %v7828_v45 = vsel %vm256_vm6, %v7822_v43, %v7756_v30  ;;  %v7839_v30 = vsel %vm244_vm7, %v1971_v2, %v7767_v29 }
 0xf92   :  { %6072 = vmatmul.msk.f32.vlgmr.msra.gmra.mxu0 %vm335_vm11, %v7828_v45  ;;  %v2176_v4 = vrot.slane %v7839_v30, 7 }
 0xfbd   :  { %v2043_v0 = vpop.f32.mrf.mxu1 }
 0xfbe   :  { %v2047_v10 = vrot.slane %v2043_v0, 7  ;;  %v2051_v1 = vadd.f32 %v2043_v0, %v7317_v9 }
 0xfc0   :  { %v2050_v7 = vadd.f32 %v2047_v10, %v7314_v5  ;;  %6445 = vtanh.f32 %v2051_v1  ;;  %v6077_v11 = vmul.f32 -1.442695, %v2051_v1 }
 0xfc2   :  { %6447 = vtanh.f32 %v2050_v7  ;;  %v6076_v29 = vmul.f32 -1.442695, %v2050_v7 }
 0xfc3   :  { %6449 = vpow2.f32 %v6077_v11 }
 0xfc4   :  { %6451 = vpow2.f32 %v6076_v29 }
 0xfc6   :  { %v6446_v60 = vpop.eup %6445 }
 0xfc7   :  { %2189 = vrot.lane.b32.xlu0 %v6446_v60, %s7060_s6 }
 0xfc8   :  { %v6448_v47 = vpop.eup %6447 }
 0xfc9   :  { %2187 = vrot.lane.b32.xlu1 %v6448_v47, %s7060_s6  ;;  %v6450_v8 = vpop.eup %6449 }
 0xfca   :  { %v6452_v39 = vpop.eup %6451  ;;  %v2142_v52 = vadd.f32 1.0, %v6450_v8 }
 0xfcb   :  { %v2141_v55 = vadd.f32 1.0, %v6452_v39 }
 0xfcc   :  { %v2169_v60 = vand.u32 2147483648, %v2142_v52  ;;  %vm2163_vm13 = vweird.f32 %v2142_v52  ;;  %v2167_v47 = vand.u32 2147483647, %v2142_v52 }
 0xfcd   :  { %v2154_v63 = vand.u32 2147483648, %v2141_v55  ;;  %vm2148_vm2 = vweird.f32 %v2141_v55  ;;  %v2152_v11 = vand.u32 2147483647, %v2141_v55 }
 0xfce   :  { %vm2168_vm3 = vcmp.eq.f32.partialorder %v2167_v47, 8.507059e+37 }
 0xfcf   :  { %v2155_v8 = vor.u32 1.1754944e-38, %v2154_v63  ;;  %vm2153_vm15 = vcmp.eq.f32.partialorder %v2152_v11, 8.507059e+37 }
 0xfd1   :  { %2177 = vrot.lane.b32.xlu1 %v2176_v4, %s7060_s6 }
 0xfd9   :  { %2179 = vrot.lane.b32.xlu1 %v7839_v30, %s7060_s6 }
 0xfe1   :  { %2095 = vrot.lane.b32.xlu1 %v2093_v16, %s7060_s6  ;;  %v2170_v16 = vor.u32 1.1754944e-38, %v2169_v60 }
0x100f   :  { %v2013_v44 = vpop.f32.mrf.mxu0 }
0x1010   :  { %v2017_v48 = vrot.slane %v2013_v44, 2  ;;  %v2018_v22 = vrot.slane %v2013_v44, 3 }
0x1012   :  { %v2021_v31 = vadd.f32 %v2017_v48, %v7325_v18  ;;  %v2022_v38 = vadd.f32 %v2018_v22, %v7321_v14 }
0x1014   :  { %6453 = vtanh.f32 %v2021_v31 }
0x1015   :  { %6455 = vtanh.f32 %v2022_v38 }
0x1016   :  { %6457 = vrcp.f32 %v2142_v52 }
0x1017   :  { %6459 = vrcp.f32 %v2141_v55 }
0x101a   :  { %v6454_v21 = vpop.eup %6453 }
0x101b   :  { %v6456_v51 = vpop.eup %6455  ;;  %2105 = vrot.lane.b32.xlu0 %v6454_v21, %s7060_s6 }
0x101c   :  { %2107 = vrot.lane.b32.xlu2 %v6456_v51, %s7060_s6  ;;  %v6458_v34 = vpop.eup %6457  ;;  %v2094_v51 = vrot.slane %v7848_v33, 3 }
0x101d   :  { %v6460_v58 = vpop.eup %6459  ;;  %v2159_v28 = vmul.f32 %v6458_v34, %v2142_v52  ;;  %vm2164_vm12 = vweird.f32 %v6458_v34 }
0x101e   :  { %v2144_v56 = vmul.f32 %v6460_v58, %v2141_v55  ;;  %vm2165_vm0 = vmor %vm2163_vm13, %vm2164_vm12  ;;  %vm2149_vm1 = vweird.f32 %v6460_v58  ;;  %v6075_v55 = vmul.f32 -1.442695, %v2022_v38 }
0x101f   :  { %v2160_v6 = vsub.f32 1.0, %v2159_v28  ;;  %vm2150_vm14 = vmor %vm2148_vm2, %vm2149_vm1 }
0x1020   :  { %v2145_v0 = vsub.f32 1.0, %v2144_v56  ;;  %6461 = vpow2.f32 %v6075_v55  ;;  %v6074_v56 = vmul.f32 -1.442695, %v2021_v31 }
0x1021   :  { %v2161_v10 = vmul.f32 %v6458_v34, %v2160_v6 }
0x1022   :  { %v2146_v1 = vmul.f32 %v6460_v58, %v2145_v0 }
0x1023   :  { %v2162_v7 = vadd.f32 %v6458_v34, %v2161_v10 }
0x1024   :  { %v2147_v2 = vadd.f32 %v6460_v58, %v2146_v1 }
0x1025   :  { %v2166_v4 = vsel %vm2165_vm0, %v6458_v34, %v2162_v7 }
0x1026   :  { %v7856_v29 = vsel %vm2168_vm3, %v2170_v16, %v2166_v4  ;;  %v2151_v48 = vsel %vm2150_vm14, %v6460_v58, %v2147_v2  ;;  %v6462_v34 = vpop.eup %6461 }
0x1027   :  { %v7859_v52 = vsel %vm2153_vm15, %v2155_v8, %v2151_v48  ;;  %v2059_v58 = vadd.f32 1.0, %v6462_v34 }
0x1029   :  { %6463 = vrcp.f32 %v2059_v58  ;;  %v2086_v47 = vand.u32 2147483648, %v2059_v58  ;;  %vm2080_vm13 = vweird.f32 %v2059_v58  ;;  %v2084_v2 = vand.u32 2147483647, %v2059_v58 }
0x102a   :  { %6465 = vpow2.f32 %v6074_v56 }
0x102b   :  { %v2087_v4 = vor.u32 1.1754944e-38, %v2086_v47  ;;  %vm2085_vm1 = vcmp.eq.f32.partialorder %v2084_v2, 8.507059e+37 }
0x102f   :  { %v6464_v28 = vpop.eup %6463 }
0x1030   :  { %v2076_v6 = vmul.f32 %v6464_v28, %v2059_v58  ;;  %v6466_v10 = vpop.eup %6465  ;;  %vm2081_vm12 = vweird.f32 %v6464_v28 }
0x1031   :  { %v2058_v7 = vadd.f32 1.0, %v6466_v10  ;;  %vm2082_vm0 = vmor %vm2080_vm13, %vm2081_vm12 }
0x1032   :  { %v2077_v0 = vsub.f32 1.0, %v2076_v6 }
0x1033   :  { %6467 = vrcp.f32 %v2058_v7  ;;  %vm2065_vm3 = vweird.f32 %v2058_v7 }
0x1034   :  { %v2078_v1 = vmul.f32 %v6464_v28, %v2077_v0 }
0x1036   :  { %v2079_v60 = vadd.f32 %v6464_v28, %v2078_v1 }
0x1038   :  { %v2083_v38 = vsel %vm2082_vm0, %v6464_v28, %v2079_v60 }
0x1039   :  { %v2190_v44 = vpop.permute.xlu0 %2189  ;;  %v7866_v63 = vsel %vm2085_vm1, %v2087_v4, %v2083_v38  ;;  %v6468_v31 = vpop.eup %6467 }
0x103a   :  { %v2194_v22 = vmul.f32 %v2190_v44, %v7856_v29  ;;  %v2061_v44 = vmul.f32 %v6468_v31, %v2058_v7  ;;  %vm2066_vm2 = vweird.f32 %v6468_v31 }
0x103b   :  { %v2188_v39 = vpop.permute.xlu1 %2187  ;;  %vm2067_vm14 = vmor %vm2065_vm3, %vm2066_vm2 }
0x103c   :  { %2199 = vrot.lane.b32.xlu2 %v2194_v22, %s7060_s6  ;;  %v2193_v21 = vmul.f32 %v2188_v39, %v7859_v52  ;;  %v2062_v48 = vsub.f32 1.0, %v2061_v44  ;;  %v2071_v39 = vand.u32 2147483648, %v2058_v7 }
0x103e   :  { %2197 = vrot.lane.b32.xlu0 %v2193_v21, %s7060_s6  ;;  %v2063_v22 = vmul.f32 %v6468_v31, %v2062_v48  ;;  %v2072_v34 = vor.u32 1.1754944e-38, %v2071_v39 }
0x1040   :  { %v2064_v8 = vadd.f32 %v6468_v31, %v2063_v22 }
0x1042   :  { %v2068_v55 = vsel %vm2067_vm14, %v6468_v31, %v2064_v8 }
0x1043   :  { %v2178_v21 = vpop.permute.xlu1 %2177 }
0x1046   :  { %2097 = vrot.lane.b32.xlu0 %v2094_v51, %s7060_s6  ;;  %v2069_v51 = vand.u32 2147483647, %v2058_v7  ;;  %v2183_v7 = vmul.f32 %v2178_v21, %v7859_v52 }
0x1048   :  { %vm2070_vm15 = vcmp.eq.f32.partialorder %v2069_v51, 8.507059e+37 }
0x1049   :  { %v2073_v58 = vsel %vm2070_vm15, %v2072_v34, %v2068_v55 }
0x104b   :  { %v2180_v6 = vpop.permute.xlu1 %2179 }
0x104c   :  { %v2184_v0 = vmul.f32 %v2180_v6, %v7856_v29 }
0x1053   :  { %v2096_v31 = vpop.permute.xlu1 %2095 }
0x1054   :  { %v2101_v44 = vmul.f32 %v2096_v31, %v2073_v58 }
0x1076   :  { %v2108_v16 = vpop.permute.xlu2 %2107 }
0x1077   :  { %v2112_v11 = vmul.f32 %v2108_v16, %v7866_v63 }
0x1079   :  { %2117 = vrot.lane.b32.xlu1 %v2112_v11, %s7060_s6 }
0x108d   :  { %v2106_v28 = vpop.permute.xlu0 %2105 }
0x108e   :  { %v2111_v56 = vmul.f32 %v2106_v28, %v2073_v58 }
0x1090   :  { %2115 = vrot.lane.b32.xlu2 %v2111_v56, %s7060_s6 }
0x1096   :  { %v2200_v10 = vpop.permute.xlu2 %2199 }
0x1097   :  { %v2204_v1 = vadd.f32 %v2200_v10, %v2184_v0 }
0x1099   :  { %6469 = vtanh.f32 %v2204_v1 }
0x109f   :  { %v6470_v60 = vpop.eup %6469 }
0x10a0   :  { %2211 = vrot.lane.b32.xlu2 %v6470_v60, %s7060_s6 }
0x10b0   :  { %v2198_v47 = vpop.permute.xlu0 %2197 }
0x10b1   :  { %v2203_v2 = vadd.f32 %v2198_v47, %v2183_v7 }
0x10b3   :  { %6471 = vtanh.f32 %v2203_v2  ;;  %v2245_v38 = vrot.slane %v2203_v2, 1 }
0x10b5   :  { %v2246_v4 = vsel %vm543_vm8, %v2204_v1, %v2245_v38 }
0x10b8   :  { %v2098_v11 = vpop.permute.xlu0 %2097 }
0x10b9   :  { %v6472_v16 = vpop.eup %6471  ;;  %v2102_v48 = vmul.f32 %v2098_v11, %v7866_v63 }
0x10ba   :  { %2209 = vrot.lane.b32.xlu0 %v6472_v16, %s7060_s6 }
0x10ea   :  { %v2116_v22 = vpop.permute.xlu2 %2115 }
0x10eb   :  { %v2118_v8 = vpop.permute.xlu1 %2117  ;;  %v2121_v39 = vadd.f32 %v2116_v22, %v2101_v44 }
0x10ec   :  { %v2122_v51 = vadd.f32 %v2118_v8, %v2102_v48 }
0x10ed   :  { %6473 = vtanh.f32 %v2121_v39  ;;  %v2228_v28 = vrot.slane %v2121_v39, 6 }
0x10ee   :  { %6475 = vtanh.f32 %v2122_v51  ;;  %v2229_v34 = vrot.slane %v2122_v51, 5 }
0x10f0   :  { %v2230_v56 = vsel %vm543_vm8, %v2229_v34, %v2228_v28 }
0x10f3   :  { %v6474_v21 = vpop.eup %6473 }
0x10f4   :  { %v6476_v55 = vpop.eup %6475  ;;  %2127 = vrot.lane.b32.xlu1 %v6474_v21, %s7060_s6 }
0x10f5   :  { %2129 = vrot.lane.b32.xlu0 %v6476_v55, %s7060_s6 }
0x10fa   :  { %v2212_v6 = vpop.permute.xlu2 %2211 }
0x10fb   :  { %v2216_v1 = vmul.f32 %v2212_v6, %v7856_v29 }
0x10fd   :  { %2247 = vrot.lane.b32.xlu0 %v2246_v4, %s7064_s23 }
0x1105   :  { %2231 = vrot.lane.b32.xlu0 %v2230_v56, %s7064_s23 }
0x112c   :  { %v2210_v0 = vpop.permute.xlu0 %2209 }
0x112d   :  { %v2215_v10 = vmul.f32 %v2210_v0, %v7859_v52 }
0x112f   :  { %v2237_v60 = vrot.slane %v2215_v10, 1 }
0x1131   :  { %v2238_v7 = vsel %vm543_vm8, %v2216_v1, %v2237_v60 }
0x1132   :  { %2239 = vrot.lane.b32.xlu2 %v2238_v7, %s7063_s1 }
0x1166   :  { %v2128_v47 = vpop.permute.xlu1 %2127 }
0x1167   :  { %v2130_v2 = vpop.permute.xlu0 %2129  ;;  %v2133_v38 = vmul.f32 %v2128_v47, %v2073_v58 }
0x1168   :  { %v2134_v4 = vmul.f32 %v2130_v2, %v7866_v63 }
0x1169   :  { %v2219_v16 = vrot.slane %v2133_v38, 6 }
0x116a   :  { %v2220_v31 = vrot.slane %v2134_v4, 5 }
0x116c   :  { %v2221_v11 = vsel %vm543_vm8, %v2220_v31, %v2219_v16 }
0x116d   :  { %2222 = vrot.lane.b32.xlu1 %v2221_v11, %s7063_s1 }
0x116f   :  { %v2248_v51 = vpop.permute.xlu0 %2247 }
0x1177   :  { %v2232_v55 = vpop.permute.xlu0 %2231 }
0x118c   :  { %v7889_v44 = vpop.permute.xlu2 %2239 }
0x118d   :  { %v2242_v29 = vsel %vm240_vm5, %v7889_v44, %v7818_v50 }
0x118e   :  { %6079 = vmatmul.msk.f32.vlgmr.msrb.gmra.mxu3 %vm335_vm11, %v2242_v29 }
0x11df   :  { %v7896_v52 = vpop.permute.xlu1 %2222 }
0x11e0   :  { %v2225_v63 = vsel %vm260_vm4, %v7896_v52, %v7828_v45  ;;  %v2250_v45 = vsel %vm240_vm5, %v2248_v51, %v7839_v30 }
0x11e1   :  { %6078 = vmatmul.msk.f32.vlgmr.msra.gmra.mxu2 %vm335_vm11, %v2225_v63  ;;  %v2453_v21 = vrot.slane %v2250_v45, 1 }
0x1211   :  { %v2320_v58 = vpop.f32.mrf.mxu3 }
0x1212   :  { %v2324_v48 = vrot.slane %v2320_v58, 1  ;;  %v2327_v22 = vadd.f32 %v2320_v58, %v7314_v5  ;;  %v2234_v5 = vsel %vm260_vm4, %v2232_v55, %v7848_v33 }
0x1213   :  { %v2371_v51 = vrot.slane %v2234_v5, 2 }
0x1214   :  { %v2328_v8 = vadd.f32 %v2324_v48, %v7317_v9  ;;  %6477 = vtanh.f32 %v2327_v22  ;;  %v2370_v9 = vrot.slane %v2234_v5, 1  ;;  %v6082_v6 = vmul.f32 -1.442695, %v2327_v22 }
0x1216   :  { %6479 = vtanh.f32 %v2328_v8  ;;  %v6083_v34 = vmul.f32 -1.442695, %v2328_v8 }
0x1218   :  { %6481 = vpow2.f32 %v6083_v34 }
0x121a   :  { %v6478_v50 = vpop.eup %6477 }
0x121b   :  { %2464 = vrot.lane.b32.xlu1 %v6478_v50, %s7060_s6 }
0x121c   :  { %v6480_v39 = vpop.eup %6479 }
0x121d   :  { %2466 = vrot.lane.b32.xlu2 %v6480_v39, %s7060_s6 }
0x121e   :  { %v6482_v28 = vpop.eup %6481 }
0x121f   :  { %v2419_v56 = vadd.f32 1.0, %v6482_v28 }
0x1221   :  { %6483 = vrcp.f32 %v2419_v56  ;;  %v2446_v29 = vand.u32 2147483648, %v2419_v56  ;;  %vm2440_vm13 = vweird.f32 %v2419_v56 }
0x1222   :  { %6485 = vpow2.f32 %v6082_v6 }
0x1223   :  { %v2447_v63 = vor.u32 1.1754944e-38, %v2446_v29 }
0x1225   :  { %2456 = vrot.lane.b32.xlu2 %v2453_v21, %s7060_s6 }
0x1227   :  { %v6484_v30 = vpop.eup %6483 }
0x1228   :  { %v2436_v60 = vmul.f32 %v6484_v30, %v2419_v56  ;;  %v6486_v2 = vpop.eup %6485  ;;  %vm2441_vm12 = vweird.f32 %v6484_v30 }
0x1229   :  { %v2418_v38 = vadd.f32 1.0, %v6486_v2  ;;  %vm2442_vm0 = vmor %vm2440_vm13, %vm2441_vm12 }
0x122a   :  { %v2437_v33 = vsub.f32 1.0, %v2436_v60 }
0x122b   :  { %v2431_v55 = vand.u32 2147483648, %v2418_v38  ;;  %vm2425_vm3 = vweird.f32 %v2418_v38 }
0x122c   :  { %v2438_v4 = vmul.f32 %v6484_v30, %v2437_v33 }
0x122d   :  { %2454 = vrot.lane.b32.xlu2 %v2250_v45, %s7060_s6  ;;  %v2432_v28 = vor.u32 1.1754944e-38, %v2431_v55 }
0x122e   :  { %v2439_v11 = vadd.f32 %v6484_v30, %v2438_v4 }
0x1235   :  { %2372 = vrot.lane.b32.xlu2 %v2370_v9, %s7060_s6  ;;  %v2429_v9 = vand.u32 2147483647, %v2418_v38 }
0x1237   :  { %vm2430_vm15 = vcmp.eq.f32.partialorder %v2429_v9, 8.507059e+37 }
0x1264   :  { %v2290_v0 = vpop.f32.mrf.mxu2 }
0x1265   :  { %v2294_v10 = vrot.slane %v2290_v0, 1  ;;  %v2295_v1 = vrot.slane %v2290_v0, 2 }
0x1267   :  { %v2298_v7 = vadd.f32 %v2294_v10, %v7325_v18  ;;  %v2299_v47 = vadd.f32 %v2295_v1, %v7321_v14  ;;  %v2444_v18 = vand.u32 2147483647, %v2419_v56  ;;  %v2443_v14 = vsel %vm2442_vm0, %v6484_v30, %v2439_v11 }
0x1269   :  { %6487 = vtanh.f32 %v2298_v7  ;;  %vm2445_vm1 = vcmp.eq.f32.partialorder %v2444_v18, 8.507059e+37  ;;  %v6080_v5 = vmul.f32 -1.442695, %v2298_v7  ;;  %v6081_v0 = vmul.f32 -1.442695, %v2299_v47 }
0x126a   :  { %6489 = vtanh.f32 %v2299_v47  ;;  %v7920_v22 = vsel %vm2445_vm1, %v2447_v63, %v2443_v14 }
0x126b   :  { %6491 = vrcp.f32 %v2418_v38 }
0x126c   :  { %6493 = vpow2.f32 %v6080_v5 }
0x126d   :  { %6495 = vpow2.f32 %v6081_v0 }
0x126f   :  { %v6488_v16 = vpop.eup %6487 }
0x1270   :  { %v6490_v31 = vpop.eup %6489  ;;  %2382 = vrot.lane.b32.xlu1 %v6488_v16, %s7060_s6 }
0x1271   :  { %2384 = vrot.lane.b32.xlu0 %v6490_v31, %s7060_s6  ;;  %v6492_v58 = vpop.eup %6491 }
0x1272   :  { %v2421_v50 = vmul.f32 %v6492_v58, %v2418_v38  ;;  %vm2426_vm2 = vweird.f32 %v6492_v58  ;;  %v6494_v10 = vpop.eup %6493 }
0x1273   :  { %vm2427_vm14 = vmor %vm2425_vm3, %vm2426_vm2  ;;  %v6496_v1 = vpop.eup %6495  ;;  %v2335_v60 = vadd.f32 1.0, %v6494_v10 }
0x1274   :  { %v2422_v39 = vsub.f32 1.0, %v2421_v50  ;;  %v2336_v33 = vadd.f32 1.0, %v6496_v1 }
0x1275   :  { %6497 = vrcp.f32 %v2335_v60  ;;  %v2348_v7 = vand.u32 2147483648, %v2335_v60  ;;  %vm2342_vm0 = vweird.f32 %v2335_v60  ;;  %v2346_v63 = vand.u32 2147483647, %v2335_v60 }
0x1276   :  { %v2423_v45 = vmul.f32 %v6492_v58, %v2422_v39  ;;  %6499 = vrcp.f32 %v2336_v33  ;;  %vm2357_vm2 = vweird.f32 %v2336_v33 }
0x1277   :  { %v2467_v48 = vpop.permute.xlu2 %2466  ;;  %v2349_v50 = vor.u32 1.1754944e-38, %v2348_v7 }
0x1278   :  { %v2471_v8 = vmul.f32 %v2467_v48, %v7920_v22  ;;  %v2424_v21 = vadd.f32 %v6492_v58, %v2423_v45  ;;  %v2361_v48 = vand.u32 2147483647, %v2336_v33 }
0x127a   :  { %2476 = vrot.lane.b32.xlu1 %v2471_v8, %s7060_s6  ;;  %v2428_v34 = vsel %vm2427_vm14, %v6492_v58, %v2424_v21  ;;  %v2363_v58 = vand.u32 2147483648, %v2336_v33  ;;  %vm2347_vm14 = vcmp.eq.f32.partialorder %v2346_v63, 8.507059e+37 }
0x127b   :  { %v7925_v56 = vsel %vm2430_vm15, %v2432_v28, %v2428_v34  ;;  %v6498_v2 = vpop.eup %6497  ;;  %vm2362_vm15 = vcmp.eq.f32.partialorder %v2361_v48, 8.507059e+37 }
0x127c   :  { %v6500_v38 = vpop.eup %6499  ;;  %v2338_v4 = vmul.f32 %v6498_v2, %v2335_v60  ;;  %vm2343_vm12 = vweird.f32 %v6498_v2 }
0x127d   :  { %v2353_v16 = vmul.f32 %v6500_v38, %v2336_v33  ;;  %vm2358_vm13 = vweird.f32 %v6500_v38  ;;  %vm2344_vm1 = vmor %vm2342_vm0, %vm2343_vm12  ;;  %vm9146_vm12 = vcmp.eq.s32.totalorder %v7669_v13, 1  ;;  %vm9147_vm0 = vcmask 253952  }
0x127e   :  { %v2339_v31 = vsub.f32 1.0, %v2338_v4  ;;  %vm2359_vm3 = vmor %vm2357_vm2, %vm2358_vm13  ;;  %vm9141_vm13 = vcmask 516352  }
0x127f   :  { %v2354_v11 = vsub.f32 1.0, %v2353_v16  ;;  %vm9149_vm2 = vmmov %vm9147_vm0 }
0x1280   :  { %v2340_v29 = vmul.f32 %v6498_v2, %v2339_v31 }
0x1281   :  { %v2355_v18 = vmul.f32 %v6500_v38, %v2354_v11 }
0x1282   :  { %2374 = vrot.lane.b32.xlu1 %v2371_v51, %s7060_s6  ;;  %v2341_v14 = vadd.f32 %v6498_v2, %v2340_v29  ;;  %v2364_v51 = vor.u32 1.1754944e-38, %v2363_v58 }
0x1283   :  { %v2356_v47 = vadd.f32 %v6500_v38, %v2355_v18 }
0x1284   :  { %v2345_v8 = vsel %vm2344_vm1, %v6498_v2, %v2341_v14  ;;  %v7946_v14 = vsel %vm260_vm4, %v7466_v41, 0.0  ;;  %v1418_v41 = vsel %vm252_vm10, %v7659_v27, 0.0  ;;  %vm9148_vm1 = vmmov %vm9147_vm0 }
0x1285   :  { %v2360_v39 = vsel %vm2359_vm3, %v6500_v38, %v2356_v47  ;;  %v7929_v45 = vsel %vm2347_vm14, %v2349_v50, %v2345_v8  ;;  %v859_v7 = vperm.slane %v7946_v14, 0  ;;  %v583_v8 = vperm.slane %v7382_v17, 0  ;;  %vm9151_vm14 = vmmov %vm9147_vm0 }
0x1286   :  { %v7931_v9 = vsel %vm2362_vm15, %v2364_v51, %v2360_v39  ;;  %v1421_v50 = vperm.slane %v1418_v41, 0  ;;  %v7961_v39 = vsel %vm244_vm7, %v7812_v20, 0.0  ;;  %v1420_v20 = vrot.slane %v1418_v41, 1  ;;  %vm9152_vm15 = vmmov %vm9147_vm0 }
0x1287   :  { %v1983_v51 = vperm.slane %v7961_v39, 0  ;;  %vm9150_vm3 = vcmp.eq.s32.totalorder %v7394_v35, 1 }
0x128d   :  { %v2465_v6 = vpop.permute.xlu1 %2464 }
0x128e   :  { %v2470_v30 = vmul.f32 %v2465_v6, %v7925_v56  ;;  %v2457_v6 = vpop.permute.xlu2 %2456 }
0x1290   :  { %2474 = vrot.lane.b32.xlu0 %v2470_v30, %s7060_s6  ;;  %v2461_v30 = vmul.f32 %v2457_v6, %v7920_v22 }
0x1296   :  { %v2455_v1 = vpop.permute.xlu2 %2454 }
0x1297   :  { %v2460_v60 = vmul.f32 %v2455_v1, %v7925_v56  ;;  %v1699_v1 = vsel %vm9146_vm12, %v7740_v49, 0.0  ;;  %vm9153_vm12 = vcmp.eq.s32.totalorder %v7377_v15, 1 }
0x129e   :  { %v2373_v4 = vpop.permute.xlu2 %2372 }
0x129f   :  { %v2378_v47 = vmul.f32 %v2373_v4, %v7929_v45 }
0x12e2   :  { %v2383_v21 = vpop.permute.xlu1 %2382 }
0x12e3   :  { %v2385_v55 = vpop.permute.xlu0 %2384  ;;  %v2388_v34 = vmul.f32 %v2383_v21, %v7929_v45 }
0x12e4   :  { %v2389_v28 = vmul.f32 %v2385_v55, %v7931_v9  ;;  %v582_v55 = vrot.slane %v7382_v17, 1  ;;  %v2257_v17 = vsel %vm240_vm5, %v7889_v44, 0.0 }
0x12e5   :  { %2392 = vrot.lane.b32.xlu0 %v2388_v34, %s7060_s6 }
0x12e6   :  { %2394 = vrot.lane.b32.xlu2 %v2389_v28, %s7060_s6  ;;  %v584_v28 = vperm.slane %v582_v55, 0 }
0x12ec   :  { %v2477_v5 = vpop.permute.xlu1 %2476 }
0x12ed   :  { %v2481_v0 = vadd.f32 %v2477_v5, %v2461_v30 }
0x12ef   :  { %6501 = vtanh.f32 %v2481_v0  ;;  %v1137_v0 = vsel %vm256_vm6, %v7564_v54, 0.0 }
0x12f0   :  { %v1139_v54 = vrot.slane %v1137_v0, 1 }
0x12f4   :  { %v2375_v16 = vpop.permute.xlu1 %2374 }
0x12f5   :  { %v6502_v10 = vpop.eup %6501  ;;  %v2379_v31 = vmul.f32 %v2375_v16, %v7931_v9 }
0x12f6   :  { %2488 = vrot.lane.b32.xlu1 %v6502_v10, %s7060_s6  ;;  %v1422_v10 = vperm.slane %v1420_v20, 0 }
0x1302   :  { %v2475_v33 = vpop.permute.xlu0 %2474 }
0x1303   :  { %v2480_v2 = vadd.f32 %v2475_v33, %v2460_v60  ;;  %v1702_v33 = vperm.slane %v1699_v1, 0 }
0x1305   :  { %6503 = vtanh.f32 %v2480_v2  ;;  %v1141_v2 = vperm.slane %v1139_v54, 0  ;;  %v8031_v54 = vld [vmem:[#allocation13 + $0x18] sm:$0xff] }
0x1306   :  { %2625 = vmatpush.msrb.mxu2 %v8031_v54 }
0x130b   :  { %v6504_v38 = vpop.eup %6503 }
0x130c   :  { %2486 = vrot.lane.b32.xlu0 %v6504_v38, %s7060_s6 }
0x1340   :  { %v2395_v11 = vpop.permute.xlu2 %2394 }
0x1341   :  { %v2399_v29 = vadd.f32 %v2395_v11, %v2379_v31 }
0x1343   :  { %6505 = vtanh.f32 %v2399_v29 }
0x1349   :  { %v6506_v18 = vpop.eup %6505 }
0x134a   :  { %2406 = vrot.lane.b32.xlu1 %v6506_v18, %s7060_s6 }
0x1352   :  { %861 = vrot.lane.b32.xlu1 %v859_v7, %s7060_s6  ;;  %v7993_v7 = vsel %vm260_vm4, %v7896_v52, 0.0 }
0x1357   :  { %v2393_v63 = vpop.permute.xlu0 %2392 }
0x1358   :  { %v2398_v58 = vadd.f32 %v2393_v63, %v2378_v47  ;;  %v858_v47 = vrot.slane %v7946_v14, 1  ;;  %v1693_v63 = vsel %vm252_vm10, %v7750_v46, 0.0 }
0x1359   :  { %v1695_v14 = vrot.slane %v1693_v63, 1 }
0x135a   :  { %6507 = vtanh.f32 %v2398_v58  ;;  %v860_v52 = vperm.slane %v858_v47, 0  ;;  %v2536_v47 = vld [vmem:[#allocation12 + $0x30] sm:$0xff] }
0x1360   :  { %v6508_v48 = vpop.eup %6507 }
0x1361   :  { %2404 = vrot.lane.b32.xlu2 %v6508_v48, %s7060_s6  ;;  %v1701_v48 = vrot.slane %v1699_v1, 1  ;;  %v8028_v1 = vld [vmem:[#allocation15 + $0x10] sm:$0xff] }
0x1368   :  { %v2489_v21 = vpop.permute.xlu1 %2488 }
0x1369   :  { %585 = vrot.lane.b32.xlu2 %v583_v8, %s7060_s6  ;;  %v2493_v34 = vmul.f32 %v2489_v21, %v7920_v22  ;;  %v1140_v22 = vperm.slane %v1137_v0, 0  ;;  %v1703_v8 = vperm.slane %v1701_v48, 0  ;;  %v8056_v48 = vld [vmem:[#allocation13] sm:$0xff] }
0x136b   :  { %v2510_v27 = vrot.slane %v2493_v34, 7 }
0x1371   :  { %1423 = vrot.lane.b32.xlu2 %v1421_v50, %s7060_s6 }
0x1379   :  { %1985 = vrot.lane.b32.xlu2 %v1983_v51, %s7060_s6 }
0x137e   :  { %v2487_v6 = vpop.permute.xlu0 %2486 }
0x137f   :  { %v2492_v30 = vmul.f32 %v2487_v6, %v7925_v56  ;;  %v2259_v56 = vrot.slane %v2257_v17, 1  ;;  %v1982_v6 = vrot.slane %v7961_v39, 1  ;;  %v2544_v39 = vld [vmem:[#allocation12 + $0x70] sm:$0xff] }
0x1380   :  { %2567 = vmatpush.msrb.mxu0 %v2544_v39 }
0x1381   :  { %587 = vrot.lane.b32.xlu2 %v584_v28, %s7060_s6  ;;  %v2511_v5 = vsel %vm543_vm8, %v2510_v27, %v2492_v30  ;;  %v2261_v60 = vperm.slane %v2259_v56, 0  ;;  %v1974_v30 = vsel %vm256_vm6, %v7822_v43, 0.0  ;;  %v2542_v43 = vld [vmem:[#allocation12 + $0x60] sm:$0xff]  ;;  %v2543_v56 = vld [vmem:[#allocation12 + $0x68] sm:$0xff] }
0x1382   :  { %2512 = vrot.lane.b32.xlu0 %v2511_v5, %s7063_s1  ;;  %v1984_v5 = vperm.slane %v1982_v6, 0  ;;  %v1976_v0 = vrot.slane %v1974_v30, 1  ;;  %2568 = vmatpush.msrb.mxu0 %v2542_v43 }
0x1389   :  { %1425 = vrot.lane.b32.xlu2 %v1422_v10, %s7060_s6 }
0x138a   :  { %1142 = vrot.lane.b32.xlu0 %v1140_v22, %s7060_s6  ;;  %v8026_v22 = vld [vmem:[#allocation15 + $0x18] sm:$0xff] }
0x138b   :  { %2651 = vmatpush.msra.mxu3 %v8026_v22 }
0x138d   :  { %2652 = vmatpush.msra.mxu3 %v8028_v1 }
0x1391   :  { %2264 = vrot.lane.b32.xlu2 %v2261_v60, %s7060_s6  ;;  %v2540_v60 = vld [vmem:[#allocation12 + $0x50] sm:$0xff] }
0x1392   :  { %1704 = vrot.lane.b32.xlu0 %v1702_v33, %s7060_s6  ;;  %v2541_v33 = vld [vmem:[#allocation12 + $0x58] sm:$0xff]  ;;  %2569 = vmatpush.msrb.mxu0 %v2540_v60 }
0x139a   :  { %1144 = vrot.lane.b32.xlu0 %v1141_v2, %s7060_s6  ;;  %v8033_v2 = vld [vmem:[#allocation15 + $0x8] sm:$0xff] }
0x139b   :  { %2653 = vmatpush.msra.mxu3 %v8033_v2 }
0x13bb   :  { %v2405_v44 = vpop.permute.xlu2 %2404 }
0x13bc   :  { %v2410_v38 = vmul.f32 %v2405_v44, %v7929_v45  ;;  %v2407_v4 = vpop.permute.xlu1 %2406  ;;  %v2260_v45 = vperm.slane %v2257_v17, 0  ;;  %v2545_v17 = vld [vmem:[#allocation12 + $0x78] sm:$0xff]  ;;  %v2538_v44 = vld [vmem:[#allocation12 + $0x40] sm:$0xff] }
0x13bd   :  { %v2411_v16 = vmul.f32 %v2407_v4, %v7931_v9  ;;  %2590 = vmatpush.msra.mxu1 %v2545_v17  ;;  %v8037_v4 = vld [vmem:[#allocation13 + $0x10] sm:$0xff]  ;;  %2570 = vmatpush.msrb.mxu0 %v2538_v44 }
0x13be   :  { %v2496_v31 = vrot.slane %v2410_v38, 7  ;;  %v2539_v38 = vld [vmem:[#allocation12 + $0x48] sm:$0xff]  ;;  %2626 = vmatpush.msrb.mxu2 %v8037_v4 }
0x13bf   :  { %v2497_v11 = vrot.slane %v2411_v16, 6  ;;  %2591 = vmatpush.msra.mxu1 %v2543_v56  ;;  %2571 = vmatpush.msrb.mxu0 %v2536_v47 }
0x13c1   :  { %v2498_v49 = vsel %vm543_vm8, %v2497_v11, %v2496_v31  ;;  %2592 = vmatpush.msra.mxu1 %v2541_v33 }
0x13c2   :  { %2499 = vrot.lane.b32.xlu1 %v2498_v49, %s7063_s1 }
0x13c3   :  { %v586_v29 = vpop.permute.xlu2 %585  ;;  %2593 = vmatpush.msra.mxu1 %v2539_v38 }
0x13c4   :  { %592 = vst.msk [vmem:[#allocation2 + $0x7] sm:$0x1] %vm9141_vm13, %v586_v29  ;;  %v862_v18 = vpop.permute.xlu1 %861  ;;  %v2253_v29 = vrot.slane %v7993_v7, 1 }
0x13c5   :  { %867 = vst.msk [vmem:[#allocation2 + $0x6] sm:$0x1] %vm9141_vm13, %v862_v18 }
0x13c6   :  { %2255 = vst.msk [vmem:[#allocation2 + $0x6] sm:$0x1] %vm9147_vm0, %v7993_v7  ;;  %v2534_v7 = vld [vmem:[#allocation12 + $0x20] sm:$0xff] }
0x13c7   :  { %2572 = vmatpush.msrb.mxu0 %v2534_v7 }
0x13ca   :  { %2262 = vrot.lane.b32.xlu1 %v2260_v45, %s7060_s6 }
0x13cb   :  { %v1424_v9 = vpop.permute.xlu2 %1423 }
0x13cc   :  { %1429 = vst.msk [vmem:[#allocation2 + $0x4] sm:$0x1] %vm9141_vm13, %v1424_v9  ;;  %v8049_v9 = vld [vmem:[#allocation15] sm:$0xff] }
0x13cd   :  { %1697 = vst.msk [vmem:[#allocation2 + $0x4] sm:$0x1] %vm9148_vm1, %v1693_v63  ;;  %vm9154_vm1 = vmmov %vm9147_vm0  ;;  %v2537_v63 = vld [vmem:[#allocation12 + $0x38] sm:$0xff]  ;;  %2654 = vmatpush.msra.mxu3 %v8049_v9 }
0x13ce   :  { %2594 = vmatpush.msra.mxu1 %v2537_v63  ;;  %2655 = vmatmul.f32.vlgmr.msra.gmra.mxu3 %v7059_v25 }
0x13cf   :  { %2907 = vmatpush.msrb.mxu3 %v8026_v22 }
0x13d1   :  { %2908 = vmatpush.msrb.mxu3 %v8028_v1 }
0x13d2   :  { %863 = vrot.lane.b32.xlu1 %v860_v52, %s7060_s6  ;;  %v8053_v52 = vld [vmem:[#allocation13 + $0x8] sm:$0xff] }
0x13d3   :  { %v1986_v58 = vpop.permute.xlu2 %1985  ;;  %2627 = vmatpush.msrb.mxu2 %v8053_v52  ;;  %2909 = vmatpush.msrb.mxu3 %v8033_v2 }
0x13d4   :  { %1991 = vst.msk [vmem:[#allocation2 + $0x2] sm:$0x1] %vm9141_vm13, %v1986_v58  ;;  %v2535_v58 = vld [vmem:[#allocation12 + $0x28] sm:$0xff] }
0x13d5   :  { %2595 = vmatpush.msra.mxu1 %v2535_v58  ;;  %2628 = vmatpush.msrb.mxu2 %v8056_v48 }
0x13d6   :  { %2629 = vmatmul.f32.vlgmr.msrb.gmra.mxu2 %v7059_v25  ;;  %2910 = vmatpush.msrb.mxu3 %v8049_v9 }
0x13d7   :  { %2879 = vmatpush.msra.mxu2 %v8031_v54 }
0x13d8   :  { %3185 = vmatpush.msra.mxu3 %v8026_v22 }
0x13d9   :  { %2880 = vmatpush.msra.mxu2 %v8037_v4 }
0x13da   :  { %1706 = vrot.lane.b32.xlu1 %v1703_v8, %s7060_s6  ;;  %v2532_v8 = vld [vmem:[#allocation12 + $0x10] sm:$0xff]  ;;  %3186 = vmatpush.msra.mxu3 %v8028_v1 }
0x13db   :  { %v588_v41 = vpop.permute.xlu2 %587  ;;  %2573 = vmatpush.msrb.mxu0 %v2532_v8  ;;  %2881 = vmatpush.msra.mxu2 %v8053_v52 }
0x13dc   :  { %593 = vst.msk [vmem:[#allocation2 + $0xf] sm:$0x1] %vm9141_vm13, %v588_v41  ;;  %v2533_v41 = vld [vmem:[#allocation12 + $0x18] sm:$0xff]  ;;  %3187 = vmatpush.msra.mxu3 %v8033_v2 }
0x13dd   :  { %2596 = vmatpush.msra.mxu1 %v2533_v41  ;;  %2882 = vmatpush.msra.mxu2 %v8056_v48 }
0x13de   :  { %3188 = vmatpush.msra.mxu3 %v8049_v9 }
0x13df   :  { %3155 = vmatpush.msrb.mxu2 %v8031_v54 }
0x13e1   :  { %3156 = vmatpush.msrb.mxu2 %v8037_v4 }
0x13e3   :  { %v1426_v50 = vpop.permute.xlu2 %1425  ;;  %3157 = vmatpush.msrb.mxu2 %v8053_v52 }
0x13e4   :  { %1430 = vst.msk [vmem:[#allocation2 + $0xc] sm:$0x1] %vm9141_vm13, %v1426_v50  ;;  %v2531_v50 = vld [vmem:[#allocation12 + $0x8] sm:$0xff] }
0x13e5   :  { %1698 = vst.msk [vmem:[#allocation2 + $0xc] sm:$0x1] %vm9149_vm2, %v1695_v14  ;;  %vm9155_vm2 = vmmov %vm9147_vm0  ;;  %v2530_v14 = vld [vmem:[#allocation12] sm:$0xff]  ;;  %2597 = vmatpush.msra.mxu1 %v2531_v50  ;;  %3158 = vmatpush.msrb.mxu2 %v8056_v48 }
0x13e6   :  { %2574 = vmatpush.msrb.mxu0 %v2530_v14 }
0x13e7   :  { %3466 = vmatpush.msrb.mxu1 %v8026_v22 }
0x13e8   :  { %3436 = vmatpush.msra.mxu0 %v8031_v54 }
0x13e9   :  { %3467 = vmatpush.msrb.mxu1 %v8028_v1 }
0x13ea   :  { %3437 = vmatpush.msra.mxu0 %v8037_v4 }
0x13eb   :  { %v2265_v46 = vpop.permute.xlu2 %2264  ;;  %3468 = vmatpush.msrb.mxu1 %v8033_v2 }
0x13ec   :  { %2269 = vst.msk [vmem:[#allocation2 + $0x9] sm:$0x1] %vm9141_vm13, %v2265_v46  ;;  %3438 = vmatpush.msra.mxu0 %v8053_v52 }
0x13ed   :  { %3469 = vmatpush.msrb.mxu1 %v8049_v9 }
0x13ee   :  { %3439 = vmatpush.msra.mxu0 %v8056_v48 }
0x13f4   :  { %v2513_v51 = vpop.permute.xlu0 %2512 }
0x13f5   :  { %v2515_v21 = vsel %vm9150_vm3, %v2513_v51, 0.0  ;;  %vm9140_vm3 = vcmask 523264  }
0x13f6   :  { %v2517_v55 = vrot.slane %v2515_v21, 1  ;;  %v2518_v34 = vperm.slane %v2515_v21, 0 }
0x13f8   :  { %v2519_v28 = vperm.slane %v2517_v55, 0  ;;  %2520 = vrot.lane.b32.xlu0 %v2518_v34, %s7060_s6 }
0x13fa   :  { %2522 = vrot.lane.b32.xlu1 %v2519_v28, %s7060_s6  ;;  %v2546_v28 = vld [vmem:[%s9129_s10] sm:$0x3] }
0x13fb   :  { %v2548_v17 = vperm.slane %v2546_v28, 0 }
0x13fc   :  { %v1143_v27 = vpop.permute.xlu0 %1142 }
0x13fd   :  { %1148 = vst.msk [vmem:[#allocation2 + $0x5] sm:$0x1] %vm9141_vm13, %v1143_v27  ;;  %v2549_v27 = vperm.slane %v2546_v28, 1 }
0x13fe   :  { %1978 = vst.msk [vmem:[#allocation2 + $0x5] sm:$0x1] %vm9151_vm14, %v1974_v30 }
0x1400   :  { %1987 = vrot.lane.b32.xlu0 %v1984_v5, %s7060_s6 }
0x1404   :  { %v1705_v20 = vpop.permute.xlu0 %1704 }
0x1405   :  { %1710 = vst.msk [vmem:[#allocation2 + $0x3] sm:$0x1] %vm9141_vm13, %v1705_v20 }
0x140c   :  { %v1145_v10 = vpop.permute.xlu0 %1144 }
0x140d   :  { %1149 = vst.msk [vmem:[#allocation2 + $0xd] sm:$0x1] %vm9141_vm13, %v1145_v10 }
0x140e   :  { %1979 = vst.msk [vmem:[#allocation2 + $0xd] sm:$0x1] %vm9152_vm15, %v1976_v0 }
0x1434   :  { %v2500_v16 = vpop.permute.xlu1 %2499 }
0x1435   :  { %v2502_v31 = vsel %vm9153_vm12, %v2500_v16, 0.0 }
0x1436   :  { %v2504_v11 = vrot.slane %v2502_v31, 1  ;;  %2506 = vst.msk [vmem:[#allocation2 + $0x7] sm:$0x1] %vm9147_vm0, %v2502_v31 }
0x1438   :  { %2507 = vst.msk [vmem:[#allocation2 + $0xf] sm:$0x1] %vm9154_vm1, %v2504_v11 }
0x143c   :  { %v2263_v49 = vpop.permute.xlu1 %2262 }
0x143d   :  { %2268 = vst.msk [vmem:[#allocation2 + $0x1] sm:$0x1] %vm9141_vm13, %v2263_v49 }
0x1444   :  { %v864_v18 = vpop.permute.xlu1 %863 }
0x1445   :  { %868 = vst.msk [vmem:[#allocation2 + $0xe] sm:$0x1] %vm9141_vm13, %v864_v18 }
0x1446   :  { %2256 = vst.msk [vmem:[#allocation2 + $0xe] sm:$0x1] %vm9155_vm2, %v2253_v29 }
0x144c   :  { %v1707_v45 = vpop.permute.xlu1 %1706 }
0x144d   :  { %1711 = vst.msk [vmem:[#allocation2 + $0xb] sm:$0x1] %vm9141_vm13, %v1707_v45 }
0x1451   :  { %v2656_v6 = vpop.f32.mrf.mxu3 }
0x1452   :  { %v2660_v30 = vrot.slane %v2656_v6, 1  ;;  %v2661_v33 = vrot.slane %v2656_v6, 2 }
0x1459   :  { %v2630_v39 = vpop.f32.mrf.mxu2 }
0x145a   :  { %v2634_v43 = vrot.slane %v2630_v39, 1 }
0x146a   :  { %v2521_v46 = vpop.permute.xlu0 %2520 }
0x146b   :  { %2526 = vst.msk [vmem:[#allocation2] sm:$0x1] %vm9141_vm13, %v2521_v46 }
0x146c   :  { %v2523_v51 = vpop.permute.xlu1 %2522 }
0x146d   :  { %2527 = vst.msk [vmem:[#allocation2 + $0x8] sm:$0x1] %vm9141_vm13, %v2523_v51 }
0x1472   :  { %v1988_v21 = vpop.permute.xlu0 %1987  ;;  %v2528_v55 = vld [vmem:[#allocation2] sm:$0xff] }
0x1473   :  { %1992 = vst.msk [vmem:[#allocation2 + $0xa] sm:$0x1] %vm9141_vm13, %v1988_v21  ;;  %6084 = vmatmul.msk.f32.vlgmr.msrb.gmra.mxu0 %vm9140_vm3, %v2528_v55  ;;  %6086 = vmatmul.msk.f32.vlgmr.msra.gmra.mxu1 %vm9140_vm3, %v2528_v55 }
0x1474   :  { %4028 = vmatpush.msra.mxu1 %v8026_v22  ;;  %3998 = vmatpush.msrb.mxu0 %v8031_v54 }
0x1476   :  { %4029 = vmatpush.msra.mxu1 %v8028_v1  ;;  %3999 = vmatpush.msrb.mxu0 %v8037_v4 }
0x1478   :  { %4030 = vmatpush.msra.mxu1 %v8033_v2  ;;  %4000 = vmatpush.msrb.mxu0 %v8053_v52 }
0x147a   :  { %v2529_v34 = vld [vmem:[#allocation2 + $0x8] sm:$0xff]  ;;  %4031 = vmatpush.msra.mxu1 %v8049_v9  ;;  %4001 = vmatpush.msrb.mxu0 %v8056_v48 }
0x147b   :  { %6085 = vmatmul.msk.f32.gmra.mxu0 %vm9140_vm3, %v2529_v34  ;;  %6087 = vmatmul.msk.f32.gmra.mxu1 %vm9140_vm3, %v2529_v34 }
0x14f0   :  { %v2576_v5 = vpop.f32.mrf.mxu0  ;;  %v2599_v20 = vpop.f32.mrf.mxu1 }
0x14f1   :  { %v8103_v0 = vadd.f32 %v2599_v20, %v2549_v27  ;;  %v8113_v49 = vadd.f32 %v2576_v5, %v2548_v17 }
0x14f3   :  { %v2664_v10 = vadd.f32 %v2660_v30, %v8103_v0  ;;  %v2637_v29 = vadd.f32 %v2630_v39, %v8113_v49 }
0x14f5   :  { %6509 = vtanh.f32 %v2664_v10  ;;  %v6090_v8 = vmul.f32 -1.442695, %v2664_v10  ;;  %v6088_v55 = vmul.f32 -1.442695, %v2637_v29 }
0x14f8   :  { %v2579_v56 = vpop.f32.mrf.mxu0  ;;  %v2602_v60 = vpop.f32.mrf.mxu1 }
0x14f9   :  { %v8106_v44 = vadd.f32 %v2579_v56, %v2548_v17  ;;  %v8108_v38 = vadd.f32 %v2602_v60, %v2549_v27 }
0x14fb   :  { %v6510_v16 = vpop.eup %6509  ;;  %v2665_v31 = vadd.f32 %v2661_v33, %v8108_v38  ;;  %v2638_v11 = vadd.f32 %v2634_v43, %v8106_v44 }
0x14fc   :  { %2784 = vrot.lane.b32.xlu0 %v6510_v16, %s7060_s6 }
0x14fd   :  { %6511 = vtanh.f32 %v2665_v31  ;;  %v6091_v63 = vmul.f32 -1.442695, %v2665_v31  ;;  %v6089_v14 = vmul.f32 -1.442695, %v2638_v11 }
0x14fe   :  { %6513 = vtanh.f32 %v2638_v11 }
0x14ff   :  { %6515 = vtanh.f32 %v2637_v29 }
0x1500   :  { %6517 = vpow2.f32 %v6091_v63 }
0x1503   :  { %v6512_v18 = vpop.eup %6511 }
0x1504   :  { %v6514_v45 = vpop.eup %6513  ;;  %2786 = vrot.lane.b32.xlu2 %v6512_v18, %s7060_s6 }
0x1505   :  { %2712 = vrot.lane.b32.xlu1 %v6514_v45, %s7060_s6  ;;  %v6516_v47 = vpop.eup %6515 }
0x1506   :  { %v6518_v7 = vpop.eup %6517 }
0x1507   :  { %v2747_v58 = vadd.f32 1.0, %v6518_v7 }
0x1509   :  { %6519 = vrcp.f32 %v2747_v58  ;;  %v2774_v5 = vand.u32 2147483648, %v2747_v58  ;;  %vm2768_vm15 = vweird.f32 %v2747_v58  ;;  %v2772_v20 = vand.u32 2147483647, %v2747_v58 }
0x150a   :  { %6521 = vpow2.f32 %v6090_v8 }
0x150b   :  { %6523 = vpow2.f32 %v6089_v14  ;;  %v2775_v43 = vor.u32 1.1754944e-38, %v2774_v5  ;;  %vm2773_vm0 = vcmp.eq.f32.partialorder %v2772_v20, 8.507059e+37 }
0x150d   :  { %2710 = vrot.lane.b32.xlu1 %v6516_v47, %s7060_s6 }
0x150f   :  { %v6520_v41 = vpop.eup %6519 }
0x1510   :  { %v6522_v50 = vpop.eup %6521  ;;  %v2764_v46 = vmul.f32 %v6520_v41, %v2747_v58  ;;  %vm2769_vm14 = vweird.f32 %v6520_v41 }
0x1511   :  { %v2746_v51 = vadd.f32 1.0, %v6522_v50  ;;  %v6524_v28 = vpop.eup %6523  ;;  %vm2770_vm12 = vmor %vm2768_vm15, %vm2769_vm14 }
0x1512   :  { %v2765_v21 = vsub.f32 1.0, %v2764_v46  ;;  %v2673_v27 = vadd.f32 1.0, %v6524_v28 }
0x1513   :  { %6525 = vrcp.f32 %v2746_v51  ;;  %v2759_v47 = vand.u32 2147483648, %v2746_v51  ;;  %vm2753_vm2 = vweird.f32 %v2746_v51  ;;  %v2757_v58 = vand.u32 2147483647, %v2746_v51 }
0x1514   :  { %v2766_v34 = vmul.f32 %v6520_v41, %v2765_v21  ;;  %6527 = vpow2.f32 %v6088_v55  ;;  %v2698_v5 = vand.u32 2147483647, %v2673_v27 }
0x1515   :  { %6529 = vrcp.f32 %v2673_v27  ;;  %vm2758_vm15 = vcmp.eq.f32.partialorder %v2757_v58, 8.507059e+37 }
0x1516   :  { %v2767_v6 = vadd.f32 %v6520_v41, %v2766_v34 }
0x1518   :  { %v2771_v10 = vsel %vm2770_vm12, %v6520_v41, %v2767_v6  ;;  %v2760_v41 = vor.u32 1.1754944e-38, %v2759_v47  ;;  %v2700_v6 = vand.u32 2147483648, %v2673_v27 }
0x1519   :  { %v6526_v30 = vpop.eup %6525  ;;  %v8119_v60 = vsel %vm2773_vm0, %v2775_v43, %v2771_v10  ;;  %vm2694_vm0 = vweird.f32 %v2673_v27 }
0x151a   :  { %v2749_v39 = vmul.f32 %v6526_v30, %v2746_v51  ;;  %v6528_v17 = vpop.eup %6527  ;;  %vm2754_vm1 = vweird.f32 %v6526_v30  ;;  %v2701_v20 = vor.u32 1.1754944e-38, %v2700_v6 }
0x151b   :  { %v2672_v33 = vadd.f32 1.0, %v6528_v17  ;;  %v6530_v11 = vpop.eup %6529  ;;  %vm2755_vm14 = vmor %vm2753_vm2, %vm2754_vm1  ;;  %vm2699_vm1 = vcmp.eq.f32.partialorder %v2698_v5, 8.507059e+37 }
0x151c   :  { %v2750_v31 = vsub.f32 1.0, %v2749_v39  ;;  %v2690_v18 = vmul.f32 %v6530_v11, %v2673_v27  ;;  %vm2695_vm12 = vweird.f32 %v6530_v11 }
0x151d   :  { %6531 = vrcp.f32 %v2672_v33  ;;  %vm2696_vm3 = vmor %vm2694_vm0, %vm2695_vm12  ;;  %vm9159_vm0 = vcmp.eq.s32.totalorder %v7377_v15, 1 }
0x151e   :  { %v2751_v29 = vmul.f32 %v6526_v30, %v2750_v31  ;;  %v2691_v63 = vsub.f32 1.0, %v2690_v18 }
0x1520   :  { %v2752_v45 = vadd.f32 %v6526_v30, %v2751_v29  ;;  %v2692_v14 = vmul.f32 %v6530_v11, %v2691_v63 }
0x1522   :  { %v2756_v8 = vsel %vm2755_vm14, %v6526_v30, %v2752_v45  ;;  %v2693_v34 = vadd.f32 %v6530_v11, %v2692_v14  ;;  %vm2679_vm14 = vweird.f32 %v2672_v33  ;;  %v2781_v45 = vmul.f32 0.0, %v8119_v60 }
0x1523   :  { %v6532_v7 = vpop.eup %6531  ;;  %v8123_v21 = vsel %vm2758_vm15, %v2760_v41, %v2756_v8 }
0x1524   :  { %v2675_v50 = vmul.f32 %v6532_v7, %v2672_v33  ;;  %v2697_v51 = vsel %vm2696_vm3, %v6530_v11, %v2693_v34  ;;  %vm2680_vm2 = vweird.f32 %v6532_v7  ;;  %v2780_v8 = vmul.f32 0.0, %v8123_v21 }
0x1525   :  { %v2702_v39 = vsel %vm2699_vm1, %v2701_v20, %v2697_v51  ;;  %vm2681_vm15 = vmor %vm2679_vm14, %vm2680_vm2  ;;  %vm9157_vm3 = vcmask 253952  }
0x1526   :  { %v2676_v28 = vsub.f32 1.0, %v2675_v50  ;;  %vm9158_vm12 = vmmov %vm9157_vm3 }
0x1527   :  { %vm9160_vm1 = vmmov %vm9159_vm0 }
0x1528   :  { %v2677_v30 = vmul.f32 %v6532_v7, %v2676_v28 }
0x152a   :  { %v2678_v43 = vadd.f32 %v6532_v7, %v2677_v30 }
0x152c   :  { %v2682_v31 = vsel %vm2681_vm15, %v6532_v7, %v2678_v43 }
0x155e   :  { %v2787_v56 = vpop.permute.xlu2 %2786 }
0x155f   :  { %v2791_v16 = vmul.f32 %v2787_v56, %v8119_v60  ;;  %v2685_v56 = vand.u32 2147483648, %v2672_v33 }
0x1561   :  { %2796 = vrot.lane.b32.xlu2 %v2791_v16, %s7060_s6  ;;  %v2683_v16 = vand.u32 2147483647, %v2672_v33  ;;  %v2686_v29 = vor.u32 1.1754944e-38, %v2685_v56 }
0x1563   :  { %vm2684_vm13 = vcmp.eq.f32.partialorder %v2683_v16, 8.507059e+37 }
0x1564   :  { %v2687_v27 = vsel %vm2684_vm13, %v2686_v29, %v2682_v31  ;;  %vm9156_vm13 = vcmp.eq.s32.totalorder %v7394_v35, 1 }
0x1565   :  { %v2706_v14 = vmul.f32 0.0, %v2687_v27 }
0x156e   :  { %v2785_v46 = vpop.permute.xlu0 %2784 }
0x156f   :  { %v2790_v55 = vmul.f32 %v2785_v46, %v8123_v21  ;;  %v2707_v46 = vmul.f32 0.0, %v2702_v39 }
0x1571   :  { %2794 = vrot.lane.b32.xlu0 %v2790_v55, %s7060_s6 }
0x1577   :  { %v2713_v10 = vpop.permute.xlu1 %2712 }
0x1578   :  { %v2717_v17 = vmul.f32 %v2713_v10, %v2702_v39 }
0x157a   :  { %2722 = vrot.lane.b32.xlu0 %v2717_v17, %s7060_s6 }
0x157f   :  { %v2711_v18 = vpop.permute.xlu1 %2710 }
0x1580   :  { %v2716_v11 = vmul.f32 %v2711_v18, %v2687_v27 }
0x1582   :  { %2720 = vrot.lane.b32.xlu2 %v2716_v11, %s7060_s6 }
0x15bb   :  { %v2797_v47 = vpop.permute.xlu2 %2796 }
0x15bc   :  { %v2801_v63 = vadd.f32 %v2797_v47, %v2781_v45 }
0x15be   :  { %6533 = vtanh.f32 %v2801_v63  ;;  %v2842_v30 = vrot.slane %v2801_v63, 6 }
0x15c4   :  { %v6534_v58 = vpop.eup %6533 }
0x15c5   :  { %2808 = vrot.lane.b32.xlu0 %v6534_v58, %s7060_s6 }
0x15dc   :  { %v2721_v7 = vpop.permute.xlu2 %2720 }
0x15dd   :  { %v2726_v50 = vadd.f32 %v2721_v7, %v2706_v14 }
0x15e3   :  { %v2795_v33 = vpop.permute.xlu0 %2794 }
0x15e4   :  { %v2800_v41 = vadd.f32 %v2795_v33, %v2780_v8 }
0x15e6   :  { %6535 = vtanh.f32 %v2800_v41  ;;  %v2841_v51 = vrot.slane %v2800_v41, 7 }
0x15e7   :  { %6537 = vtanh.f32 %v2726_v50 }
0x15e8   :  { %v2843_v20 = vsel %vm543_vm8, %v2842_v30, %v2841_v51 }
0x15ec   :  { %v6536_v55 = vpop.eup %6535  ;;  %v2723_v34 = vpop.permute.xlu0 %2722 }
0x15ed   :  { %v2727_v28 = vadd.f32 %v2723_v34, %v2707_v46  ;;  %2806 = vrot.lane.b32.xlu1 %v6536_v55, %s7060_s6  ;;  %v6538_v6 = vpop.eup %6537 }
0x15ef   :  { %6539 = vtanh.f32 %v2727_v28  ;;  %v2824_v10 = vrot.slane %v2727_v28, 7 }
0x15f1   :  { %v2825_v17 = vsel %vm543_vm8, %v2824_v10, %v2726_v50 }
0x15f5   :  { %v6540_v5 = vpop.eup %6539  ;;  %2732 = vrot.lane.b32.xlu1 %v6538_v6, %s7060_s6 }
0x15f6   :  { %2734 = vrot.lane.b32.xlu2 %v6540_v5, %s7060_s6 }
0x15fd   :  { %2844 = vrot.lane.b32.xlu1 %v2843_v20, %s7064_s23 }
0x1605   :  { %2826 = vrot.lane.b32.xlu1 %v2825_v17, %s7064_s23 }
0x1637   :  { %v2809_v43 = vpop.permute.xlu0 %2808 }
0x1638   :  { %v2813_v56 = vmul.f32 %v2809_v43, %v8119_v60 }
0x163a   :  { %v2833_v18 = vrot.slane %v2813_v56, 6 }
0x1650   :  { %v2735_v29 = vpop.permute.xlu2 %2734 }
0x1651   :  { %v2739_v45 = vmul.f32 %v2735_v29, %v2702_v39 }
0x1653   :  { %v2816_v58 = vrot.slane %v2739_v45, 7 }
0x165f   :  { %v2807_v16 = vpop.permute.xlu1 %2806 }
0x1660   :  { %v2812_v31 = vmul.f32 %v2807_v16, %v8123_v21 }
0x1662   :  { %v2832_v11 = vrot.slane %v2812_v31, 7 }
0x1664   :  { %v2834_v47 = vsel %vm543_vm8, %v2833_v18, %v2832_v11 }
0x1665   :  { %2835 = vrot.lane.b32.xlu0 %v2834_v47, %s7063_s1 }
0x1667   :  { %v2733_v63 = vpop.permute.xlu1 %2732 }
0x1668   :  { %v2738_v8 = vmul.f32 %v2733_v63, %v2687_v27 }
0x166a   :  { %v2817_v33 = vsel %vm543_vm8, %v2816_v58, %v2738_v8 }
0x166b   :  { %2818 = vrot.lane.b32.xlu2 %v2817_v33, %s7063_s1 }
0x166f   :  { %v2845_v17 = vpop.permute.xlu1 %2844 }
0x1670   :  { %v8179_v43 = vsel %vm9160_vm1, %v2845_v17, 0.0 }
0x1671   :  { %v3045_v56 = vrot.slane %v8179_v43, 2  ;;  %v3046_v16 = vrot.slane %v8179_v43, 3 }
0x16c5   :  { %v2819_v41 = vpop.permute.xlu2 %2818 }
0x16c6   :  { %v8147_v60 = vsel %vm9156_vm13, %v2819_v41, 0.0 }
0x16c7   :  { %v2849_v21 = vrot.slane %v8147_v60, 1  ;;  %2851 = vst.msk [vmem:[#allocation3] sm:$0x1] %vm9157_vm3, %v8147_v60  ;;  %6092 = vmatmul.msk.f32.vlgmr.msra.gmra.mxu2 %vm335_vm11, %v8147_v60 }
0x16c8   :  { %3717 = vmatpush.msra.mxu2 %v8031_v54 }
0x16c9   :  { %2852 = vst.msk [vmem:[#allocation3 + $0x8] sm:$0x1] %vm9158_vm12, %v2849_v21 }
0x16ca   :  { %3718 = vmatpush.msra.mxu2 %v8037_v4 }
0x16cc   :  { %3719 = vmatpush.msra.mxu2 %v8053_v52 }
0x16ce   :  { %3720 = vmatpush.msra.mxu2 %v8056_v48 }
0x16d7   :  { %v2836_v39 = vpop.permute.xlu0 %2835 }
0x16d8   :  { %v8161_v27 = vsel %vm9159_vm0, %v2836_v39, 0.0 }
0x16d9   :  { %6093 = vmatmul.msk.f32.vlgmr.msrb.gmra.mxu3 %vm335_vm11, %v8161_v27 }
0x16da   :  { %3747 = vmatpush.msrb.mxu3 %v8026_v22 }
0x16dc   :  { %3748 = vmatpush.msrb.mxu3 %v8028_v1 }
0x16de   :  { %3749 = vmatpush.msrb.mxu3 %v8033_v2 }
0x16e0   :  { %3750 = vmatpush.msrb.mxu3 %v8049_v9 }
0x174a   :  { %v2884_v7 = vpop.f32.mrf.mxu2 }
0x174b   :  { %v2888_v14 = vrot.slane %v2884_v7, 7  ;;  %v2892_v46 = vadd.f32 %v2884_v7, %v8106_v44 }
0x174d   :  { %v2891_v50 = vadd.f32 %v2888_v14, %v8113_v49 }
0x174f   :  { %6541 = vtanh.f32 %v2891_v50  ;;  %v6094_v29 = vmul.f32 -1.442695, %v2891_v50  ;;  %v6095_v50 = vmul.f32 -1.442695, %v2892_v46 }
0x1750   :  { %6543 = vtanh.f32 %v2892_v46 }
0x1755   :  { %v6542_v55 = vpop.eup %6541 }
0x1756   :  { %2974 = vrot.lane.b32.xlu1 %v6542_v55, %s7060_s6  ;;  %v6544_v5 = vpop.eup %6543 }
0x175c   :  { %v2912_v34 = vpop.f32.mrf.mxu3 }
0x175d   :  { %v2916_v28 = vrot.slane %v2912_v34, 2  ;;  %v2917_v6 = vrot.slane %v2912_v34, 3 }
0x175e   :  { %2976 = vrot.lane.b32.xlu1 %v6544_v5, %s7060_s6 }
0x175f   :  { %v2920_v51 = vadd.f32 %v2916_v28, %v8103_v0  ;;  %v2921_v30 = vadd.f32 %v2917_v6, %v8108_v38 }
0x1761   :  { %6545 = vtanh.f32 %v2920_v51  ;;  %v6097_v31 = vmul.f32 -1.442695, %v2921_v30  ;;  %v6096_v58 = vmul.f32 -1.442695, %v2920_v51  ;;  %v2827_v51 = vpop.permute.xlu1 %2826 }
0x1762   :  { %6547 = vtanh.f32 %v2921_v30 }
0x1763   :  { %6549 = vpow2.f32 %v6097_v31 }
0x1764   :  { %6551 = vpow2.f32 %v6094_v29 }
0x1767   :  { %v6546_v20 = vpop.eup %6545 }
0x1768   :  { %v6548_v10 = vpop.eup %6547  ;;  %3057 = vrot.lane.b32.xlu0 %v6546_v20, %s7060_s6 }
0x1769   :  { %3059 = vrot.lane.b32.xlu2 %v6548_v10, %s7060_s6  ;;  %v6550_v18 = vpop.eup %6549 }
0x176a   :  { %v3011_v11 = vadd.f32 1.0, %v6550_v18  ;;  %v6552_v45 = vpop.eup %6551 }
0x176b   :  { %v2928_v47 = vadd.f32 1.0, %v6552_v45 }
0x176c   :  { %6553 = vrcp.f32 %v3011_v11  ;;  %v3038_v28 = vand.u32 2147483648, %v3011_v11  ;;  %vm3032_vm14 = vweird.f32 %v3011_v11  ;;  %v3036_v6 = vand.u32 2147483647, %v3011_v11 }
0x176d   :  { %6555 = vrcp.f32 %v2928_v47  ;;  %vm2935_vm12 = vweird.f32 %v2928_v47  ;;  %v2939_v29 = vand.u32 2147483647, %v2928_v47 }
0x176e   :  { %6557 = vpow2.f32 %v6096_v58  ;;  %v3039_v20 = vor.u32 1.1754944e-38, %v3038_v28  ;;  %vm3037_vm13 = vcmp.eq.f32.partialorder %v3036_v6, 8.507059e+37 }
0x176f   :  { %vm2940_vm1 = vcmp.eq.f32.partialorder %v2939_v29, 8.507059e+37 }
0x1770   :  { %3047 = vrot.lane.b32.xlu0 %v3045_v56, %s7060_s6 }
0x1771   :  { %3049 = vrot.lane.b32.xlu2 %v3046_v16, %s7060_s6  ;;  %v2941_v16 = vand.u32 2147483648, %v2928_v47 }
0x1772   :  { %v6554_v63 = vpop.eup %6553 }
0x1773   :  { %v3028_v8 = vmul.f32 %v6554_v63, %v3011_v11  ;;  %v6556_v33 = vpop.eup %6555  ;;  %vm3033_vm2 = vweird.f32 %v6554_v63  ;;  %v2942_v45 = vor.u32 1.1754944e-38, %v2941_v16 }
0x1774   :  { %v2931_v21 = vmul.f32 %v6556_v33, %v2928_v47  ;;  %v6558_v39 = vpop.eup %6557  ;;  %vm3034_vm15 = vmor %vm3032_vm14, %vm3033_vm2  ;;  %vm2936_vm3 = vweird.f32 %v6556_v33  ;;  %vm9161_vm2 = vcmp.eq.s32.totalorder %v7394_v35, 1 }
0x1775   :  { %v3029_v41 = vsub.f32 1.0, %v3028_v8  ;;  %v3010_v14 = vadd.f32 1.0, %v6558_v39  ;;  %vm2937_vm0 = vmor %vm2935_vm12, %vm2936_vm3  ;;  %v8195_v47 = vsel %vm9161_vm2, %v2827_v51, 0.0 }
0x1776   :  { %v2932_v55 = vsub.f32 1.0, %v2931_v21  ;;  %v2963_v16 = vrot.slane %v8195_v47, 7 }
0x1777   :  { %v3030_v7 = vmul.f32 %v6554_v63, %v3029_v41  ;;  %6559 = vrcp.f32 %v3010_v14 }
0x1778   :  { %v2933_v5 = vmul.f32 %v6556_v33, %v2932_v55  ;;  %6561 = vpow2.f32 %v6095_v50  ;;  %v3021_v50 = vand.u32 2147483647, %v3010_v14 }
0x1779   :  { %v3031_v34 = vadd.f32 %v6554_v63, %v3030_v7 }
0x177a   :  { %v2934_v10 = vadd.f32 %v6556_v33, %v2933_v5  ;;  %vm3022_vm3 = vcmp.eq.f32.partialorder %v3021_v50, 8.507059e+37 }
0x177b   :  { %v3035_v30 = vsel %vm3034_vm15, %v6554_v63, %v3031_v34  ;;  %v3023_v34 = vand.u32 2147483648, %v3010_v14  ;;  %vm3017_vm15 = vweird.f32 %v3010_v14 }
0x177c   :  { %v8185_v17 = vsel %vm3037_vm13, %v3039_v20, %v3035_v30  ;;  %v2938_v18 = vsel %vm2937_vm0, %v6556_v33, %v2934_v10 }
0x177d   :  { %v6560_v31 = vpop.eup %6559  ;;  %v8189_v8 = vsel %vm2940_vm1, %v2942_v45, %v2938_v18  ;;  %v3024_v5 = vor.u32 1.1754944e-38, %v3023_v34 }
0x177e   :  { %v6562_v11 = vpop.eup %6561  ;;  %v3013_v63 = vmul.f32 %v6560_v31, %v3010_v14  ;;  %vm3018_vm14 = vweird.f32 %v6560_v31 }
0x177f   :  { %v2929_v41 = vadd.f32 1.0, %v6562_v11  ;;  %vm3019_vm13 = vmor %vm3017_vm15, %vm3018_vm14  ;;  %vm9162_vm14 = vcmask 253952  }
0x1780   :  { %v3014_v39 = vsub.f32 1.0, %v3013_v63  ;;  %vm9163_vm15 = vmmov %vm9162_vm14 }
0x1781   :  { %6563 = vrcp.f32 %v2929_v41  ;;  %v2956_v29 = vand.u32 2147483648, %v2929_v41  ;;  %vm2950_vm0 = vweird.f32 %v2929_v41  ;;  %v2954_v18 = vand.u32 2147483647, %v2929_v41 }
0x1782   :  { %v3015_v33 = vmul.f32 %v6560_v31, %v3014_v39 }
0x1783   :  { %vm2955_vm2 = vcmp.eq.f32.partialorder %v2954_v18, 8.507059e+37 }
0x1784   :  { %v3016_v7 = vadd.f32 %v6560_v31, %v3015_v33 }
0x1786   :  { %v3020_v6 = vsel %vm3019_vm13, %v6560_v31, %v3016_v7  ;;  %v2957_v31 = vor.u32 1.1754944e-38, %v2956_v29 }
0x1787   :  { %v6564_v55 = vpop.eup %6563  ;;  %v3025_v20 = vsel %vm3022_vm3, %v3024_v5, %v3020_v6 }
0x1788   :  { %v2946_v28 = vmul.f32 %v6564_v55, %v2929_v41  ;;  %vm2951_vm12 = vweird.f32 %v6564_v55 }
0x1789   :  { %vm2952_vm1 = vmor %vm2950_vm0, %vm2951_vm12 }
0x178a   :  { %v2947_v51 = vsub.f32 1.0, %v2946_v28 }
0x17c3   :  { %v3060_v56 = vpop.permute.xlu2 %3059 }
0x17c4   :  { %v3064_v46 = vmul.f32 %v3060_v56, %v8185_v17  ;;  %v2948_v56 = vmul.f32 %v6564_v55, %v2947_v51 }
0x17c6   :  { %3069 = vrot.lane.b32.xlu2 %v3064_v46, %s7060_s6  ;;  %v2949_v46 = vadd.f32 %v6564_v55, %v2948_v56 }
0x17c8   :  { %v2975_v58 = vpop.permute.xlu1 %2974  ;;  %v2953_v14 = vsel %vm2952_vm1, %v6564_v55, %v2949_v46 }
0x17c9   :  { %v2980_v21 = vmul.f32 %v2975_v58, %v8189_v8  ;;  %v2958_v45 = vsel %vm2955_vm2, %v2957_v31, %v2953_v14 }
0x17cb   :  { %2984 = vrot.lane.b32.xlu1 %v2980_v21, %s7060_s6  ;;  %v3050_v58 = vpop.permute.xlu2 %3049 }
0x17cc   :  { %v3054_v21 = vmul.f32 %v3050_v58, %v8185_v17 }
0x17ce   :  { %2966 = vrot.lane.b32.xlu2 %v8195_v47, %s7060_s6 }
0x17d0   :  { %v2977_v11 = vpop.permute.xlu1 %2976 }
0x17d1   :  { %v2981_v63 = vmul.f32 %v2977_v11, %v2958_v45 }
0x17da   :  { %v3058_v30 = vpop.permute.xlu0 %3057 }
0x17db   :  { %v3063_v10 = vmul.f32 %v3058_v30, %v3025_v20 }
0x17dd   :  { %3067 = vrot.lane.b32.xlu0 %v3063_v10, %s7060_s6 }
0x17e2   :  { %v3048_v41 = vpop.permute.xlu0 %3047 }
0x17e3   :  { %v3053_v34 = vmul.f32 %v3048_v41, %v3025_v20 }
0x17e5   :  { %2964 = vrot.lane.b32.xlu0 %v2963_v16, %s7060_s6 }
0x17ed   :  { %2986 = vrot.lane.b32.xlu0 %v2981_v63, %s7060_s6 }
0x1820   :  { %v3070_v39 = vpop.permute.xlu2 %3069 }
0x1821   :  { %v3074_v33 = vadd.f32 %v3070_v39, %v3054_v21 }
0x1823   :  { %6565 = vtanh.f32 %v3074_v33  ;;  %v3115_v31 = vrot.slane %v3074_v33, 5 }
0x1828   :  { %v2967_v10 = vpop.permute.xlu2 %2966 }
0x1829   :  { %v6566_v7 = vpop.eup %6565  ;;  %v2971_v56 = vmul.f32 %v2967_v10, %v2958_v45 }
0x182a   :  { %3081 = vrot.lane.b32.xlu1 %v6566_v7, %s7060_s6 }
0x183d   :  { %v2985_v30 = vpop.permute.xlu1 %2984 }
0x184f   :  { %v3068_v50 = vpop.permute.xlu0 %3067 }
0x1850   :  { %v3073_v55 = vadd.f32 %v3068_v50, %v3053_v34 }
0x1852   :  { %6567 = vtanh.f32 %v3073_v55  ;;  %v3114_v14 = vrot.slane %v3073_v55, 6 }
0x1854   :  { %v3116_v11 = vsel %vm543_vm8, %v3115_v31, %v3114_v14 }
0x1857   :  { %v2965_v28 = vpop.permute.xlu0 %2964 }
0x1858   :  { %v6568_v6 = vpop.eup %6567  ;;  %v2970_v5 = vmul.f32 %v2965_v28, %v8189_v8 }
0x1859   :  { %3079 = vrot.lane.b32.xlu2 %v6568_v6, %s7060_s6 }
0x185a   :  { %v2990_v51 = vadd.f32 %v2985_v30, %v2970_v5 }
0x185c   :  { %6569 = vtanh.f32 %v2990_v51  ;;  %v3097_v63 = vrot.slane %v2990_v51, 1 }
0x185f   :  { %v2987_v16 = vpop.permute.xlu0 %2986 }
0x1860   :  { %v2991_v46 = vadd.f32 %v2987_v16, %v2971_v56 }
0x1862   :  { %v6570_v29 = vpop.eup %6569  ;;  %6571 = vtanh.f32 %v2991_v46  ;;  %v3098_v58 = vsel %vm543_vm8, %v2991_v46, %v3097_v63 }
0x1863   :  { %2996 = vrot.lane.b32.xlu0 %v6570_v29, %s7060_s6 }
0x1868   :  { %v6572_v18 = vpop.eup %6571 }
0x1869   :  { %2998 = vrot.lane.b32.xlu2 %v6572_v18, %s7060_s6 }
0x1871   :  { %3117 = vrot.lane.b32.xlu2 %v3116_v11, %s7064_s23 }
0x1879   :  { %3099 = vrot.lane.b32.xlu2 %v3098_v58, %s7064_s23 }
0x189c   :  { %v3082_v21 = vpop.permute.xlu1 %3081 }
0x189d   :  { %v3086_v39 = vmul.f32 %v3082_v21, %v8185_v17 }
0x189f   :  { %v3106_v34 = vrot.slane %v3086_v39, 5 }
0x18b3   :  { %v3080_v7 = vpop.permute.xlu2 %3079 }
0x18b4   :  { %v3085_v41 = vmul.f32 %v3080_v7, %v3025_v20 }
0x18b6   :  { %v3105_v50 = vrot.slane %v3085_v41, 6 }
0x18b8   :  { %v3107_v28 = vsel %vm543_vm8, %v3106_v34, %v3105_v50 }
0x18b9   :  { %3108 = vrot.lane.b32.xlu1 %v3107_v28, %s7063_s1 }
0x18c3   :  { %v2999_v33 = vpop.permute.xlu2 %2998 }
0x18c4   :  { %v3003_v5 = vmul.f32 %v2999_v33, %v2958_v45 }
0x18d5   :  { %v2997_v55 = vpop.permute.xlu0 %2996 }
0x18d6   :  { %v3002_v6 = vmul.f32 %v2997_v55, %v8189_v8 }
0x18d8   :  { %v3089_v30 = vrot.slane %v3002_v6, 1 }
0x18da   :  { %v3090_v51 = vsel %vm543_vm8, %v3003_v5, %v3089_v30 }
0x18db   :  { %3091 = vrot.lane.b32.xlu0 %v3090_v51, %s7063_s1 }
0x192b   :  { %v8219_v10 = vpop.permute.xlu1 %3108 }
0x192c   :  { %v8225_v17 = vsel %vm260_vm4, %v8219_v10, %v8161_v27 }
0x192d   :  { %6099 = vmatmul.msk.f32.vlgmr.msra.gmra.mxu3 %vm335_vm11, %v8225_v17 }
0x192e   :  { %4309 = vmatpush.msra.mxu3 %v8026_v22 }
0x1930   :  { %4310 = vmatpush.msra.mxu3 %v8028_v1 }
0x1932   :  { %4311 = vmatpush.msra.mxu3 %v8033_v2 }
0x1934   :  { %4312 = vmatpush.msra.mxu3 %v8049_v9 }
0x194d   :  { %v3092_v8 = vpop.permute.xlu0 %3091 }
0x194e   :  { %v8236_v20 = vsel %vm240_vm5, %v3092_v8, %v8147_v60  ;;  %v3121_v45 = vsel %vm240_vm5, %v3092_v8, 0.0 }
0x194f   :  { %v3123_v56 = vrot.slane %v3121_v45, 1  ;;  %3125 = vst.msk [vmem:[#allocation3 + $0x1] sm:$0x1] %vm9162_vm14, %v3121_v45  ;;  %6098 = vmatmul.msk.f32.vlgmr.msrb.gmra.mxu2 %vm335_vm11, %v8236_v20 }
0x1950   :  { %4279 = vmatpush.msrb.mxu2 %v8031_v54  ;;  %v3118_v54 = vpop.permute.xlu2 %3117 }
0x1951   :  { %3126 = vst.msk [vmem:[#allocation3 + $0x9] sm:$0x1] %vm9163_vm15, %v3123_v56 }
0x1952   :  { %4280 = vmatpush.msrb.mxu2 %v8037_v4  ;;  %v8255_v4 = vsel %vm260_vm4, %v3118_v54, %v8179_v43 }
0x1954   :  { %4281 = vmatpush.msrb.mxu2 %v8053_v52  ;;  %v3324_v52 = vrot.slane %v8255_v4, 3 }
0x1956   :  { %4282 = vmatpush.msrb.mxu2 %v8056_v48  ;;  %v3325_v48 = vrot.slane %v8255_v4, 4 }
0x1958   :  { %v3100_v58 = vpop.permute.xlu2 %3099 }
0x1959   :  { %v8268_v21 = vsel %vm240_vm5, %v3100_v58, %v8195_v47 }
0x195a   :  { %v3241_v39 = vrot.slane %v8268_v21, 6 }
0x19b0   :  { %v3190_v22 = vpop.f32.mrf.mxu3 }
0x19b1   :  { %v3194_v1 = vrot.slane %v3190_v22, 3  ;;  %v3195_v2 = vrot.slane %v3190_v22, 4 }
0x19b3   :  { %v3198_v9 = vadd.f32 %v3194_v1, %v8103_v0  ;;  %v3199_v60 = vadd.f32 %v3195_v2, %v8108_v38 }
0x19b5   :  { %6573 = vtanh.f32 %v3198_v9  ;;  %v6102_v7 = vmul.f32 -1.442695, %v3198_v9  ;;  %v6103_v41 = vmul.f32 -1.442695, %v3199_v60 }
0x19b6   :  { %6575 = vtanh.f32 %v3199_v60 }
0x19bb   :  { %v6574_v16 = vpop.eup %6573 }
0x19bc   :  { %v6576_v46 = vpop.eup %6575  ;;  %3336 = vrot.lane.b32.xlu1 %v6574_v16, %s7060_s6 }
0x19bd   :  { %3338 = vrot.lane.b32.xlu0 %v6576_v46, %s7060_s6 }
0x19c4   :  { %3326 = vrot.lane.b32.xlu1 %v3324_v52, %s7060_s6 }
0x19c5   :  { %3328 = vrot.lane.b32.xlu0 %v3325_v48, %s7060_s6 }
0x19d2   :  { %v3160_v29 = vpop.f32.mrf.mxu2 }
0x19d3   :  { %v3164_v18 = vrot.slane %v3160_v29, 6  ;;  %v3165_v14 = vrot.slane %v3160_v29, 7 }
0x19d5   :  { %v3168_v31 = vadd.f32 %v3164_v18, %v8113_v49  ;;  %v3169_v11 = vadd.f32 %v3165_v14, %v8106_v44 }
0x19d7   :  { %6577 = vtanh.f32 %v3168_v31  ;;  %v6100_v50 = vmul.f32 -1.442695, %v3168_v31  ;;  %v6101_v2 = vmul.f32 -1.442695, %v3169_v11 }
0x19d8   :  { %6579 = vtanh.f32 %v3169_v11 }
0x19d9   :  { %6581 = vpow2.f32 %v6102_v7 }
0x19da   :  { %6583 = vpow2.f32 %v6103_v41 }
0x19db   :  { %6585 = vpow2.f32 %v6100_v50 }
0x19dd   :  { %v6578_v63 = vpop.eup %6577 }
0x19de   :  { %v6580_v43 = vpop.eup %6579  ;;  %3253 = vrot.lane.b32.xlu2 %v6578_v63, %s7060_s6 }
0x19df   :  { %3255 = vrot.lane.b32.xlu1 %v6580_v43, %s7060_s6  ;;  %v6582_v34 = vpop.eup %6581 }
0x19e0   :  { %v6584_v28 = vpop.eup %6583  ;;  %v3289_v33 = vadd.f32 1.0, %v6582_v34 }
0x19e1   :  { %v3290_v55 = vadd.f32 1.0, %v6584_v28  ;;  %v6586_v6 = vpop.eup %6585 }
0x19e2   :  { %6587 = vrcp.f32 %v3289_v33  ;;  %v3206_v47 = vadd.f32 1.0, %v6586_v6  ;;  %v3302_v46 = vand.u32 2147483648, %v3289_v33  ;;  %vm3296_vm12 = vweird.f32 %v3289_v33 }
0x19e3   :  { %6589 = vrcp.f32 %v3290_v55  ;;  %v3300_v52 = vand.u32 2147483647, %v3289_v33  ;;  %v3317_v48 = vand.u32 2147483648, %v3290_v55  ;;  %vm3311_vm1 = vweird.f32 %v3290_v55 }
0x19e4   :  { %6591 = vrcp.f32 %v3206_v47  ;;  %v3315_v18 = vand.u32 2147483647, %v3290_v55  ;;  %v3303_v31 = vor.u32 1.1754944e-38, %v3302_v46  ;;  %v3219_v6 = vand.u32 2147483648, %v3206_v47 }
0x19e5   :  { %6593 = vpow2.f32 %v6101_v2  ;;  %vm3301_vm14 = vcmp.eq.f32.partialorder %v3300_v52, 8.507059e+37  ;;  %v3318_v11 = vor.u32 1.1754944e-38, %v3317_v48 }
0x19e6   :  { %vm3316_vm15 = vcmp.eq.f32.partialorder %v3315_v18, 8.507059e+37 }
0x19e7   :  { %3243 = vrot.lane.b32.xlu1 %v3241_v39, %s7060_s6 }
0x19e8   :  { %v6588_v5 = vpop.eup %6587 }
0x19e9   :  { %v6590_v30 = vpop.eup %6589  ;;  %v3292_v51 = vmul.f32 %v6588_v5, %v3289_v33  ;;  %vm3297_vm13 = vweird.f32 %v6588_v5 }
0x19ea   :  { %v3307_v8 = vmul.f32 %v6590_v30, %v3290_v55  ;;  %v6592_v22 = vpop.eup %6591  ;;  %vm3312_vm3 = vweird.f32 %v6590_v30  ;;  %vm3298_vm0 = vmor %vm3296_vm12, %vm3297_vm13 }
0x19eb   :  { %v3293_v45 = vsub.f32 1.0, %v3292_v51  ;;  %v3209_v60 = vmul.f32 %v6592_v22, %v3206_v47  ;;  %vm3313_vm2 = vmor %vm3311_vm1, %vm3312_vm3  ;;  %v6594_v58 = vpop.eup %6593  ;;  %vm3214_vm13 = vweird.f32 %v6592_v22  ;;  %vm3213_vm3 = vweird.f32 %v3206_v47 }
0x19ec   :  { %v3308_v56 = vsub.f32 1.0, %v3307_v8  ;;  %v3207_v33 = vadd.f32 1.0, %v6594_v58  ;;  %vm3215_vm12 = vmor %vm3213_vm3, %vm3214_vm13  ;;  %v3220_v51 = vor.u32 1.1754944e-38, %v3219_v6  ;;  %v3242_v8 = vrot.slane %v8268_v21, 7 }
0x19ed   :  { %v3294_v1 = vmul.f32 %v6588_v5, %v3293_v45  ;;  %v3210_v29 = vsub.f32 1.0, %v3209_v60  ;;  %vm9164_vm13 = vcmask 253952  }
0x19ee   :  { %v3309_v9 = vmul.f32 %v6590_v30, %v3308_v56  ;;  %6595 = vrcp.f32 %v3207_v33  ;;  %vm9165_vm3 = vmmov %vm9164_vm13 }
0x19ef   :  { %v3295_v16 = vadd.f32 %v6588_v5, %v3294_v1  ;;  %v3211_v43 = vmul.f32 %v6592_v22, %v3210_v29 }
0x19f0   :  { %v3310_v54 = vadd.f32 %v6590_v30, %v3309_v9 }
0x19f1   :  { %v3299_v14 = vsel %vm3298_vm0, %v6588_v5, %v3295_v16  ;;  %v3212_v55 = vadd.f32 %v6592_v22, %v3211_v43  ;;  %v3217_v5 = vand.u32 2147483647, %v3206_v47 }
0x19f2   :  { %v3314_v63 = vsel %vm3313_vm2, %v6590_v30, %v3310_v54  ;;  %v8272_v7 = vsel %vm3301_vm14, %v3303_v31, %v3299_v14  ;;  %vm3228_vm2 = vweird.f32 %v3207_v33  ;;  %v3232_v54 = vand.u32 2147483647, %v3207_v33 }
0x19f3   :  { %v8275_v34 = vsel %vm3316_vm15, %v3318_v11, %v3314_v63  ;;  %v3216_v30 = vsel %vm3215_vm12, %v6592_v22, %v3212_v55  ;;  %vm3218_vm0 = vcmp.eq.f32.partialorder %v3217_v5, 8.507059e+37  ;;  %v3234_v22 = vand.u32 2147483648, %v3207_v33 }
0x19f4   :  { %v8281_v45 = vsel %vm3218_vm0, %v3220_v51, %v3216_v30  ;;  %v6596_v2 = vpop.eup %6595  ;;  %vm3233_vm15 = vcmp.eq.f32.partialorder %v3232_v54, 8.507059e+37 }
0x19f5   :  { %v3224_v9 = vmul.f32 %v6596_v2, %v3207_v33  ;;  %vm3229_vm1 = vweird.f32 %v6596_v2  ;;  %v3235_v48 = vor.u32 1.1754944e-38, %v3234_v22 }
0x19f6   :  { %vm3230_vm14 = vmor %vm3228_vm2, %vm3229_vm1 }
0x19f7   :  { %v3225_v60 = vsub.f32 1.0, %v3224_v9 }
0x19f9   :  { %v3226_v47 = vmul.f32 %v6596_v2, %v3225_v60 }
0x19fb   :  { %v3227_v46 = vadd.f32 %v6596_v2, %v3226_v47 }
0x19fd   :  { %v3231_v52 = vsel %vm3230_vm14, %v6596_v2, %v3227_v46 }
0x19fe   :  { %v3236_v29 = vsel %vm3233_vm15, %v3235_v48, %v3231_v52 }
0x1a2e   :  { %v3337_v39 = vpop.permute.xlu1 %3336 }
0x1a2f   :  { %v3342_v41 = vmul.f32 %v3337_v39, %v8272_v7  ;;  %v3339_v50 = vpop.permute.xlu0 %3338 }
0x1a30   :  { %v3343_v28 = vmul.f32 %v3339_v50, %v8275_v34 }
0x1a31   :  { %3346 = vrot.lane.b32.xlu0 %v3342_v41, %s7060_s6 }
0x1a32   :  { %3348 = vrot.lane.b32.xlu2 %v3343_v28, %s7060_s6 }
0x1a36   :  { %v3327_v16 = vpop.permute.xlu1 %3326 }
0x1a37   :  { %v3329_v31 = vpop.permute.xlu0 %3328  ;;  %v3332_v55 = vmul.f32 %v3327_v16, %v8272_v7 }
0x1a38   :  { %v3254_v56 = vpop.permute.xlu2 %3253  ;;  %v3333_v63 = vmul.f32 %v3329_v31, %v8275_v34 }
0x1a39   :  { %v3259_v1 = vmul.f32 %v3254_v56, %v8281_v45  ;;  %3245 = vrot.lane.b32.xlu0 %v3242_v8, %s7060_s6 }
0x1a3b   :  { %3263 = vrot.lane.b32.xlu2 %v3259_v1, %s7060_s6 }
0x1a51   :  { %v3256_v18 = vpop.permute.xlu1 %3255 }
0x1a52   :  { %v3260_v14 = vmul.f32 %v3256_v18, %v3236_v29 }
0x1a54   :  { %3265 = vrot.lane.b32.xlu1 %v3260_v14, %s7060_s6 }
0x1a59   :  { %v3244_v58 = vpop.permute.xlu1 %3243 }
0x1a5a   :  { %v3249_v39 = vmul.f32 %v3244_v58, %v8281_v45 }
0x1a8c   :  { %v3349_v11 = vpop.permute.xlu2 %3348 }
0x1a8d   :  { %v3353_v43 = vadd.f32 %v3349_v11, %v3333_v63 }
0x1a8f   :  { %6597 = vtanh.f32 %v3353_v43  ;;  %v3396_v60 = vrot.slane %v3353_v43, 4 }
0x1a95   :  { %v6598_v41 = vpop.eup %6597  ;;  %v3264_v50 = vpop.permute.xlu2 %3263 }
0x1a96   :  { %3360 = vrot.lane.b32.xlu2 %v6598_v41, %s7060_s6  ;;  %v3269_v28 = vadd.f32 %v3264_v50, %v3249_v39 }
0x1a98   :  { %6599 = vtanh.f32 %v3269_v28  ;;  %v3377_v46 = vrot.slane %v3269_v28, 2 }
0x1a9e   :  { %v6600_v33 = vpop.eup %6599 }
0x1a9f   :  { %3275 = vrot.lane.b32.xlu1 %v6600_v33, %s7060_s6  ;;  %v6837_v33 = vld [vmem:[#allocation15 + $0x8] sm:$0xff] }
0x1aa3   :  { %v3347_v6 = vpop.permute.xlu0 %3346 }
0x1aa4   :  { %v3352_v5 = vadd.f32 %v3347_v6, %v3332_v55  ;;  %v6838_v55 = vld [vmem:[#allocation15] sm:$0xff] }
0x1aa6   :  { %6601 = vtanh.f32 %v3352_v5  ;;  %v3395_v9 = vrot.slane %v3352_v5, 5 }
0x1aa8   :  { %v3397_v47 = vsel %vm543_vm8, %v3396_v60, %v3395_v9 }
0x1aab   :  { %v3246_v51 = vpop.permute.xlu0 %3245 }
0x1aac   :  { %v6602_v30 = vpop.eup %6601  ;;  %v3250_v8 = vmul.f32 %v3246_v51, %v3236_v29  ;;  %v6839_v51 = vld [vmem:[#allocation13 + $0x18] sm:$0xff] }
0x1aad   :  { %3358 = vrot.lane.b32.xlu0 %v6602_v30, %s7060_s6 }
0x1ac6   :  { %v3266_v56 = vpop.permute.xlu1 %3265 }
0x1ac7   :  { %v3270_v1 = vadd.f32 %v3266_v56, %v3250_v8  ;;  %v6840_v8 = vld [vmem:[#allocation13 + $0x10] sm:$0xff]  ;;  %v6841_v56 = vld [vmem:[#allocation13 + $0x8] sm:$0xff] }
0x1ac9   :  { %6603 = vtanh.f32 %v3270_v1  ;;  %v3378_v16 = vrot.slane %v3270_v1, 1  ;;  %v6842_v1 = vld [vmem:[#allocation13] sm:$0xff] }
0x1acb   :  { %v3379_v22 = vsel %vm543_vm8, %v3378_v16, %v3377_v46 }
0x1acf   :  { %v6604_v2 = vpop.eup %6603 }
0x1ad0   :  { %3277 = vrot.lane.b32.xlu0 %v6604_v2, %s7060_s6 }
0x1ad8   :  { %3398 = vrot.lane.b32.xlu0 %v3397_v47, %s7064_s23 }
0x1ae0   :  { %3380 = vrot.lane.b32.xlu0 %v3379_v22, %s7064_s23 }
0x1af0   :  { %v3361_v54 = vpop.permute.xlu2 %3360 }
0x1af1   :  { %v3365_v52 = vmul.f32 %v3361_v54, %v8275_v34 }
0x1af3   :  { %v3387_v14 = vrot.slane %v3365_v52, 4 }
0x1b11   :  { %v3276_v11 = vpop.permute.xlu1 %3275 }
0x1b12   :  { %v3281_v43 = vmul.f32 %v3276_v11, %v8281_v45  ;;  %v6835_v45 = vld [vmem:[#allocation15 + $0x18] sm:$0xff] }
0x1b14   :  { %v3368_v41 = vrot.slane %v3281_v43, 2 }
0x1b1f   :  { %v3359_v48 = vpop.permute.xlu0 %3358 }
0x1b20   :  { %v3364_v18 = vmul.f32 %v3359_v48, %v8272_v7 }
0x1b22   :  { %v3386_v31 = vrot.slane %v3364_v18, 5 }
0x1b24   :  { %v3388_v63 = vsel %vm543_vm8, %v3387_v14, %v3386_v31 }
0x1b25   :  { %3389 = vrot.lane.b32.xlu2 %v3388_v63, %s7063_s1 }
0x1b42   :  { %v3278_v58 = vpop.permute.xlu0 %3277 }
0x1b43   :  { %v3282_v39 = vmul.f32 %v3278_v58, %v3236_v29  ;;  %v6836_v29 = vld [vmem:[#allocation15 + $0x10] sm:$0xff] }
0x1b45   :  { %v3369_v50 = vrot.slane %v3282_v39, 1 }
0x1b47   :  { %v3370_v28 = vsel %vm543_vm8, %v3369_v50, %v3368_v41 }
0x1b48   :  { %3371 = vrot.lane.b32.xlu1 %v3370_v28, %s7063_s1 }
0x1b4a   :  { %v3399_v22 = vpop.permute.xlu0 %3398 }
0x1b4b   :  { %v8333_v54 = vsel %vm256_vm6, %v3399_v22, %v8255_v4 }
0x1b4c   :  { %v3605_v52 = vrot.slane %v8333_v54, 4  ;;  %v3606_v48 = vrot.slane %v8333_v54, 5 }
0x1b52   :  { %v3381_v50 = vpop.permute.xlu0 %3380 }
0x1b53   :  { %v8346_v28 = vsel %vm244_vm7, %v3381_v50, %v8268_v21 }
0x1b7f   :  { %v8305_v34 = vpop.permute.xlu2 %3389 }
0x1b80   :  { %v8311_v7 = vsel %vm256_vm6, %v8305_v34, %v8225_v17 }
0x1b81   :  { %6105 = vmatmul.msk.f32.vlgmr.msrb.gmra.mxu1 %vm335_vm11, %v8311_v7 }
0x1b82   :  { %4586 = vmatpush.msrb.mxu1 %v6835_v45  ;;  %v3522_v45 = vrot.slane %v8346_v28, 5 }
0x1b84   :  { %4587 = vmatpush.msrb.mxu1 %v6836_v29 }
0x1b86   :  { %4588 = vmatpush.msrb.mxu1 %v6837_v33 }
0x1b88   :  { %4589 = vmatpush.msrb.mxu1 %v6838_v55 }
0x1bba   :  { %v3372_v6 = vpop.permute.xlu1 %3371 }
0x1bbb   :  { %v8318_v5 = vsel %vm244_vm7, %v3372_v6, %v8236_v20  ;;  %v3402_v17 = vsel %vm244_vm7, %v3372_v6, 0.0 }
0x1bbc   :  { %v3404_v30 = vrot.slane %v3402_v17, 1  ;;  %3406 = vst.msk [vmem:[#allocation3 + $0x2] sm:$0x1] %vm9164_vm13, %v3402_v17  ;;  %6104 = vmatmul.msk.f32.vlgmr.msra.gmra.mxu0 %vm335_vm11, %v8318_v5 }
0x1bbd   :  { %4556 = vmatpush.msra.mxu0 %v6839_v51 }
0x1bbe   :  { %3407 = vst.msk [vmem:[#allocation3 + $0xa] sm:$0x1] %vm9165_vm3, %v3404_v30 }
0x1bbf   :  { %4557 = vmatpush.msra.mxu0 %v6840_v8 }
0x1bc1   :  { %4558 = vmatpush.msra.mxu0 %v6841_v56 }
0x1bc3   :  { %4559 = vmatpush.msra.mxu0 %v6842_v1 }
0x1bfe   :  { %v3471_v20 = vpop.f32.mrf.mxu1 }
0x1bff   :  { %v3475_v2 = vrot.slane %v3471_v20, 4  ;;  %v3476_v9 = vrot.slane %v3471_v20, 5 }
0x1c01   :  { %v3479_v60 = vadd.f32 %v3475_v2, %v8103_v0  ;;  %v3480_v47 = vadd.f32 %v3476_v9, %v8108_v38 }
0x1c03   :  { %6605 = vtanh.f32 %v3479_v60  ;;  %v6108_v18 = vmul.f32 -1.442695, %v3479_v60  ;;  %v6109_v33 = vmul.f32 -1.442695, %v3480_v47 }
0x1c04   :  { %6607 = vtanh.f32 %v3480_v47 }
0x1c05   :  { %6609 = vpow2.f32 %v6108_v18 }
0x1c09   :  { %v6606_v16 = vpop.eup %6605 }
0x1c0a   :  { %v6608_v46 = vpop.eup %6607  ;;  %3617 = vrot.lane.b32.xlu2 %v6606_v16, %s7060_s6 }
0x1c0b   :  { %3619 = vrot.lane.b32.xlu1 %v6608_v46, %s7060_s6  ;;  %v6610_v4 = vpop.eup %6609  ;;  %v3523_v46 = vrot.slane %v8346_v28, 6 }
0x1c0c   :  { %v3570_v39 = vadd.f32 1.0, %v6610_v4 }
0x1c0e   :  { %v3583_v56 = vand.u32 2147483648, %v3570_v39  ;;  %vm3577_vm0 = vweird.f32 %v3570_v39  ;;  %v3581_v1 = vand.u32 2147483647, %v3570_v39 }
0x1c10   :  { %v3584_v20 = vor.u32 1.1754944e-38, %v3583_v56  ;;  %vm3582_vm2 = vcmp.eq.f32.partialorder %v3581_v1, 8.507059e+37 }
0x1c12   :  { %3607 = vrot.lane.b32.xlu2 %v3605_v52, %s7060_s6 }
0x1c13   :  { %3609 = vrot.lane.b32.xlu1 %v3606_v48, %s7060_s6 }
0x1c39   :  { %v3441_v14 = vpop.f32.mrf.mxu0 }
0x1c3a   :  { %v3445_v31 = vrot.slane %v3441_v14, 5  ;;  %v3446_v63 = vrot.slane %v3441_v14, 6 }
0x1c3c   :  { %v3449_v11 = vadd.f32 %v3445_v31, %v8113_v49  ;;  %v3450_v43 = vadd.f32 %v3446_v63, %v8106_v44 }
0x1c3e   :  { %6611 = vtanh.f32 %v3449_v11  ;;  %v6107_v48 = vmul.f32 -1.442695, %v3450_v43 }
0x1c3f   :  { %6613 = vtanh.f32 %v3450_v43 }
0x1c40   :  { %6615 = vrcp.f32 %v3570_v39 }
0x1c41   :  { %6617 = vpow2.f32 %v6109_v33 }
0x1c44   :  { %v6612_v58 = vpop.eup %6611 }
0x1c45   :  { %v6614_v41 = vpop.eup %6613  ;;  %3534 = vrot.lane.b32.xlu0 %v6612_v58, %s7060_s6 }
0x1c46   :  { %3536 = vrot.lane.b32.xlu2 %v6614_v41, %s7060_s6  ;;  %v6616_v29 = vpop.eup %6615 }
0x1c47   :  { %v3573_v55 = vmul.f32 %v6616_v29, %v3570_v39  ;;  %v6618_v30 = vpop.eup %6617  ;;  %vm3578_vm12 = vweird.f32 %v6616_v29 }
0x1c48   :  { %v3571_v51 = vadd.f32 1.0, %v6618_v30  ;;  %vm3579_vm1 = vmor %vm3577_vm0, %vm3578_vm12 }
0x1c49   :  { %v3574_v6 = vsub.f32 1.0, %v3573_v55 }
0x1c4a   :  { %6619 = vrcp.f32 %v3571_v51  ;;  %v3598_v14 = vand.u32 2147483648, %v3571_v51  ;;  %vm3592_vm15 = vweird.f32 %v3571_v51  ;;  %v3596_v31 = vand.u32 2147483647, %v3571_v51 }
0x1c4b   :  { %v3575_v17 = vmul.f32 %v6616_v29, %v3574_v6  ;;  %6621 = vpow2.f32 %v6107_v48 }
0x1c4c   :  { %v3599_v4 = vor.u32 1.1754944e-38, %v3598_v14  ;;  %vm3597_vm3 = vcmp.eq.f32.partialorder %v3596_v31, 8.507059e+37 }
0x1c4d   :  { %v3576_v8 = vadd.f32 %v6616_v29, %v3575_v17 }
0x1c4e   :  { %3524 = vrot.lane.b32.xlu2 %v3522_v45, %s7060_s6 }
0x1c4f   :  { %v3580_v21 = vsel %vm3579_vm1, %v6616_v29, %v3576_v8  ;;  %v6106_v29 = vmul.f32 -1.442695, %v3449_v11 }
0x1c50   :  { %v8350_v9 = vsel %vm3582_vm2, %v3584_v20, %v3580_v21  ;;  %v6620_v47 = vpop.eup %6619 }
0x1c51   :  { %v3588_v16 = vmul.f32 %v6620_v47, %v3571_v51  ;;  %vm3593_vm14 = vweird.f32 %v6620_v47  ;;  %v6622_v58 = vpop.eup %6621 }
0x1c52   :  { %vm3594_vm13 = vmor %vm3592_vm15, %vm3593_vm14  ;;  %v3488_v45 = vadd.f32 1.0, %v6622_v58 }
0x1c53   :  { %v3589_v22 = vsub.f32 1.0, %v3588_v16 }
0x1c54   :  { %6623 = vrcp.f32 %v3488_v45  ;;  %v3515_v56 = vand.u32 2147483648, %v3488_v45  ;;  %vm3509_vm0 = vweird.f32 %v3488_v45  ;;  %v3513_v1 = vand.u32 2147483647, %v3488_v45 }
0x1c55   :  { %v3590_v52 = vmul.f32 %v6620_v47, %v3589_v22  ;;  %6625 = vpow2.f32 %v6106_v29 }
0x1c56   :  { %v3516_v20 = vor.u32 1.1754944e-38, %v3515_v56  ;;  %vm3514_vm2 = vcmp.eq.f32.partialorder %v3513_v1, 8.507059e+37 }
0x1c57   :  { %v3591_v18 = vadd.f32 %v6620_v47, %v3590_v52 }
0x1c59   :  { %v3595_v63 = vsel %vm3594_vm13, %v6620_v47, %v3591_v18 }
0x1c5a   :  { %v8356_v41 = vsel %vm3597_vm3, %v3599_v4, %v3595_v63  ;;  %v6624_v43 = vpop.eup %6623 }
0x1c5b   :  { %v3505_v33 = vmul.f32 %v6624_v43, %v3488_v45  ;;  %v6626_v6 = vpop.eup %6625  ;;  %vm3510_vm12 = vweird.f32 %v6624_v43 }
0x1c5c   :  { %v3487_v30 = vadd.f32 1.0, %v6626_v6  ;;  %vm3511_vm1 = vmor %vm3509_vm0, %vm3510_vm12  ;;  %vm9166_vm12 = vcmp.eq.s32.totalorder %v7669_v13, 1 }
0x1c5d   :  { %v3506_v55 = vsub.f32 1.0, %v3505_v33  ;;  %vm9167_vm0 = vmmov %vm9166_vm12 }
0x1c5e   :  { %6627 = vrcp.f32 %v3487_v30  ;;  %v3500_v48 = vand.u32 2147483648, %v3487_v30  ;;  %vm3494_vm15 = vweird.f32 %v3487_v30  ;;  %v3498_v18 = vand.u32 2147483647, %v3487_v30 }
0x1c5f   :  { %v3507_v17 = vmul.f32 %v6624_v43, %v3506_v55 }
0x1c60   :  { %v3501_v31 = vor.u32 1.1754944e-38, %v3500_v48  ;;  %vm3499_vm3 = vcmp.eq.f32.partialorder %v3498_v18, 8.507059e+37 }
0x1c61   :  { %v3508_v8 = vadd.f32 %v6624_v43, %v3507_v17 }
0x1c63   :  { %v3512_v21 = vsel %vm3511_vm1, %v6624_v43, %v3508_v8  ;;  %vm9168_vm1 = vcmask 253952  }
0x1c64   :  { %v3618_v2 = vpop.permute.xlu2 %3617 }
0x1c65   :  { %v3623_v60 = vmul.f32 %v3618_v2, %v8350_v9  ;;  %v8360_v2 = vsel %vm3514_vm2, %v3516_v20, %v3512_v21  ;;  %vm9169_vm2 = vmmov %vm9168_vm1 }
0x1c67   :  { %3627 = vrot.lane.b32.xlu1 %v3623_v60, %s7060_s6  ;;  %v6628_v60 = vpop.eup %6627 }
0x1c68   :  { %v3490_v16 = vmul.f32 %v6628_v60, %v3487_v30  ;;  %vm3495_vm14 = vweird.f32 %v6628_v60 }
0x1c69   :  { %vm3496_vm13 = vmor %vm3494_vm15, %vm3495_vm14 }
0x1c6a   :  { %vm9170_vm14 = vmmov %vm9167_vm0 }
0x1c6c   :  { %v3608_v51 = vpop.permute.xlu2 %3607 }
0x1c6f   :  { %3526 = vrot.lane.b32.xlu1 %v3523_v46, %s7060_s6  ;;  %v3491_v46 = vsub.f32 1.0, %v3490_v16 }
0x1c71   :  { %v3492_v22 = vmul.f32 %v6628_v60, %v3491_v46 }
0x1c73   :  { %v3493_v52 = vadd.f32 %v6628_v60, %v3492_v22 }
0x1c75   :  { %v3497_v14 = vsel %vm3496_vm13, %v6628_v60, %v3493_v52 }
0x1c76   :  { %v3502_v63 = vsel %vm3499_vm3, %v3501_v31, %v3497_v14 }
0x1c7d   :  { %v3620_v39 = vpop.permute.xlu1 %3619 }
0x1c7e   :  { %v3624_v50 = vmul.f32 %v3620_v39, %v8356_v41 }
0x1c80   :  { %3629 = vrot.lane.b32.xlu0 %v3624_v50, %s7060_s6  ;;  %v3613_v50 = vmul.f32 %v3608_v51, %v8350_v9 }
0x1c85   :  { %v3610_v39 = vpop.permute.xlu1 %3609 }
0x1c86   :  { %v3614_v33 = vmul.f32 %v3610_v39, %v8356_v41 }
0x1ca0   :  { %v3537_v11 = vpop.permute.xlu2 %3536 }
0x1ca1   :  { %v3541_v47 = vmul.f32 %v3537_v11, %v8360_v2 }
0x1ca3   :  { %3546 = vrot.lane.b32.xlu2 %v3541_v47, %s7060_s6 }
0x1ca8   :  { %v3525_v17 = vpop.permute.xlu2 %3524 }
0x1ca9   :  { %v3530_v47 = vmul.f32 %v3525_v17, %v3502_v63 }
0x1cb7   :  { %v3535_v4 = vpop.permute.xlu0 %3534 }
0x1cb8   :  { %v3540_v58 = vmul.f32 %v3535_v4, %v3502_v63 }
0x1cba   :  { %3544 = vrot.lane.b32.xlu0 %v3540_v58, %s7060_s6 }
0x1cd9   :  { %v3628_v45 = vpop.permute.xlu1 %3627 }
0x1cda   :  { %v3633_v43 = vadd.f32 %v3628_v45, %v3613_v50 }
0x1cdc   :  { %6629 = vtanh.f32 %v3633_v43  ;;  %v3676_v11 = vrot.slane %v3633_v43, 4 }
0x1ce1   :  { %v3527_v30 = vpop.permute.xlu1 %3526 }
0x1ce2   :  { %v6630_v29 = vpop.eup %6629  ;;  %v3531_v56 = vmul.f32 %v3527_v30, %v8360_v2 }
0x1ce3   :  { %3639 = vrot.lane.b32.xlu1 %v6630_v29, %s7060_s6 }
0x1cf2   :  { %v3630_v55 = vpop.permute.xlu0 %3629 }
0x1cf3   :  { %v3634_v6 = vadd.f32 %v3630_v55, %v3614_v33 }
0x1cf5   :  { %6631 = vtanh.f32 %v3634_v6  ;;  %v3677_v20 = vrot.slane %v3634_v6, 3 }
0x1cf7   :  { %v3678_v60 = vsel %vm543_vm8, %v3677_v20, %v3676_v11 }
0x1cfb   :  { %v6632_v8 = vpop.eup %6631 }
0x1cfc   :  { %3641 = vrot.lane.b32.xlu0 %v6632_v8, %s7060_s6 }
0x1cfd   :  { %v3547_v1 = vpop.permute.xlu2 %3546 }
0x1cfe   :  { %v3551_v51 = vadd.f32 %v3547_v1, %v3531_v56 }
0x1d00   :  { %6633 = vtanh.f32 %v3551_v51  ;;  %v3659_v22 = vrot.slane %v3551_v51, 2 }
0x1d06   :  { %v6634_v21 = vpop.eup %6633 }
0x1d07   :  { %3558 = vrot.lane.b32.xlu1 %v6634_v21, %s7060_s6 }
0x1d0f   :  { %3679 = vrot.lane.b32.xlu1 %v3678_v60, %s7064_s23 }
0x1d2c   :  { %v3545_v16 = vpop.permute.xlu0 %3544 }
0x1d2d   :  { %v3550_v46 = vadd.f32 %v3545_v16, %v3530_v47 }
0x1d2f   :  { %6635 = vtanh.f32 %v3550_v46  ;;  %v3658_v52 = vrot.slane %v3550_v46, 3 }
0x1d31   :  { %v3660_v48 = vsel %vm543_vm8, %v3659_v22, %v3658_v52 }
0x1d32   :  { %3661 = vrot.lane.b32.xlu1 %v3660_v48, %s7064_s23 }
0x1d35   :  { %v6636_v18 = vpop.eup %6635 }
0x1d36   :  { %3556 = vrot.lane.b32.xlu2 %v6636_v18, %s7060_s6 }
0x1d55   :  { %v3640_v14 = vpop.permute.xlu1 %3639 }
0x1d56   :  { %v3645_v31 = vmul.f32 %v3640_v14, %v8350_v9 }
0x1d58   :  { %v3667_v39 = vrot.slane %v3645_v31, 4 }
0x1d6e   :  { %v3642_v4 = vpop.permute.xlu0 %3641 }
0x1d6f   :  { %v3646_v58 = vmul.f32 %v3642_v4, %v8356_v41 }
0x1d71   :  { %v3668_v50 = vrot.slane %v3646_v58, 3 }
0x1d73   :  { %v3669_v45 = vsel %vm543_vm8, %v3668_v50, %v3667_v39 }
0x1d74   :  { %3670 = vrot.lane.b32.xlu0 %v3669_v45, %s7063_s1 }
0x1d79   :  { %v3559_v43 = vpop.permute.xlu1 %3558 }
0x1d7a   :  { %v3563_v29 = vmul.f32 %v3559_v43, %v8360_v2 }
0x1d7c   :  { %v3650_v6 = vrot.slane %v3563_v29, 2 }
0x1d81   :  { %v3680_v16 = vpop.permute.xlu1 %3679 }
0x1d82   :  { %v8412_v52 = vsel %vm252_vm10, %v3680_v16, %v8333_v54 }
0x1d83   :  { %v3886_v18 = vrot.slane %v8412_v52, 5  ;;  %v3887_v14 = vrot.slane %v8412_v52, 6 }
0x1d90   :  { %v3557_v33 = vpop.permute.xlu2 %3556 }
0x1d91   :  { %v3562_v55 = vmul.f32 %v3557_v33, %v3502_v63 }
0x1d93   :  { %v3649_v17 = vrot.slane %v3562_v55, 3 }
0x1d95   :  { %v3651_v30 = vsel %vm543_vm8, %v3650_v6, %v3649_v17 }
0x1d96   :  { %3652 = vrot.lane.b32.xlu2 %v3651_v30, %s7063_s1 }
0x1da4   :  { %v3662_v58 = vpop.permute.xlu1 %3661 }
0x1da5   :  { %v8424_v54 = vsel %vm9170_vm14, %v3662_v58, %v8346_v28 }
0x1da6   :  { %v3803_v39 = vrot.slane %v8424_v54, 4 }
0x1de6   :  { %v8383_v9 = vpop.permute.xlu0 %3670 }
0x1de7   :  { %v8389_v41 = vsel %vm252_vm10, %v8383_v9, %v8311_v7 }
0x1de8   :  { %6111 = vmatmul.msk.f32.vlgmr.msrb.gmra.mxu3 %vm335_vm11, %v8389_v41 }
0x1df0   :  { %v3653_v2 = vpop.permute.xlu2 %3652 }
0x1df1   :  { %v8396_v63 = vsel %vm9166_vm12, %v3653_v2, %v8318_v5  ;;  %v3683_v8 = vsel %vm9167_vm0, %v3653_v2, 0.0 }
0x1df2   :  { %v3685_v56 = vrot.slane %v3683_v8, 1  ;;  %3687 = vst.msk [vmem:[#allocation3 + $0x3] sm:$0x1] %vm9168_vm1, %v3683_v8  ;;  %6110 = vmatmul.msk.f32.vlgmr.msra.gmra.mxu2 %vm335_vm11, %v8396_v63 }
0x1df4   :  { %3688 = vst.msk [vmem:[#allocation3 + $0xb] sm:$0x1] %vm9169_vm2, %v3685_v56 }
0x1e6b   :  { %v3752_v7 = vpop.f32.mrf.mxu3 }
0x1e6c   :  { %v3756_v1 = vrot.slane %v3752_v7, 5  ;;  %v3757_v51 = vrot.slane %v3752_v7, 6 }
0x1e6e   :  { %v3760_v21 = vadd.f32 %v3756_v1, %v8103_v0  ;;  %v3761_v20 = vadd.f32 %v3757_v51, %v8108_v38 }
0x1e70   :  { %6637 = vtanh.f32 %v3760_v21  ;;  %v6115_v50 = vmul.f32 -1.442695, %v3761_v20  ;;  %v6114_v33 = vmul.f32 -1.442695, %v3760_v21 }
0x1e71   :  { %6639 = vtanh.f32 %v3761_v20 }
0x1e75   :  { %v3722_v5 = vpop.f32.mrf.mxu2 }
0x1e76   :  { %v6638_v11 = vpop.eup %6637  ;;  %v3726_v60 = vrot.slane %v3722_v5, 4  ;;  %v3727_v46 = vrot.slane %v3722_v5, 5 }
0x1e77   :  { %v6640_v47 = vpop.eup %6639  ;;  %3898 = vrot.lane.b32.xlu0 %v6638_v11, %s7060_s6 }
0x1e78   :  { %v3730_v22 = vadd.f32 %v3726_v60, %v8113_v49  ;;  %3900 = vrot.lane.b32.xlu2 %v6640_v47, %s7060_s6  ;;  %v3731_v48 = vadd.f32 %v3727_v46, %v8106_v44 }
0x1e7a   :  { %6641 = vtanh.f32 %v3730_v22  ;;  %v6112_v30 = vmul.f32 -1.442695, %v3730_v22  ;;  %v6113_v56 = vmul.f32 -1.442695, %v3731_v48 }
0x1e7b   :  { %6643 = vtanh.f32 %v3731_v48 }
0x1e7c   :  { %6645 = vpow2.f32 %v6115_v50 }
0x1e7f   :  { %3888 = vrot.lane.b32.xlu0 %v3886_v18, %s7060_s6 }
0x1e80   :  { %v6642_v31 = vpop.eup %6641  ;;  %3890 = vrot.lane.b32.xlu2 %v3887_v14, %s7060_s6 }
0x1e81   :  { %3815 = vrot.lane.b32.xlu1 %v6642_v31, %s7060_s6  ;;  %v6644_v4 = vpop.eup %6643 }
0x1e82   :  { %v6646_v45 = vpop.eup %6645 }
0x1e83   :  { %v3852_v43 = vadd.f32 1.0, %v6646_v45 }
0x1e85   :  { %6647 = vrcp.f32 %v3852_v43  ;;  %v3879_v7 = vand.u32 2147483648, %v3852_v43  ;;  %vm3873_vm13 = vweird.f32 %v3852_v43  ;;  %v3877_v1 = vand.u32 2147483647, %v3852_v43 }
0x1e86   :  { %6649 = vpow2.f32 %v6114_v33 }
0x1e87   :  { %3817 = vrot.lane.b32.xlu0 %v6644_v4, %s7060_s6  ;;  %6651 = vpow2.f32 %v6112_v30  ;;  %v3880_v21 = vor.u32 1.1754944e-38, %v3879_v7  ;;  %vm3878_vm12 = vcmp.eq.f32.partialorder %v3877_v1, 8.507059e+37 }
0x1e8b   :  { %v6648_v29 = vpop.eup %6647 }
0x1e8c   :  { %v3869_v55 = vmul.f32 %v6648_v29, %v3852_v43  ;;  %v6650_v17 = vpop.eup %6649  ;;  %vm3874_vm15 = vweird.f32 %v6648_v29 }
0x1e8d   :  { %v3851_v8 = vadd.f32 1.0, %v6650_v17  ;;  %vm3875_vm3 = vmor %vm3873_vm13, %vm3874_vm15  ;;  %v6652_v20 = vpop.eup %6651 }
0x1e8e   :  { %v3870_v6 = vsub.f32 1.0, %v3869_v55  ;;  %v3768_v47 = vadd.f32 1.0, %v6652_v20 }
0x1e8f   :  { %3805 = vrot.lane.b32.xlu0 %v3803_v39, %s7060_s6  ;;  %6653 = vrcp.f32 %v3851_v8  ;;  %v3864_v50 = vand.u32 2147483648, %v3851_v8  ;;  %vm3858_vm1 = vweird.f32 %v3851_v8  ;;  %v3862_v45 = vand.u32 2147483647, %v3851_v8 }
0x1e90   :  { %v3871_v2 = vmul.f32 %v6648_v29, %v3870_v6  ;;  %6655 = vpow2.f32 %v6113_v56  ;;  %v3781_v7 = vand.u32 2147483648, %v3768_v47  ;;  %vm3775_vm13 = vweird.f32 %v3768_v47 }
0x1e91   :  { %6657 = vrcp.f32 %v3768_v47  ;;  %v3865_v55 = vor.u32 1.1754944e-38, %v3864_v50  ;;  %vm3863_vm14 = vcmp.eq.f32.partialorder %v3862_v45, 8.507059e+37 }
0x1e92   :  { %v3872_v28 = vadd.f32 %v6648_v29, %v3871_v2 }
0x1e94   :  { %v3876_v51 = vsel %vm3875_vm3, %v6648_v29, %v3872_v28 }
0x1e95   :  { %v8428_v5 = vsel %vm3878_vm12, %v3880_v21, %v3876_v51  ;;  %v6654_v60 = vpop.eup %6653  ;;  %v3782_v21 = vor.u32 1.1754944e-38, %v3781_v7 }
0x1e96   :  { %v6656_v46 = vpop.eup %6655  ;;  %v3854_v22 = vmul.f32 %v6654_v60, %v3851_v8  ;;  %vm3859_vm0 = vweird.f32 %v6654_v60  ;;  %v3779_v8 = vand.u32 2147483647, %v3768_v47 }
0x1e97   :  { %v3769_v48 = vadd.f32 1.0, %v6656_v46  ;;  %v6658_v14 = vpop.eup %6657  ;;  %vm3860_vm2 = vmor %vm3858_vm1, %vm3859_vm0 }
0x1e98   :  { %v3855_v18 = vsub.f32 1.0, %v3854_v22  ;;  %v3771_v4 = vmul.f32 %v6658_v14, %v3768_v47  ;;  %vm3776_vm15 = vweird.f32 %v6658_v14  ;;  %vm3780_vm12 = vcmp.eq.f32.partialorder %v3779_v8, 8.507059e+37 }
0x1e99   :  { %6659 = vrcp.f32 %v3769_v48  ;;  %vm3777_vm3 = vmor %vm3775_vm13, %vm3776_vm15  ;;  %v3796_v22 = vand.u32 2147483648, %v3769_v48  ;;  %vm3790_vm1 = vweird.f32 %v3769_v48  ;;  %vm9171_vm15 = vcmp.eq.s32.totalorder %v7669_v13, 1 }
0x1e9a   :  { %v3856_v31 = vmul.f32 %v6654_v60, %v3855_v18  ;;  %v3772_v43 = vsub.f32 1.0, %v3771_v4  ;;  %vm9172_vm13 = vmmov %vm9171_vm15 }
0x1e9c   :  { %v3857_v58 = vadd.f32 %v6654_v60, %v3856_v31  ;;  %v3773_v6 = vmul.f32 %v6658_v14, %v3772_v43  ;;  %v3794_v31 = vand.u32 2147483647, %v3769_v48 }
0x1e9e   :  { %v3861_v29 = vsel %vm3860_vm2, %v6654_v60, %v3857_v58  ;;  %v3774_v56 = vadd.f32 %v6658_v14, %v3773_v6 }
0x1e9f   :  { %v6660_v39 = vpop.eup %6659  ;;  %v8432_v30 = vsel %vm3863_vm14, %v3865_v55, %v3861_v29  ;;  %vm3795_vm14 = vcmp.eq.f32.partialorder %v3794_v31, 8.507059e+37 }
0x1ea0   :  { %v3786_v33 = vmul.f32 %v6660_v39, %v3769_v48  ;;  %v3778_v51 = vsel %vm3777_vm3, %v6658_v14, %v3774_v56  ;;  %vm3791_vm0 = vweird.f32 %v6660_v39  ;;  %v3797_v14 = vor.u32 1.1754944e-38, %v3796_v22 }
0x1ea1   :  { %vm3792_vm2 = vmor %vm3790_vm1, %vm3791_vm0 }
0x1ea2   :  { %v3787_v28 = vsub.f32 1.0, %v3786_v33 }
0x1ea4   :  { %v3788_v1 = vmul.f32 %v6660_v39, %v3787_v28 }
0x1ea6   :  { %v3789_v60 = vadd.f32 %v6660_v39, %v3788_v1 }
0x1ea8   :  { %v3793_v47 = vsel %vm3792_vm2, %v6660_v39, %v3789_v60 }
0x1ea9   :  { %v3798_v4 = vsel %vm3795_vm14, %v3797_v14, %v3793_v47 }
0x1ed2   :  { %v3901_v11 = vpop.permute.xlu2 %3900 }
0x1ed3   :  { %v3905_v16 = vmul.f32 %v3901_v11, %v8428_v5  ;;  %v3804_v11 = vrot.slane %v8424_v54, 5 }
0x1ed5   :  { %3910 = vrot.lane.b32.xlu1 %v3905_v16, %s7060_s6  ;;  %v3783_v16 = vsel %vm3780_vm12, %v3782_v21, %v3778_v51 }
0x1eda   :  { %v3891_v45 = vpop.permute.xlu2 %3890 }
0x1edb   :  { %v3895_v29 = vmul.f32 %v3891_v45, %v8428_v5 }
0x1ee9   :  { %v3899_v17 = vpop.permute.xlu0 %3898 }
0x1eea   :  { %v3904_v2 = vmul.f32 %v3899_v17, %v8432_v30 }
0x1eec   :  { %3908 = vrot.lane.b32.xlu2 %v3904_v2, %s7060_s6 }
0x1ef1   :  { %v3889_v20 = vpop.permute.xlu0 %3888 }
0x1ef2   :  { %v3894_v43 = vmul.f32 %v3889_v20, %v8432_v30 }
0x1ef3   :  { %v3816_v46 = vpop.permute.xlu1 %3815 }
0x1ef4   :  { %v3821_v18 = vmul.f32 %v3816_v46, %v3783_v16  ;;  %3807 = vrot.lane.b32.xlu2 %v3804_v11, %s7060_s6 }
0x1ef6   :  { %3825 = vrot.lane.b32.xlu1 %v3821_v18, %s7060_s6 }
0x1ef9   :  { %v3818_v58 = vpop.permute.xlu0 %3817 }
0x1efa   :  { %v3822_v50 = vmul.f32 %v3818_v58, %v3798_v4 }
0x1efc   :  { %3827 = vrot.lane.b32.xlu0 %v3822_v50, %s7060_s6 }
0x1f01   :  { %v3806_v2 = vpop.permute.xlu0 %3805 }
0x1f02   :  { %v3811_v28 = vmul.f32 %v3806_v2, %v3783_v16 }
0x1f46   :  { %v3909_v33 = vpop.permute.xlu2 %3908 }
0x1f47   :  { %v3914_v55 = vadd.f32 %v3909_v33, %v3894_v43  ;;  %v3911_v6 = vpop.permute.xlu1 %3910 }
0x1f48   :  { %v3915_v48 = vadd.f32 %v3911_v6, %v3895_v29 }
0x1f49   :  { %6661 = vtanh.f32 %v3914_v55  ;;  %v3957_v60 = vrot.slane %v3914_v55, 3 }
0x1f4a   :  { %6663 = vtanh.f32 %v3915_v48  ;;  %v3958_v46 = vrot.slane %v3915_v48, 2 }
0x1f4c   :  { %v3959_v22 = vsel %vm543_vm8, %v3958_v46, %v3957_v60 }
0x1f4e   :  { %v3808_v8 = vpop.permute.xlu2 %3807 }
0x1f4f   :  { %v6662_v17 = vpop.eup %6661  ;;  %v3812_v1 = vmul.f32 %v3808_v8, %v3798_v4 }
0x1f50   :  { %v6664_v39 = vpop.eup %6663  ;;  %3920 = vrot.lane.b32.xlu2 %v6662_v17, %s7060_s6 }
0x1f51   :  { %3922 = vrot.lane.b32.xlu1 %v6664_v39, %s7060_s6 }
0x1f68   :  { %v3826_v56 = vpop.permute.xlu1 %3825 }
0x1f69   :  { %v3831_v7 = vadd.f32 %v3826_v56, %v3811_v28 }
0x1f6b   :  { %6665 = vtanh.f32 %v3831_v7  ;;  %v3939_v31 = vrot.slane %v3831_v7, 4 }
0x1f6e   :  { %v3828_v51 = vpop.permute.xlu0 %3827 }
0x1f6f   :  { %v3832_v20 = vadd.f32 %v3828_v51, %v3812_v1 }
0x1f71   :  { %v6666_v21 = vpop.eup %6665  ;;  %6667 = vtanh.f32 %v3832_v20  ;;  %v3940_v18 = vrot.slane %v3832_v20, 3 }
0x1f72   :  { %3837 = vrot.lane.b32.xlu0 %v6666_v21, %s7060_s6 }
0x1f73   :  { %v3941_v47 = vsel %vm543_vm8, %v3940_v18, %v3939_v31 }
0x1f77   :  { %v6668_v11 = vpop.eup %6667 }
0x1f78   :  { %3839 = vrot.lane.b32.xlu2 %v6668_v11, %s7060_s6 }
0x1f80   :  { %3960 = vrot.lane.b32.xlu2 %v3959_v22, %s7064_s23 }
0x1f88   :  { %3942 = vrot.lane.b32.xlu2 %v3941_v47, %s7064_s23 }
0x1faa   :  { %v3921_v14 = vpop.permute.xlu2 %3920 }
0x1fab   :  { %v3926_v58 = vmul.f32 %v3921_v14, %v8432_v30 }
0x1fad   :  { %v3948_v43 = vrot.slane %v3926_v58, 3 }
0x1fc3   :  { %v3923_v50 = vpop.permute.xlu1 %3922 }
0x1fc4   :  { %v3927_v45 = vmul.f32 %v3923_v50, %v8428_v5 }
0x1fc6   :  { %v3949_v29 = vrot.slane %v3927_v45, 2 }
0x1fc8   :  { %v3950_v33 = vsel %vm543_vm8, %v3949_v29, %v3948_v43 }
0x1fc9   :  { %3951 = vrot.lane.b32.xlu1 %v3950_v33, %s7063_s1 }
0x1fd2   :  { %v3840_v55 = vpop.permute.xlu2 %3839 }
0x1fd3   :  { %v3844_v6 = vmul.f32 %v3840_v55, %v3798_v4 }
0x1fd5   :  { %v3931_v39 = vrot.slane %v3844_v6, 3 }
0x1fda   :  { %v3961_v21 = vpop.permute.xlu2 %3960 }
0x1fe2   :  { %v3943_v58 = vpop.permute.xlu2 %3942 }
0x1fe3   :  { %v8496_v50 = vsel %vm252_vm10, %v3943_v58, %v8424_v54 }
0x1fe4   :  { %v3838_v48 = vpop.permute.xlu0 %3837  ;;  %v4084_v45 = vrot.slane %v8496_v50, 3 }
0x1fe5   :  { %v3843_v17 = vmul.f32 %v3838_v48, %v3783_v16 }
0x1fe7   :  { %v3930_v2 = vrot.slane %v3843_v17, 4 }
0x1fe9   :  { %v3932_v28 = vsel %vm543_vm8, %v3931_v39, %v3930_v2 }
0x1fea   :  { %3933 = vrot.lane.b32.xlu0 %v3932_v28, %s7063_s1 }
0x203b   :  { %v8456_v30 = vpop.permute.xlu1 %3951 }
0x203c   :  { %v8462_v5 = vsel %vm9171_vm15, %v8456_v30, %v8389_v41 }
0x203d   :  { %6117 = vmatmul.msk.f32.vlgmr.msra.gmra.mxu1 %vm335_vm11, %v8462_v5 }
0x205c   :  { %v8466_v4 = vpop.permute.xlu0 %3933 }
0x205d   :  { %v8472_v16 = vsel %vm252_vm10, %v8466_v4, %v8396_v63  ;;  %v8483_v63 = vsel %vm9172_vm13, %v3961_v21, %v8412_v52 }
0x205e   :  { %6116 = vmatmul.msk.f32.vlgmr.msrb.gmra.mxu0 %vm335_vm11, %v8472_v16  ;;  %v4167_v11 = vrot.slane %v8483_v63, 6  ;;  %v4168_v60 = vrot.slane %v8483_v63, 7 }
0x20ba   :  { %v4033_v56 = vpop.f32.mrf.mxu1 }
0x20bb   :  { %v4037_v7 = vrot.slane %v4033_v56, 6  ;;  %v4038_v8 = vrot.slane %v4033_v56, 7 }
0x20bd   :  { %v4041_v41 = vadd.f32 %v4037_v7, %v8103_v0  ;;  %v4042_v1 = vadd.f32 %v4038_v8, %v8108_v38 }
0x20bf   :  { %6669 = vtanh.f32 %v4041_v41  ;;  %v6120_v43 = vmul.f32 -1.442695, %v4041_v41  ;;  %v6121_v29 = vmul.f32 -1.442695, %v4042_v1 }
0x20c0   :  { %6671 = vtanh.f32 %v4042_v1 }
0x20c5   :  { %v6670_v51 = vpop.eup %6669 }
0x20c6   :  { %v6672_v20 = vpop.eup %6671  ;;  %4179 = vrot.lane.b32.xlu1 %v6670_v51, %s7060_s6 }
0x20c7   :  { %4181 = vrot.lane.b32.xlu0 %v6672_v20, %s7060_s6 }
0x20ce   :  { %4169 = vrot.lane.b32.xlu1 %v4167_v11, %s7060_s6 }
0x20cf   :  { %4171 = vrot.lane.b32.xlu0 %v4168_v60, %s7060_s6 }
0x20db   :  { %v4003_v46 = vpop.f32.mrf.mxu0 }
0x20dc   :  { %v4007_v22 = vrot.slane %v4003_v46, 3  ;;  %v4008_v18 = vrot.slane %v4003_v46, 4 }
0x20de   :  { %v4011_v31 = vadd.f32 %v4007_v22, %v8113_v49  ;;  %v4012_v47 = vadd.f32 %v4008_v18, %v8106_v44 }
0x20e0   :  { %6673 = vtanh.f32 %v4011_v31  ;;  %v6118_v33 = vmul.f32 -1.442695, %v4011_v31  ;;  %v6119_v51 = vmul.f32 -1.442695, %v4012_v47 }
0x20e1   :  { %6675 = vtanh.f32 %v4012_v47 }
0x20e2   :  { %6677 = vpow2.f32 %v6120_v43 }
0x20e3   :  { %6679 = vpow2.f32 %v6121_v29 }
0x20e4   :  { %6681 = vpow2.f32 %v6118_v33 }
0x20e6   :  { %v6674_v14 = vpop.eup %6673 }
0x20e7   :  { %v6676_v52 = vpop.eup %6675  ;;  %4096 = vrot.lane.b32.xlu2 %v6674_v14, %s7060_s6 }
0x20e8   :  { %4098 = vrot.lane.b32.xlu1 %v6676_v52, %s7060_s6  ;;  %v6678_v55 = vpop.eup %6677 }
0x20e9   :  { %v6680_v6 = vpop.eup %6679  ;;  %v4132_v48 = vadd.f32 1.0, %v6678_v55 }
0x20ea   :  { %v4133_v17 = vadd.f32 1.0, %v6680_v6  ;;  %v6682_v39 = vpop.eup %6681 }
0x20eb   :  { %6683 = vrcp.f32 %v4132_v48  ;;  %v4049_v2 = vadd.f32 1.0, %v6682_v39  ;;  %v4145_v22 = vand.u32 2147483648, %v4132_v48  ;;  %vm4139_vm0 = vweird.f32 %v4132_v48 }
0x20ec   :  { %6685 = vrcp.f32 %v4133_v17  ;;  %v4160_v31 = vand.u32 2147483648, %v4133_v17  ;;  %v4143_v14 = vand.u32 2147483647, %v4132_v48  ;;  %vm4154_vm1 = vweird.f32 %v4133_v17 }
0x20ed   :  { %6687 = vrcp.f32 %v4049_v2  ;;  %v4158_v52 = vand.u32 2147483647, %v4133_v17  ;;  %v4146_v47 = vor.u32 1.1754944e-38, %v4145_v22 }
0x20ee   :  { %6689 = vpow2.f32 %v6119_v51  ;;  %v4161_v33 = vor.u32 1.1754944e-38, %v4160_v31  ;;  %vm4144_vm15 = vcmp.eq.f32.partialorder %v4143_v14, 8.507059e+37 }
0x20ef   :  { %vm4159_vm13 = vcmp.eq.f32.partialorder %v4158_v52, 8.507059e+37 }
0x20f0   :  { %4086 = vrot.lane.b32.xlu1 %v4084_v45, %s7060_s6 }
0x20f1   :  { %v6684_v54 = vpop.eup %6683 }
0x20f2   :  { %v6686_v28 = vpop.eup %6685  ;;  %v4135_v56 = vmul.f32 %v6684_v54, %v4132_v48  ;;  %vm4140_vm3 = vweird.f32 %v6684_v54 }
0x20f3   :  { %v4150_v7 = vmul.f32 %v6686_v28, %v4133_v17  ;;  %v6688_v1 = vpop.eup %6687  ;;  %vm4155_vm12 = vweird.f32 %v6686_v28  ;;  %vm4141_vm2 = vmor %vm4139_vm0, %vm4140_vm3 }
0x20f4   :  { %v4136_v8 = vsub.f32 1.0, %v4135_v56  ;;  %v4052_v11 = vmul.f32 %v6688_v1, %v4049_v2  ;;  %vm4156_vm14 = vmor %vm4154_vm1, %vm4155_vm12  ;;  %v6690_v29 = vpop.eup %6689  ;;  %vm4057_vm3 = vweird.f32 %v6688_v1  ;;  %vm4056_vm12 = vweird.f32 %v4049_v2 }
0x20f5   :  { %v4151_v41 = vsub.f32 1.0, %v4150_v7  ;;  %v4050_v7 = vadd.f32 1.0, %v6690_v29  ;;  %vm4058_vm0 = vmor %vm4056_vm12, %vm4057_vm3 }
0x20f6   :  { %v4137_v20 = vmul.f32 %v6684_v54, %v4136_v8  ;;  %v4053_v18 = vsub.f32 1.0, %v4052_v11 }
0x20f7   :  { %v4152_v21 = vmul.f32 %v6686_v28, %v4151_v41  ;;  %6691 = vrcp.f32 %v4050_v7  ;;  %v4075_v52 = vand.u32 2147483647, %v4050_v7 }
0x20f8   :  { %v4138_v60 = vadd.f32 %v6684_v54, %v4137_v20  ;;  %v4054_v43 = vmul.f32 %v6688_v1, %v4053_v18  ;;  %v4085_v20 = vrot.slane %v8496_v50, 4 }
0x20f9   :  { %v4153_v46 = vadd.f32 %v6686_v28, %v4152_v21 }
0x20fa   :  { %v4142_v58 = vsel %vm4141_vm2, %v6684_v54, %v4138_v60  ;;  %v4055_v8 = vadd.f32 %v6688_v1, %v4054_v43  ;;  %v4062_v54 = vand.u32 2147483648, %v4049_v2 }
0x20fb   :  { %v4157_v45 = vsel %vm4156_vm14, %v6686_v28, %v4153_v46  ;;  %v8500_v6 = vsel %vm4144_vm15, %v4146_v47, %v4142_v58  ;;  %v4060_v28 = vand.u32 2147483647, %v4049_v2  ;;  %vm4071_vm14 = vweird.f32 %v4050_v7 }
0x20fc   :  { %v8502_v56 = vsel %vm4159_vm13, %v4161_v33, %v4157_v45  ;;  %v4059_v41 = vsel %vm4058_vm0, %v6688_v1, %v4055_v8  ;;  %v4063_v51 = vor.u32 1.1754944e-38, %v4062_v54  ;;  %v4077_v1 = vand.u32 2147483648, %v4050_v7 }
0x20fd   :  { %vm4061_vm1 = vcmp.eq.f32.partialorder %v4060_v28, 8.507059e+37  ;;  %v6692_v46 = vpop.eup %6691  ;;  %vm4076_vm13 = vcmp.eq.f32.partialorder %v4075_v52, 8.507059e+37 }
0x20fe   :  { %v8509_v11 = vsel %vm4061_vm1, %v4063_v51, %v4059_v41  ;;  %v4067_v22 = vmul.f32 %v6692_v46, %v4050_v7  ;;  %vm4072_vm2 = vweird.f32 %v6692_v46  ;;  %v4078_v45 = vor.u32 1.1754944e-38, %v4077_v1 }
0x20ff   :  { %vm4073_vm15 = vmor %vm4071_vm14, %vm4072_vm2 }
0x2100   :  { %v4068_v18 = vsub.f32 1.0, %v4067_v22 }
0x2102   :  { %v4069_v2 = vmul.f32 %v6692_v46, %v4068_v18 }
0x2104   :  { %v4070_v14 = vadd.f32 %v6692_v46, %v4069_v2 }
0x2106   :  { %v4074_v58 = vsel %vm4073_vm15, %v6692_v46, %v4070_v14 }
0x2107   :  { %v4079_v47 = vsel %vm4076_vm13, %v4078_v45, %v4074_v58 }
0x2138   :  { %v4180_v55 = vpop.permute.xlu1 %4179 }
0x2139   :  { %v4182_v39 = vpop.permute.xlu0 %4181  ;;  %v4185_v48 = vmul.f32 %v4180_v55, %v8500_v6 }
0x213a   :  { %v4186_v17 = vmul.f32 %v4182_v39, %v8502_v56 }
0x213b   :  { %4189 = vrot.lane.b32.xlu0 %v4185_v48, %s7060_s6 }
0x213c   :  { %4191 = vrot.lane.b32.xlu2 %v4186_v17, %s7060_s6 }
0x2140   :  { %v4170_v31 = vpop.permute.xlu1 %4169 }
0x2141   :  { %v4097_v21 = vpop.permute.xlu2 %4096  ;;  %v4172_v33 = vpop.permute.xlu0 %4171  ;;  %v4175_v51 = vmul.f32 %v4170_v31, %v8500_v6 }
0x2142   :  { %v4102_v60 = vmul.f32 %v4097_v21, %v8509_v11  ;;  %v4176_v55 = vmul.f32 %v4172_v33, %v8502_v56 }
0x2143   :  { %4088 = vrot.lane.b32.xlu0 %v4085_v20, %s7060_s6 }
0x2144   :  { %4106 = vrot.lane.b32.xlu2 %v4102_v60, %s7060_s6 }
0x215a   :  { %v4099_v43 = vpop.permute.xlu1 %4098 }
0x215b   :  { %v4103_v29 = vmul.f32 %v4099_v43, %v4079_v47 }
0x215d   :  { %4108 = vrot.lane.b32.xlu1 %v4103_v29, %s7060_s6 }
0x2162   :  { %v4087_v17 = vpop.permute.xlu1 %4086 }
0x2163   :  { %v4092_v8 = vmul.f32 %v4087_v17, %v8509_v11 }
0x2196   :  { %v4192_v39 = vpop.permute.xlu2 %4191 }
0x2197   :  { %v4196_v48 = vadd.f32 %v4192_v39, %v4176_v55 }
0x2199   :  { %6693 = vtanh.f32 %v4196_v48  ;;  %v4239_v52 = vrot.slane %v4196_v48, 1 }
0x219e   :  { %v4107_v54 = vpop.permute.xlu2 %4106 }
0x219f   :  { %v6694_v7 = vpop.eup %6693  ;;  %v4112_v28 = vadd.f32 %v4107_v54, %v4092_v8 }
0x21a0   :  { %4203 = vrot.lane.b32.xlu2 %v6694_v7, %s7060_s6 }
0x21a1   :  { %6695 = vtanh.f32 %v4112_v28  ;;  %v4220_v45 = vrot.slane %v4112_v28, 5 }
0x21a7   :  { %v6696_v41 = vpop.eup %6695 }
0x21a8   :  { %4118 = vrot.lane.b32.xlu1 %v6696_v41, %s7060_s6 }
0x21ad   :  { %v4190_v20 = vpop.permute.xlu0 %4189 }
0x21ae   :  { %v4195_v21 = vadd.f32 %v4190_v20, %v4175_v51 }
0x21b0   :  { %6697 = vtanh.f32 %v4195_v21  ;;  %v4238_v1 = vrot.slane %v4195_v21, 2 }
0x21b2   :  { %v4240_v58 = vsel %vm543_vm8, %v4239_v52, %v4238_v1 }
0x21b5   :  { %v4089_v46 = vpop.permute.xlu0 %4088 }
0x21b6   :  { %v6698_v60 = vpop.eup %6697  ;;  %v4093_v22 = vmul.f32 %v4089_v46, %v4079_v47 }
0x21b7   :  { %4201 = vrot.lane.b32.xlu0 %v6698_v60, %s7060_s6 }
0x21cf   :  { %v4109_v18 = vpop.permute.xlu1 %4108 }
0x21d0   :  { %v4113_v2 = vadd.f32 %v4109_v18, %v4093_v22 }
0x21d2   :  { %6699 = vtanh.f32 %v4113_v2  ;;  %v4221_v31 = vrot.slane %v4113_v2, 4 }
0x21d4   :  { %v4222_v43 = vsel %vm543_vm8, %v4221_v31, %v4220_v45 }
0x21d8   :  { %v6700_v14 = vpop.eup %6699 }
0x21d9   :  { %4120 = vrot.lane.b32.xlu0 %v6700_v14, %s7060_s6 }
0x21e1   :  { %4241 = vrot.lane.b32.xlu0 %v4240_v58, %s7064_s23 }
0x21e9   :  { %4223 = vrot.lane.b32.xlu0 %v4222_v43, %s7064_s23 }
0x21fa   :  { %v4204_v29 = vpop.permute.xlu2 %4203 }
0x21fb   :  { %v4208_v33 = vmul.f32 %v4204_v29, %v8502_v56 }
0x21fd   :  { %v4230_v17 = vrot.slane %v4208_v33, 1 }
0x221a   :  { %v4119_v54 = vpop.permute.xlu1 %4118 }
0x221b   :  { %v4124_v7 = vmul.f32 %v4119_v54, %v8509_v11 }
0x221d   :  { %v4211_v51 = vrot.slane %v4124_v7, 5 }
0x2229   :  { %v4202_v55 = vpop.permute.xlu0 %4201 }
0x222a   :  { %v4207_v39 = vmul.f32 %v4202_v55, %v8500_v6 }
0x222c   :  { %v4229_v8 = vrot.slane %v4207_v39, 2 }
0x222e   :  { %v4231_v48 = vsel %vm543_vm8, %v4230_v17, %v4229_v8 }
0x222f   :  { %4232 = vrot.lane.b32.xlu2 %v4231_v48, %s7063_s1 }
0x224b   :  { %v4121_v28 = vpop.permute.xlu0 %4120 }
0x224c   :  { %v4125_v41 = vmul.f32 %v4121_v28, %v4079_v47 }
0x224e   :  { %v4212_v20 = vrot.slane %v4125_v41, 4 }
0x2250   :  { %v4213_v21 = vsel %vm543_vm8, %v4212_v20, %v4211_v51 }
0x2251   :  { %4214 = vrot.lane.b32.xlu1 %v4213_v21, %s7063_s1 }
0x2253   :  { %v4242_v14 = vpop.permute.xlu0 %4241 }
0x225b   :  { %v4224_v52 = vpop.permute.xlu0 %4223 }
0x225c   :  { %v8569_v58 = vsel %vm256_vm6, %v4224_v52, %v8496_v50 }
0x225d   :  { %v4364_v31 = vrot.slane %v8569_v58, 2 }
0x2289   :  { %v8533_v56 = vpop.permute.xlu2 %4232 }
0x228a   :  { %v8539_v6 = vsel %vm244_vm7, %v8533_v56, %v8462_v5 }
0x228b   :  { %6123 = vmatmul.msk.f32.vlgmr.msra.gmra.mxu3 %vm335_vm11, %v8539_v6 }
0x22c3   :  { %v8543_v11 = vpop.permute.xlu1 %4214 }
0x22c4   :  { %v8549_v47 = vsel %vm256_vm6, %v8543_v11, %v8472_v16  ;;  %v8560_v16 = vsel %vm244_vm7, %v4242_v14, %v8483_v63 }
0x22c5   :  { %6122 = vmatmul.msk.f32.vlgmr.msrb.gmra.mxu2 %vm335_vm11, %v8549_v47  ;;  %v4447_v1 = vrot.slane %v8560_v16, 7 }
0x230e   :  { %v4314_v60 = vpop.f32.mrf.mxu3 }
0x230f   :  { %v4318_v46 = vrot.slane %v4314_v60, 7  ;;  %v4322_v22 = vadd.f32 %v4314_v60, %v8108_v38 }
0x2311   :  { %v4321_v5 = vadd.f32 %v4318_v46, %v8103_v0  ;;  %6701 = vtanh.f32 %v4322_v22  ;;  %v6127_v48 = vmul.f32 -1.442695, %v4322_v22 }
0x2313   :  { %6703 = vtanh.f32 %v4321_v5  ;;  %v6126_v45 = vmul.f32 -1.442695, %v4321_v5 }
0x2315   :  { %6705 = vpow2.f32 %v6126_v45  ;;  %v4365_v45 = vrot.slane %v8569_v58, 3 }
0x2317   :  { %v6702_v18 = vpop.eup %6701 }
0x2318   :  { %4460 = vrot.lane.b32.xlu1 %v6702_v18, %s7060_s6 }
0x2319   :  { %v6704_v2 = vpop.eup %6703 }
0x231a   :  { %4458 = vrot.lane.b32.xlu2 %v6704_v2, %s7060_s6 }
0x231b   :  { %v6706_v39 = vpop.eup %6705 }
0x231c   :  { %v4412_v50 = vadd.f32 1.0, %v6706_v39 }
0x231e   :  { %v4425_v60 = vand.u32 2147483648, %v4412_v50  ;;  %vm4419_vm12 = vweird.f32 %v4412_v50  ;;  %v4423_v46 = vand.u32 2147483647, %v4412_v50 }
0x2320   :  { %v4426_v18 = vor.u32 1.1754944e-38, %v4425_v60  ;;  %vm4424_vm1 = vcmp.eq.f32.partialorder %v4423_v46, 8.507059e+37 }
0x2322   :  { %4448 = vrot.lane.b32.xlu2 %v4447_v1, %s7060_s6 }
0x232a   :  { %4450 = vrot.lane.b32.xlu2 %v8560_v16, %s7060_s6 }
0x2332   :  { %4366 = vrot.lane.b32.xlu2 %v4364_v31, %s7060_s6 }
0x2348   :  { %v4284_v63 = vpop.f32.mrf.mxu2 }
0x2349   :  { %v4288_v43 = vrot.slane %v4284_v63, 2  ;;  %v4289_v29 = vrot.slane %v4284_v63, 3 }
0x234b   :  { %v4292_v33 = vadd.f32 %v4288_v43, %v8113_v49  ;;  %v4293_v55 = vadd.f32 %v4289_v29, %v8106_v44 }
0x234d   :  { %6707 = vtanh.f32 %v4292_v33 }
0x234e   :  { %6709 = vtanh.f32 %v4293_v55 }
0x234f   :  { %6711 = vrcp.f32 %v4412_v50 }
0x2350   :  { %6713 = vpow2.f32 %v6127_v48 }
0x2353   :  { %v6708_v17 = vpop.eup %6707 }
0x2354   :  { %v6710_v8 = vpop.eup %6709  ;;  %4376 = vrot.lane.b32.xlu1 %v6708_v17, %s7060_s6 }
0x2355   :  { %4378 = vrot.lane.b32.xlu0 %v6710_v8, %s7060_s6  ;;  %v6712_v54 = vpop.eup %6711 }
0x2356   :  { %v4415_v7 = vmul.f32 %v6712_v54, %v4412_v50  ;;  %v6714_v41 = vpop.eup %6713  ;;  %vm4420_vm3 = vweird.f32 %v6712_v54 }
0x2357   :  { %v4413_v51 = vadd.f32 1.0, %v6714_v41  ;;  %vm4421_vm0 = vmor %vm4419_vm12, %vm4420_vm3 }
0x2358   :  { %v4416_v28 = vsub.f32 1.0, %v4415_v7  ;;  %v6124_v7 = vmul.f32 -1.442695, %v4292_v33 }
0x2359   :  { %6715 = vrcp.f32 %v4413_v51  ;;  %v4440_v29 = vand.u32 2147483648, %v4413_v51  ;;  %vm4434_vm14 = vweird.f32 %v4413_v51  ;;  %v4438_v39 = vand.u32 2147483647, %v4413_v51 }
0x235a   :  { %v4417_v20 = vmul.f32 %v6712_v54, %v4416_v28  ;;  %v6125_v28 = vmul.f32 -1.442695, %v4293_v55  ;;  %6717 = vpow2.f32 %v6124_v7 }
0x235b   :  { %v4441_v8 = vor.u32 1.1754944e-38, %v4440_v29  ;;  %vm4439_vm13 = vcmp.eq.f32.partialorder %v4438_v39, 8.507059e+37 }
0x235c   :  { %v4418_v21 = vadd.f32 %v6712_v54, %v4417_v20  ;;  %6719 = vpow2.f32 %v6125_v28 }
0x235e   :  { %v4422_v5 = vsel %vm4421_vm0, %v6712_v54, %v4418_v21 }
0x235f   :  { %v6716_v2 = vpop.eup %6715  ;;  %v8577_v22 = vsel %vm4424_vm1, %v4426_v18, %v4422_v5 }
0x2360   :  { %v4430_v52 = vmul.f32 %v6716_v2, %v4413_v51  ;;  %vm4435_vm2 = vweird.f32 %v6716_v2  ;;  %v6718_v41 = vpop.eup %6717 }
0x2361   :  { %vm4436_vm15 = vmor %vm4434_vm14, %vm4435_vm2  ;;  %v4329_v21 = vadd.f32 1.0, %v6718_v41 }
0x2362   :  { %v4431_v31 = vsub.f32 1.0, %v4430_v52  ;;  %v6720_v20 = vpop.eup %6719 }
0x2363   :  { %v4330_v60 = vadd.f32 1.0, %v6720_v20  ;;  %6721 = vrcp.f32 %v4329_v21  ;;  %v4342_v33 = vand.u32 2147483648, %v4329_v21  ;;  %vm4336_vm0 = vweird.f32 %v4329_v21 }
0x2364   :  { %v4432_v63 = vmul.f32 %v6716_v2, %v4431_v31 }
0x2365   :  { %6723 = vrcp.f32 %v4330_v60  ;;  %vm4351_vm2 = vweird.f32 %v4330_v60  ;;  %v4343_v39 = vor.u32 1.1754944e-38, %v4342_v33 }
0x2366   :  { %v4433_v43 = vadd.f32 %v6716_v2, %v4432_v63  ;;  %v4357_v63 = vand.u32 2147483648, %v4330_v60 }
0x2368   :  { %v4437_v17 = vsel %vm4436_vm15, %v6716_v2, %v4433_v43  ;;  %v4355_v43 = vand.u32 2147483647, %v4330_v60 }
0x2369   :  { %v8583_v50 = vsel %vm4439_vm13, %v4441_v8, %v4437_v17  ;;  %v6722_v51 = vpop.eup %6721  ;;  %v4358_v8 = vor.u32 1.1754944e-38, %v4357_v63 }
0x236a   :  { %v4332_v5 = vmul.f32 %v6722_v51, %v4329_v21  ;;  %vm4337_vm3 = vweird.f32 %v6722_v51  ;;  %vm4356_vm13 = vcmp.eq.f32.partialorder %v4355_v43, 8.507059e+37 }
0x236b   :  { %v6724_v46 = vpop.eup %6723  ;;  %vm4338_vm1 = vmor %vm4336_vm0, %vm4337_vm3 }
0x236c   :  { %v4347_v18 = vmul.f32 %v6724_v46, %v4330_v60  ;;  %v4333_v2 = vsub.f32 1.0, %v4332_v5  ;;  %vm4352_vm12 = vweird.f32 %v6724_v46 }
0x236d   :  { %vm4353_vm14 = vmor %vm4351_vm2, %vm4352_vm12 }
0x2374   :  { %v4459_v14 = vpop.permute.xlu2 %4458 }
0x2375   :  { %v4464_v1 = vmul.f32 %v4459_v14, %v8577_v22  ;;  %v4348_v14 = vsub.f32 1.0, %v4347_v18 }
0x2377   :  { %4468 = vrot.lane.b32.xlu1 %v4464_v1, %s7060_s6  ;;  %v4334_v1 = vmul.f32 %v6722_v51, %v4333_v2  ;;  %v4349_v52 = vmul.f32 %v6724_v46, %v4348_v14 }
0x2379   :  { %v4335_v31 = vadd.f32 %v6722_v51, %v4334_v1  ;;  %v4350_v55 = vadd.f32 %v6724_v46, %v4349_v52 }
0x237b   :  { %v4339_v29 = vsel %vm4338_vm1, %v6722_v51, %v4335_v31  ;;  %v4354_v17 = vsel %vm4353_vm14, %v6724_v46, %v4350_v55 }
0x237c   :  { %v4359_v28 = vsel %vm4356_vm13, %v4358_v8, %v4354_v17 }
0x237f   :  { %4368 = vrot.lane.b32.xlu1 %v4365_v45, %s7060_s6  ;;  %v4340_v45 = vand.u32 2147483647, %v4329_v21  ;;  %v4449_v21 = vpop.permute.xlu2 %4448 }
0x2380   :  { %v4454_v60 = vmul.f32 %v4449_v21, %v8577_v22 }
0x2381   :  { %vm4341_vm15 = vcmp.eq.f32.partialorder %v4340_v45, 8.507059e+37 }
0x2387   :  { %v4451_v18 = vpop.permute.xlu2 %4450 }
0x2388   :  { %v4455_v2 = vmul.f32 %v4451_v18, %v8583_v50 }
0x238a   :  { %v4461_v48 = vpop.permute.xlu1 %4460 }
0x238b   :  { %v4465_v54 = vmul.f32 %v4461_v48, %v8583_v50  ;;  %v4344_v48 = vsel %vm4341_vm15, %v4343_v39, %v4339_v29 }
0x238d   :  { %4470 = vrot.lane.b32.xlu0 %v4465_v54, %s7060_s6 }
0x238f   :  { %v4367_v31 = vpop.permute.xlu2 %4366 }
0x2390   :  { %v4372_v17 = vmul.f32 %v4367_v31, %v4344_v48 }
0x23c6   :  { %v4377_v54 = vpop.permute.xlu1 %4376 }
0x23c7   :  { %v4382_v7 = vmul.f32 %v4377_v54, %v4344_v48  ;;  %v4379_v41 = vpop.permute.xlu0 %4378 }
0x23c8   :  { %v4383_v20 = vmul.f32 %v4379_v41, %v4359_v28 }
0x23c9   :  { %4386 = vrot.lane.b32.xlu0 %v4382_v7, %s7060_s6 }
0x23ca   :  { %4388 = vrot.lane.b32.xlu2 %v4383_v20, %s7060_s6 }
0x23e9   :  { %v4469_v51 = vpop.permute.xlu1 %4468 }
0x23ea   :  { %v4474_v5 = vadd.f32 %v4469_v51, %v4454_v60 }
0x23ec   :  { %6725 = vtanh.f32 %v4474_v5  ;;  %v4516_v29 = vrot.slane %v4474_v5, 1 }
0x23f1   :  { %v4369_v33 = vpop.permute.xlu1 %4368 }
0x23f2   :  { %v6726_v46 = vpop.eup %6725  ;;  %v4373_v55 = vmul.f32 %v4369_v33, %v4359_v28 }
0x23f3   :  { %4480 = vrot.lane.b32.xlu1 %v6726_v46, %s7060_s6 }
0x23ff   :  { %v4471_v14 = vpop.permute.xlu0 %4470 }
0x2400   :  { %v4475_v1 = vadd.f32 %v4471_v14, %v4455_v2 }
0x2402   :  { %6727 = vtanh.f32 %v4475_v1  ;;  %v4517_v39 = vsel %vm543_vm8, %v4475_v1, %v4516_v29 }
0x2408   :  { %v6728_v52 = vpop.eup %6727 }
0x2409   :  { %4482 = vrot.lane.b32.xlu0 %v6728_v52, %s7060_s6 }
0x2424   :  { %v4389_v45 = vpop.permute.xlu2 %4388 }
0x2425   :  { %v4393_v63 = vadd.f32 %v4389_v45, %v4373_v55 }
0x2427   :  { %6729 = vtanh.f32 %v4393_v63  ;;  %v4500_v7 = vrot.slane %v4393_v63, 5 }
0x242d   :  { %v6730_v43 = vpop.eup %6729 }
0x242e   :  { %4400 = vrot.lane.b32.xlu1 %v6730_v43, %s7060_s6 }
0x2436   :  { %4518 = vrot.lane.b32.xlu1 %v4517_v39, %s7064_s23 }
0x243b   :  { %v4387_v8 = vpop.permute.xlu0 %4386 }
0x243c   :  { %v4392_v54 = vadd.f32 %v4387_v8, %v4372_v17 }
0x243e   :  { %6731 = vtanh.f32 %v4392_v54  ;;  %v4499_v41 = vrot.slane %v4392_v54, 6 }
0x2440   :  { %v4501_v20 = vsel %vm543_vm8, %v4500_v7, %v4499_v41 }
0x2441   :  { %4502 = vrot.lane.b32.xlu1 %v4501_v20, %s7064_s23 }
0x2444   :  { %v6732_v21 = vpop.eup %6731 }
0x2445   :  { %4398 = vrot.lane.b32.xlu2 %v6732_v21, %s7060_s6 }
0x2465   :  { %v4481_v60 = vpop.permute.xlu1 %4480 }
0x2466   :  { %v4486_v51 = vmul.f32 %v4481_v60, %v8577_v22 }
0x2468   :  { %v4508_v46 = vrot.slane %v4486_v51, 1 }
0x247b   :  { %v4483_v5 = vpop.permute.xlu0 %4482 }
0x247c   :  { %v4487_v18 = vmul.f32 %v4483_v5, %v8583_v50 }
0x247e   :  { %v4509_v2 = vsel %vm543_vm8, %v4487_v18, %v4508_v46 }
0x247f   :  { %4510 = vrot.lane.b32.xlu0 %v4509_v2, %s7063_s1 }
0x249f   :  { %v4399_v14 = vpop.permute.xlu2 %4398 }
0x24a0   :  { %v4401_v1 = vpop.permute.xlu1 %4400  ;;  %v4404_v52 = vmul.f32 %v4399_v14, %v4344_v48 }
0x24a1   :  { %v4405_v31 = vmul.f32 %v4401_v1, %v4359_v28 }
0x24a2   :  { %v4490_v33 = vrot.slane %v4404_v52, 6 }
0x24a3   :  { %v4491_v55 = vrot.slane %v4405_v31, 5 }
0x24a5   :  { %v4492_v45 = vsel %vm543_vm8, %v4491_v55, %v4490_v33 }
0x24a6   :  { %4493 = vrot.lane.b32.xlu2 %v4492_v45, %s7063_s1 }
0x24a8   :  { %v4519_v8 = vpop.permute.xlu1 %4518 }
0x24b3   :  { %v4503_v51 = vpop.permute.xlu1 %4502 }
0x24f1   :  { %v8605_v63 = vpop.permute.xlu0 %4510 }
0x24f2   :  { %v4513_v22 = vsel %vm240_vm5, %v8605_v63, %v8539_v6 }
0x24f3   :  { %6129 = vmatmul.msk.f32.vlgmr.msrb.gmra.mxu1 %vm335_vm11, %v4513_v22 }
0x2500   :  { %v8612_v50 = vpop.permute.xlu2 %4493 }
0x2501   :  { %v4496_v48 = vsel %vm260_vm4, %v8612_v50, %v8549_v47  ;;  %v4521_v47 = vsel %vm240_vm5, %v4519_v8, %v8560_v16 }
0x2502   :  { %6128 = vmatmul.msk.f32.vlgmr.msra.gmra.mxu0 %vm335_vm11, %v4496_v48  ;;  %v4724_v20 = vrot.slane %v4521_v47, 1 }
0x2570   :  { %v4591_v28 = vpop.f32.mrf.mxu1 }
0x2571   :  { %v4595_v43 = vrot.slane %v4591_v28, 1  ;;  %v4598_v29 = vadd.f32 %v4591_v28, %v8103_v0 }
0x2573   :  { %v4599_v39 = vadd.f32 %v4595_v43, %v8108_v38  ;;  %6733 = vtanh.f32 %v4598_v29  ;;  %v6132_v16 = vmul.f32 -1.442695, %v4598_v29 }
0x2575   :  { %6735 = vtanh.f32 %v4599_v39  ;;  %v6133_v52 = vmul.f32 -1.442695, %v4599_v39 }
0x2579   :  { %v6734_v6 = vpop.eup %6733 }
0x257a   :  { %4735 = vrot.lane.b32.xlu2 %v6734_v6, %s7060_s6 }
0x257b   :  { %v6736_v17 = vpop.eup %6735 }
0x257c   :  { %4737 = vrot.lane.b32.xlu0 %v6736_v17, %s7060_s6 }
0x257f   :  { %v4561_v54 = vpop.f32.mrf.mxu0 }
0x2580   :  { %v4565_v7 = vrot.slane %v4561_v54, 1  ;;  %v4566_v41 = vrot.slane %v4561_v54, 2 }
0x2582   :  { %v4569_v0 = vadd.f32 %v4565_v7, %v8113_v49  ;;  %v4570_v38 = vadd.f32 %v4566_v41, %v8106_v44  ;;  %v8635_v49 = vsel %vm260_vm4, %v4503_v51, %v8569_v58 }
0x2583   :  { %v4641_v44 = vrot.slane %v8635_v49, 1 }
0x2584   :  { %6737 = vtanh.f32 %v4569_v0  ;;  %4727 = vrot.lane.b32.xlu0 %v4724_v20, %s7060_s6  ;;  %v6130_v18 = vmul.f32 -1.442695, %v4569_v0  ;;  %v6131_v29 = vmul.f32 -1.442695, %v4570_v38 }
0x2585   :  { %6739 = vtanh.f32 %v4570_v38 }
0x2586   :  { %6741 = vpow2.f32 %v6132_v16 }
0x258a   :  { %v6738_v21 = vpop.eup %6737 }
0x258b   :  { %v6740_v60 = vpop.eup %6739  ;;  %4653 = vrot.lane.b32.xlu2 %v6738_v21, %s7060_s6 }
0x258c   :  { %4655 = vrot.lane.b32.xlu1 %v6740_v60, %s7060_s6  ;;  %4725 = vrot.lane.b32.xlu0 %v4521_v47, %s7060_s6  ;;  %v6742_v5 = vpop.eup %6741 }
0x258d   :  { %v4689_v46 = vadd.f32 1.0, %v6742_v5 }
0x258f   :  { %6743 = vrcp.f32 %v4689_v46  ;;  %v4702_v22 = vand.u32 2147483648, %v4689_v46  ;;  %vm4696_vm3 = vweird.f32 %v4689_v46  ;;  %v4700_v43 = vand.u32 2147483647, %v4689_v46 }
0x2590   :  { %6745 = vpow2.f32 %v6130_v18 }
0x2591   :  { %6747 = vpow2.f32 %v6133_v52  ;;  %v4703_v17 = vor.u32 1.1754944e-38, %v4702_v22  ;;  %vm4701_vm0 = vcmp.eq.f32.partialorder %v4700_v43, 8.507059e+37 }
0x2594   :  { %4643 = vrot.lane.b32.xlu0 %v4641_v44, %s7060_s6 }
0x2595   :  { %v6744_v2 = vpop.eup %6743 }
0x2596   :  { %v4692_v14 = vmul.f32 %v6744_v2, %v4689_v46  ;;  %v6746_v1 = vpop.eup %6745  ;;  %vm4697_vm11 = vweird.f32 %v6744_v2 }
0x2597   :  { %v4606_v31 = vadd.f32 1.0, %v6746_v1  ;;  %v6748_v55 = vpop.eup %6747  ;;  %vm4698_vm12 = vmor %vm4696_vm3, %vm4697_vm11 }
0x2598   :  { %v4693_v33 = vsub.f32 1.0, %v4692_v14  ;;  %v4690_v28 = vadd.f32 1.0, %v6748_v55 }
0x2599   :  { %6749 = vrcp.f32 %v4606_v31  ;;  %v4619_v51 = vand.u32 2147483648, %v4606_v31  ;;  %vm4613_vm2 = vweird.f32 %v4606_v31  ;;  %v4617_v44 = vand.u32 2147483647, %v4606_v31 }
0x259a   :  { %v4694_v58 = vmul.f32 %v6744_v2, %v4693_v33  ;;  %6751 = vrcp.f32 %v4690_v28  ;;  %vm4711_vm11 = vweird.f32 %v4690_v28 }
0x259b   :  { %6753 = vpow2.f32 %v6131_v29  ;;  %v4620_v46 = vor.u32 1.1754944e-38, %v4619_v51  ;;  %vm4618_vm15 = vcmp.eq.f32.partialorder %v4617_v44, 8.507059e+37 }
0x259c   :  { %v4695_v45 = vadd.f32 %v6744_v2, %v4694_v58  ;;  %v4717_v58 = vand.u32 2147483648, %v4690_v28 }
0x259e   :  { %v4699_v6 = vsel %vm4698_vm12, %v6744_v2, %v4695_v45  ;;  %v4718_v22 = vor.u32 1.1754944e-38, %v4717_v58 }
0x259f   :  { %v6750_v48 = vpop.eup %6749  ;;  %v8639_v54 = vsel %vm4701_vm0, %v4703_v17, %v4699_v6 }
0x25a0   :  { %v4609_v8 = vmul.f32 %v6750_v48, %v4606_v31  ;;  %v6752_v41 = vpop.eup %6751  ;;  %vm4614_vm1 = vweird.f32 %v6750_v48  ;;  %v4715_v31 = vand.u32 2147483647, %v4690_v28 }
0x25a1   :  { %v6754_v20 = vpop.eup %6753  ;;  %v4707_v21 = vmul.f32 %v6752_v41, %v4690_v28  ;;  %vm4615_vm14 = vmor %vm4613_vm2, %vm4614_vm1  ;;  %vm4712_vm13 = vweird.f32 %v6752_v41 }
0x25a2   :  { %v4610_v7 = vsub.f32 1.0, %v4609_v8  ;;  %v4607_v60 = vadd.f32 1.0, %v6754_v20  ;;  %vm4713_vm3 = vmor %vm4711_vm11, %vm4712_vm13  ;;  %vm4716_vm12 = vcmp.eq.f32.partialorder %v4715_v31, 8.507059e+37  ;;  %vm9174_vm13 = vcmask 516352  }
0x25a3   :  { %v4708_v16 = vsub.f32 1.0, %v4707_v21  ;;  %vm9175_vm11 = vmmov %vm9174_vm13 }
0x25a4   :  { %v4611_v0 = vmul.f32 %v6750_v48, %v4610_v7  ;;  %6755 = vrcp.f32 %v4607_v60  ;;  %vm4628_vm1 = vweird.f32 %v4607_v60  ;;  %v4632_v28 = vand.u32 2147483647, %v4607_v60 }
0x25a5   :  { %v4709_v18 = vmul.f32 %v6752_v41, %v4708_v16 }
0x25a6   :  { %v4612_v38 = vadd.f32 %v6750_v48, %v4611_v0 }
0x25a7   :  { %v4710_v33 = vadd.f32 %v6752_v41, %v4709_v18 }
0x25a8   :  { %v4616_v5 = vsel %vm4615_vm14, %v6750_v48, %v4612_v38  ;;  %vm4633_vm14 = vcmp.eq.f32.partialorder %v4632_v28, 8.507059e+37  ;;  %v3127_v28 = vsel %vm260_vm4, %v8219_v10, 0.0 }
0x25a9   :  { %v8643_v2 = vsel %vm4618_vm15, %v4620_v46, %v4616_v5  ;;  %v4714_v45 = vsel %vm4713_vm3, %v6752_v41, %v4710_v33  ;;  %vm9173_vm15 = vcmp.eq.s32.totalorder %v7669_v13, 1  ;;  %vm9176_vm3 = vcmask 253952  }
0x25aa   :  { %v6756_v52 = vpop.eup %6755  ;;  %v8647_v43 = vsel %vm4716_vm12, %v4718_v22, %v4714_v45  ;;  %v3689_v45 = vsel %vm252_vm10, %v8383_v9, 0.0  ;;  %v2854_v9 = vrot.slane %v8161_v27, 1  ;;  %vm9177_vm12 = vmmov %vm9175_vm11 }
0x25ab   :  { %v4624_v55 = vmul.f32 %v6756_v52, %v4607_v60  ;;  %vm4629_vm0 = vweird.f32 %v6756_v52 }
0x25ac   :  { %vm4630_vm2 = vmor %vm4628_vm1, %vm4629_vm0 }
0x25ad   :  { %v4625_v29 = vsub.f32 1.0, %v4624_v55  ;;  %v2855_v55 = vperm.slane %v8161_v27, 0  ;;  %vm9178_vm0 = vmmov %vm9176_vm3 }
0x25ae   :  { %vm9179_vm1 = vmmov %vm9175_vm11 }
0x25af   :  { %v4626_v17 = vmul.f32 %v6756_v52, %v4625_v29 }
0x25b1   :  { %v4627_v8 = vadd.f32 %v6756_v52, %v4626_v17 }
0x25b3   :  { %v4631_v7 = vsel %vm4630_vm2, %v6756_v52, %v4627_v8  ;;  %v8673_v8 = vsel %vm244_vm7, %v8533_v56, 0.0  ;;  %v3691_v56 = vrot.slane %v3689_v45, 1  ;;  %vm9180_vm2 = vmmov %vm9179_vm1 }
0x25d4   :  { %v4736_v39 = vpop.permute.xlu2 %4735 }
0x25d5   :  { %v4741_v47 = vmul.f32 %v4736_v39, %v8639_v54  ;;  %v4642_v39 = vrot.slane %v8635_v49, 2 }
0x25d7   :  { %4745 = vrot.lane.b32.xlu1 %v4741_v47, %s7060_s6  ;;  %v4634_v47 = vand.u32 2147483648, %v4607_v60 }
0x25d9   :  { %v4635_v41 = vor.u32 1.1754944e-38, %v4634_v47 }
0x25db   :  { %v8653_v20 = vsel %vm4633_vm14, %v4635_v41, %v4631_v7  ;;  %v2856_v7 = vperm.slane %v2854_v9, 0  ;;  %v3130_v41 = vperm.slane %v3127_v28, 0  ;;  %vm9181_vm14 = vmmov %vm9179_vm1 }
0x25e5   :  { %v4654_v14 = vpop.permute.xlu2 %4653 }
0x25e6   :  { %v4659_v1 = vmul.f32 %v4654_v14, %v8643_v2 }
0x25e8   :  { %4663 = vrot.lane.b32.xlu1 %v4659_v1, %s7060_s6 }
0x25ee   :  { %v4738_v48 = vpop.permute.xlu0 %4737 }
0x25ef   :  { %v4742_v6 = vmul.f32 %v4738_v48, %v8647_v43  ;;  %v3692_v48 = vperm.slane %v3689_v45, 0 }
0x25f1   :  { %4747 = vrot.lane.b32.xlu2 %v4742_v6, %s7060_s6 }
0x25f6   :  { %v4728_v38 = vpop.permute.xlu0 %4727 }
0x25f7   :  { %v4732_v60 = vmul.f32 %v4728_v38, %v8647_v43 }
0x25f9   :  { %4645 = vrot.lane.b32.xlu2 %v4642_v39, %s7060_s6  ;;  %v4254_v39 = vperm.slane %v8673_v8, 0 }
0x25fe   :  { %v4656_v0 = vpop.permute.xlu1 %4655  ;;  %v4726_v51 = vpop.permute.xlu0 %4725 }
0x25ff   :  { %v4660_v21 = vmul.f32 %v4656_v0, %v8653_v20  ;;  %v4731_v49 = vmul.f32 %v4726_v51, %v8639_v54  ;;  %v4528_v0 = vsel %vm240_vm5, %v8605_v63, 0.0  ;;  %v3129_v51 = vrot.slane %v3127_v28, 1 }
0x2600   :  { %v4531_v38 = vperm.slane %v4528_v0, 0  ;;  %v4530_v27 = vrot.slane %v4528_v0, 1 }
0x2601   :  { %4665 = vrot.lane.b32.xlu0 %v4660_v21, %s7060_s6  ;;  %v3693_v21 = vperm.slane %v3691_v56, 0 }
0x2602   :  { %v4532_v10 = vperm.slane %v4530_v27, 0 }
0x2606   :  { %v4644_v1 = vpop.permute.xlu0 %4643 }
0x2607   :  { %v4649_v52 = vmul.f32 %v4644_v1, %v8643_v2  ;;  %v3970_v1 = vsel %vm9173_vm15, %v8456_v30, 0.0  ;;  %vm9182_vm15 = vmmov %vm9178_vm0 }
0x2649   :  { %v4746_v44 = vpop.permute.xlu1 %4745 }
0x264a   :  { %v4751_v16 = vadd.f32 %v4746_v44, %v4731_v49  ;;  %v3131_v49 = vperm.slane %v3129_v51, 0 }
0x264b   :  { %v4748_v5 = vpop.permute.xlu2 %4747 }
0x264c   :  { %6757 = vtanh.f32 %v4751_v16  ;;  %v4752_v46 = vadd.f32 %v4748_v5, %v4732_v60 }
0x264e   :  { %6759 = vtanh.f32 %v4752_v46 }
0x2652   :  { %v6758_v18 = vpop.eup %6757 }
0x2653   :  { %4757 = vrot.lane.b32.xlu1 %v6758_v18, %s7060_s6  ;;  %v4646_v22 = vpop.permute.xlu2 %4645  ;;  %v3408_v18 = vsel %vm256_vm6, %v8305_v34, 0.0 }
0x2654   :  { %v6760_v14 = vpop.eup %6759  ;;  %v4650_v29 = vmul.f32 %v4646_v22, %v8653_v20  ;;  %v3410_v45 = vrot.slane %v3408_v18, 1 }
0x2655   :  { %4759 = vrot.lane.b32.xlu2 %v6760_v14, %s7060_s6  ;;  %v3411_v14 = vperm.slane %v3408_v18, 0 }
0x265a   :  { %v4664_v33 = vpop.permute.xlu1 %4663 }
0x265b   :  { %v4669_v58 = vadd.f32 %v4664_v33, %v4649_v52  ;;  %v3973_v52 = vperm.slane %v3970_v1, 0 }
0x265d   :  { %6761 = vtanh.f32 %v4669_v58 }
0x2663   :  { %v6762_v31 = vpop.eup %6761 }
0x2664   :  { %4675 = vrot.lane.b32.xlu0 %v6762_v31, %s7060_s6 }
0x266c   :  { %2857 = vrot.lane.b32.xlu0 %v2855_v55, %s7060_s6 }
0x2673   :  { %v4666_v6 = vpop.permute.xlu0 %4665 }
0x2674   :  { %v4670_v17 = vadd.f32 %v4666_v6, %v4650_v29  ;;  %3694 = vrot.lane.b32.xlu0 %v3692_v48, %s7060_s6  ;;  %v3412_v48 = vperm.slane %v3410_v45, 0  ;;  %v3972_v29 = vrot.slane %v3970_v1, 1  ;;  %v4805_v1 = vld [vmem:[%s9132_s13 + $0x20] sm:$0xff] }
0x2676   :  { %6763 = vtanh.f32 %v4670_v17  ;;  %v3964_v17 = vsel %vm252_vm10, %v8466_v4, 0.0 }
0x2677   :  { %v3966_v4 = vrot.slane %v3964_v17, 1 }
0x267c   :  { %v6764_v47 = vpop.eup %6763  ;;  %4256 = vrot.lane.b32.xlu0 %v4254_v39, %s7060_s6 }
0x267d   :  { %4677 = vrot.lane.b32.xlu2 %v6764_v47, %s7060_s6 }
0x2684   :  { %2859 = vrot.lane.b32.xlu0 %v2856_v7, %s7060_s6 }
0x2685   :  { %3132 = vrot.lane.b32.xlu2 %v3130_v41, %s7060_s6 }
0x268c   :  { %3696 = vrot.lane.b32.xlu0 %v3693_v21, %s7060_s6 }
0x268d   :  { %4533 = vrot.lane.b32.xlu2 %v4531_v38, %s7060_s6 }
0x2694   :  { %4535 = vrot.lane.b32.xlu0 %v4532_v10, %s7060_s6 }
0x2695   :  { %3134 = vrot.lane.b32.xlu2 %v3131_v49, %s7060_s6 }
0x26af   :  { %v4760_v44 = vpop.permute.xlu2 %4759 }
0x26b0   :  { %v4764_v16 = vmul.f32 %v4760_v44, %v8647_v43 }
0x26b2   :  { %v4781_v5 = vrot.slane %v4764_v16, 7  ;;  %v4253_v16 = vrot.slane %v8673_v8, 1  ;;  %v4807_v8 = vld [vmem:[%s9132_s13 + $0x30] sm:$0xff] }
0x26c5   :  { %v4758_v60 = vpop.permute.xlu1 %4757 }
0x26c6   :  { %v4763_v63 = vmul.f32 %v4758_v60, %v8639_v54 }
0x26c8   :  { %v4782_v46 = vsel %vm543_vm8, %v4781_v5, %v4763_v63  ;;  %v4245_v5 = vsel %vm256_vm6, %v8543_v11, 0.0  ;;  %v4808_v11 = vld [vmem:[%s9132_s13 + $0x38] sm:$0xff] }
0x26c9   :  { %4783 = vrot.lane.b32.xlu1 %v4782_v46, %s7063_s1  ;;  %v4247_v46 = vrot.slane %v4245_v5, 1  ;;  %4827 = vmatpush.msra.mxu2 %v4808_v11 }
0x26cb   :  { %4828 = vmatpush.msra.mxu2 %v4807_v8 }
0x26d1   :  { %3413 = vrot.lane.b32.xlu1 %v3411_v14, %s7060_s6  ;;  %v4806_v14 = vld [vmem:[%s9132_s13 + $0x28] sm:$0xff] }
0x26d2   :  { %4829 = vmatpush.msra.mxu2 %v4806_v14 }
0x26d4   :  { %4830 = vmatpush.msra.mxu2 %v4805_v1 }
0x26d6   :  { %v4676_v43 = vpop.permute.xlu0 %4675 }
0x26d7   :  { %v4681_v33 = vmul.f32 %v4676_v43, %v8643_v2  ;;  %v4678_v54 = vpop.permute.xlu2 %4677  ;;  %v4522_v2 = vsel %vm260_vm4, %v8612_v50, 0.0  ;;  %v4804_v43 = vld [vmem:[%s9132_s13 + $0x18] sm:$0xff] }
0x26d8   :  { %v4682_v58 = vmul.f32 %v4678_v54, %v8653_v20  ;;  %v3974_v20 = vperm.slane %v3972_v29, 0  ;;  %v4524_v47 = vrot.slane %v4522_v2, 1  ;;  %4831 = vmatpush.msra.mxu2 %v4804_v43  ;;  %v4801_v54 = vld [vmem:[%s9132_s13] sm:$0xff] }
0x26d9   :  { %v4767_v31 = vrot.slane %v4681_v33, 7  ;;  %3975 = vrot.lane.b32.xlu1 %v3973_v52, %s7060_s6  ;;  %v4803_v52 = vld [vmem:[%s9132_s13 + $0x10] sm:$0xff]  ;;  %v4802_v33 = vld [vmem:[%s9132_s13 + $0x8] sm:$0xff] }
0x26da   :  { %v4768_v55 = vrot.slane %v4682_v58, 6  ;;  %4832 = vmatpush.msra.mxu2 %v4803_v52 }
0x26dc   :  { %v4769_v34 = vsel %vm543_vm8, %v4768_v55, %v4767_v31  ;;  %4833 = vmatpush.msra.mxu2 %v4802_v33  ;;  %v8773_v31 = vshrl.u32 %v225_v62, 7  ;;  %v6246_v62 = vld [vmem:[%s9133_s14] ss:$0 sm:$0xff] }
0x26dd   :  { %4770 = vrot.lane.b32.xlu2 %v4769_v34, %s7063_s1  ;;  %s6021_s1 = sshll.u32 %s9135_s16, 4  ;;  %s6022_s1 = int_to_ptr.hbm [resolvable:$true] %s6021_s1 }
0x26de   :  { %v2858_v22 = vpop.permute.xlu0 %2857  ;;  %4834 = vmatpush.msra.mxu2 %v4801_v54  ;;  %6192 = vset.pattern.permute.xlu1 %v8773_v31 }
0x26df   :  { %2863 = vst.msk [vmem:[#allocation3 + $0x7] sm:$0x1] %vm9174_vm13, %v2858_v22  ;;  %v3133_v30 = vpop.permute.xlu2 %3132  ;;  %vm9183_vm13 = vmmov %vm9179_vm1  ;;  %6194 = vset.pattern.permute.xlu2 %v8773_v31  ;;  %6193 = vset.pattern.permute.xlu0 %v8773_v31 }
0x26e0   :  { %3138 = vst.msk [vmem:[#allocation3 + $0x6] sm:$0x1] %vm9175_vm11, %v3133_v30  ;;  %vm9184_vm11 = vmmov %vm9179_vm1 }
0x26e1   :  { %4526 = vst.msk [vmem:[#allocation3 + $0x6] sm:$0x1] %vm9176_vm3, %v4522_v2  ;;  %3415 = vrot.lane.b32.xlu1 %v3412_v48, %s7060_s6  ;;  %vm9185_vm3 = vmmov %vm9178_vm0 }
0x26e5   :  { %3977 = vrot.lane.b32.xlu2 %v3974_v20, %s7060_s6 }
0x26e6   :  { %v3695_v6 = vpop.permute.xlu0 %3694 }
0x26e7   :  { %3700 = vst.msk [vmem:[#allocation3 + $0x4] sm:$0x1] %vm9177_vm12, %v3695_v6  ;;  %v4534_v39 = vpop.permute.xlu2 %4533  ;;  %vm9186_vm12 = vmmov %vm9179_vm1 }
0x26e8   :  { %3968 = vst.msk [vmem:[#allocation3 + $0x4] sm:$0x1] %vm9178_vm0, %v3964_v17  ;;  %vm9187_vm0 = vcmp.eq.s32.totalorder %v7377_v15, 1 }
0x26e9   :  { %4539 = vst.msk [vmem:[#allocation3 + $0x1] sm:$0x1] %vm9179_vm1, %v4534_v39  ;;  %vm9188_vm1 = vmmov %vm9185_vm3 }
0x26ee   :  { %v4257_v50 = vpop.permute.xlu0 %4256 }
0x26ef   :  { %4262 = vst.msk [vmem:[#allocation3 + $0x2] sm:$0x1] %vm9180_vm2, %v4257_v50  ;;  %v3135_v9 = vpop.permute.xlu2 %3134  ;;  %vm9189_vm2 = vmmov %vm9188_vm1 }
0x26f0   :  { %3139 = vst.msk [vmem:[#allocation3 + $0xe] sm:$0x1] %vm9181_vm14, %v3135_v9  ;;  %vm9190_vm14 = vcmp.eq.s32.totalorder %v7394_v35, 1  ;;  %v4255_v35 = vperm.slane %v4253_v16, 0 }
0x26f1   :  { %4527 = vst.msk [vmem:[#allocation3 + $0xe] sm:$0x1] %vm9182_vm15, %v4524_v47  ;;  %vm9191_vm15 = vmmov %vm9184_vm11  ;;  %v8797_v47 = vld [vmem:[%s9134_s15] sm:$0xff] }
0x26f6   :  { %v2860_v28 = vpop.permute.xlu0 %2859 }
0x26f7   :  { %2864 = vst.msk [vmem:[#allocation3 + $0xf] sm:$0x1] %vm9183_vm13, %v2860_v28  ;;  %vm9192_vm13 = vmmov %vm9184_vm11 }
0x26fe   :  { %v3697_v7 = vpop.permute.xlu0 %3696 }
0x26ff   :  { %3701 = vst.msk [vmem:[#allocation3 + $0xc] sm:$0x1] %vm9184_vm11, %v3697_v7  ;;  %vm9193_vm11 = vmmov %vm9188_vm1 }
0x2700   :  { %3969 = vst.msk [vmem:[#allocation3 + $0xc] sm:$0x1] %vm9185_vm3, %v3966_v4  ;;  %vm9194_vm3 = vmmov %vm9186_vm12 }
0x2706   :  { %v4536_v41 = vpop.permute.xlu0 %4535 }
0x2707   :  { %4540 = vst.msk [vmem:[#allocation3 + $0x9] sm:$0x1] %vm9186_vm12, %v4536_v41  ;;  %vm9195_vm12 = vmmov %vm9194_vm3 }
0x2737   :  { %v4771_v56 = vpop.permute.xlu2 %4770 }
0x2738   :  { %v4773_v0 = vsel %vm9187_vm0, %v4771_v56, 0.0  ;;  %vm9196_vm0 = vmmov %vm9188_vm1 }
0x2739   :  { %v4775_v21 = vrot.slane %v4773_v0, 1  ;;  %4777 = vst.msk [vmem:[#allocation3 + $0x7] sm:$0x1] %vm9188_vm1, %v4773_v0  ;;  %vm9197_vm1 = vmmov %vm9194_vm3 }
0x273b   :  { %4778 = vst.msk [vmem:[#allocation3 + $0xf] sm:$0x1] %vm9189_vm2, %v4775_v21  ;;  %v4784_v38 = vpop.permute.xlu1 %4783  ;;  %vm9198_vm2 = vmmov %vm9197_vm1 }
0x273c   :  { %v4786_v27 = vsel %vm9190_vm14, %v4784_v38, 0.0  ;;  %vm9199_vm14 = vmmov %vm9197_vm1 }
0x273d   :  { %v4788_v51 = vrot.slane %v4786_v27, 1  ;;  %v4789_v10 = vperm.slane %v4786_v27, 0 }
0x273f   :  { %v4790_v49 = vperm.slane %v4788_v51, 0  ;;  %v3978_v44 = vpop.permute.xlu2 %3977  ;;  %4791 = vrot.lane.b32.xlu1 %v4789_v10, %s7060_s6 }
0x2740   :  { %3982 = vst.msk [vmem:[#allocation3 + $0xb] sm:$0x1] %vm9191_vm15, %v3978_v44  ;;  %vm9200_vm15 = vcmask 523264  }
0x2741   :  { %4793 = vrot.lane.b32.xlu2 %v4790_v49, %s7060_s6 }
0x2743   :  { %v3414_v60 = vpop.permute.xlu1 %3413 }
0x2744   :  { %3419 = vst.msk [vmem:[#allocation3 + $0x5] sm:$0x1] %vm9192_vm13, %v3414_v60  ;;  %vm9201_vm13 = vmmov %vm9200_vm15 }
0x2745   :  { %4249 = vst.msk [vmem:[#allocation3 + $0x5] sm:$0x1] %vm9193_vm11, %v4245_v5  ;;  %vm4905_vm11 = vcmask 64512  }
0x2747   :  { %4258 = vrot.lane.b32.xlu1 %v4255_v35, %s7060_s6  ;;  %s6019_s6 = sshll.u32 %s7086_s8, 4  ;;  %s6020_s6 = int_to_ptr.vmem [resolvable:$true] %s6019_s6 }
0x274b   :  { %v3976_v63 = vpop.permute.xlu1 %3975 }
0x274c   :  { %3981 = vst.msk [vmem:[#allocation3 + $0x3] sm:$0x1] %vm9194_vm3, %v3976_v63  ;;  %vm4861_vm3 = vcmask 58368  }
0x2753   :  { %v3416_v18 = vpop.permute.xlu1 %3415 }
0x2754   :  { %3420 = vst.msk [vmem:[#allocation3 + $0xd] sm:$0x1] %vm9195_vm12, %v3416_v18  ;;  %vm4882_vm12 = vcmask 1042434  }
0x2755   :  { %4250 = vst.msk [vmem:[#allocation3 + $0xd] sm:$0x1] %vm9196_vm0, %v4247_v46  ;;  %vm4885_vm0 = vcmask 59393  }
0x279b   :  { %v4794_v58 = vpop.permute.xlu2 %4793 }
0x279c   :  { %4798 = vst.msk [vmem:[#allocation3 + $0x8] sm:$0x1] %vm9197_vm1, %v4794_v58  ;;  %vm9202_vm1 = vcmp.eq.s32.totalorder %v7669_v13, 1 }
0x27b1   :  { %v4792_v55 = vpop.permute.xlu1 %4791 }
0x27b2   :  { %4797 = vst.msk [vmem:[#allocation3] sm:$0x1] %vm9198_vm2, %v4792_v55 }
0x27b9   :  { %v4259_v45 = vpop.permute.xlu1 %4258  ;;  %v4799_v34 = vld [vmem:[#allocation3] sm:$0xff] }
0x27ba   :  { %4263 = vst.msk [vmem:[#allocation3 + $0xa] sm:$0x1] %vm9199_vm14, %v4259_v45  ;;  %6134 = vmatmul.msk.f32.vlgmr.msra.gmra.mxu2 %vm9200_vm15, %v4799_v34  ;;  %vm4963_vm14 = vcmask 1043459   ;;  %vm4966_vm15 = vcmask 60418  }
0x27c1   :  { %v4800_v22 = vld [vmem:[#allocation3 + $0x8] sm:$0xff] }
0x27c2   :  { %6135 = vmatmul.msk.f32.gmra.mxu2 %vm9201_vm13, %v4800_v22  ;;  %vm5044_vm13 = vcmask 1044484  }
0x283d   :  { %v4836_v48 = vpop.f32.mrf.mxu2 }
0x283e   :  { %v8785_v29 = vadd.f32 %v6246_v62, %v4836_v48 }
0x2840   :  { %v5455_v30 = vperm.slane %v8785_v29, 1  ;;  %v5439_v2 = vperm.slane %v8785_v29, 0  ;;  %v5537_v50 = vperm.slane %v8785_v29, 2  ;;  %v5845_v12 = vperm.slane %v8785_v29, 6 }
0x2842   :  { %5460 = vperm.xlu2 %6194, %v5455_v30   ;;  %5444 = vperm.xlu1 %6192, %v5439_v2  }
0x2845   :  { %v4839_v20 = vpop.f32.mrf.mxu2 }
0x2846   :  { %v8789_v6 = vadd.f32 %v6246_v62, %v4839_v20 }
0x2848   :  { %v5462_v17 = vperm.slane %v8789_v6, 1  ;;  %v5446_v39 = vperm.slane %v8789_v6, 0 }
0x284a   :  { %5467 = vperm.xlu1 %6192, %v5462_v17   ;;  %5451 = vperm.xlu0 %6193, %v5446_v39  }
0x2852   :  { %5542 = vperm.xlu0 %6193, %v5537_v50  }
0x289c   :  { %v5461_v4 = vpop.permute.xlu2 %5460 }
0x28b4   :  { %v5445_v9 = vpop.permute.xlu1 %5444 }
0x28b5   :  { %v5453_v28 = vadd.f32 %v5445_v9, %v8797_v47 }
0x28b7   :  { %v5469_v7 = vadd.f32 %v5461_v4, %v5453_v28 }
0x28b9   :  { %v5471_v41 = vsel %vm4905_vm11, %v5469_v7, -inf }
0x28ba   :  { %v5472_v56 = vrot.slane %v5471_v41, 4 }
0x28bc   :  { %v5473_v0 = vmax.f32 %v5471_v41, %v5472_v56  ;;  %v5452_v21 = vpop.permute.xlu0 %5451  ;;  %v5468_v51 = vpop.permute.xlu1 %5467  ;;  %v5517_v41 = vrot.slane %v8789_v6, 7 }
0x28bd   :  { %v5454_v38 = vadd.f32 %v5452_v21, %v8797_v47 }
0x28be   :  { %v5474_v27 = vrot.slane %v5473_v0, 2 }
0x28bf   :  { %v5470_v10 = vadd.f32 %v5468_v51, %v5454_v38  ;;  %v5518_v38 = vsel %vm543_vm8, %v5517_v41, %v8785_v29 }
0x28c0   :  { %v5475_v49 = vmax.f32 %v5473_v0, %v5474_v27 }
0x28c1   :  { %v5478_v44 = vsel %vm4905_vm11, %v5470_v10, -inf }
0x28c2   :  { %v5476_v16 = vrot.slane %v5475_v49, 1  ;;  %v5479_v60 = vrot.slane %v5478_v44, 4 }
0x28c4   :  { %v5477_v5 = vmax.f32 %v5475_v49, %v5476_v16  ;;  %v5480_v35 = vmax.f32 %v5478_v44, %v5479_v60  ;;  %v5544_v49 = vperm.slane %v8789_v6, 2  ;;  %v8819_v44 = vld [vmem:[%s9121_s2] sm:$0x3]  ;;  %v5543_v60 = vpop.permute.xlu0 %5542 }
0x28c6   :  { %v5485_v63 = vsub.f32 %v5469_v7, %v5477_v5  ;;  %v5481_v46 = vrot.slane %v5480_v35, 2 }
0x28c8   :  { %v5487_v18 = vmul.f32 1.442695, %v5485_v63  ;;  %v5482_v11 = vmax.f32 %v5480_v35, %v5481_v46 }
0x28ca   :  { %6765 = vpow2.f32 %v5487_v18  ;;  %v5483_v8 = vrot.slane %v5482_v11, 1 }
0x28cc   :  { %v5484_v14 = vmax.f32 %v5482_v11, %v5483_v8 }
0x28ce   :  { %v5486_v1 = vsub.f32 %v5470_v10, %v5484_v14 }
0x28d0   :  { %v6766_v43 = vpop.eup %6765  ;;  %v5489_v52 = vmul.f32 1.442695, %v5486_v1 }
0x28d1   :  { %v5491_v33 = vsel %vm4905_vm11, %v6766_v43, 0.0 }
0x28d2   :  { %v5492_v54 = vrot.slane %v5491_v33, 4  ;;  %6767 = vpow2.f32 %v5489_v52 }
0x28d4   :  { %v5493_v58 = vadd.f32 %v5492_v54, %v5491_v33 }
0x28d6   :  { %v5494_v55 = vrot.slane %v5493_v58, 2 }
0x28d8   :  { %v6768_v45 = vpop.eup %6767  ;;  %v5495_v34 = vadd.f32 %v5494_v55, %v5493_v58 }
0x28d9   :  { %v5498_v22 = vsel %vm4905_vm11, %v6768_v45, 0.0 }
0x28da   :  { %v5496_v62 = vrot.slane %v5495_v34, 1  ;;  %v5499_v48 = vrot.slane %v5498_v22, 4 }
0x28dc   :  { %v5500_v30 = vadd.f32 %v5499_v48, %v5498_v22  ;;  %v5497_v2 = vadd.f32 %v5496_v62, %v5495_v34 }
0x28de   :  { %v5501_v20 = vrot.slane %v5500_v30, 2  ;;  %6769 = vlog2.f32 %v5497_v2 }
0x28e0   :  { %v5502_v17 = vadd.f32 %v5501_v20, %v5500_v30 }
0x28e2   :  { %v5503_v39 = vrot.slane %v5502_v17, 1 }
0x28e4   :  { %v5504_v50 = vadd.f32 %v5503_v39, %v5502_v17  ;;  %v6770_v9 = vpop.eup %6769 }
0x28e5   :  { %v5506_v28 = vmul.f32 0.6931472, %v6770_v9 }
0x28e6   :  { %6771 = vlog2.f32 %v5504_v50 }
0x28e7   :  { %v5509_v56 = vadd.f32 %v5506_v28, %v5477_v5 }
0x28ec   :  { %v6772_v4 = vpop.eup %6771 }
0x28ed   :  { %v5508_v7 = vmul.f32 0.6931472, %v6772_v4 }
0x28ef   :  { %v5510_v0 = vadd.f32 %v5508_v7, %v5484_v14 }
0x28f1   :  { %v5513_v21 = vsel %vm543_vm8, %v5510_v0, %v5509_v56 }
0x28f2   :  { %v8811_v27 = vsel %vm240_vm5, %v5513_v21, %v5518_v38 }
0x28f3   :  { %v5528_v51 = vperm.slane %v8811_v27, 1  ;;  %v5521_v10 = vperm.slane %v8811_v27, 0 }
0x28f5   :  { %5533 = vperm.xlu1 %6192, %v5528_v51   ;;  %5526 = vperm.xlu2 %6194, %v5521_v10  }
0x28fd   :  { %6195 = vset.pattern.permute.xlu1 %v7061_v40  ;;  %5549 = vperm.xlu2 %6194, %v5544_v49  }
0x28fe   :  { %4845 = vperm.xlu1 %6195, %v8819_v44  }
0x2905   :  { %6196 = vset.pattern.permute.xlu2 %v7066_v57 }
0x2906   :  { %4868 = vperm.xlu2 %6196, %v8819_v44   ;;  %6197 = vset.pattern.permute.xlu1 %v8773_v31 }
0x290e   :  { %6198 = vset.pattern.permute.xlu2 %v8773_v31 }
0x294f   :  { %v5527_v32 = vpop.permute.xlu2 %5526 }
0x2950   :  { %v5535_v16 = vadd.f32 %v5527_v32, %v8797_v47 }
0x2952   :  { %v5551_v5 = vadd.f32 %v5543_v60, %v5535_v16 }
0x2954   :  { %v5553_v35 = vsel %vm4905_vm11, %v5551_v5, -inf }
0x2955   :  { %v5554_v63 = vrot.slane %v5553_v35, 4 }
0x2957   :  { %v5555_v40 = vmax.f32 %v5553_v35, %v5554_v63  ;;  %v5550_v52 = vpop.permute.xlu2 %5549 }
0x2959   :  { %v5556_v46 = vrot.slane %v5555_v40, 2 }
0x295b   :  { %v5557_v18 = vmax.f32 %v5555_v40, %v5556_v46 }
0x295d   :  { %v5558_v11 = vrot.slane %v5557_v18, 1 }
0x295f   :  { %v5559_v8 = vmax.f32 %v5557_v18, %v5558_v11 }
0x2960   :  { %v4869_v24 = vpop.permute.xlu2 %4868 }
0x2961   :  { %v5567_v57 = vsub.f32 %v5551_v5, %v5559_v8 }
0x2963   :  { %v5569_v14 = vmul.f32 1.442695, %v5567_v57 }
0x2965   :  { %6773 = vpow2.f32 %v5569_v14 }
0x2967   :  { %v5534_v1 = vpop.permute.xlu1 %5533 }
0x2968   :  { %v5536_v43 = vadd.f32 %v5534_v1, %v8797_v47 }
0x296a   :  { %v5552_v33 = vadd.f32 %v5550_v52, %v5536_v43 }
0x296b   :  { %v6774_v55 = vpop.eup %6773 }
0x296c   :  { %v5560_v54 = vsel %vm4905_vm11, %v5552_v33, -inf  ;;  %v5573_v62 = vsel %vm4905_vm11, %v6774_v55, 0.0  ;;  %v5614_v55 = vperm.slane %v8785_v29, 3 }
0x296d   :  { %v5561_v58 = vrot.slane %v5560_v54, 4  ;;  %v5574_v20 = vrot.slane %v5573_v62, 4 }
0x296f   :  { %v5562_v45 = vmax.f32 %v5560_v54, %v5561_v58  ;;  %v5575_v4 = vadd.f32 %v5574_v20, %v5573_v62  ;;  %v5621_v58 = vperm.slane %v8789_v6, 3 }
0x2970   :  { %v4846_v34 = vpop.permute.xlu1 %4845 }
0x2971   :  { %v5563_v22 = vrot.slane %v5562_v45, 2  ;;  %vm4847_vm5 = vcmp.eq.s32.totalorder %v4846_v34, %v7356_v3  ;;  %v5576_v21 = vrot.slane %v5575_v4, 2 }
0x2972   :  { %v6136_v48 = vsel %vm4847_vm5, 1.0, %v7059_v25  ;;  %vm5047_vm5 = vcmask 61443  }
0x2973   :  { %v5564_v30 = vmax.f32 %v5562_v45, %v5563_v22  ;;  %v4851_v2 = vrot.slane %v6136_v48, 1  ;;  %v4854_v9 = vmul.f32 %v6136_v48, %v8785_v29  ;;  %v5577_v38 = vadd.f32 %v5576_v21, %v5575_v4 }
0x2974   :  { %v4889_v45 = vperm.slane %v6136_v48, 0 }
0x2975   :  { %v5565_v17 = vrot.slane %v5564_v30, 1  ;;  %v4855_v39 = vmul.f32 %v4851_v2, %v8789_v6  ;;  %v5578_v49 = vrot.slane %v5577_v38, 1 }
0x2977   :  { %v5566_v50 = vmax.f32 %v5564_v30, %v5565_v17  ;;  %v4858_v28 = vrot.slane %v4855_v39, 7  ;;  %v5579_v60 = vadd.f32 %v5578_v49, %v5577_v38 }
0x2979   :  { %v5568_v7 = vsub.f32 %v5552_v33, %v5566_v50  ;;  %v4859_v41 = vsel %vm543_vm8, %v4858_v28, %v4854_v9 }
0x297a   :  { %v4862_v56 = vsel %vm4861_vm3, %v4859_v41, 0.0 }
0x297b   :  { %v5571_v0 = vmul.f32 1.442695, %v5568_v7  ;;  %4863 = vadd.xlane.f32.xlu0 %v4862_v56 }
0x297d   :  { %6775 = vpow2.f32 %v5571_v0 }
0x297e   :  { %6777 = vlog2.f32 %v5579_v60 }
0x2983   :  { %v6776_v51 = vpop.eup %6775 }
0x2984   :  { %v5580_v10 = vsel %vm4905_vm11, %v6776_v51, 0.0  ;;  %v6778_v46 = vpop.eup %6777 }
0x2985   :  { %v5581_v32 = vrot.slane %v5580_v10, 4  ;;  %v5588_v18 = vmul.f32 0.6931472, %v6778_v46 }
0x2987   :  { %v5582_v16 = vadd.f32 %v5581_v32, %v5580_v10  ;;  %v5591_v14 = vadd.f32 %v5588_v18, %v5559_v8  ;;  %v4896_v8 = vperm.slane %v6136_v48, 1 }
0x2989   :  { %v5583_v5 = vrot.slane %v5582_v16, 2  ;;  %v6199_v34 = vpack.i.bf16 %v4896_v8, %v4889_v45 }
0x298b   :  { %v5584_v35 = vadd.f32 %v5583_v5, %v5582_v16 }
0x298d   :  { %v5585_v63 = vrot.slane %v5584_v35, 1 }
0x298f   :  { %v5586_v40 = vadd.f32 %v5585_v63, %v5584_v35 }
0x2991   :  { %6779 = vlog2.f32 %v5586_v40 }
0x2997   :  { %v6780_v11 = vpop.eup %6779 }
0x2998   :  { %v5590_v57 = vmul.f32 0.6931472, %v6780_v11 }
0x299a   :  { %v5592_v1 = vadd.f32 %v5590_v57, %v5566_v50 }
0x299c   :  { %v5595_v43 = vsel %vm543_vm8, %v5592_v1, %v5591_v14 }
0x299d   :  { %v8843_v52 = vsel %vm244_vm7, %v5595_v43, %v8811_v27  ;;  %vm4870_vm7 = vcmp.eq.s32.totalorder %v4869_v24, %v7356_v3 }
0x299e   :  { %v5605_v33 = vperm.slane %v8843_v52, 1  ;;  %v5598_v54 = vperm.slane %v8843_v52, 0  ;;  %v8852_v27 = vsel %vm4870_vm7, 1.0, %v7059_v25  ;;  %vm5125_vm7 = vcmask 1045509  }
0x299f   :  { %v4874_v22 = vrot.slane %v8852_v27, 7  ;;  %v4878_v62 = vmul.f32 %v8852_v27, %v8789_v6  ;;  %v4920_v8 = vrot.slane %v8852_v27, 1 }
0x29a0   :  { %5610 = vperm.xlu2 %6198, %v5605_v33   ;;  %5603 = vperm.xlu1 %6197, %v5598_v54  }
0x29a1   :  { %v4877_v30 = vmul.f32 %v4874_v22, %v8785_v29  ;;  %v4881_v48 = vrot.slane %v4878_v62, 7 }
0x29a3   :  { %v4883_v2 = vsel %vm4882_vm12, %v4881_v48, %v4877_v30  ;;  %vm5128_vm12 = vcmask 62468  }
0x29a4   :  { %v4886_v20 = vsel %vm4885_vm0, %v4883_v2, 0.0 }
0x29a8   :  { %5626 = vperm.xlu2 %6198, %v5621_v58   ;;  %5619 = vperm.xlu1 %6197, %v5614_v55  }
0x29b0   :  { %6200 = vperm.xlu2 %6198, %v6199_v34   ;;  %6204 = vset.pattern.permute.xlu1 %v7068_v61 }
0x29d2   :  { %4887 = vadd.xlane.f32.xlu1 %v4886_v20 }
0x29eb   :  { %4948 = vperm.xlu1 %6204, %v8819_v44  }
0x29f3   :  { %6212 = vset.pattern.permute.xlu1 %v8773_v31 }
0x29fa   :  { %v5611_v61 = vpop.permute.xlu2 %5610 }
0x29fb   :  { %v5613_v17 = vadd.f32 %v5611_v61, %v8797_v47 }
0x2a02   :  { %v5627_v39 = vpop.permute.xlu2 %5626 }
0x2a03   :  { %v5629_v50 = vadd.f32 %v5627_v39, %v5613_v17 }
0x2a05   :  { %v5637_v9 = vsel %vm4905_vm11, %v5629_v50, -inf }
0x2a06   :  { %v5638_v28 = vrot.slane %v5637_v9, 4 }
0x2a08   :  { %v5639_v4 = vmax.f32 %v5637_v9, %v5638_v28 }
0x2a0a   :  { %v5640_v7 = vrot.slane %v5639_v4, 2  ;;  %v6201_v41 = vpop.permute.xlu2 %6200 }
0x2a0b   :  { %v6203_v56 = vunpack.i.h.bf16 %v6201_v41  ;;  %v6202_v0 = vunpack.i.l.bf16 %v6201_v41 }
0x2a0c   :  { %v5641_v21 = vmax.f32 %v5639_v4, %v5640_v7 }
0x2a0d   :  { %v4904_v38 = vmul.f32 %v6203_v56, %v8797_v47  ;;  %v4903_v51 = vmul.f32 %v6202_v0, %v8797_v47 }
0x2a0e   :  { %v5642_v10 = vrot.slane %v5641_v21, 1 }
0x2a0f   :  { %v4913_v49 = vsel %vm4905_vm11, %v4904_v38, 0.0  ;;  %v4906_v32 = vsel %vm4905_vm11, %v4903_v51, 0.0 }
0x2a10   :  { %v5643_v16 = vmax.f32 %v5641_v21, %v5642_v10  ;;  %v4914_v60 = vrot.slane %v4913_v49, 4  ;;  %v4907_v5 = vrot.slane %v4906_v32, 4 }
0x2a12   :  { %v5645_v35 = vsub.f32 %v5629_v50, %v5643_v16  ;;  %v4915_v63 = vadd.f32 %v4914_v60, %v4913_v49  ;;  %v4908_v40 = vadd.f32 %v4907_v5, %v4906_v32  ;;  %v5604_v46 = vpop.permute.xlu1 %5603 }
0x2a13   :  { %v5612_v54 = vadd.f32 %v5604_v46, %v8797_v47 }
0x2a14   :  { %v4916_v18 = vrot.slane %v4915_v63, 2  ;;  %v4909_v11 = vrot.slane %v4908_v40, 2  ;;  %v5648_v57 = vmul.f32 1.442695, %v5645_v35 }
0x2a16   :  { %v4917_v14 = vadd.f32 %v4916_v18, %v4915_v63  ;;  %v4910_v1 = vadd.f32 %v4909_v11, %v4908_v40  ;;  %6781 = vpow2.f32 %v5648_v57 }
0x2a18   :  { %v4918_v43 = vrot.slane %v4917_v14, 1  ;;  %v4911_v33 = vrot.slane %v4910_v1, 1 }
0x2a1a   :  { %v5620_v58 = vpop.permute.xlu1 %5619  ;;  %v4912_v55 = vadd.f32 %v4911_v33, %v4910_v1  ;;  %v4919_v45 = vadd.f32 %v4918_v43, %v4917_v14 }
0x2a1b   :  { %v5628_v34 = vadd.f32 %v5620_v58, %v5612_v54 }
0x2a1c   :  { %v4923_v24 = vmul.f32 %v4920_v8, %v4919_v45  ;;  %v4922_v30 = vmul.f32 %v8852_v27, %v4912_v55  ;;  %v6782_v2 = vpop.eup %6781 }
0x2a1d   :  { %v5630_v22 = vsel %vm4905_vm11, %v5628_v34, -inf  ;;  %v5657_v50 = vsel %vm4905_vm11, %v6782_v2, 0.0 }
0x2a1e   :  { %v5631_v62 = vrot.slane %v5630_v22, 4  ;;  %v4926_v48 = vrot.slane %v4923_v24, 7  ;;  %v5658_v28 = vrot.slane %v5657_v50, 4 }
0x2a20   :  { %v5632_v20 = vmax.f32 %v5630_v22, %v5631_v62  ;;  %v4927_v61 = vsel %vm543_vm8, %v4926_v48, %v4922_v30  ;;  %v5659_v41 = vadd.f32 %v5658_v28, %v5657_v50  ;;  %v5698_v28 = vperm.slane %v8789_v6, 4 }
0x2a21   :  { %v4929_v17 = vsel %vm4861_vm3, %v4927_v61, 0.0  ;;  %v8889_v61 = vpop.xlane.xlu0 %4863 }
0x2a22   :  { %v5633_v39 = vrot.slane %v5632_v20, 2  ;;  %4930 = vadd.xlane.f32.xlu2 %v4929_v17  ;;  %v5660_v21 = vrot.slane %v5659_v41, 2  ;;  %v4865_v26 = vsel %vm7361_vm9, %v8889_v61, 0.0 }
0x2a24   :  { %v5634_v9 = vmax.f32 %v5632_v20, %v5633_v39  ;;  %v5661_v38 = vadd.f32 %v5660_v21, %v5659_v41 }
0x2a26   :  { %v5635_v4 = vrot.slane %v5634_v9, 1  ;;  %v5662_v49 = vrot.slane %v5661_v38, 1 }
0x2a28   :  { %v5636_v7 = vmax.f32 %v5634_v9, %v5635_v4  ;;  %v5663_v5 = vadd.f32 %v5662_v49, %v5661_v38  ;;  %v5691_v9 = vperm.slane %v8785_v29, 4  ;;  %v4970_v4 = vperm.slane %v8852_v27, 0 }
0x2a2a   :  { %v5644_v56 = vsub.f32 %v5628_v34, %v5636_v7 }
0x2a2c   :  { %v5646_v0 = vmul.f32 1.442695, %v5644_v56 }
0x2a2e   :  { %6783 = vpow2.f32 %v5646_v0 }
0x2a2f   :  { %6785 = vlog2.f32 %v5663_v5 }
0x2a34   :  { %v6784_v51 = vpop.eup %6783 }
0x2a35   :  { %v5650_v10 = vsel %vm4905_vm11, %v6784_v51, 0.0  ;;  %v6786_v18 = vpop.eup %6785 }
0x2a36   :  { %v5651_v32 = vrot.slane %v5650_v10, 4  ;;  %v5667_v11 = vmul.f32 0.6931472, %v6786_v18 }
0x2a38   :  { %v5652_v60 = vadd.f32 %v5651_v32, %v5650_v10  ;;  %v5669_v1 = vadd.f32 %v5667_v11, %v5643_v16 }
0x2a3a   :  { %v5653_v35 = vrot.slane %v5652_v60, 2 }
0x2a3c   :  { %v5654_v63 = vadd.f32 %v5653_v35, %v5652_v60 }
0x2a3e   :  { %v5655_v40 = vrot.slane %v5654_v63, 1 }
0x2a40   :  { %v5656_v46 = vadd.f32 %v5655_v40, %v5654_v63 }
0x2a42   :  { %6787 = vlog2.f32 %v5656_v46 }
0x2a45   :  { %v4888_v55 = vpop.xlane.xlu1 %4887 }
0x2a48   :  { %v6788_v57 = vpop.eup %6787 }
0x2a49   :  { %v5665_v14 = vmul.f32 0.6931472, %v6788_v57 }
0x2a4b   :  { %v5668_v43 = vadd.f32 %v5665_v14, %v5636_v7  ;;  %v4977_v7 = vperm.slane %v8852_v27, 1 }
0x2a4d   :  { %v5672_v33 = vsel %vm543_vm8, %v5669_v1, %v5668_v43  ;;  %v6205_v41 = vpack.i.bf16 %v4977_v7, %v4970_v4 }
0x2a4e   :  { %v8878_v54 = vsel %vm9202_vm1, %v5672_v33, %v8843_v52 }
0x2a4f   :  { %v5682_v58 = vperm.slane %v8878_v54, 1  ;;  %v5675_v50 = vperm.slane %v8878_v54, 0 }
0x2a51   :  { %5687 = vperm.xlu2 %6198, %v5682_v58  }
0x2a5d   :  { %v4949_v45 = vpop.permute.xlu1 %4948 }
0x2a5e   :  { %vm4950_vm2 = vcmp.eq.s32.totalorder %v4949_v45, %v7356_v3 }
0x2a5f   :  { %v8883_v8 = vsel %vm4950_vm2, 1.0, %v7059_v25  ;;  %vm5206_vm2 = vcmask 1046534  }
0x2a60   :  { %v4954_v16 = vrot.slane %v8883_v8, 6  ;;  %v4955_v34 = vrot.slane %v8883_v8, 7 }
0x2a62   :  { %v4959_v24 = vmul.f32 %v4955_v34, %v8789_v6  ;;  %v4958_v13 = vmul.f32 %v4954_v16, %v8785_v29 }
0x2a64   :  { %v4962_v52 = vrot.slane %v4959_v24, 7 }
0x2a66   :  { %v4964_v22 = vsel %vm4963_vm14, %v4962_v52, %v4958_v13  ;;  %vm5209_vm14 = vcmask 63493  }
0x2a67   :  { %v4967_v62 = vsel %vm4966_vm15, %v4964_v22, 0.0  ;;  %vm5287_vm15 = vcmask 1047559  }
0x2a68   :  { %4968 = vadd.xlane.f32.xlu1 %v4967_v62 }
0x2a95   :  { %v4931_v30 = vpop.xlane.xlu2 %4930 }
0x2a96   :  { %v4933_v48 = vrot.slane %v4931_v30, 7 }
0x2a98   :  { %v4935_v2 = vadd.f32 %v4933_v48, %v4888_v55 }
0x2a9a   :  { %v4937_v20 = vrot.slane %v4935_v2, 1 }
0x2a9c   :  { %4938 = vrot.lane.b32.xlu0 %v4937_v20, %s7071_s19 }
0x2aab   :  { %v5688_v49 = vpop.permute.xlu2 %5687 }
0x2aac   :  { %v5690_v5 = vadd.f32 %v5688_v49, %v8797_v47 }
0x2b0e   :  { %v4939_v17 = vpop.permute.xlu0 %4938 }
0x2b0f   :  { %v4941_v39 = vsel %vm7361_vm9, %v4939_v17, 0.0 }
0x2b10   :  { %4943 = vrot.lane.b32.xlu0 %v4941_v39, %s7072_s26 }
0x2b18   :  { %5680 = vperm.xlu0 %6193, %v5675_v50  }
0x2b20   :  { %5696 = vperm.xlu0 %6193, %v5691_v9  }
0x2b28   :  { %5703 = vperm.xlu0 %6193, %v5698_v28  }
0x2b30   :  { %6206 = vperm.xlu0 %6193, %v6205_v41  }
0x2b38   :  { %6210 = vset.pattern.permute.xlu0 %v7070_v36 }
0x2b82   :  { %v8899_v56 = vpop.permute.xlu0 %4943 }
0x2b8a   :  { %v5681_v0 = vpop.permute.xlu0 %5680 }
0x2b8b   :  { %v5689_v21 = vadd.f32 %v5681_v0, %v8797_v47 }
0x2b92   :  { %v5697_v38 = vpop.permute.xlu0 %5696 }
0x2b93   :  { %v5705_v51 = vadd.f32 %v5697_v38, %v5689_v21 }
0x2b95   :  { %v5707_v10 = vsel %vm4905_vm11, %v5705_v51, -inf }
0x2b96   :  { %v5708_v32 = vrot.slane %v5707_v10, 4 }
0x2b98   :  { %v5709_v60 = vmax.f32 %v5707_v10, %v5708_v32 }
0x2b9a   :  { %v5710_v35 = vrot.slane %v5709_v60, 2  ;;  %v5704_v27 = vpop.permute.xlu0 %5703 }
0x2b9b   :  { %v5706_v63 = vadd.f32 %v5704_v27, %v5690_v5 }
0x2b9c   :  { %v5711_v40 = vmax.f32 %v5709_v60, %v5710_v35 }
0x2b9d   :  { %v5714_v36 = vsel %vm4905_vm11, %v5706_v63, -inf }
0x2b9e   :  { %v5712_v46 = vrot.slane %v5711_v40, 1  ;;  %v5715_v18 = vrot.slane %v5714_v36, 4 }
0x2ba0   :  { %v5713_v11 = vmax.f32 %v5711_v40, %v5712_v46  ;;  %v5716_v57 = vmax.f32 %v5714_v36, %v5715_v18 }
0x2ba2   :  { %v5721_v14 = vsub.f32 %v5705_v51, %v5713_v11  ;;  %v5717_v1 = vrot.slane %v5716_v57, 2  ;;  %v6207_v43 = vpop.permute.xlu0 %6206  ;;  %v5000_v51 = vrot.slane %v8883_v8, 1 }
0x2ba3   :  { %v6209_v33 = vunpack.i.h.bf16 %v6207_v43  ;;  %v6208_v58 = vunpack.i.l.bf16 %v6207_v43 }
0x2ba4   :  { %v5723_v55 = vmul.f32 1.442695, %v5721_v14  ;;  %v5718_v45 = vmax.f32 %v5716_v57, %v5717_v1 }
0x2ba5   :  { %v4985_v16 = vmul.f32 %v6209_v33, %v8797_v47  ;;  %v4984_v34 = vmul.f32 %v6208_v58, %v8797_v47 }
0x2ba6   :  { %6789 = vpow2.f32 %v5723_v55  ;;  %v5719_v24 = vrot.slane %v5718_v45, 1 }
0x2ba7   :  { %v4993_v13 = vsel %vm4905_vm11, %v4985_v16, 0.0  ;;  %v4986_v52 = vsel %vm4905_vm11, %v4984_v34, 0.0 }
0x2ba8   :  { %v5720_v22 = vmax.f32 %v5718_v45, %v5719_v24  ;;  %v4994_v62 = vrot.slane %v4993_v13, 4  ;;  %v4987_v30 = vrot.slane %v4986_v52, 4 }
0x2baa   :  { %v5722_v48 = vsub.f32 %v5706_v63, %v5720_v22  ;;  %v4995_v2 = vadd.f32 %v4994_v62, %v4993_v13  ;;  %v4988_v20 = vadd.f32 %v4987_v30, %v4986_v52  ;;  %v5768_v30 = vperm.slane %v8785_v29, 5 }
0x2bac   :  { %v6790_v17 = vpop.eup %6789  ;;  %v5725_v39 = vmul.f32 1.442695, %v5722_v48  ;;  %v4996_v50 = vrot.slane %v4995_v2, 2  ;;  %v4989_v9 = vrot.slane %v4988_v20, 2 }
0x2bad   :  { %v5727_v28 = vsel %vm4905_vm11, %v6790_v17, 0.0 }
0x2bae   :  { %v5728_v4 = vrot.slane %v5727_v28, 4  ;;  %6791 = vpow2.f32 %v5725_v39  ;;  %v4997_v7 = vadd.f32 %v4996_v50, %v4995_v2  ;;  %v4990_v41 = vadd.f32 %v4989_v9, %v4988_v20  ;;  %v4969_v20 = vpop.xlane.xlu1 %4968 }
0x2bb0   :  { %v5729_v0 = vadd.f32 %v5728_v4, %v5727_v28  ;;  %v4998_v21 = vrot.slane %v4997_v7, 1  ;;  %v4991_v38 = vrot.slane %v4990_v41, 1  ;;  %v5775_v28 = vperm.slane %v8789_v6, 5 }
0x2bb1   :  { %v5051_v4 = vperm.slane %v8883_v8, 0 }
0x2bb2   :  { %v5730_v10 = vrot.slane %v5729_v0, 2  ;;  %v4992_v49 = vadd.f32 %v4991_v38, %v4990_v41  ;;  %v4999_v32 = vadd.f32 %v4998_v21, %v4997_v7  ;;  %v5058_v7 = vperm.slane %v8883_v8, 1 }
0x2bb4   :  { %v6792_v60 = vpop.eup %6791  ;;  %v5731_v5 = vadd.f32 %v5730_v10, %v5729_v0  ;;  %v5004_v35 = vmul.f32 %v5000_v51, %v4999_v32  ;;  %v5003_v36 = vmul.f32 %v8883_v8, %v4992_v49  ;;  %v6213_v41 = vpack.i.bf16 %v5058_v7, %v5051_v4 }
0x2bb5   :  { %v5734_v27 = vsel %vm4905_vm11, %v6792_v60, 0.0 }
0x2bb6   :  { %v5732_v63 = vrot.slane %v5731_v5, 1  ;;  %v5735_v40 = vrot.slane %v5734_v27, 4  ;;  %v5007_v46 = vrot.slane %v5004_v35, 7 }
0x2bb8   :  { %v5736_v18 = vadd.f32 %v5735_v40, %v5734_v27  ;;  %v5008_v57 = vsel %vm543_vm8, %v5007_v46, %v5003_v36  ;;  %v5733_v1 = vadd.f32 %v5732_v63, %v5731_v5 }
0x2bb9   :  { %v5010_v14 = vsel %vm4861_vm3, %v5008_v57, 0.0 }
0x2bba   :  { %v5737_v43 = vrot.slane %v5736_v18, 2  ;;  %5011 = vadd.xlane.f32.xlu2 %v5010_v14  ;;  %6793 = vlog2.f32 %v5733_v1 }
0x2bbc   :  { %v5738_v33 = vadd.f32 %v5737_v43, %v5736_v18 }
0x2bbe   :  { %v5739_v58 = vrot.slane %v5738_v33, 1 }
0x2bc0   :  { %v5740_v55 = vadd.f32 %v5739_v58, %v5738_v33  ;;  %v6794_v45 = vpop.eup %6793 }
0x2bc1   :  { %v5742_v16 = vmul.f32 0.6931472, %v6794_v45 }
0x2bc2   :  { %6795 = vlog2.f32 %v5740_v55 }
0x2bc3   :  { %v5745_v13 = vadd.f32 %v5742_v16, %v5713_v11 }
0x2bc8   :  { %v6796_v34 = vpop.eup %6795 }
0x2bc9   :  { %v5744_v24 = vmul.f32 0.6931472, %v6796_v34 }
0x2bcb   :  { %v5746_v52 = vadd.f32 %v5744_v24, %v5720_v22 }
0x2bcd   :  { %v5749_v62 = vsel %vm543_vm8, %v5746_v52, %v5745_v13 }
0x2bce   :  { %v8924_v11 = vsel %vm252_vm10, %v5749_v62, %v8878_v54  ;;  %v4946_v54 = vadd.f32 %v8899_v56, %v4865_v26 }
0x2bcf   :  { %v5752_v22 = vperm.slane %v8924_v11, 0  ;;  %v5759_v63 = vperm.slane %v8924_v11, 1 }
0x2bd2   :  { %5773 = vperm.xlu2 %6198, %v5768_v30  }
0x2c2d   :  { %v5012_v48 = vpop.xlane.xlu2 %5011 }
0x2c2e   :  { %v5014_v2 = vrot.slane %v5012_v48, 6 }
0x2c30   :  { %v5016_v17 = vadd.f32 %v5014_v2, %v4969_v20 }
0x2c32   :  { %v5018_v39 = vrot.slane %v5016_v17, 2 }
0x2c34   :  { %5019 = vrot.lane.b32.xlu0 %v5018_v39, %s7073_s27 }
0x2ca6   :  { %v5020_v50 = vpop.permute.xlu0 %5019 }
0x2ca7   :  { %v5022_v9 = vsel %vm7361_vm9, %v5020_v50, 0.0  ;;  %v5774_v50 = vpop.permute.xlu2 %5773 }
0x2ca8   :  { %5024 = vrot.lane.b32.xlu0 %v5022_v9, %s7074_s29 }
0x2cb0   :  { %5029 = vperm.xlu0 %6210, %v8819_v44  }
0x2cb8   :  { %6211 = vset.pattern.permute.xlu0 %v8773_v31 }
0x2cc0   :  { %5757 = vperm.xlu0 %6211, %v5752_v22  }
0x2cc8   :  { %5780 = vperm.xlu0 %6211, %v5775_v28  }
0x2cd0   :  { %6214 = vperm.xlu0 %6211, %v6213_v41  }
0x2cd8   :  { %6218 = vset.pattern.permute.xlu0 %v7069_v23 }
0x2d1a   :  { %v5025_v0 = vpop.permute.xlu0 %5024 }
0x2d1b   :  { %v8935_v21 = vadd.f32 %v5025_v0, %v4946_v54 }
0x2d22   :  { %v5030_v38 = vpop.permute.xlu0 %5029 }
0x2d23   :  { %vm5031_vm10 = vcmp.eq.s32.totalorder %v5030_v38, %v7356_v3 }
0x2d24   :  { %v8939_v51 = vsel %vm5031_vm10, 1.0, %v7059_v25  ;;  %vm5370_vm10 = vcmask 64519  }
0x2d25   :  { %v5035_v8 = vrot.slane %v8939_v51, 5  ;;  %v5036_v10 = vrot.slane %v8939_v51, 6  ;;  %v5081_v52 = vrot.slane %v8939_v51, 1 }
0x2d27   :  { %v5040_v23 = vmul.f32 %v5036_v10, %v8789_v6  ;;  %v5039_v61 = vmul.f32 %v5035_v8, %v8785_v29 }
0x2d29   :  { %v5043_v49 = vrot.slane %v5040_v23, 7 }
0x2d2b   :  { %v5045_v56 = vsel %vm5044_vm13, %v5043_v49, %v5039_v61  ;;  %vm5374_vm13 = vcmask 57344  }
0x2d2c   :  { %v5048_v32 = vsel %vm5047_vm5, %v5045_v56, 0.0  ;;  %vm9203_vm5 = vcmp.eq.s32.totalorder %v7377_v15, 1 }
0x2d2d   :  { %5049 = vadd.xlane.f32.xlu1 %v5048_v32 }
0x2d32   :  { %v5758_v60 = vpop.permute.xlu0 %5757 }
0x2d33   :  { %v5766_v39 = vadd.f32 %v5758_v60, %v8797_v47 }
0x2d35   :  { %v5782_v9 = vadd.f32 %v5774_v50, %v5766_v39 }
0x2d37   :  { %v5784_v22 = vsel %vm4905_vm11, %v5782_v9, -inf }
0x2d38   :  { %v5785_v28 = vrot.slane %v5784_v22, 4 }
0x2d3a   :  { %v5781_v5 = vpop.permute.xlu0 %5780  ;;  %v5786_v4 = vmax.f32 %v5784_v22, %v5785_v28 }
0x2d3c   :  { %v5787_v7 = vrot.slane %v5786_v4, 2 }
0x2d3e   :  { %v5788_v41 = vmax.f32 %v5786_v4, %v5787_v7 }
0x2d40   :  { %v5789_v26 = vrot.slane %v5788_v41, 1 }
0x2d42   :  { %v6215_v35 = vpop.permute.xlu0 %6214  ;;  %v5790_v54 = vmax.f32 %v5788_v41, %v5789_v26 }
0x2d43   :  { %v6217_v27 = vunpack.i.h.bf16 %v6215_v35  ;;  %v6216_v36 = vunpack.i.l.bf16 %v6215_v35 }
0x2d44   :  { %v5798_v38 = vsub.f32 %v5782_v9, %v5790_v54 }
0x2d45   :  { %v5066_v40 = vmul.f32 %v6217_v27, %v8797_v47  ;;  %v5065_v18 = vmul.f32 %v6216_v36, %v8797_v47 }
0x2d46   :  { %5764 = vperm.xlu1 %6212, %v5759_v63   ;;  %v5800_v8 = vmul.f32 1.442695, %v5798_v38 }
0x2d47   :  { %v5074_v46 = vsel %vm4905_vm11, %v5066_v40, 0.0  ;;  %v5067_v14 = vsel %vm4905_vm11, %v5065_v18, 0.0 }
0x2d48   :  { %v5075_v57 = vrot.slane %v5074_v46, 4  ;;  %v5068_v43 = vrot.slane %v5067_v14, 4  ;;  %6797 = vpow2.f32 %v5800_v8 }
0x2d4a   :  { %v5076_v1 = vadd.f32 %v5075_v57, %v5074_v46  ;;  %v5069_v58 = vadd.f32 %v5068_v43, %v5067_v14 }
0x2d4c   :  { %v5077_v33 = vrot.slane %v5076_v1, 2  ;;  %v5070_v45 = vrot.slane %v5069_v58, 2 }
0x2d4e   :  { %v5078_v55 = vadd.f32 %v5077_v33, %v5076_v1  ;;  %v5071_v34 = vadd.f32 %v5070_v45, %v5069_v58  ;;  %v6798_v32 = vpop.eup %6797 }
0x2d4f   :  { %v5804_v27 = vsel %vm4905_vm11, %v6798_v32, 0.0 }
0x2d50   :  { %v5079_v16 = vrot.slane %v5078_v55, 1  ;;  %v5072_v13 = vrot.slane %v5071_v34, 1  ;;  %v5805_v40 = vrot.slane %v5804_v27, 4 }
0x2d52   :  { %v5080_v24 = vadd.f32 %v5079_v16, %v5078_v55  ;;  %v5073_v30 = vadd.f32 %v5072_v13, %v5071_v34  ;;  %v5806_v18 = vadd.f32 %v5805_v40, %v5804_v27 }
0x2d54   :  { %v5085_v62 = vmul.f32 %v5081_v52, %v5080_v24  ;;  %v5084_v2 = vmul.f32 %v8939_v51, %v5073_v30  ;;  %v5807_v1 = vrot.slane %v5806_v18, 2 }
0x2d56   :  { %v5088_v48 = vrot.slane %v5085_v62, 7 }
0x2d58   :  { %v5089_v20 = vsel %vm543_vm8, %v5088_v48, %v5084_v2 }
0x2d59   :  { %v5091_v17 = vsel %vm4861_vm3, %v5089_v20, 0.0 }
0x2d70   :  { %5092 = vadd.xlane.f32.xlu1 %v5091_v17 }
0x2da0   :  { %v5050_v0 = vpop.xlane.xlu1 %5049 }
0x2db8   :  { %v5765_v10 = vpop.permute.xlu1 %5764 }
0x2db9   :  { %v5767_v23 = vadd.f32 %v5765_v10, %v8797_v47  ;;  %v5808_v47 = vadd.f32 %v5807_v1, %v5806_v18 }
0x2dbb   :  { %v5783_v61 = vadd.f32 %v5781_v5, %v5767_v23  ;;  %v5809_v33 = vrot.slane %v5808_v47, 1 }
0x2dbd   :  { %v5791_v49 = vsel %vm4905_vm11, %v5783_v61, -inf  ;;  %v5810_v45 = vadd.f32 %v5809_v33, %v5808_v47 }
0x2dbe   :  { %v5792_v56 = vrot.slane %v5791_v49, 4 }
0x2dc0   :  { %v5793_v60 = vmax.f32 %v5791_v49, %v5792_v56 }
0x2dc2   :  { %v5794_v35 = vrot.slane %v5793_v60, 2 }
0x2dc4   :  { %v5795_v63 = vmax.f32 %v5793_v60, %v5794_v35 }
0x2dc6   :  { %v5796_v36 = vrot.slane %v5795_v63, 1 }
0x2dc8   :  { %v5797_v46 = vmax.f32 %v5795_v63, %v5796_v36 }
0x2dca   :  { %v5799_v57 = vsub.f32 %v5783_v61, %v5797_v46 }
0x2dcc   :  { %v5802_v14 = vmul.f32 1.442695, %v5799_v57 }
0x2dce   :  { %6799 = vpow2.f32 %v5802_v14 }
0x2dcf   :  { %6801 = vlog2.f32 %v5810_v45 }
0x2dd4   :  { %v6800_v43 = vpop.eup %6799 }
0x2dd5   :  { %v5811_v5 = vsel %vm4905_vm11, %v6800_v43, 0.0  ;;  %v6802_v62 = vpop.eup %6801 }
0x2dd6   :  { %v5812_v58 = vrot.slane %v5811_v5, 4  ;;  %v5819_v2 = vmul.f32 0.6931472, %v6802_v62 }
0x2dd8   :  { %v5813_v55 = vadd.f32 %v5812_v58, %v5811_v5  ;;  %v5822_v50 = vadd.f32 %v5819_v2, %v5790_v54  ;;  %v5139_v2 = vperm.slane %v8939_v51, 1 }
0x2dda   :  { %v5814_v16 = vrot.slane %v5813_v55, 2 }
0x2ddc   :  { %v5815_v34 = vadd.f32 %v5814_v16, %v5813_v55 }
0x2dde   :  { %v5816_v24 = vrot.slane %v5815_v34, 1 }
0x2de0   :  { %v5817_v13 = vadd.f32 %v5816_v24, %v5815_v34 }
0x2de2   :  { %6803 = vlog2.f32 %v5817_v13 }
0x2de3   :  { %v5093_v52 = vpop.xlane.xlu1 %5092 }
0x2de4   :  { %v5095_v30 = vrot.slane %v5093_v52, 5 }
0x2de6   :  { %v5097_v48 = vadd.f32 %v5095_v30, %v5050_v0 }
0x2de8   :  { %v6804_v20 = vpop.eup %6803  ;;  %v5099_v17 = vrot.slane %v5097_v48, 3  ;;  %v5132_v48 = vperm.slane %v8939_v51, 0 }
0x2de9   :  { %v5821_v39 = vmul.f32 0.6931472, %v6804_v20 }
0x2dea   :  { %5100 = vrot.lane.b32.xlu0 %v5099_v17, %s7075_s7 }
0x2deb   :  { %v5823_v9 = vadd.f32 %v5821_v39, %v5797_v46  ;;  %v6220_v39 = vpack.i.bf16 %v5139_v2, %v5132_v48 }
0x2ded   :  { %v5826_v22 = vsel %vm543_vm8, %v5823_v9, %v5822_v50 }
0x2dee   :  { %v8964_v28 = vsel %vm256_vm6, %v5826_v22, %v8924_v11  ;;  %v5852_v11 = vperm.slane %v8789_v6, 6 }
0x2def   :  { %v5836_v4 = vperm.slane %v8964_v28, 1  ;;  %v5829_v7 = vperm.slane %v8964_v28, 0 }
0x2df1   :  { %5841 = vperm.xlu1 %6212, %v5836_v4  }
0x2df2   :  { %5110 = vperm.xlu0 %6218, %v8819_v44  }
0x2df9   :  { %6225 = vset.pattern.permute.xlu1 %v7067_v42 }
0x2dfa   :  { %6219 = vset.pattern.permute.xlu0 %v8773_v31  ;;  %5191 = vperm.xlu1 %6225, %v8819_v44  }
0x2e02   :  { %6226 = vset.pattern.permute.xlu1 %v7065_v19  ;;  %5834 = vperm.xlu0 %6219, %v5829_v7  }
0x2e03   :  { %5272 = vperm.xlu1 %6226, %v8819_v44  }
0x2e0a   :  { %5850 = vperm.xlu0 %6219, %v5845_v12  }
0x2e0b   :  { %6227 = vset.pattern.permute.xlu1 %v8773_v31  ;;  %v8987_v31 = vld [vmem:[%s9134_s15] sm:$0xff]  ;;  %s7077_s15 = smov 4  }
0x2e12   :  { %5857 = vperm.xlu0 %6219, %v5852_v11  }
0x2e5c   :  { %v5101_v42 = vpop.permute.xlu0 %5100 }
0x2e5d   :  { %v5103_v41 = vsel %vm7361_vm9, %v5101_v42, 0.0 }
0x2e5e   :  { %5105 = vrot.lane.b32.xlu2 %v5103_v41, %s7076_s28 }
0x2e63   :  { %v5842_v56 = vpop.permute.xlu1 %5841 }
0x2e64   :  { %v5111_v26 = vpop.permute.xlu0 %5110  ;;  %v5844_v27 = vadd.f32 %v8987_v31, %v5842_v56 }
0x2e65   :  { %vm5112_vm6 = vcmp.eq.s32.totalorder %v5111_v26, %v7356_v3 }
0x2e66   :  { %v8981_v19 = vsel %vm5112_vm6, 1.0, %v7059_v25  ;;  %vm6012_vm6 = vcmask 0  }
0x2e67   :  { %v5117_v54 = vrot.slane %v8981_v19, 5  ;;  %v5116_v23 = vrot.slane %v8981_v19, 4 }
0x2e69   :  { %v5121_v38 = vmul.f32 %v5117_v54, %v8789_v6  ;;  %v5120_v60 = vmul.f32 %v5116_v23, %v8785_v29 }
0x2e6b   :  { %v5124_v49 = vrot.slane %v5121_v38, 7 }
0x2e6d   :  { %v5126_v63 = vsel %vm5125_vm7, %v5124_v49, %v5120_v60 }
0x2e6e   :  { %v5129_v57 = vsel %vm5128_vm12, %v5126_v63, 0.0 }
0x2e74   :  { %v5835_v44 = vpop.permute.xlu0 %5834 }
0x2e75   :  { %v5843_v0 = vadd.f32 %v8987_v31, %v5835_v44 }
0x2e7c   :  { %v5851_v8 = vpop.permute.xlu0 %5850 }
0x2e7d   :  { %v5859_v10 = vadd.f32 %v5851_v8, %v5843_v0 }
0x2e7f   :  { %v5861_v61 = vsel %vm4905_vm11, %v5859_v10, -inf }
0x2e80   :  { %v5862_v32 = vrot.slane %v5861_v61, 4 }
0x2e82   :  { %v5863_v35 = vmax.f32 %v5861_v61, %v5862_v32 }
0x2e84   :  { %v5864_v40 = vrot.slane %v5863_v35, 2  ;;  %v5858_v36 = vpop.permute.xlu0 %5857 }
0x2e85   :  { %v5860_v46 = vadd.f32 %v5858_v36, %v5844_v27 }
0x2e86   :  { %v5865_v18 = vmax.f32 %v5863_v35, %v5864_v40 }
0x2e87   :  { %v5868_v14 = vsel %vm4905_vm11, %v5860_v46, -inf  ;;  %5130 = vadd.xlane.f32.xlu2 %v5129_v57 }
0x2e88   :  { %v5866_v1 = vrot.slane %v5865_v18, 1  ;;  %v5869_v47 = vrot.slane %v5868_v14, 4 }
0x2e8a   :  { %v5867_v43 = vmax.f32 %v5865_v18, %v5866_v1  ;;  %v5870_v5 = vmax.f32 %v5868_v14, %v5869_v47 }
0x2e8c   :  { %v5875_v33 = vsub.f32 %v5859_v10, %v5867_v43  ;;  %v5871_v58 = vrot.slane %v5870_v5, 2 }
0x2e8e   :  { %v5877_v55 = vmul.f32 1.442695, %v5875_v33  ;;  %v5872_v45 = vmax.f32 %v5870_v5, %v5871_v58 }
0x2e90   :  { %6805 = vpow2.f32 %v5877_v55  ;;  %v5873_v16 = vrot.slane %v5872_v45, 1  ;;  %v5162_v55 = vrot.slane %v8981_v19, 1 }
0x2e92   :  { %v5874_v34 = vmax.f32 %v5872_v45, %v5873_v16 }
0x2e94   :  { %v5876_v24 = vsub.f32 %v5860_v46, %v5874_v34 }
0x2e96   :  { %v6806_v13 = vpop.eup %6805  ;;  %v5879_v52 = vmul.f32 1.442695, %v5876_v24 }
0x2e97   :  { %v5881_v62 = vsel %vm4905_vm11, %v6806_v13, 0.0 }
0x2e98   :  { %v5882_v30 = vrot.slane %v5881_v62, 4  ;;  %6807 = vpow2.f32 %v5879_v52  ;;  %v5192_v52 = vpop.permute.xlu1 %5191 }
0x2e99   :  { %vm5193_vm0 = vcmp.eq.s32.totalorder %v5192_v52, %v7356_v3 }
0x2e9a   :  { %v5883_v20 = vadd.f32 %v5882_v30, %v5881_v62  ;;  %v5922_v30 = vperm.slane %v8785_v29, 7  ;;  %v9018_v48 = vsel %vm5193_vm0, 1.0, %v7059_v25 }
0x2e9c   :  { %v5884_v17 = vrot.slane %v5883_v20, 2 }
0x2e9e   :  { %v6808_v50 = vpop.eup %6807  ;;  %v5885_v9 = vadd.f32 %v5884_v17, %v5883_v20  ;;  %v5301_v20 = vperm.slane %v9018_v48, 1 }
0x2e9f   :  { %v5888_v22 = vsel %vm4905_vm11, %v6808_v50, 0.0  ;;  %6221 = vperm.xlu2 %6198, %v6220_v39  }
0x2ea0   :  { %v5886_v4 = vrot.slane %v5885_v9, 1  ;;  %v5889_v7 = vrot.slane %v5888_v22, 4  ;;  %v5273_v62 = vpop.permute.xlu1 %5272 }
0x2ea1   :  { %vm5274_vm1 = vcmp.eq.s32.totalorder %v5273_v62, %v7356_v3 }
0x2ea2   :  { %v5890_v12 = vadd.f32 %v5889_v7, %v5888_v22  ;;  %v5887_v11 = vadd.f32 %v5886_v4, %v5885_v9  ;;  %v9021_v2 = vsel %vm5274_vm1, 1.0, %v7059_v25  ;;  %v5198_v7 = vrot.slane %v9018_v48, 4 }
0x2ea3   :  { %v5385_v17 = vperm.slane %v9021_v2, 1 }
0x2ea4   :  { %v5891_v42 = vrot.slane %v5890_v12, 2  ;;  %6809 = vlog2.f32 %v5887_v11  ;;  %v5197_v11 = vrot.slane %v9018_v48, 3 }
0x2ea5   :  { %v6233_v39 = vpack.i.bf16 %v5385_v17, %v5301_v20 }
0x2ea6   :  { %v5892_v41 = vadd.f32 %v5891_v42, %v5890_v12  ;;  %v5202_v12 = vmul.f32 %v5198_v7, %v8789_v6 }
0x2ea7   :  { %6243 = vset.pattern.permute.xlu2 %v7062_v53 }
0x2ea8   :  { %v5893_v26 = vrot.slane %v5892_v41, 1  ;;  %v5205_v42 = vrot.slane %v5202_v12, 7 }
0x2eaa   :  { %v5894_v44 = vadd.f32 %v5893_v26, %v5892_v41  ;;  %v6810_v51 = vpop.eup %6809  ;;  %v5201_v41 = vmul.f32 %v5197_v11, %v8785_v29 }
0x2eab   :  { %v5896_v54 = vmul.f32 0.6931472, %v6810_v51  ;;  %v6844_v51 = vld [vmem:[%s9121_s2] sm:$0x3]  ;;  %s7079_s2 = smov 5  }
0x2eac   :  { %6811 = vlog2.f32 %v5894_v44  ;;  %v5207_v26 = vsel %vm5206_vm2, %v5205_v42, %v5201_v41 }
0x2ead   :  { %v5899_v8 = vadd.f32 %v5896_v54, %v5867_v43  ;;  %v5210_v44 = vsel %vm5209_vm14, %v5207_v26, 0.0 }
0x2eb2   :  { %v6812_v0 = vpop.eup %6811 }
0x2eb3   :  { %v5898_v38 = vmul.f32 0.6931472, %v6812_v0 }
0x2eb5   :  { %v5900_v10 = vadd.f32 %v5898_v38, %v5874_v34  ;;  %v5929_v38 = vperm.slane %v8789_v6, 7 }
0x2eb7   :  { %v9002_v23 = vsel %vm543_vm8, %v5900_v10, %v5899_v8 }
0x2eb8   :  { %v9004_v61 = vpop.permute.xlu2 %5105  ;;  %v9039_v8 = vsel %vm260_vm4, %v9002_v23, %v8964_v28 }
0x2eb9   :  { %v5906_v10 = vperm.slane %v9039_v8, 0  ;;  %v5108_v37 = vadd.f32 %v9004_v61, %v8935_v21 }
0x2efa   :  { %v5131_v49 = vpop.xlane.xlu2 %5130 }
0x2f02   :  { %v6222_v56 = vpop.permute.xlu2 %6221 }
0x2f03   :  { %v6224_v32 = vunpack.i.h.bf16 %v6222_v56  ;;  %v6223_v60 = vunpack.i.l.bf16 %v6222_v56  ;;  %v5213_v56 = vperm.slane %v8981_v19, 0 }
0x2f05   :  { %v5147_v53 = vmul.f32 %v8987_v31, %v6224_v32  ;;  %v5146_v35 = vmul.f32 %v8987_v31, %v6223_v60  ;;  %v5220_v32 = vperm.slane %v8981_v19, 1 }
0x2f07   :  { %v5155_v27 = vsel %vm4905_vm11, %v5147_v53, 0.0  ;;  %v5148_v63 = vsel %vm4905_vm11, %v5146_v35, 0.0  ;;  %v6228_v60 = vpack.i.bf16 %v5213_v56, %v5220_v32  ;;  %v5294_v53 = vperm.slane %v9018_v48, 0 }
0x2f08   :  { %v5156_v40 = vrot.slane %v5155_v27, 4  ;;  %v5149_v36 = vrot.slane %v5148_v63, 4  ;;  %v5378_v35 = vperm.slane %v9021_v2, 0 }
0x2f0a   :  { %v5157_v46 = vadd.f32 %v5156_v40, %v5155_v27  ;;  %v5150_v18 = vadd.f32 %v5149_v36, %v5148_v63  ;;  %v6238_v27 = vpack.i.bf16 %v5378_v35, %v5294_v53 }
0x2f0c   :  { %v5158_v57 = vrot.slane %v5157_v46, 2  ;;  %v5151_v14 = vrot.slane %v5150_v18, 2 }
0x2f0e   :  { %v5159_v1 = vadd.f32 %v5158_v57, %v5157_v46  ;;  %v5152_v47 = vadd.f32 %v5151_v14, %v5150_v18 }
0x2f10   :  { %v5160_v43 = vrot.slane %v5159_v1, 1  ;;  %v5153_v5 = vrot.slane %v5152_v47, 1 }
0x2f12   :  { %v5154_v33 = vadd.f32 %v5153_v5, %v5152_v47  ;;  %v5161_v58 = vadd.f32 %v5160_v43, %v5159_v1 }
0x2f14   :  { %v5166_v45 = vmul.f32 %v5162_v55, %v5161_v58  ;;  %v5165_v16 = vmul.f32 %v8981_v19, %v5154_v33 }
0x2f16   :  { %v5169_v34 = vrot.slane %v5166_v45, 7 }
0x2f18   :  { %v5170_v24 = vsel %vm543_vm8, %v5169_v34, %v5165_v16 }
0x2f19   :  { %v5172_v13 = vsel %vm4861_vm3, %v5170_v24, 0.0 }
0x2f1a   :  { %5173 = vadd.xlane.f32.xlu0 %v5172_v13 }
0x2f2e   :  { %5927 = vperm.xlu0 %6219, %v5922_v30  }
0x2f36   :  { %6234 = vperm.xlu0 %6219, %v6233_v39  }
0x2f8d   :  { %v5174_v50 = vpop.xlane.xlu0 %5173 }
0x2f8e   :  { %v5176_v9 = vrot.slane %v5174_v50, 4 }
0x2f90   :  { %v5178_v22 = vadd.f32 %v5176_v9, %v5131_v49  ;;  %v5913_v49 = vperm.slane %v9039_v8, 1 }
0x2f92   :  { %v5180_v4 = vrot.slane %v5178_v22, 4 }
0x2f94   :  { %5181 = vrot.lane.b32.xlu2 %v5180_v4, %s7077_s15 }
0x2fa0   :  { %v5928_v63 = vpop.permute.xlu0 %5927 }
0x2fa8   :  { %v6235_v36 = vpop.permute.xlu0 %6234 }
0x2fa9   :  { %v6236_v18 = vunpack.i.l.bf16 %v6235_v36  ;;  %v6237_v14 = vunpack.i.h.bf16 %v6235_v36 }
0x2fab   :  { %v5309_v1 = vmul.f32 %v8987_v31, %v6236_v18  ;;  %v5393_v5 = vmul.f32 %v8987_v31, %v6237_v14 }
0x2fad   :  { %v5317_v33 = vsel %vm4905_vm11, %v5309_v1, 0.0  ;;  %v5401_v16 = vsel %vm4905_vm11, %v5393_v5, 0.0 }
0x2fae   :  { %v5318_v34 = vrot.slane %v5317_v33, 4  ;;  %v5402_v30 = vrot.slane %v5401_v16, 4 }
0x2fb0   :  { %v5319_v20 = vadd.f32 %v5318_v34, %v5317_v33  ;;  %v5403_v11 = vadd.f32 %v5402_v30, %v5401_v16 }
0x2fb2   :  { %v5320_v26 = vrot.slane %v5319_v20, 2  ;;  %v5404_v56 = vrot.slane %v5403_v11, 2 }
0x2fb4   :  { %v5321_v32 = vadd.f32 %v5320_v26, %v5319_v20  ;;  %v5405_v18 = vadd.f32 %v5404_v56, %v5403_v11 }
0x2fb6   :  { %v5322_v1 = vrot.slane %v5321_v32, 1  ;;  %v5406_v30 = vrot.slane %v5405_v18, 1 }
0x2fbd   :  { %5211 = vadd.xlane.f32.xlu2 %v5210_v44 }
0x2fd5   :  { %5353 = vperm.xlu2 %6243, %v6844_v51  }
0x2fee   :  { %v5182_v54 = vpop.permute.xlu2 %5181 }
0x2fef   :  { %v5184_v0 = vsel %vm7361_vm9, %v5182_v54, 0.0 }
0x2ff0   :  { %5186 = vrot.lane.b32.xlu1 %v5184_v0, %s7078_s20 }
0x2ff8   :  { %5934 = vperm.xlu1 %6227, %v5929_v38  }
0x3000   :  { %5911 = vperm.xlu1 %6227, %v5906_v10  }
0x3008   :  { %5918 = vperm.xlu1 %6227, %v5913_v49  }
0x3010   :  { %6229 = vperm.xlu1 %6227, %v6228_v60  }
0x3018   :  { %6239 = vperm.xlu1 %6227, %v6238_v27  }
0x3030   :  { %v9059_v17 = vpop.xlane.xlu2 %5211 }
0x3062   :  { %v5187_v28 = vpop.permute.xlu1 %5186 }
0x3063   :  { %v9049_v23 = vadd.f32 %v5187_v28, %v5108_v37 }
0x306a   :  { %v5935_v40 = vpop.permute.xlu1 %5934 }
0x3072   :  { %v5912_v46 = vpop.permute.xlu1 %5911 }
0x3073   :  { %v5920_v19 = vadd.f32 %v8987_v31, %v5912_v46 }
0x3075   :  { %v5936_v57 = vadd.f32 %v5928_v63, %v5920_v19  ;;  %v5354_v63 = vpop.permute.xlu2 %5353 }
0x3076   :  { %vm5355_vm4 = vcmp.eq.s32.totalorder %v5354_v63, %v7356_v3 }
0x3077   :  { %v5938_v47 = vsel %vm4905_vm11, %v5936_v57, -inf }
0x3078   :  { %v5939_v43 = vrot.slane %v5938_v47, 4 }
0x307a   :  { %v5940_v21 = vmax.f32 %v5938_v47, %v5939_v43  ;;  %v5919_v61 = vpop.permute.xlu1 %5918 }
0x307b   :  { %v5921_v58 = vadd.f32 %v8987_v31, %v5919_v61 }
0x307c   :  { %v5941_v55 = vrot.slane %v5940_v21, 2 }
0x307d   :  { %v5937_v45 = vadd.f32 %v5935_v40, %v5921_v58 }
0x307e   :  { %v5942_v24 = vmax.f32 %v5940_v21, %v5941_v55 }
0x307f   :  { %v5945_v13 = vsel %vm4905_vm11, %v5937_v45, -inf }
0x3080   :  { %v5943_v52 = vrot.slane %v5942_v24, 1  ;;  %v5946_v62 = vrot.slane %v5945_v13, 4 }
0x3082   :  { %v9061_v39 = vmax.f32 %v5942_v24, %v5943_v52  ;;  %v5947_v50 = vmax.f32 %v5945_v13, %v5946_v62  ;;  %v6230_v9 = vpop.permute.xlu1 %6229  ;;  %v5279_v24 = vrot.slane %v9021_v2, 3  ;;  %v9080_v13 = vsel %vm5355_vm4, 1.0, %v7059_v25 }
0x3083   :  { %v6232_v22 = vunpack.i.h.bf16 %v6230_v9  ;;  %v6231_v4 = vunpack.i.l.bf16 %v6230_v9 }
0x3084   :  { %v5952_v7 = vsub.f32 %v5936_v57, %v9061_v39  ;;  %v5948_v12 = vrot.slane %v5947_v50, 2 }
0x3085   :  { %v5227_v42 = vmul.f32 %v8987_v31, %v6232_v22  ;;  %v5228_v41 = vmul.f32 %v8987_v31, %v6231_v4  ;;  %v5323_v4 = vadd.f32 %v5322_v1, %v5321_v32  ;;  %v5360_v1 = vrot.slane %v9080_v13, 2 }
0x3086   :  { %v5954_v44 = vmul.f32 1.442695, %v5952_v7  ;;  %v5949_v51 = vmax.f32 %v5947_v50, %v5948_v12  ;;  %v5324_v7 = vrot.slane %v9021_v2, 1  ;;  %v5359_v12 = vrot.slane %v9080_v13, 1 }
0x3087   :  { %v5229_v54 = vsel %vm4905_vm11, %v5227_v42, 0.0  ;;  %v5236_v0 = vsel %vm4905_vm11, %v5228_v41, 0.0  ;;  %v5278_v41 = vrot.slane %v9021_v2, 2 }
0x3088   :  { %6813 = vpow2.f32 %v5954_v44  ;;  %v5950_v38 = vrot.slane %v5949_v51, 1  ;;  %v5230_v10 = vrot.slane %v5229_v54, 4  ;;  %v5237_v49 = vrot.slane %v5236_v0, 4 }
0x308a   :  { %v9068_v60 = vmax.f32 %v5949_v51, %v5950_v38  ;;  %v5231_v53 = vadd.f32 %v5230_v10, %v5229_v54  ;;  %v5238_v35 = vadd.f32 %v5237_v49, %v5236_v0  ;;  %v6240_v27 = vpop.permute.xlu1 %6239  ;;  %v5283_v54 = vmul.f32 %v5279_v24, %v8789_v6 }
0x308b   :  { %v6242_v37 = vunpack.i.h.bf16 %v6240_v27  ;;  %v6241_v28 = vunpack.i.l.bf16 %v6240_v27  ;;  %v5407_v0 = vadd.f32 %v5406_v30, %v5405_v18 }
0x308c   :  { %v5953_v40 = vsub.f32 %v5937_v45, %v9068_v60  ;;  %v5232_v36 = vrot.slane %v5231_v53, 2  ;;  %v5239_v46 = vrot.slane %v5238_v35, 2 }
0x308d   :  { %v5392_v19 = vmul.f32 %v8987_v31, %v6242_v37  ;;  %v5308_v57 = vmul.f32 %v8987_v31, %v6241_v28  ;;  %v5243_v31 = vrot.slane %v9018_v48, 1  ;;  %v5410_v27 = vmul.f32 %v5407_v0, %v5359_v12 }
0x308e   :  { %v6814_v14 = vpop.eup %6813  ;;  %v5956_v47 = vmul.f32 1.442695, %v5953_v40  ;;  %v5233_v43 = vadd.f32 %v5232_v36, %v5231_v53  ;;  %v5240_v5 = vadd.f32 %v5239_v46, %v5238_v35  ;;  %v5328_v35 = vmul.f32 %v5324_v7, %v5323_v4 }
0x308f   :  { %v5958_v21 = vsel %vm4905_vm11, %v6814_v14, 0.0  ;;  %v5394_v61 = vsel %vm4905_vm11, %v5392_v19, 0.0  ;;  %v5310_v33 = vsel %vm4905_vm11, %v5308_v57, 0.0  ;;  %v5282_v14 = vmul.f32 %v5278_v41, %v8785_v29 }
0x3090   :  { %v5959_v58 = vrot.slane %v5958_v21, 4  ;;  %6815 = vpow2.f32 %v5956_v47  ;;  %v5234_v55 = vrot.slane %v5233_v43, 1  ;;  %v5241_v45 = vrot.slane %v5240_v5, 1 }
0x3091   :  { %v5395_v16 = vrot.slane %v5394_v61, 4  ;;  %v5311_v34 = vrot.slane %v5310_v33, 4  ;;  %v5331_v57 = vrot.slane %v5328_v35, 7  ;;  %v5413_v47 = vrot.slane %v5410_v27, 7 }
0x3092   :  { %v5960_v3 = vadd.f32 %v5959_v58, %v5958_v21  ;;  %v5235_v52 = vadd.f32 %v5234_v55, %v5233_v43  ;;  %v5242_v62 = vadd.f32 %v5241_v45, %v5240_v5 }
0x3093   :  { %v5396_v20 = vadd.f32 %v5395_v16, %v5394_v61  ;;  %v5312_v50 = vadd.f32 %v5311_v34, %v5310_v33 }
0x3094   :  { %v5961_v9 = vrot.slane %v5960_v3, 2  ;;  %v5247_v22 = vmul.f32 %v5243_v31, %v5242_v62  ;;  %v5246_v44 = vmul.f32 %v9018_v48, %v5235_v52  ;;  %v5286_v48 = vrot.slane %v5283_v54, 7 }
0x3095   :  { %v5397_v11 = vrot.slane %v5396_v20, 2  ;;  %v5313_v42 = vrot.slane %v5312_v50, 2  ;;  %v5364_v31 = vmul.f32 %v5360_v1, %v8789_v6 }
0x3096   :  { %v6816_v26 = vpop.eup %6815  ;;  %v5962_v25 = vadd.f32 %v5961_v9, %v5960_v3  ;;  %v5250_v51 = vrot.slane %v5247_v22, 7  ;;  %v5288_v61 = vsel %vm5287_vm15, %v5286_v48, %v5282_v14 }
0x3097   :  { %v5965_v38 = vsel %vm4905_vm11, %v6816_v26, 0.0  ;;  %v5398_v10 = vadd.f32 %v5397_v11, %v5396_v20  ;;  %v5314_v49 = vadd.f32 %v5313_v42, %v5312_v50  ;;  %vm5290_vm11 = vcmask 64518  }
0x3098   :  { %v5963_v56 = vrot.slane %v5962_v25, 1  ;;  %v5966_v32 = vrot.slane %v5965_v38, 4  ;;  %v5251_v53 = vsel %vm543_vm8, %v5250_v51, %v5246_v44  ;;  %v5291_v34 = vsel %vm5290_vm11, %v5288_v61, 0.0 }
0x3099   :  { %v5399_v37 = vrot.slane %v5398_v10, 1  ;;  %v5315_v28 = vrot.slane %v5314_v49, 1  ;;  %v5253_v63 = vsel %vm4861_vm3, %v5251_v53, 0.0 }
0x309a   :  { %v5967_v40 = vadd.f32 %v5966_v32, %v5965_v38  ;;  %5254 = vadd.xlane.f32.xlu0 %v5253_v63  ;;  %v5964_v18 = vadd.f32 %v5963_v56, %v5962_v25 }
0x309b   :  { %v5400_v36 = vadd.f32 %v5399_v37, %v5398_v10  ;;  %v5316_v46 = vadd.f32 %v5315_v28, %v5314_v49 }
0x309c   :  { %v5968_v19 = vrot.slane %v5967_v40, 2  ;;  %6817 = vlog2.f32 %v5964_v18 }
0x309d   :  { %v5409_v43 = vmul.f32 %v9080_v13, %v5400_v36  ;;  %v5327_v5 = vmul.f32 %v9021_v2, %v5316_v46  ;;  %v5363_v2 = vmul.f32 %v5359_v12, %v8785_v29  ;;  %v5367_v13 = vrot.slane %v5364_v31, 7 }
0x309e   :  { %v5969_v21 = vadd.f32 %v5968_v19, %v5967_v40  ;;  %v7085_v46 = vmov 2.0  }
0x309f   :  { %v5414_v33 = vsel %vm543_vm8, %v5413_v47, %v5409_v43  ;;  %v5332_v58 = vsel %vm543_vm8, %v5331_v57, %v5327_v5  ;;  %v5371_v52 = vsel %vm5370_vm10, %v5363_v2, 0.0  ;;  %v5375_v30 = vsel %vm5374_vm13, %v5367_v13, 0.0 }
0x30a0   :  { %v5970_v55 = vrot.slane %v5969_v21, 1  ;;  %v5416_v45 = vsel %vm4861_vm3, %v5414_v33, 0.0  ;;  %v5334_v16 = vsel %vm4861_vm3, %v5332_v58, 0.0 }
0x30a1   :  { %5417 = vadd.xlane.f32.xlu2 %v5416_v45  ;;  %5335 = vadd.xlane.f32.xlu1 %v5334_v16 }
0x30a2   :  { %v5971_v24 = vadd.f32 %v5970_v55, %v5969_v21  ;;  %5292 = vadd.xlane.f32.xlu0 %v5291_v34  ;;  %v6818_v3 = vpop.eup %6817 }
0x30a3   :  { %v5973_v62 = vmul.f32 0.6931472, %v6818_v3 }
0x30a4   :  { %6819 = vlog2.f32 %v5971_v24 }
0x30a5   :  { %v5976_v9 = vadd.f32 %v5973_v62, %v9061_v39 }
0x30a9   :  { %5372 = vadd.xlane.f32.xlu1 %v5371_v52 }
0x30aa   :  { %v6820_v20 = vpop.eup %6819  ;;  %5376 = vadd.xlane.f32.xlu0 %v5375_v30 }
0x30ab   :  { %v5975_v50 = vmul.f32 0.6931472, %v6820_v20 }
0x30ad   :  { %v5977_v6 = vadd.f32 %v5975_v50, %v9068_v60 }
0x30af   :  { %v5980_v22 = vsel %vm543_vm8, %v5977_v6, %v5976_v9  ;;  %vm5426_vm8 = vcmask 1040384  }
0x30b0   :  { %v5982_v29 = vsel %vm9203_vm5, %v5980_v22, %v9039_v8 }
0x30b1   :  { %v5983_v4 = vsel %vm4861_vm3, %v5982_v29, -inf }
0x30b2   :  { %5984 = vmax.xlane.f32.xlu1 %v5983_v4 }
0x310d   :  { %v5255_v7 = vpop.xlane.xlu0 %5254 }
0x310e   :  { %v5257_v12 = vrot.slane %v5255_v7, 3 }
0x3110   :  { %v5259_v11 = vadd.f32 %v5257_v12, %v9059_v17 }
0x3112   :  { %v5261_v42 = vrot.slane %v5259_v11, 5 }
0x3114   :  { %v5336_v41 = vpop.xlane.xlu1 %5335  ;;  %5262 = vrot.lane.b32.xlu0 %v5261_v42, %s7079_s2  ;;  %v5418_v25 = vpop.xlane.xlu2 %5417 }
0x3115   :  { %v5338_v39 = vrot.slane %v5336_v41, 2  ;;  %v5293_v26 = vpop.xlane.xlu0 %5292  ;;  %v5420_v51 = vrot.slane %v5418_v25, 1 }
0x3117   :  { %v5340_v60 = vadd.f32 %v5338_v39, %v5293_v26 }
0x3119   :  { %v5342_v44 = vrot.slane %v5340_v60, 6 }
0x311b   :  { %5343 = vrot.lane.b32.xlu1 %v5342_v44, %s7080_s18 }
0x311c   :  { %v5373_v15 = vpop.xlane.xlu1 %5372 }
0x311d   :  { %v5422_v8 = vadd.f32 %v5420_v51, %v5373_v15  ;;  %v5377_v54 = vpop.xlane.xlu0 %5376 }
0x311e   :  { %v5423_v0 = vadd.f32 %v5420_v51, %v5377_v54 }
0x311f   :  { %v5427_v38 = vrot.slane %v5422_v8, 7 }
0x3120   :  { %v5428_v10 = vrot.slane %v5423_v0, 7 }
0x3122   :  { %v5429_v17 = vsel %vm5426_vm8, %v5427_v38, %v5428_v10 }
0x3123   :  { %5430 = vrot.lane.b32.xlu2 %v5429_v17, %s7081_s21 }
0x3125   :  { %v5985_v32 = vpop.xlane.xlu1 %5984 }
0x3126   :  { %v5986_v28 = vsub.f32 %v5982_v29, %v5985_v32 }
0x3128   :  { %v5987_v63 = vmul.f32 1.442695, %v5986_v28 }
0x312a   :  { %6821 = vpow2.f32 %v5987_v63 }
0x312b   :  { %6823 = vrcp.f32 %v7085_v46 }
0x3130   :  { %v6822_v40 = vpop.eup %6821 }
0x3131   :  { %v5989_v48 = vsel %vm4861_vm3, %v6822_v40, 0.0  ;;  %v6824_v14 = vpop.eup %6823 }
0x3132   :  { %v6005_v43 = vmul.f32 2.0, %v6824_v14  ;;  %vm6009_vm3 = vweird.f32 %v6824_v14 }
0x3134   :  { %v6006_v58 = vsub.f32 1.0, %v6005_v43 }
0x3136   :  { %v6007_v16 = vmul.f32 %v6824_v14, %v6006_v58 }
0x3138   :  { %v6008_v24 = vadd.f32 %v6824_v14, %v6007_v16 }
0x313a   :  { %v6010_v13 = vsel %vm6009_vm3, %v6824_v14, %v6008_v24 }
0x317d   :  { %v5431_v49 = vpop.permute.xlu2 %5430 }
0x317e   :  { %v5433_v56 = vsel %vm7361_vm9, %v5431_v49, 0.0 }
0x317f   :  { %5435 = vrot.lane.b32.xlu2 %v5433_v56, %s7082_s22 }
0x3186   :  { %v5263_v53 = vpop.permute.xlu0 %5262 }
0x3187   :  { %v5265_v35 = vsel %vm7361_vm9, %v5263_v53, 0.0 }
0x3188   :  { %5267 = vrot.lane.b32.xlu0 %v5265_v35, %s7083_s4 }
0x318d   :  { %v5344_v27 = vpop.permute.xlu1 %5343 }
0x318e   :  { %v5346_v37 = vsel %vm7361_vm9, %v5344_v27, 0.0  ;;  %vm5996_vm9 = vcmask 1024  }
0x318f   :  { %5348 = vrot.lane.b32.xlu1 %v5346_v37, %s7084_s5 }
0x31b2   :  { %5990 = vadd.xlane.f32.xlu0 %v5989_v48 }
0x31d9   :  { %v5436_v5 = vpop.permute.xlu2 %5435 }
0x31fa   :  { %v5268_v36 = vpop.permute.xlu0 %5267 }
0x31fb   :  { %v5270_v57 = vadd.f32 %v5268_v36, %v9049_v23 }
0x3201   :  { %v5349_v19 = vpop.permute.xlu1 %5348 }
0x3202   :  { %v5351_v59 = vadd.f32 %v5349_v19, %v5270_v57 }
0x3204   :  { %v5438_v21 = vadd.f32 %v5436_v5, %v5351_v59 }
0x3225   :  { %v5991_v18 = vpop.xlane.xlu0 %5990 }
0x3226   :  { %6825 = vlog2.f32 %v5991_v18 }
0x322c   :  { %v6826_v1 = vpop.eup %6825 }
0x322d   :  { %v5993_v47 = vmul.f32 0.6931472, %v6826_v1 }
0x322f   :  { %v5994_v61 = vadd.f32 %v5993_v47, %v5985_v32 }
0x3231   :  { %v5995_v33 = vsub.f32 %v5994_v61, %v5438_v21 }
0x3233   :  { %v5997_v55 = vsel %vm5996_vm9, %v5995_v33, 0.0 }
0x3234   :  { %v5998_v45 = vrot.slane %v5997_v55, 4 }
0x3236   :  { %v5999_v34 = vadd.f32 %v5998_v45, %v5997_v55 }
0x3238   :  { %v6000_v31 = vrot.slane %v5999_v34, 2 }
0x323a   :  { %v6001_v2 = vadd.f32 %v6000_v31, %v5999_v34 }
0x323c   :  { %v6002_v23 = vrot.slane %v6001_v2, 1 }
0x323e   :  { %v6003_v3 = vadd.f32 %v6002_v23, %v6001_v2 }
0x3240   :  { %v6011_v52 = vmul.f32 %v6010_v13, %v6003_v3 }
0x3242   :  { %6013 = vst.msk [vmem:[#allocation16] sm:$0x1] %vm6012_vm6, %v6011_v52 }
0x3243   :  { %6024 = dma.vmem_to_hbm [thread:$0]  %s6020_s6, 16, %s6022_s1, [#allocation6]  }
0x3244   :  { %7045 = dma.done.wait [#allocation6], 16  }
0x3245   :  { %7046 = vsyncadd [#allocation6], 4294967280 }
0x3246   :  { %6029 = vsyncpa [#allocation5], 1 }
0x3247   :  { %6030 = vsyncpa [#allocation8], 1 }
0x3248   :  { %6031 = vsyncpa [#allocation11], 1 }
0x3249   :  { %6032 = vsyncpa [#allocation14], 1 }
0x324a   :  { %6033 = vsyncpa [#allocation6], 1 }

</bundles_post_ra>
